<compile_context>
chip_gen: v5e
topology: v5e:2x2
jax: 0.10.0
libtpu: 0.0.40
codegen_flags: <defaults>
</compile_context>

<pallas_src>
import functools

import numpy as np
import jax
import jax.numpy as jnp
from jax import lax
from jax.experimental import pallas as pl
from jax.experimental.pallas import tpu as pltpu

EPS = 1e-5
HIGHEST = lax.Precision.HIGHEST  # reference only

# (dy, ky) taps per output-row parity for ConvTranspose2d(k=4, s=2, p=1):
#   out[2m + r] += x[m + dy] * W[ky]   for each (dy, ky) in _TAPS[r]
_TAPS = {0: ((0, 1), (-1, 3)), 1: ((0, 2), (1, 0))}


def _full_specs(shapes):
    # whole-array blocks (block dims equal the full array dims -> always legal)
    return [pl.BlockSpec(s, lambda i, n=len(s): (0,) * n) for s in shapes]


# --------------------------------------------------------------------------------------
# Kernel 1: fc1 + tconv2 (1x1 -> 4x4 transposed conv == per-tap matmul) + BatchNorm + ReLU
# --------------------------------------------------------------------------------------
def _head_kernel(B, Cout, x_ref, w1_ref, b1_ref, w2_ref, g_ref, b_ref, out_ref, acc_ref):
    # x: (B, nz+ny) bf16   w1: (nz+ny, 384) bf16   b1: (1, 384) f32
    # w2: (16, 384, Cout) bf16  [index = ky*4 + kx]   g/b: (1, Cout) f32
    # out: (16*B, Cout) bf16  row = k*B + b          acc: (16*B, Cout) f32 scratch
    fc1 = jnp.dot(x_ref[...], w1_ref[...],
                  preferred_element_type=jnp.float32) + b1_ref[...]
    fc1b = fc1.astype(jnp.bfloat16)
    for k in range(16):
        acc_ref[k * B:(k + 1) * B, :] = jnp.dot(
            fc1b, w2_ref[k], preferred_element_type=jnp.float32)
    h = acc_ref[...]                                  # (16B, Cout) f32
    n = 16 * B
    mean = jnp.sum(h, axis=0, keepdims=True) / n
    var = jnp.sum(jnp.square(h - mean), axis=0, keepdims=True) / n
    y = (h - mean) * lax.rsqrt(var + EPS) * g_ref[...] + b_ref[...]
    out_ref[...] = jnp.maximum(y, 0.0).astype(out_ref.dtype)


def head_pallas(x_bf16, w1, b1, w2t, gamma, beta):
    B = x_bf16.shape[0]
    Cout = w2t.shape[-1]
    R = 16 * B
    kernel = functools.partial(_head_kernel, B, Cout)
    return pl.pallas_call(
        kernel,
        out_shape=jax.ShapeDtypeStruct((R, Cout), jnp.bfloat16),
        grid=(1,),
        in_specs=_full_specs([x_bf16.shape, w1.shape, b1.shape,
                              w2t.shape, gamma.shape, beta.shape]),
        out_specs=pl.BlockSpec((R, Cout), lambda i: (0, 0)),
        scratch_shapes=[pltpu.VMEM((R, Cout), jnp.float32)],
        compiler_params=pltpu.CompilerParams(dimension_semantics=("arbitrary",)),
    )(x_bf16, w1, b1, w2t, gamma, beta)


# --------------------------------------------------------------------------------------
# Kernel 2: ConvTranspose2d(k=4, s=2, p=1) via 4 parity planes + BN/ReLU (or tanh)
# --------------------------------------------------------------------------------------
def _tconv_kernel(R, Cout, bn, xs_ref, w_ref, g_ref, b_ref, out_ref, acc_ref):
    # xs: (9, R, Cin) bf16  shifted & flattened inputs, shift index = (dy+1)*3 + (dx+1)
    # w : (16, Cin, Cout) bf16, index = ky*4 + kx
    # out: (4*R, Cout), parity-major rows: p = ry*2 + rx
    # acc: (4*R, Cout) f32 scratch (BN accumulation)
    for p, (ry, rx) in enumerate(((0, 0), (0, 1), (1, 0), (1, 1))):
        acc = jnp.zeros((R, Cout), jnp.float32)
        for dy, ky in _TAPS[ry]:
            for dx, kx in _TAPS[rx]:
                s = (dy + 1) * 3 + (dx + 1)
                k = ky * 4 + kx
                acc = acc + jnp.dot(xs_ref[s], w_ref[k],
                                    preferred_element_type=jnp.float32)
        if bn:
            acc_ref[p * R:(p + 1) * R, :] = acc
        else:
            out_ref[p * R:(p + 1) * R, :] = jnp.tanh(acc).astype(out_ref.dtype)
    if bn:
        h = acc_ref[...]                              # (4R, Cout) f32
        n = 4 * R
        mean = jnp.sum(h, axis=0, keepdims=True) / n
        var = jnp.sum(jnp.square(h - mean), axis=0, keepdims=True) / n
        y = (h - mean) * lax.rsqrt(var + EPS) * g_ref[...] + b_ref[...]
        out_ref[...] = jnp.maximum(y, 0.0).astype(out_ref.dtype)


def tconv_up2_pallas(x_nhwc, w_t, gamma, beta, *, bn=True, out_dtype=jnp.bfloat16):
    # x_nhwc: (B, H, W, Cin) bf16 -> (B, 2H, 2W, Cout)
    B, H, W, Cin = x_nhwc.shape
    Cout = w_t.shape[-1]
    R = B * H * W
    xp = jnp.pad(x_nhwc, ((0, 0), (1, 1), (1, 1), (0, 0)))
    shifts = [xp[:, 1 + dy:1 + dy + H, 1 + dx:1 + dx + W, :].reshape(R, Cin)
              for dy in (-1, 0, 1) for dx in (-1, 0, 1)]
    xs = jnp.stack(shifts, axis=0).astype(jnp.bfloat16)   # (9, R, Cin) bf16

    kernel = functools.partial(_tconv_kernel, R, Cout, bn)
    out = pl.pallas_call(
        kernel,
        out_shape=jax.ShapeDtypeStruct((4 * R, Cout), out_dtype),
        grid=(1,),
        in_specs=_full_specs([xs.shape, w_t.shape, gamma.shape, beta.shape]),
        out_specs=pl.BlockSpec((4 * R, Cout), lambda i: (0, 0)),
        scratch_shapes=[pltpu.VMEM((4 * R, Cout), jnp.float32)],
        compiler_params=pltpu.CompilerParams(dimension_semantics=("arbitrary",)),
    )(xs, w_t, gamma, beta)
    # interleave parity planes back to dense NHWC
    out = out.reshape(2, 2, B, H, W, Cout).transpose(2, 3, 0, 4, 1, 5)
    return out.reshape(B, 2 * H, 2 * W, Cout)


# --------------------------------------------------------------------------------------
# Full forward
# --------------------------------------------------------------------------------------
def netg_res32_forward(params, z, y):
    y_emb = jnp.take(params["embed"], y, axis=0)              # embedding gather (glue)
    x = jnp.concatenate([z, y_emb], axis=1).astype(jnp.bfloat16)   # (B, nz+ny)
    B = z.shape[0]

    h = head_pallas(x, params["w1"], params["b1"], params["w2t"],
                    params["bn2_g"], params["bn2_b"])          # (16B, 192) bf16
    t2 = h.reshape(4, 4, B, 192).transpose(2, 0, 1, 3)         # (B, 4, 4, 192) NHWC

    t3 = tconv_up2_pallas(t2, params["w3t"], params["bn3_g"], params["bn3_b"],
                          bn=True)                             # (B, 8, 8, 96)
    t4 = tconv_up2_pallas(t3, params["w4t"], params["bn4_g"], params["bn4_b"],
                          bn=True)                             # (B, 16, 16, 48)
    t5 = tconv_up2_pallas(t4, params["w5t"], params["ones3"], params["zeros3"],
                          bn=False, out_dtype=jnp.float32)     # (B, 32, 32, 3)
    return t5.transpose(0, 3, 1, 2)                            # NCHW (B, 3, 32, 32)


# --------------------------------------------------------------------------------------
# Deterministic parameter init (synthetic; shapes follow the PyTorch module)
# Weights are rounded to bf16 once; kernels and reference share the rounded values.
# --------------------------------------------------------------------------------------
def init_params(key, nz=32, ny=10, num_classes=10):
    ks = jax.random.split(key, 6)

    def nrm(k, shape, scale=0.05):
        return scale * jax.random.normal(k, shape, jnp.float32)

    embed = nrm(ks[0], (num_classes, ny), 1.0)
    w1 = nrm(ks[1], (nz + ny, 384)).astype(jnp.bfloat16)      # Linear stored (in, out)
    b1 = jnp.zeros((1, 384), jnp.float32)
    # ConvTranspose2d weights in PyTorch layout (Cin, Cout, kH, kW), bf16
    w2 = nrm(ks[2], (384, 192, 4, 4)).astype(jnp.bfloat16)
    w3 = nrm(ks[3], (192, 96, 4, 4)).astype(jnp.bfloat16)
    w4 = nrm(ks[4], (96, 48, 4, 4)).astype(jnp.bfloat16)
    w5 = nrm(ks[5], (48, 3, 4, 4)).astype(jnp.bfloat16)

    def to_taps(w):  # (Cin, Cout, kH, kW) -> (16, Cin, Cout), index = ky*4 + kx
        cin, cout = w.shape[0], w.shape[1]
        return jnp.transpose(w, (2, 3, 0, 1)).reshape(16, cin, cout)

    params = dict(
        embed=embed, w1=w1, b1=b1,
        w2t=to_taps(w2), w3t=to_taps(w3), w4t=to_taps(w4), w5t=to_taps(w5),
        bn2_g=jnp.ones((1, 192), jnp.float32), bn2_b=jnp.zeros((1, 192), jnp.float32),
        bn3_g=jnp.ones((1, 96), jnp.float32), bn3_b=jnp.zeros((1, 96), jnp.float32),
        bn4_g=jnp.ones((1, 48), jnp.float32), bn4_b=jnp.zeros((1, 48), jnp.float32),
        ones3=jnp.ones((1, 3), jnp.float32), zeros3=jnp.zeros((1, 3), jnp.float32),
    )
    params["_raw"] = dict(w2=w2, w3=w3, w4=w4, w5=w5)   # bf16; reference upcasts
    return params


# --------------------------------------------------------------------------------------
# Pure-JAX f32 reference (PyTorch semantics, same bf16-rounded weights) for correctness
# --------------------------------------------------------------------------------------
def _convT_ref(x, w, stride, pad):
    # x: NCHW f32, w: (Cin, Cout, kH, kW)  == torch ConvTranspose2d
    w = w.astype(jnp.float32)
    k = w.shape[2]
    w_conv = jnp.flip(jnp.transpose(w, (1, 0, 2, 3)), axis=(2, 3))
    return lax.conv_general_dilated(
        x, w_conv, window_strides=(1, 1),
        padding=[(k - 1 - pad, k - 1 - pad)] * 2,
        lhs_dilation=(stride, stride),
        dimension_numbers=("NCHW", "OIHW", "NCHW"),
        precision=HIGHEST)


def _bn_relu_ref(x, g, b):
    mean = jnp.mean(x, axis=(0, 2, 3), keepdims=True)
    var = jnp.mean(jnp.square(x - mean), axis=(0, 2, 3), keepdims=True)
    y = (x - mean) * lax.rsqrt(var + EPS) * g.reshape(1, -1, 1, 1) + b.reshape(1, -1, 1, 1)
    return jnp.maximum(y, 0.0)


def reference_forward(params, z, y):
    raw = params["_raw"]
    y_emb = jnp.take(params["embed"], y, axis=0)
    x = jnp.concatenate([z, y_emb], axis=1)
    fc1 = jnp.dot(x, params["w1"].astype(jnp.float32), precision=HIGHEST) + params["b1"]
    h = fc1.reshape(-1, 384, 1, 1)
    t2 = _bn_relu_ref(_convT_ref(h, raw["w2"], 1, 0), params["bn2_g"], params["bn2_b"])
    t3 = _bn_relu_ref(_convT_ref(t2, raw["w3"], 2, 1), params["bn3_g"], params["bn3_b"])
    t4 = _bn_relu_ref(_convT_ref(t3, raw["w4"], 2, 1), params["bn4_g"], params["bn4_b"])
    return jnp.tanh(_convT_ref(t4, raw["w5"], 2, 1))


if __name__ == "__main__":
    key = jax.random.PRNGKey(0)
    kp, kz, ky = jax.random.split(key, 3)
    B, nz, ny, num_classes = 2, 32, 10, 10

    params = init_params(kp, nz=nz, ny=ny, num_classes=num_classes)
    z = jax.random.normal(kz, (B, nz), jnp.float32)
    y = jax.random.randint(ky, (B,), 0, num_classes)

    out = jax.block_until_ready(netg_res32_forward(params, z, y))
    assert out.shape == (B, 3, 32, 32), out.shape

    ref = jax.block_until_ready(reference_forward(params, z, y))
    # Kernel feeds bf16 activations to the MXU (f32 accumulation); tolerance reflects
    # only that activation rounding since weights are identical bf16 on both paths.
    err = float(np.max(np.abs(np.asarray(out) - np.asarray(ref))))
    assert np.allclose(np.asarray(out), np.asarray(ref), atol=2e-2, rtol=2e-2), err

    print("KERNEL_OK")
</pallas_src>

<mosaic_0001>
module attributes {stable_mosaic.version = 11 : i64} {
  func.func @_head_kernel(%arg0: i32, %arg1: memref<2x42xbf16, #tpu.memory_space<vmem>>, %arg2: memref<42x384xbf16, #tpu.memory_space<vmem>>, %arg3: memref<1x384xf32, #tpu.memory_space<vmem>>, %arg4: memref<16x384x192xbf16, #tpu.memory_space<vmem>>, %arg5: memref<1x192xf32, #tpu.memory_space<vmem>>, %arg6: memref<1x192xf32, #tpu.memory_space<vmem>>, %arg7: memref<32x192xbf16, #tpu.memory_space<vmem>>, %arg8: memref<32x192xf32, #tpu.memory_space<vmem>>) attributes {dimension_semantics = [#tpu.dimension_semantics<arbitrary>], iteration_bounds = array<i64: 1>, scalar_prefetch = 0 : i64, scratch_operands = 1 : i64, tpu.core_type = #tpu.core_type<tc>, window_params = [{pipeline_mode = #tpu.pipeline_mode<synchronous>, transform_indices = @transform_0, window_bounds = array<i64: 2, 42>}, {pipeline_mode = #tpu.pipeline_mode<synchronous>, transform_indices = @transform_1, window_bounds = array<i64: 42, 384>}, {pipeline_mode = #tpu.pipeline_mode<synchronous>, transform_indices = @transform_2, window_bounds = array<i64: 1, 384>}, {pipeline_mode = #tpu.pipeline_mode<synchronous>, transform_indices = @transform_3, window_bounds = array<i64: 16, 384, 192>}, {pipeline_mode = #tpu.pipeline_mode<synchronous>, transform_indices = @transform_4, window_bounds = array<i64: 1, 192>}, {pipeline_mode = #tpu.pipeline_mode<synchronous>, transform_indices = @transform_5, window_bounds = array<i64: 1, 192>}, {pipeline_mode = #tpu.pipeline_mode<synchronous>, transform_indices = @transform_6, window_bounds = array<i64: 32, 192>}]} {
    %c0 = arith.constant 0 : index
    %c0_0 = arith.constant 0 : index
    %0 = vector.load %arg1[%c0, %c0_0] : memref<2x42xbf16, #tpu.memory_space<vmem>>, vector<2x42xbf16>
    %c0_1 = arith.constant 0 : index
    %c0_2 = arith.constant 0 : index
    %1 = vector.load %arg2[%c0_1, %c0_2] : memref<42x384xbf16, #tpu.memory_space<vmem>>, vector<42x384xbf16>
    %cst = arith.constant dense<0.000000e+00> : vector<2x384xf32>
    %2 = tpu.matmul %0, %1, %cst {dimension_numbers = #tpu.dot_dimension_numbers<[1], [0], [0], [1], [0, 0, 1, 1], [], []>} : vector<2x42xbf16>, vector<42x384xbf16>, vector<2x384xf32> -> vector<2x384xf32>
    %c0_3 = arith.constant 0 : index
    %c0_4 = arith.constant 0 : index
    %3 = vector.load %arg3[%c0_3, %c0_4] : memref<1x384xf32, #tpu.memory_space<vmem>>, vector<1x384xf32>
    %4 = vector.broadcast %3 : vector<1x384xf32> to vector<2x384xf32>
    %5 = arith.addf %2, %4 : vector<2x384xf32>
    %6 = arith.truncf %5 : vector<2x384xf32> to vector<2x384xbf16>
    %c0_5 = arith.constant 0 : index
    %c0_6 = arith.constant 0 : index
    %c0_7 = arith.constant 0 : index
    %7 = vector.load %arg4[%c0_5, %c0_6, %c0_7] : memref<16x384x192xbf16, #tpu.memory_space<vmem>>, vector<1x384x192xbf16>
    %8 = vector.shape_cast %7 : vector<1x384x192xbf16> to vector<384x192xbf16>
    %cst_8 = arith.constant dense<0.000000e+00> : vector<2x192xf32>
    %9 = tpu.matmul %6, %8, %cst_8 {dimension_numbers = #tpu.dot_dimension_numbers<[1], [0], [0], [1], [0, 0, 1, 1], [], []>} : vector<2x384xbf16>, vector<384x192xbf16>, vector<2x192xf32> -> vector<2x192xf32>
    %c0_9 = arith.constant 0 : index
    %c0_10 = arith.constant 0 : index
    %10 = vector.load %arg8[%c0_9, %c0_10] : memref<32x192xf32, #tpu.memory_space<vmem>>, vector<2x192xf32>
    tpu.vector_store %arg8[%c0_9, %c0_10], %9 {strides = array<i32>} : memref<32x192xf32, #tpu.memory_space<vmem>>, vector<2x192xf32>,
    %c1 = arith.constant 1 : index
    %c0_11 = arith.constant 0 : index
    %c0_12 = arith.constant 0 : index
    %11 = vector.load %arg4[%c1, %c0_11, %c0_12] : memref<16x384x192xbf16, #tpu.memory_space<vmem>>, vector<1x384x192xbf16>
    %12 = vector.shape_cast %11 : vector<1x384x192xbf16> to vector<384x192xbf16>
    %cst_13 = arith.constant dense<0.000000e+00> : vector<2x192xf32>
    %13 = tpu.matmul %6, %12, %cst_13 {dimension_numbers = #tpu.dot_dimension_numbers<[1], [0], [0], [1], [0, 0, 1, 1], [], []>} : vector<2x384xbf16>, vector<384x192xbf16>, vector<2x192xf32> -> vector<2x192xf32>
    %c2 = arith.constant 2 : index
    %c0_14 = arith.constant 0 : index
    %14 = vector.load %arg8[%c2, %c0_14] : memref<32x192xf32, #tpu.memory_space<vmem>>, vector<2x192xf32>
    tpu.vector_store %arg8[%c2, %c0_14], %13 {strides = array<i32>} : memref<32x192xf32, #tpu.memory_space<vmem>>, vector<2x192xf32>,
    %c2_15 = arith.constant 2 : index
    %c0_16 = arith.constant 0 : index
    %c0_17 = arith.constant 0 : index
    %15 = vector.load %arg4[%c2_15, %c0_16, %c0_17] : memref<16x384x192xbf16, #tpu.memory_space<vmem>>, vector<1x384x192xbf16>
    %16 = vector.shape_cast %15 : vector<1x384x192xbf16> to vector<384x192xbf16>
    %cst_18 = arith.constant dense<0.000000e+00> : vector<2x192xf32>
    %17 = tpu.matmul %6, %16, %cst_18 {dimension_numbers = #tpu.dot_dimension_numbers<[1], [0], [0], [1], [0, 0, 1, 1], [], []>} : vector<2x384xbf16>, vector<384x192xbf16>, vector<2x192xf32> -> vector<2x192xf32>
    %c4 = arith.constant 4 : index
    %c0_19 = arith.constant 0 : index
    %18 = vector.load %arg8[%c4, %c0_19] : memref<32x192xf32, #tpu.memory_space<vmem>>, vector<2x192xf32>
    tpu.vector_store %arg8[%c4, %c0_19], %17 {strides = array<i32>} : memref<32x192xf32, #tpu.memory_space<vmem>>, vector<2x192xf32>,
    %c3 = arith.constant 3 : index
    %c0_20 = arith.constant 0 : index
    %c0_21 = arith.constant 0 : index
    %19 = vector.load %arg4[%c3, %c0_20, %c0_21] : memref<16x384x192xbf16, #tpu.memory_space<vmem>>, vector<1x384x192xbf16>
    %20 = vector.shape_cast %19 : vector<1x384x192xbf16> to vector<384x192xbf16>
    %cst_22 = arith.constant dense<0.000000e+00> : vector<2x192xf32>
    %21 = tpu.matmul %6, %20, %cst_22 {dimension_numbers = #tpu.dot_dimension_numbers<[1], [0], [0], [1], [0, 0, 1, 1], [], []>} : vector<2x384xbf16>, vector<384x192xbf16>, vector<2x192xf32> -> vector<2x192xf32>
    %c6 = arith.constant 6 : index
    %c0_23 = arith.constant 0 : index
    %22 = vector.load %arg8[%c6, %c0_23] : memref<32x192xf32, #tpu.memory_space<vmem>>, vector<2x192xf32>
    tpu.vector_store %arg8[%c6, %c0_23], %21 {strides = array<i32>} : memref<32x192xf32, #tpu.memory_space<vmem>>, vector<2x192xf32>,
    %c4_24 = arith.constant 4 : index
    %c0_25 = arith.constant 0 : index
    %c0_26 = arith.constant 0 : index
    %23 = vector.load %arg4[%c4_24, %c0_25, %c0_26] : memref<16x384x192xbf16, #tpu.memory_space<vmem>>, vector<1x384x192xbf16>
    %24 = vector.shape_cast %23 : vector<1x384x192xbf16> to vector<384x192xbf16>
    %cst_27 = arith.constant dense<0.000000e+00> : vector<2x192xf32>
    %25 = tpu.matmul %6, %24, %cst_27 {dimension_numbers = #tpu.dot_dimension_numbers<[1], [0], [0], [1], [0, 0, 1, 1], [], []>} : vector<2x384xbf16>, vector<384x192xbf16>, vector<2x192xf32> -> vector<2x192xf32>
    %c8 = arith.constant 8 : index
    %c0_28 = arith.constant 0 : index
    %26 = vector.load %arg8[%c8, %c0_28] : memref<32x192xf32, #tpu.memory_space<vmem>>, vector<2x192xf32>
    tpu.vector_store %arg8[%c8, %c0_28], %25 {strides = array<i32>} : memref<32x192xf32, #tpu.memory_space<vmem>>, vector<2x192xf32>,
    %c5 = arith.constant 5 : index
    %c0_29 = arith.constant 0 : index
    %c0_30 = arith.constant 0 : index
    %27 = vector.load %arg4[%c5, %c0_29, %c0_30] : memref<16x384x192xbf16, #tpu.memory_space<vmem>>, vector<1x384x192xbf16>
    %28 = vector.shape_cast %27 : vector<1x384x192xbf16> to vector<384x192xbf16>
    %cst_31 = arith.constant dense<0.000000e+00> : vector<2x192xf32>
    %29 = tpu.matmul %6, %28, %cst_31 {dimension_numbers = #tpu.dot_dimension_numbers<[1], [0], [0], [1], [0, 0, 1, 1], [], []>} : vector<2x384xbf16>, vector<384x192xbf16>, vector<2x192xf32> -> vector<2x192xf32>
    %c10 = arith.constant 10 : index
    %c0_32 = arith.constant 0 : index
    %30 = vector.load %arg8[%c10, %c0_32] : memref<32x192xf32, #tpu.memory_space<vmem>>, vector<2x192xf32>
    tpu.vector_store %arg8[%c10, %c0_32], %29 {strides = array<i32>} : memref<32x192xf32, #tpu.memory_space<vmem>>, vector<2x192xf32>,
    %c6_33 = arith.constant 6 : index
    %c0_34 = arith.constant 0 : index
    %c0_35 = arith.constant 0 : index
    %31 = vector.load %arg4[%c6_33, %c0_34, %c0_35] : memref<16x384x192xbf16, #tpu.memory_space<vmem>>, vector<1x384x192xbf16>
    %32 = vector.shape_cast %31 : vector<1x384x192xbf16> to vector<384x192xbf16>
    %cst_36 = arith.constant dense<0.000000e+00> : vector<2x192xf32>
    %33 = tpu.matmul %6, %32, %cst_36 {dimension_numbers = #tpu.dot_dimension_numbers<[1], [0], [0], [1], [0, 0, 1, 1], [], []>} : vector<2x384xbf16>, vector<384x192xbf16>, vector<2x192xf32> -> vector<2x192xf32>
    %c12 = arith.constant 12 : index
    %c0_37 = arith.constant 0 : index
    %34 = vector.load %arg8[%c12, %c0_37] : memref<32x192xf32, #tpu.memory_space<vmem>>, vector<2x192xf32>
    tpu.vector_store %arg8[%c12, %c0_37], %33 {strides = array<i32>} : memref<32x192xf32, #tpu.memory_space<vmem>>, vector<2x192xf32>,
    %c7 = arith.constant 7 : index
    %c0_38 = arith.constant 0 : index
    %c0_39 = arith.constant 0 : index
    %35 = vector.load %arg4[%c7, %c0_38, %c0_39] : memref<16x384x192xbf16, #tpu.memory_space<vmem>>, vector<1x384x192xbf16>
    %36 = vector.shape_cast %35 : vector<1x384x192xbf16> to vector<384x192xbf16>
    %cst_40 = arith.constant dense<0.000000e+00> : vector<2x192xf32>
    %37 = tpu.matmul %6, %36, %cst_40 {dimension_numbers = #tpu.dot_dimension_numbers<[1], [0], [0], [1], [0, 0, 1, 1], [], []>} : vector<2x384xbf16>, vector<384x192xbf16>, vector<2x192xf32> -> vector<2x192xf32>
    %c14 = arith.constant 14 : index
    %c0_41 = arith.constant 0 : index
    %38 = vector.load %arg8[%c14, %c0_41] : memref<32x192xf32, #tpu.memory_space<vmem>>, vector<2x192xf32>
    tpu.vector_store %arg8[%c14, %c0_41], %37 {strides = array<i32>} : memref<32x192xf32, #tpu.memory_space<vmem>>, vector<2x192xf32>,
    %c8_42 = arith.constant 8 : index
    %c0_43 = arith.constant 0 : index
    %c0_44 = arith.constant 0 : index
    %39 = vector.load %arg4[%c8_42, %c0_43, %c0_44] : memref<16x384x192xbf16, #tpu.memory_space<vmem>>, vector<1x384x192xbf16>
    %40 = vector.shape_cast %39 : vector<1x384x192xbf16> to vector<384x192xbf16>
    %cst_45 = arith.constant dense<0.000000e+00> : vector<2x192xf32>
    %41 = tpu.matmul %6, %40, %cst_45 {dimension_numbers = #tpu.dot_dimension_numbers<[1], [0], [0], [1], [0, 0, 1, 1], [], []>} : vector<2x384xbf16>, vector<384x192xbf16>, vector<2x192xf32> -> vector<2x192xf32>
    %c16 = arith.constant 16 : index
    %c0_46 = arith.constant 0 : index
    %42 = vector.load %arg8[%c16, %c0_46] : memref<32x192xf32, #tpu.memory_space<vmem>>, vector<2x192xf32>
    tpu.vector_store %arg8[%c16, %c0_46], %41 {strides = array<i32>} : memref<32x192xf32, #tpu.memory_space<vmem>>, vector<2x192xf32>,
    %c9 = arith.constant 9 : index
    %c0_47 = arith.constant 0 : index
    %c0_48 = arith.constant 0 : index
    %43 = vector.load %arg4[%c9, %c0_47, %c0_48] : memref<16x384x192xbf16, #tpu.memory_space<vmem>>, vector<1x384x192xbf16>
    %44 = vector.shape_cast %43 : vector<1x384x192xbf16> to vector<384x192xbf16>
    %cst_49 = arith.constant dense<0.000000e+00> : vector<2x192xf32>
    %45 = tpu.matmul %6, %44, %cst_49 {dimension_numbers = #tpu.dot_dimension_numbers<[1], [0], [0], [1], [0, 0, 1, 1], [], []>} : vector<2x384xbf16>, vector<384x192xbf16>, vector<2x192xf32> -> vector<2x192xf32>
    %c18 = arith.constant 18 : index
    %c0_50 = arith.constant 0 : index
    %46 = vector.load %arg8[%c18, %c0_50] : memref<32x192xf32, #tpu.memory_space<vmem>>, vector<2x192xf32>
    tpu.vector_store %arg8[%c18, %c0_50], %45 {strides = array<i32>} : memref<32x192xf32, #tpu.memory_space<vmem>>, vector<2x192xf32>,
    %c10_51 = arith.constant 10 : index
    %c0_52 = arith.constant 0 : index
    %c0_53 = arith.constant 0 : index
    %47 = vector.load %arg4[%c10_51, %c0_52, %c0_53] : memref<16x384x192xbf16, #tpu.memory_space<vmem>>, vector<1x384x192xbf16>
    %48 = vector.shape_cast %47 : vector<1x384x192xbf16> to vector<384x192xbf16>
    %cst_54 = arith.constant dense<0.000000e+00> : vector<2x192xf32>
    %49 = tpu.matmul %6, %48, %cst_54 {dimension_numbers = #tpu.dot_dimension_numbers<[1], [0], [0], [1], [0, 0, 1, 1], [], []>} : vector<2x384xbf16>, vector<384x192xbf16>, vector<2x192xf32> -> vector<2x192xf32>
    %c20 = arith.constant 20 : index
    %c0_55 = arith.constant 0 : index
    %50 = vector.load %arg8[%c20, %c0_55] : memref<32x192xf32, #tpu.memory_space<vmem>>, vector<2x192xf32>
    tpu.vector_store %arg8[%c20, %c0_55], %49 {strides = array<i32>} : memref<32x192xf32, #tpu.memory_space<vmem>>, vector<2x192xf32>,
    %c11 = arith.constant 11 : index
    %c0_56 = arith.constant 0 : index
    %c0_57 = arith.constant 0 : index
    %51 = vector.load %arg4[%c11, %c0_56, %c0_57] : memref<16x384x192xbf16, #tpu.memory_space<vmem>>, vector<1x384x192xbf16>
    %52 = vector.shape_cast %51 : vector<1x384x192xbf16> to vector<384x192xbf16>
    %cst_58 = arith.constant dense<0.000000e+00> : vector<2x192xf32>
    %53 = tpu.matmul %6, %52, %cst_58 {dimension_numbers = #tpu.dot_dimension_numbers<[1], [0], [0], [1], [0, 0, 1, 1], [], []>} : vector<2x384xbf16>, vector<384x192xbf16>, vector<2x192xf32> -> vector<2x192xf32>
    %c22 = arith.constant 22 : index
    %c0_59 = arith.constant 0 : index
    %54 = vector.load %arg8[%c22, %c0_59] : memref<32x192xf32, #tpu.memory_space<vmem>>, vector<2x192xf32>
    tpu.vector_store %arg8[%c22, %c0_59], %53 {strides = array<i32>} : memref<32x192xf32, #tpu.memory_space<vmem>>, vector<2x192xf32>,
    %c12_60 = arith.constant 12 : index
    %c0_61 = arith.constant 0 : index
    %c0_62 = arith.constant 0 : index
    %55 = vector.load %arg4[%c12_60, %c0_61, %c0_62] : memref<16x384x192xbf16, #tpu.memory_space<vmem>>, vector<1x384x192xbf16>
    %56 = vector.shape_cast %55 : vector<1x384x192xbf16> to vector<384x192xbf16>
    %cst_63 = arith.constant dense<0.000000e+00> : vector<2x192xf32>
    %57 = tpu.matmul %6, %56, %cst_63 {dimension_numbers = #tpu.dot_dimension_numbers<[1], [0], [0], [1], [0, 0, 1, 1], [], []>} : vector<2x384xbf16>, vector<384x192xbf16>, vector<2x192xf32> -> vector<2x192xf32>
    %c24 = arith.constant 24 : index
    %c0_64 = arith.constant 0 : index
    %58 = vector.load %arg8[%c24, %c0_64] : memref<32x192xf32, #tpu.memory_space<vmem>>, vector<2x192xf32>
    tpu.vector_store %arg8[%c24, %c0_64], %57 {strides = array<i32>} : memref<32x192xf32, #tpu.memory_space<vmem>>, vector<2x192xf32>,
    %c13 = arith.constant 13 : index
    %c0_65 = arith.constant 0 : index
    %c0_66 = arith.constant 0 : index
    %59 = vector.load %arg4[%c13, %c0_65, %c0_66] : memref<16x384x192xbf16, #tpu.memory_space<vmem>>, vector<1x384x192xbf16>
    %60 = vector.shape_cast %59 : vector<1x384x192xbf16> to vector<384x192xbf16>
    %cst_67 = arith.constant dense<0.000000e+00> : vector<2x192xf32>
    %61 = tpu.matmul %6, %60, %cst_67 {dimension_numbers = #tpu.dot_dimension_numbers<[1], [0], [0], [1], [0, 0, 1, 1], [], []>} : vector<2x384xbf16>, vector<384x192xbf16>, vector<2x192xf32> -> vector<2x192xf32>
    %c26 = arith.constant 26 : index
    %c0_68 = arith.constant 0 : index
    %62 = vector.load %arg8[%c26, %c0_68] : memref<32x192xf32, #tpu.memory_space<vmem>>, vector<2x192xf32>
    tpu.vector_store %arg8[%c26, %c0_68], %61 {strides = array<i32>} : memref<32x192xf32, #tpu.memory_space<vmem>>, vector<2x192xf32>,
    %c14_69 = arith.constant 14 : index
    %c0_70 = arith.constant 0 : index
    %c0_71 = arith.constant 0 : index
    %63 = vector.load %arg4[%c14_69, %c0_70, %c0_71] : memref<16x384x192xbf16, #tpu.memory_space<vmem>>, vector<1x384x192xbf16>
    %64 = vector.shape_cast %63 : vector<1x384x192xbf16> to vector<384x192xbf16>
    %cst_72 = arith.constant dense<0.000000e+00> : vector<2x192xf32>
    %65 = tpu.matmul %6, %64, %cst_72 {dimension_numbers = #tpu.dot_dimension_numbers<[1], [0], [0], [1], [0, 0, 1, 1], [], []>} : vector<2x384xbf16>, vector<384x192xbf16>, vector<2x192xf32> -> vector<2x192xf32>
    %c28 = arith.constant 28 : index
    %c0_73 = arith.constant 0 : index
    %66 = vector.load %arg8[%c28, %c0_73] : memref<32x192xf32, #tpu.memory_space<vmem>>, vector<2x192xf32>
    tpu.vector_store %arg8[%c28, %c0_73], %65 {strides = array<i32>} : memref<32x192xf32, #tpu.memory_space<vmem>>, vector<2x192xf32>,
    %c15 = arith.constant 15 : index
    %c0_74 = arith.constant 0 : index
    %c0_75 = arith.constant 0 : index
    %67 = vector.load %arg4[%c15, %c0_74, %c0_75] : memref<16x384x192xbf16, #tpu.memory_space<vmem>>, vector<1x384x192xbf16>
    %68 = vector.shape_cast %67 : vector<1x384x192xbf16> to vector<384x192xbf16>
    %cst_76 = arith.constant dense<0.000000e+00> : vector<2x192xf32>
    %69 = tpu.matmul %6, %68, %cst_76 {dimension_numbers = #tpu.dot_dimension_numbers<[1], [0], [0], [1], [0, 0, 1, 1], [], []>} : vector<2x384xbf16>, vector<384x192xbf16>, vector<2x192xf32> -> vector<2x192xf32>
    %c30 = arith.constant 30 : index
    %c0_77 = arith.constant 0 : index
    %70 = vector.load %arg8[%c30, %c0_77] : memref<32x192xf32, #tpu.memory_space<vmem>>, vector<2x192xf32>
    tpu.vector_store %arg8[%c30, %c0_77], %69 {strides = array<i32>} : memref<32x192xf32, #tpu.memory_space<vmem>>, vector<2x192xf32>,
    %c0_78 = arith.constant 0 : index
    %c0_79 = arith.constant 0 : index
    %71 = vector.load %arg8[%c0_78, %c0_79] : memref<32x192xf32, #tpu.memory_space<vmem>>, vector<32x192xf32>
    %cst_80 = arith.constant dense<0.000000e+00> : vector<192xf32>
    %72 = vector.multi_reduction <add>, %71, %cst_80 [0] : vector<32x192xf32> to vector<192xf32>
    %73 = vector.shape_cast %72 : vector<192xf32> to vector<1x192xf32>
    %cst_81 = arith.constant 3.200000e+01 : f32
    %74 = vector.broadcast %cst_81 : f32 to vector<1x192xf32>
    %75 = arith.divf %73, %74 : vector<1x192xf32>
    %76 = vector.broadcast %75 : vector<1x192xf32> to vector<32x192xf32>
    %77 = arith.subf %71, %76 : vector<32x192xf32>
    %78 = arith.mulf %77, %77 : vector<32x192xf32>
    %cst_82 = arith.constant dense<0.000000e+00> : vector<192xf32>
    %79 = vector.multi_reduction <add>, %78, %cst_82 [0] : vector<32x192xf32> to vector<192xf32>
    %80 = vector.shape_cast %79 : vector<192xf32> to vector<1x192xf32>
    %cst_83 = arith.constant 3.200000e+01 : f32
    %81 = vector.broadcast %cst_83 : f32 to vector<1x192xf32>
    %82 = arith.divf %80, %81 : vector<1x192xf32>
    %83 = vector.broadcast %75 : vector<1x192xf32> to vector<32x192xf32>
    %84 = arith.subf %71, %83 : vector<32x192xf32>
    %cst_84 = arith.constant 9.99999974E-6 : f32
    %85 = vector.broadcast %cst_84 : f32 to vector<1x192xf32>
    %86 = arith.addf %82, %85 : vector<1x192xf32>
    %87 = math.rsqrt %86 : vector<1x192xf32>
    %88 = vector.broadcast %87 : vector<1x192xf32> to vector<32x192xf32>
    %89 = arith.mulf %84, %88 : vector<32x192xf32>
    %c0_85 = arith.constant 0 : index
    %c0_86 = arith.constant 0 : index
    %90 = vector.load %arg5[%c0_85, %c0_86] : memref<1x192xf32, #tpu.memory_space<vmem>>, vector<1x192xf32>
    %91 = vector.broadcast %90 : vector<1x192xf32> to vector<32x192xf32>
    %92 = arith.mulf %89, %91 : vector<32x192xf32>
    %c0_87 = arith.constant 0 : index
    %c0_88 = arith.constant 0 : index
    %93 = vector.load %arg6[%c0_87, %c0_88] : memref<1x192xf32, #tpu.memory_space<vmem>>, vector<1x192xf32>
    %94 = vector.broadcast %93 : vector<1x192xf32> to vector<32x192xf32>
    %95 = arith.addf %92, %94 : vector<32x192xf32>
    %cst_89 = arith.constant 0.000000e+00 : f32
    %96 = vector.broadcast %cst_89 : f32 to vector<32x192xf32>
    %97 = arith.maximumf %95, %96 : vector<32x192xf32>
    %98 = arith.truncf %97 : vector<32x192xf32> to vector<32x192xbf16>
    %c0_90 = arith.constant 0 : index
    %c0_91 = arith.constant 0 : index
    %99 = vector.load %arg7[%c0_90, %c0_91] : memref<32x192xbf16, #tpu.memory_space<vmem>>, vector<32x192xbf16>
    tpu.vector_store %arg7[%c0_90, %c0_91], %98 {strides = array<i32>} : memref<32x192xbf16, #tpu.memory_space<vmem>>, vector<32x192xbf16>,
    return
  }
  func.func @transform_0(%arg0: i32) -> (i32, i32) {
    %c0_i32 = arith.constant 0 : i32
    %c0_i32_0 = arith.constant 0 : i32
    %c0_i32_1 = arith.constant 0 : i32
    return %c0_i32, %c0_i32_0 : i32, i32
  }
  func.func @transform_1(%arg0: i32) -> (i32, i32) {
    %c0_i32 = arith.constant 0 : i32
    %c0_i32_0 = arith.constant 0 : i32
    %c0_i32_1 = arith.constant 0 : i32
    return %c0_i32, %c0_i32_0 : i32, i32
  }
  func.func @transform_2(%arg0: i32) -> (i32, i32) {
    %c0_i32 = arith.constant 0 : i32
    %c0_i32_0 = arith.constant 0 : i32
    %c0_i32_1 = arith.constant 0 : i32
    return %c0_i32, %c0_i32_0 : i32, i32
  }
  func.func @transform_3(%arg0: i32) -> (i32, i32, i32) {
    %c0_i32 = arith.constant 0 : i32
    %c0_i32_0 = arith.constant 0 : i32
    %c0_i32_1 = arith.constant 0 : i32
    %c0_i32_2 = arith.constant 0 : i32
    return %c0_i32, %c0_i32_0, %c0_i32_1 : i32, i32, i32
  }
  func.func @transform_4(%arg0: i32) -> (i32, i32) {
    %c0_i32 = arith.constant 0 : i32
    %c0_i32_0 = arith.constant 0 : i32
    %c0_i32_1 = arith.constant 0 : i32
    return %c0_i32, %c0_i32_0 : i32, i32
  }
  func.func @transform_5(%arg0: i32) -> (i32, i32) {
    %c0_i32 = arith.constant 0 : i32
    %c0_i32_0 = arith.constant 0 : i32
    %c0_i32_1 = arith.constant 0 : i32
    return %c0_i32, %c0_i32_0 : i32, i32
  }
  func.func @transform_6(%arg0: i32) -> (i32, i32) {
    %c0_i32 = arith.constant 0 : i32
    %c0_i32_0 = arith.constant 0 : i32
    %c0_i32_1 = arith.constant 0 : i32
    return %c0_i32, %c0_i32_0 : i32, i32
  }
}

</mosaic_0001>

<bundles_post_ra>
// kernel: tpu_custom_call.1
= control target key start
LH: loop header
LB: loop body
LE: loop exit
PB: predicated region body
PF: predicated region fallthrough
CT: control target
= control target key end

     0   :  { %vm95_vm0 = vcmask 1044480   ;;  %vm91_vm1 = vcmask 343040   ;;  %s15890_s0 = inlined_call_operand.vmem [shape: bf16[2,42], index: 0, kind: input, shape index: {}]   ;;  %s15891_s1 = inlined_call_operand.vmem [shape: bf16[42,384], index: 1, kind: input, shape index: {}]   ;;  %s15892_s2 = inlined_call_operand.vmem [shape: f32[1,384], index: 2, kind: input, shape index: {}]   ;;  %s15893_s3 = inlined_call_operand.vmem [shape: bf16[16,384,192], index: 3, kind: input, shape index: {}]   ;;  %s15894_s4 = inlined_call_operand.vmem [shape: f32[1,192], index: 4, kind: input, shape index: {}]   ;;  %s15895_s5 = inlined_call_operand.vmem [shape: f32[1,192], index: 5, kind: input, shape index: {}]   ;;  %s15896_s6 = inlined_call_operand.hbm [shape: bf16[32,192], index: 6, kind: output, shape index: {}]  }
   0x1   :  { %v6327_v0 = vld [vmem:[%s15891_s1 + $0x30] sm:$0xf]  ;;  %v10139_v1 = vld [vmem:[%s15891_s1 + $0x38] sm:$0x10]  ;;  %v10138_v3 = vld [vmem:[%s15891_s1 + $0x34] sm:$0xf] }
   0x2   :  { %v6328_v2 = vor.u32 %v10139_v1, %v6327_v0  ;;  %v6329_v4 = vld [vmem:[%s15891_s1 + $0x3c] sm:$0x10]  ;;  %v6335_v5 = vld [vmem:[%s15891_s1 + $0x38] sm:$0xf]  ;;  %v10140_v7 = vld [vmem:[%s15891_s1 + $0x40] sm:$0x10] }
   0x3   :  { %v6332_v6 = vor.u32 %v10138_v3, %v6329_v4  ;;  %v6315_v8 = vld [vmem:[%s15891_s1 + $0x18] sm:$0xf]  ;;  %v10136_v9 = vld [vmem:[%s15891_s1 + $0x20] sm:$0xf0]  ;;  %v6336_v11 = vor.u32 %v10140_v7, %v6335_v5  ;;  %v10135_v12 = vld [vmem:[%s15891_s1 + $0x1c] sm:$0xf] }
   0x4   :  { %v97_v10 = vsel %vm95_vm0, %v6328_v2, 0  ;;  %v6317_v13 = vld [vmem:[%s15891_s1 + $0x24] sm:$0xf0]  ;;  %v6316_v15 = vor.u32 %v10136_v9, %v6315_v8  ;;  %v6323_v16 = vld [vmem:[%s15891_s1 + $0x20] sm:$0xf] }
   0x5   :  { %110 = vmatpush.bf16.msra.mxu0 %v97_v10  ;;  %v100_v14 = vsel %vm95_vm0, %v6332_v6, 0  ;;  %v10137_v17 = vld [vmem:[%s15891_s1 + $0x28] sm:$0xf0]  ;;  %v103_v18 = vsel %vm95_vm0, %v6336_v11, 0  ;;  %v6320_v19 = vor.u32 %v10135_v12, %v6317_v13  ;;  %v6303_v20 = vld [vmem:[%s15891_s1] sm:$0xf] }
   0x6   :  { %123 = vmatpush.bf16.msra.mxu1 %v100_v14  ;;  %v10133_v21 = vld [vmem:[%s15891_s1 + $0x8] sm:$0xf0]  ;;  %136 = vmatpush.bf16.msra.mxu2 %v103_v18  ;;  %v6324_v22 = vor.u32 %v10137_v17, %v6323_v16  ;;  %v10132_v23 = vld [vmem:[%s15891_s1 + $0x4] sm:$0xf]  ;;  %v6305_v24 = vld [vmem:[%s15891_s1 + $0xc] sm:$0xf0] }
   0x7   :  { %v6311_v25 = vld [vmem:[%s15891_s1 + $0x8] sm:$0xf]  ;;  %v10134_v26 = vld [vmem:[%s15891_s1 + $0x10] sm:$0xf0]  ;;  %v6398_v27 = vld [vmem:[%s15893_s3 + $0x70] sm:$0xf]  ;;  %v6304_v28 = vor.u32 %v10133_v21, %v6303_v20  ;;  %v6308_v32 = vor.u32 %v10132_v23, %v6305_v24 }
   0x8   :  { %v10156_v29 = vld [vmem:[%s15893_s3 + $0x74] sm:$0xf0]  ;;  %v6462_v30 = vld [vmem:[%s15893_s3 + $0xf0] sm:$0xf]  ;;  %v10155_v35 = vld [vmem:[%s15893_s3 + $0x74] sm:$0xf]  ;;  %v6312_v38 = vor.u32 %v10134_v26, %v6311_v25 }
   0x9   :  { %111 = vmatpush.bf16.msra.mxu0 %v6316_v15  ;;  %v10172_v31 = vld [vmem:[%s15893_s3 + $0xf4] sm:$0xf0]  ;;  %v6399_v33 = vor.u32 %v10156_v29, %v6398_v27  ;;  %v6400_v36 = vld [vmem:[%s15893_s3 + $0x78] sm:$0xf0]  ;;  %v6390_v37 = vld [vmem:[%s15893_s3 + $0x60] sm:$0xf] }
   0xa   :  { %124 = vmatpush.bf16.msra.mxu1 %v6320_v19  ;;  %v6463_v34 = vor.u32 %v10172_v31, %v6462_v30  ;;  %137 = vmatpush.bf16.msra.mxu2 %v6324_v22  ;;  %v10154_v39 = vld [vmem:[%s15893_s3 + $0x64] sm:$0xf0]  ;;  %v6454_v40 = vld [vmem:[%s15893_s3 + $0xe0] sm:$0xf]  ;;  %v6403_v43 = vor.u32 %v10155_v35, %v6400_v36  ;;  %v6526_v44 = vld [vmem:[%s15893_s3 + $0x170] sm:$0xf] }
   0xb   :  { %v10170_v41 = vld [vmem:[%s15893_s3 + $0xe4] sm:$0xf0]  ;;  %v25_v42 = vld [vmem:[%s15890_s0] sm:$0x1]  ;;  %435 = vmatpush.bf16.msra.mxu3 %v6399_v33  ;;  %v6391_v45 = vor.u32 %v10154_v39, %v6390_v37  ;;  %v10153_v46 = vld [vmem:[%s15893_s3 + $0x64] sm:$0xf] }
   0xc   :  { %v6392_v47 = vld [vmem:[%s15893_s3 + $0x68] sm:$0xf0]  ;;  %v10188_v48 = vld [vmem:[%s15893_s3 + $0x174] sm:$0xf0]  ;;  %v6455_v49 = vor.u32 %v10170_v41, %v6454_v40  ;;  %v6382_v50 = vld [vmem:[%s15893_s3 + $0x50] sm:$0xf] }
   0xd   :  { %112 = vmatpush.bf16.msra.mxu0 %v6304_v28  ;;  %v10152_v51 = vld [vmem:[%s15893_s3 + $0x54] sm:$0xf0]  ;;  %v6527_v52 = vor.u32 %v10188_v48, %v6526_v44  ;;  %v6446_v53 = vld [vmem:[%s15893_s3 + $0xd0] sm:$0xf]  ;;  %v6395_v55 = vor.u32 %v10153_v46, %v6392_v47  ;;  %v6518_v56 = vld [vmem:[%s15893_s3 + $0x160] sm:$0xf] }
   0xe   :  { %125 = vmatpush.bf16.msra.mxu1 %v6308_v32  ;;  %138 = vmatpush.bf16.msra.mxu2 %v6312_v38  ;;  %v10168_v54 = vld [vmem:[%s15893_s3 + $0xd4] sm:$0xf0]  ;;  %v10186_v57 = vld [vmem:[%s15893_s3 + $0x164] sm:$0xf0]  ;;  %v6383_v58 = vor.u32 %v10152_v51, %v6382_v50  ;;  %v10151_v59 = vld [vmem:[%s15893_s3 + $0x54] sm:$0xf] }
   0xf   :  { %436 = vmatpush.bf16.msra.mxu3 %v6391_v45  ;;  %v6384_v60 = vld [vmem:[%s15893_s3 + $0x58] sm:$0xf0]  ;;  %v6447_v61 = vor.u32 %v10168_v54, %v6446_v53  ;;  %v6374_v62 = vld [vmem:[%s15893_s3 + $0x40] sm:$0xf]  ;;  %v10150_v63 = vld [vmem:[%s15893_s3 + $0x44] sm:$0xf0]  ;;  %v6519_v0 = vor.u32 %v10186_v57, %v6518_v56 }
  0x10   :  { %6337 = vmatmul.msk.bf16.vlgmr.msra.gmra.mxu0 %vm91_vm1, %v25_v42  ;;  %v6438_v1 = vld [vmem:[%s15893_s3 + $0xc0] sm:$0xf]  ;;  %v10166_v2 = vld [vmem:[%s15893_s3 + $0xc4] sm:$0xf0]  ;;  %v6387_v3 = vor.u32 %v10151_v59, %v6384_v60  ;;  %v6510_v4 = vld [vmem:[%s15893_s3 + $0x150] sm:$0xf]  ;;  %v6375_v6 = vor.u32 %v10150_v63, %v6374_v62 }
  0x11   :  { %448 = vmatpush.bf16.msrb.mxu0 %v6463_v34  ;;  %6338 = vmatmul.msk.bf16.vlgmr.msra.gmra.mxu1 %vm91_vm1, %v25_v42  ;;  %v10184_v5 = vld [vmem:[%s15893_s3 + $0x154] sm:$0xf0]  ;;  %v10149_v7 = vld [vmem:[%s15893_s3 + $0x44] sm:$0xf]  ;;  %v6376_v8 = vld [vmem:[%s15893_s3 + $0x48] sm:$0xf0]  ;;  %v6439_v9 = vor.u32 %v10166_v2, %v6438_v1 }
  0x12   :  { %474 = vmatpush.bf16.msrb.mxu2 %v6403_v43  ;;  %461 = vmatpush.bf16.msrb.mxu1 %v6527_v52  ;;  %v6366_v10 = vld [vmem:[%s15893_s3 + $0x30] sm:$0xf]  ;;  %v10148_v11 = vld [vmem:[%s15893_s3 + $0x34] sm:$0xf0]  ;;  %v6511_v12 = vor.u32 %v10184_v5, %v6510_v4  ;;  %v6379_v15 = vor.u32 %v10149_v7, %v6376_v8  ;;  %v6502_v16 = vld [vmem:[%s15893_s3 + $0x140] sm:$0xf] }
  0x13   :  { %6339 = vmatmul.msk.bf16.vlgmr.msra.gmra.mxu2 %vm91_vm1, %v25_v42  ;;  %437 = vmatpush.bf16.msra.mxu3 %v6383_v58  ;;  %v6430_v13 = vld [vmem:[%s15893_s3 + $0xb0] sm:$0xf]  ;;  %v10164_v14 = vld [vmem:[%s15893_s3 + $0xb4] sm:$0xf0]  ;;  %v10182_v17 = vld [vmem:[%s15893_s3 + $0x144] sm:$0xf0]  ;;  %v6367_v18 = vor.u32 %v10148_v11, %v6366_v10 }
  0x14   :  { %v10147_v19 = vld [vmem:[%s15893_s3 + $0x34] sm:$0xf]  ;;  %v6368_v20 = vld [vmem:[%s15893_s3 + $0x38] sm:$0xf0]  ;;  %v6431_v21 = vor.u32 %v10164_v14, %v6430_v13  ;;  %v6358_v22 = vld [vmem:[%s15893_s3 + $0x20] sm:$0xf]  ;;  %v6503_v24 = vor.u32 %v10182_v17, %v6502_v16 }
  0x15   :  { %449 = vmatpush.bf16.msrb.mxu0 %v6455_v49  ;;  %v10146_v23 = vld [vmem:[%s15893_s3 + $0x24] sm:$0xf0]  ;;  %v6422_v25 = vld [vmem:[%s15893_s3 + $0xa0] sm:$0xf]  ;;  %v6371_v27 = vor.u32 %v10147_v19, %v6368_v20  ;;  %v6494_v28 = vld [vmem:[%s15893_s3 + $0x130] sm:$0xf] }
  0x16   :  { %475 = vmatpush.bf16.msrb.mxu2 %v6395_v55  ;;  %462 = vmatpush.bf16.msrb.mxu1 %v6519_v0  ;;  %v10162_v26 = vld [vmem:[%s15893_s3 + $0xa4] sm:$0xf0]  ;;  %v10180_v29 = vld [vmem:[%s15893_s3 + $0x134] sm:$0xf0]  ;;  %v6359_v30 = vor.u32 %v10146_v23, %v6358_v22  ;;  %v10145_v31 = vld [vmem:[%s15893_s3 + $0x24] sm:$0xf] }
  0x17   :  { %438 = vmatpush.bf16.msra.mxu3 %v6375_v6  ;;  %v6360_v32 = vld [vmem:[%s15893_s3 + $0x28] sm:$0xf0]  ;;  %v6423_v33 = vor.u32 %v10162_v26, %v6422_v25  ;;  %v6350_v34 = vld [vmem:[%s15893_s3 + $0x10] sm:$0xf]  ;;  %v10144_v35 = vld [vmem:[%s15893_s3 + $0x14] sm:$0xf0]  ;;  %v6495_v36 = vor.u32 %v10180_v29, %v6494_v28 }
  0x18   :  { %v6414_v37 = vld [vmem:[%s15893_s3 + $0x90] sm:$0xf]  ;;  %v10160_v38 = vld [vmem:[%s15893_s3 + $0x94] sm:$0xf0]  ;;  %v6363_v39 = vor.u32 %v10145_v31, %v6360_v32  ;;  %v6486_v40 = vld [vmem:[%s15893_s3 + $0x120] sm:$0xf]  ;;  %v6351_v42 = vor.u32 %v10144_v35, %v6350_v34 }
  0x19   :  { %450 = vmatpush.bf16.msrb.mxu0 %v6447_v61  ;;  %v10178_v41 = vld [vmem:[%s15893_s3 + $0x124] sm:$0xf0]  ;;  %v10143_v43 = vld [vmem:[%s15893_s3 + $0x14] sm:$0xf]  ;;  %v6352_v44 = vld [vmem:[%s15893_s3 + $0x18] sm:$0xf0]  ;;  %v6415_v46 = vor.u32 %v10160_v38, %v6414_v37 }
  0x1a   :  { %476 = vmatpush.bf16.msrb.mxu2 %v6387_v3  ;;  %463 = vmatpush.bf16.msrb.mxu1 %v6511_v12  ;;  %v6342_v45 = vld [vmem:[%s15893_s3] sm:$0xf]  ;;  %v10142_v47 = vld [vmem:[%s15893_s3 + $0x4] sm:$0xf0]  ;;  %v6487_v50 = vor.u32 %v10178_v41, %v6486_v40  ;;  %v10171_v51 = vld [vmem:[%s15893_s3 + $0xf4] sm:$0xf]  ;;  %v6355_v54 = vor.u32 %v10143_v43, %v6352_v44 }
  0x1b   :  { %439 = vmatpush.bf16.msra.mxu3 %v6367_v18  ;;  %v6406_v48 = vld [vmem:[%s15893_s3 + $0x80] sm:$0xf]  ;;  %v10158_v49 = vld [vmem:[%s15893_s3 + $0x84] sm:$0xf0]  ;;  %v6464_v52 = vld [vmem:[%s15893_s3 + $0xf8] sm:$0xf0]  ;;  %v6343_v58 = vor.u32 %v10142_v47, %v6342_v45 }
  0x1c   :  { %v10187_v53 = vld [vmem:[%s15893_s3 + $0x174] sm:$0xf]  ;;  %v6528_v55 = vld [vmem:[%s15893_s3 + $0x178] sm:$0xf0]  ;;  %v6478_v56 = vld [vmem:[%s15893_s3 + $0x110] sm:$0xf]  ;;  %v6407_v61 = vor.u32 %v10158_v49, %v6406_v48  ;;  %v6467_v62 = vor.u32 %v10171_v51, %v6464_v52 }
  0x1d   :  { %451 = vmatpush.bf16.msrb.mxu0 %v6439_v9  ;;  %v10176_v57 = vld [vmem:[%s15893_s3 + $0x114] sm:$0xf0]  ;;  %v10141_v59 = vld [vmem:[%s15893_s3 + $0x4] sm:$0xf]  ;;  %v6344_v60 = vld [vmem:[%s15893_s3 + $0x8] sm:$0xf0]  ;;  %v6531_v1 = vor.u32 %v10187_v53, %v6528_v55 }
  0x1e   :  { %477 = vmatpush.bf16.msrb.mxu2 %v6379_v15  ;;  %464 = vmatpush.bf16.msrb.mxu1 %v6503_v24  ;;  %v6702_v63 = vld [vmem:[%s15893_s3 + $0x270] sm:$0xf]  ;;  %v10220_v0 = vld [vmem:[%s15893_s3 + $0x274] sm:$0xf0]  ;;  %v6479_v2 = vor.u32 %v10176_v57, %v6478_v56  ;;  %v10169_v3 = vld [vmem:[%s15893_s3 + $0xe4] sm:$0xf]  ;;  %v6347_v6 = vor.u32 %v10141_v59, %v6344_v60 }
  0x1f   :  { %440 = vmatpush.bf16.msra.mxu3 %v6359_v30  ;;  %v6456_v4 = vld [vmem:[%s15893_s3 + $0xe8] sm:$0xf0]  ;;  %v10185_v5 = vld [vmem:[%s15893_s3 + $0x164] sm:$0xf]  ;;  %v6470_v8 = vld [vmem:[%s15893_s3 + $0x100] sm:$0xf]  ;;  %v6703_v10 = vor.u32 %v10220_v0, %v6702_v63 }
  0x20   :  { %v6520_v7 = vld [vmem:[%s15893_s3 + $0x168] sm:$0xf0]  ;;  %v10174_v9 = vld [vmem:[%s15893_s3 + $0x104] sm:$0xf0]  ;;  %v6638_v11 = vld [vmem:[%s15893_s3 + $0x1f0] sm:$0xf]  ;;  %v6459_v13 = vor.u32 %v10169_v3, %v6456_v4 }
  0x21   :  { %452 = vmatpush.bf16.msrb.mxu0 %v6431_v21  ;;  %v10204_v12 = vld [vmem:[%s15893_s3 + $0x1f4] sm:$0xf0]  ;;  %v6694_v14 = vld [vmem:[%s15893_s3 + $0x260] sm:$0xf]  ;;  %v10218_v15 = vld [vmem:[%s15893_s3 + $0x264] sm:$0xf0]  ;;  %v6523_v16 = vor.u32 %v10185_v5, %v6520_v7  ;;  %v6471_v17 = vor.u32 %v10174_v9, %v6470_v8 }
  0x22   :  { %478 = vmatpush.bf16.msrb.mxu2 %v6371_v27  ;;  %465 = vmatpush.bf16.msrb.mxu1 %v6495_v36  ;;  %v10167_v18 = vld [vmem:[%s15893_s3 + $0xd4] sm:$0xf]  ;;  %v6448_v19 = vld [vmem:[%s15893_s3 + $0xd8] sm:$0xf0]  ;;  %v6639_v20 = vor.u32 %v10204_v12, %v6638_v11  ;;  %v6695_v23 = vor.u32 %v10218_v15, %v6694_v14  ;;  %v6630_v24 = vld [vmem:[%s15893_s3 + $0x1e0] sm:$0xf] }
  0x23   :  { %441 = vmatpush.bf16.msra.mxu3 %v6351_v42  ;;  %v10183_v21 = vld [vmem:[%s15893_s3 + $0x154] sm:$0xf]  ;;  %v6512_v22 = vld [vmem:[%s15893_s3 + $0x158] sm:$0xf0]  ;;  %v10202_v25 = vld [vmem:[%s15893_s3 + $0x1e4] sm:$0xf0] }
  0x25   :  { %453 = vmatpush.bf16.msrb.mxu0 %v6423_v33 }
  0x26   :  { %479 = vmatpush.bf16.msrb.mxu2 %v6363_v39  ;;  %466 = vmatpush.bf16.msrb.mxu1 %v6487_v50 }
  0x27   :  { %442 = vmatpush.bf16.msra.mxu3 %v6343_v58 }
  0x29   :  { %454 = vmatpush.bf16.msrb.mxu0 %v6415_v46 }
  0x2a   :  { %480 = vmatpush.bf16.msrb.mxu2 %v6355_v54  ;;  %467 = vmatpush.bf16.msrb.mxu1 %v6479_v2 }
  0x2b   :  { %487 = vmatpush.bf16.msrb.mxu3 %v6467_v62 }
  0x2d   :  { %455 = vmatpush.bf16.msrb.mxu0 %v6407_v61 }
  0x2e   :  { %481 = vmatpush.bf16.msrb.mxu2 %v6347_v6 }
  0x31   :  { %500 = vmatpush.bf16.msra.mxu0 %v6531_v1 }
  0x32   :  { %818 = vmatpush.bf16.msra.mxu2 %v6703_v10 }
  0x33   :  { %11 = vsyncpa [#allocation4], 0  ;;  %488 = vmatpush.bf16.msrb.mxu3 %v6459_v13  ;;  %v6451_v26 = vor.u32 %v10167_v18, %v6448_v19  ;;  %v6686_v27 = vld [vmem:[%s15893_s3 + $0x250] sm:$0xf]  ;;  %v10216_v28 = vld [vmem:[%s15893_s3 + $0x254] sm:$0xf0]  ;;  %468 = vmatpush.bf16.msrb.mxu1 %v6471_v17  ;;  %v6515_v29 = vor.u32 %v10183_v21, %v6512_v22  ;;  %v6631_v32 = vor.u32 %v10202_v25, %v6630_v24 }
  0x34   :  { %v10165_v30 = vld [vmem:[%s15893_s3 + $0xc4] sm:$0xf]  ;;  %v6440_v31 = vld [vmem:[%s15893_s3 + $0xc8] sm:$0xf0]  ;;  %v6687_v35 = vor.u32 %v10216_v28, %v6686_v27  ;;  %v6622_v36 = vld [vmem:[%s15893_s3 + $0x1d0] sm:$0xf] }
  0x35   :  { %501 = vmatpush.bf16.msra.mxu0 %v6523_v16  ;;  %v10181_v33 = vld [vmem:[%s15893_s3 + $0x144] sm:$0xf]  ;;  %v6504_v34 = vld [vmem:[%s15893_s3 + $0x148] sm:$0xf0]  ;;  %v10200_v37 = vld [vmem:[%s15893_s3 + $0x1d4] sm:$0xf0]  ;;  %v6443_v38 = vor.u32 %v10165_v30, %v6440_v31 }
  0x36   :  { %819 = vmatpush.bf16.msra.mxu2 %v6695_v23  ;;  %v6678_v39 = vld [vmem:[%s15893_s3 + $0x240] sm:$0xf]  ;;  %v10214_v40 = vld [vmem:[%s15893_s3 + $0x244] sm:$0xf0]  ;;  %v6507_v41 = vor.u32 %v10181_v33, %v6504_v34  ;;  %v10163_v42 = vld [vmem:[%s15893_s3 + $0xb4] sm:$0xf]  ;;  %v6623_v44 = vor.u32 %v10200_v37, %v6622_v36 }
  0x37   :  { %805 = vmatpush.bf16.msra.mxu1 %v6639_v20  ;;  %489 = vmatpush.bf16.msrb.mxu3 %v6451_v26  ;;  %v6432_v43 = vld [vmem:[%s15893_s3 + $0xb8] sm:$0xf0]  ;;  %v10179_v45 = vld [vmem:[%s15893_s3 + $0x134] sm:$0xf]  ;;  %v6679_v47 = vor.u32 %v10214_v40, %v6678_v39  ;;  %v6614_v48 = vld [vmem:[%s15893_s3 + $0x1c0] sm:$0xf] }
  0x38   :  { %v6496_v46 = vld [vmem:[%s15893_s3 + $0x138] sm:$0xf0]  ;;  %v10198_v49 = vld [vmem:[%s15893_s3 + $0x1c4] sm:$0xf0]  ;;  %v6435_v50 = vor.u32 %v10163_v42, %v6432_v43  ;;  %v6670_v51 = vld [vmem:[%s15893_s3 + $0x230] sm:$0xf] }
  0x39   :  { %502 = vmatpush.bf16.msra.mxu0 %v6515_v29  ;;  %v10212_v52 = vld [vmem:[%s15893_s3 + $0x234] sm:$0xf0]  ;;  %v6499_v53 = vor.u32 %v10179_v45, %v6496_v46  ;;  %v10161_v54 = vld [vmem:[%s15893_s3 + $0xa4] sm:$0xf]  ;;  %v6424_v55 = vld [vmem:[%s15893_s3 + $0xa8] sm:$0xf0]  ;;  %v6615_v56 = vor.u32 %v10198_v49, %v6614_v48 }
  0x3a   :  { %820 = vmatpush.bf16.msra.mxu2 %v6687_v35  ;;  %v10177_v57 = vld [vmem:[%s15893_s3 + $0x124] sm:$0xf]  ;;  %v6488_v58 = vld [vmem:[%s15893_s3 + $0x128] sm:$0xf0]  ;;  %v6671_v59 = vor.u32 %v10212_v52, %v6670_v51  ;;  %v6606_v60 = vld [vmem:[%s15893_s3 + $0x1b0] sm:$0xf]  ;;  %v6427_v62 = vor.u32 %v10161_v54, %v6424_v55 }
  0x3b   :  { %806 = vmatpush.bf16.msra.mxu1 %v6631_v32  ;;  %490 = vmatpush.bf16.msrb.mxu3 %v6443_v38  ;;  %v10196_v61 = vld [vmem:[%s15893_s3 + $0x1b4] sm:$0xf0]  ;;  %v6662_v63 = vld [vmem:[%s15893_s3 + $0x220] sm:$0xf]  ;;  %v10210_v0 = vld [vmem:[%s15893_s3 + $0x224] sm:$0xf0]  ;;  %v6491_v1 = vor.u32 %v10177_v57, %v6488_v58 }
  0x3c   :  { %v6607_v2 = vor.u32 %v10196_v61, %v6606_v60  ;;  %v6663_v3 = vor.u32 %v10210_v0, %v6662_v63  ;;  %v10159_v4 = vld [vmem:[%s15893_s3 + $0x94] sm:$0xf]  ;;  %v6416_v5 = vld [vmem:[%s15893_s3 + $0x98] sm:$0xf0]  ;;  %v6654_v9 = vld [vmem:[%s15893_s3 + $0x210] sm:$0xf] }
  0x3d   :  { %503 = vmatpush.bf16.msra.mxu0 %v6507_v41  ;;  %v10175_v6 = vld [vmem:[%s15893_s3 + $0x114] sm:$0xf]  ;;  %v6419_v7 = vor.u32 %v10159_v4, %v6416_v5  ;;  %v6480_v8 = vld [vmem:[%s15893_s3 + $0x118] sm:$0xf0]  ;;  %v10208_v10 = vld [vmem:[%s15893_s3 + $0x214] sm:$0xf0] }
  0x3e   :  { %821 = vmatpush.bf16.msra.mxu2 %v6679_v47  ;;  %v6483_v11 = vor.u32 %v10175_v6, %v6480_v8  ;;  %v6655_v12 = vor.u32 %v10208_v10, %v6654_v9  ;;  %v6598_v13 = vld [vmem:[%s15893_s3 + $0x1a0] sm:$0xf]  ;;  %v10194_v14 = vld [vmem:[%s15893_s3 + $0x1a4] sm:$0xf0]  ;;  %v10157_v16 = vld [vmem:[%s15893_s3 + $0x84] sm:$0xf] }
  0x3f   :  { %807 = vmatpush.bf16.msra.mxu1 %v6623_v44  ;;  %491 = vmatpush.bf16.msrb.mxu3 %v6435_v50  ;;  %v6599_v15 = vor.u32 %v10194_v14, %v6598_v13  ;;  %v6408_v17 = vld [vmem:[%s15893_s3 + $0x88] sm:$0xf0]  ;;  %v10173_v18 = vld [vmem:[%s15893_s3 + $0x104] sm:$0xf]  ;;  %v6646_v21 = vld [vmem:[%s15893_s3 + $0x200] sm:$0xf] }
  0x40   :  { %v6411_v19 = vor.u32 %v10157_v16, %v6408_v17  ;;  %v6472_v20 = vld [vmem:[%s15893_s3 + $0x108] sm:$0xf0]  ;;  %v10206_v22 = vld [vmem:[%s15893_s3 + $0x204] sm:$0xf0]  ;;  %v6590_v25 = vld [vmem:[%s15893_s3 + $0x190] sm:$0xf] }
  0x41   :  { %504 = vmatpush.bf16.msra.mxu0 %v6499_v53  ;;  %v6475_v23 = vor.u32 %v10173_v18, %v6472_v20  ;;  %v6647_v24 = vor.u32 %v10206_v22, %v6646_v21  ;;  %v10192_v26 = vld [vmem:[%s15893_s3 + $0x194] sm:$0xf0]  ;;  %v6582_v28 = vld [vmem:[%s15893_s3 + $0x180] sm:$0xf]  ;;  %v10190_v29 = vld [vmem:[%s15893_s3 + $0x184] sm:$0xf0] }
  0x42   :  { %822 = vmatpush.bf16.msra.mxu2 %v6671_v59  ;;  %v6591_v27 = vor.u32 %v10192_v26, %v6590_v25  ;;  %v6583_v30 = vor.u32 %v10190_v29, %v6582_v28  ;;  %v38_v31 = vld [vmem:[%s15892_s2] sm:$0x7]  ;;  %v6766_v34 = vld [vmem:[%s15893_s3 + $0x2f0] sm:$0xf]  ;;  %v10236_v35 = vld [vmem:[%s15893_s3 + $0x2f4] sm:$0xf0] }
  0x43   :  { %808 = vmatpush.bf16.msra.mxu1 %v6615_v56  ;;  %492 = vmatpush.bf16.msrb.mxu3 %v6427_v62  ;;  %v40_v32 = vperm.slane %v38_v31, 0  ;;  %v41_v33 = vperm.slane %v38_v31, 1  ;;  %v10203_v36 = vld [vmem:[%s15893_s3 + $0x1f4] sm:$0xf]  ;;  %v6640_v38 = vld [vmem:[%s15893_s3 + $0x1f8] sm:$0xf0]  ;;  %v6767_v44 = vor.u32 %v10236_v35, %v6766_v34 }
  0x44   :  { %v10235_v39 = vld [vmem:[%s15893_s3 + $0x2f4] sm:$0xf]  ;;  %v6768_v40 = vld [vmem:[%s15893_s3 + $0x2f8] sm:$0xf0]  ;;  %v6643_v46 = vor.u32 %v10203_v36, %v6640_v38  ;;  %v6758_v48 = vld [vmem:[%s15893_s3 + $0x2e0] sm:$0xf] }
  0x45   :  { %505 = vmatpush.bf16.msra.mxu0 %v6491_v1  ;;  %v6771_v47 = vor.u32 %v10235_v39, %v6768_v40  ;;  %v10234_v49 = vld [vmem:[%s15893_s3 + $0x2e4] sm:$0xf0]  ;;  %v10201_v50 = vld [vmem:[%s15893_s3 + $0x1e4] sm:$0xf]  ;;  %v6632_v52 = vld [vmem:[%s15893_s3 + $0x1e8] sm:$0xf0] }
  0x46   :  { %823 = vmatpush.bf16.msra.mxu2 %v6663_v3  ;;  %v10233_v53 = vld [vmem:[%s15893_s3 + $0x2e4] sm:$0xf]  ;;  %v6760_v54 = vld [vmem:[%s15893_s3 + $0x2e8] sm:$0xf0]  ;;  %v42_v55 = vperm.slane %v38_v31, 2  ;;  %v6759_v56 = vor.u32 %v10234_v49, %v6758_v48  ;;  %v6635_v59 = vor.u32 %v10201_v50, %v6632_v52  ;;  %vm514_vm2 = vcmask 517120  }
  0x47   :  { %809 = vmatpush.bf16.msra.mxu1 %v6607_v2  ;;  %493 = vmatpush.bf16.msrb.mxu3 %v6419_v7  ;;  %v10219_v57 = vld [vmem:[%s15893_s3 + $0x274] sm:$0xf]  ;;  %v6704_v58 = vld [vmem:[%s15893_s3 + $0x278] sm:$0xf0]  ;;  %v6763_v60 = vor.u32 %v10233_v53, %v6760_v54  ;;  %v6750_v61 = vld [vmem:[%s15893_s3 + $0x2d0] sm:$0xf] }
  0x48   :  { %v10232_v62 = vld [vmem:[%s15893_s3 + $0x2d4] sm:$0xf0]  ;;  %v10199_v63 = vld [vmem:[%s15893_s3 + $0x1d4] sm:$0xf]  ;;  %v6624_v2 = vld [vmem:[%s15893_s3 + $0x1d8] sm:$0xf0]  ;;  %v6707_v7 = vor.u32 %v10219_v57, %v6704_v58 }
  0x49   :  { %506 = vmatpush.bf16.msra.mxu0 %v6483_v11  ;;  %v10231_v3 = vld [vmem:[%s15893_s3 + $0x2d4] sm:$0xf]  ;;  %v6752_v4 = vld [vmem:[%s15893_s3 + $0x2d8] sm:$0xf0]  ;;  %v6751_v8 = vor.u32 %v10232_v62, %v6750_v61  ;;  %v10217_v9 = vld [vmem:[%s15893_s3 + $0x264] sm:$0xf] }
  0x4a   :  { %824 = vmatpush.bf16.msra.mxu2 %v6655_v12  ;;  %v6696_v10 = vld [vmem:[%s15893_s3 + $0x268] sm:$0xf0]  ;;  %v6627_v12 = vor.u32 %v10199_v63, %v6624_v2  ;;  %v6755_v13 = vor.u32 %v10231_v3, %v6752_v4  ;;  %v6742_v14 = vld [vmem:[%s15893_s3 + $0x2c0] sm:$0xf]  ;;  %v10197_v16 = vld [vmem:[%s15893_s3 + $0x1c4] sm:$0xf] }
  0x4b   :  { %810 = vmatpush.bf16.msra.mxu1 %v6599_v15  ;;  %494 = vmatpush.bf16.msrb.mxu3 %v6411_v19  ;;  %v10230_v15 = vld [vmem:[%s15893_s3 + $0x2c4] sm:$0xf0]  ;;  %v6616_v17 = vld [vmem:[%s15893_s3 + $0x1c8] sm:$0xf0]  ;;  %v10229_v18 = vld [vmem:[%s15893_s3 + $0x2c4] sm:$0xf]  ;;  %v6699_v20 = vor.u32 %v10217_v9, %v6696_v10 }
  0x4c   :  { %v6744_v19 = vld [vmem:[%s15893_s3 + $0x2c8] sm:$0xf0]  ;;  %v6743_v21 = vor.u32 %v10230_v15, %v6742_v14  ;;  %v6619_v22 = vor.u32 %v10197_v16, %v6616_v17  ;;  %v6688_v25 = vld [vmem:[%s15893_s3 + $0x258] sm:$0xf0]  ;;  %v6734_v26 = vld [vmem:[%s15893_s3 + $0x2b0] sm:$0xf] }
  0x4d   :  { %507 = vmatpush.bf16.msra.mxu0 %v6475_v23  ;;  %v6747_v23 = vor.u32 %v10229_v18, %v6744_v19  ;;  %v10228_v28 = vld [vmem:[%s15893_s3 + $0x2b4] sm:$0xf0]  ;;  %v10195_v29 = vld [vmem:[%s15893_s3 + $0x1b4] sm:$0xf]  ;;  %v10213_v36 = vld [vmem:[%s15893_s3 + $0x244] sm:$0xf] }
  0x4e   :  { %825 = vmatpush.bf16.msra.mxu2 %v6647_v24  ;;  %v10215_v24 = vld [vmem:[%s15893_s3 + $0x254] sm:$0xf]  ;;  %v6735_v34 = vor.u32 %v10228_v28, %v6734_v26  ;;  %v6726_v38 = vld [vmem:[%s15893_s3 + $0x2a0] sm:$0xf]  ;;  %v10226_v40 = vld [vmem:[%s15893_s3 + $0x2a4] sm:$0xf0] }
  0x4f   :  { %811 = vmatpush.bf16.msra.mxu1 %v6591_v27  ;;  %v10227_v31 = vld [vmem:[%s15893_s3 + $0x2b4] sm:$0xf]  ;;  %v6672_v50 = vld [vmem:[%s15893_s3 + $0x238] sm:$0xf0]  ;;  %v6718_v52 = vld [vmem:[%s15893_s3 + $0x290] sm:$0xf] }
  0x50   :  { %v10211_v49 = vld [vmem:[%s15893_s3 + $0x234] sm:$0xf]  ;;  %v10224_v54 = vld [vmem:[%s15893_s3 + $0x294] sm:$0xf0]  ;;  %v6720_v58 = vld [vmem:[%s15893_s3 + $0x298] sm:$0xf0] }
  0x51   :  { %v10223_v57 = vld [vmem:[%s15893_s3 + $0x294] sm:$0xf]  ;;  %v6664_v61 = vld [vmem:[%s15893_s3 + $0x228] sm:$0xf0]  ;;  %v6719_v62 = vor.u32 %v10224_v54, %v6718_v52  ;;  %v10189_v2 = vld [vmem:[%s15893_s3 + $0x184] sm:$0xf] }
  0x52   :  { %v6723_v3 = vor.u32 %v10223_v57, %v6720_v58  ;;  %v6584_v4 = vld [vmem:[%s15893_s3 + $0x188] sm:$0xf0]  ;;  %v6942_v9 = vld [vmem:[%s15893_s3 + $0x3f0] sm:$0xf]  ;;  %v6880_v14 = vld [vmem:[%s15893_s3 + $0x378] sm:$0xf0] }
  0x53   :  { %812 = vmatpush.bf16.msra.mxu1 %v6583_v30  ;;  %v6608_v30 = vld [vmem:[%s15893_s3 + $0x1b8] sm:$0xf0]  ;;  %v6587_v16 = vor.u32 %v10189_v2, %v6584_v4  ;;  %v10207_v17 = vld [vmem:[%s15893_s3 + $0x214] sm:$0xf]  ;;  %v10249_v28 = vld [vmem:[%s15893_s3 + $0x364] sm:$0xf] }
  0x54   :  { %v6611_v35 = vor.u32 %v10195_v29, %v6608_v30  ;;  %v6656_v18 = vld [vmem:[%s15893_s3 + $0x218] sm:$0xf0]  ;;  %v6872_v29 = vld [vmem:[%s15893_s3 + $0x368] sm:$0xf0]  ;;  %v10205_v30 = vld [vmem:[%s15893_s3 + $0x204] sm:$0xf] }
  0x55   :  { %v6659_v26 = vor.u32 %v10207_v17, %v6656_v18  ;;  %v6854_v52 = vld [vmem:[%s15893_s3 + $0x340] sm:$0xf]  ;;  %v6856_v57 = vld [vmem:[%s15893_s3 + $0x348] sm:$0xf0]  ;;  %v6910_v2 = vld [vmem:[%s15893_s3 + $0x3b0] sm:$0xf] }
  0x56   :  { %v6918_v54 = vld [vmem:[%s15893_s3 + $0x3c0] sm:$0xf]  ;;  %v10243_v4 = vld [vmem:[%s15893_s3 + $0x334] sm:$0xf]  ;;  %v10241_v17 = vld [vmem:[%s15893_s3 + $0x324] sm:$0xf] }
  0x57   :  { %v6840_v18 = vld [vmem:[%s15893_s3 + $0x328] sm:$0xf0]  ;;  %vm890_vm3 = vcmask 519170   ;;  %vm1266_vm4 = vcmask 521220   ;;  %vm1642_vm5 = vcmask 523270   ;;  %vm6143_vm6 = vcmask 523264  }
  0x58   :  { %vm6276_vm14 = vcmask 1043456   ;;  %vm6277_vm15 = vcmask 523268   ;;  %s6289_s20 = sshll.u32 %s15896_s6, 4  ;;  %s10947_s21 = smov 128   ;;  %s6290_s20 = int_to_ptr.hbm [resolvable:$true] %s6289_s20 }
  0x59   :  { %vm6278_vm0 = vmor %vm6277_vm15, %vm6276_vm14  ;;  %s10948_s22 = smov 8  }
  0x8d   :  { %v114_v37 = vpop.f32.mrf.mxu0 }
  0x8e   :  { %v115_v41 = vadd.f32 %v114_v37, %v40_v32  ;;  %v127_v42 = vpop.f32.mrf.mxu1  ;;  %v6736_v32 = vld [vmem:[%s15893_s3 + $0x2b8] sm:$0xf0]  ;;  %v6680_v37 = vld [vmem:[%s15893_s3 + $0x248] sm:$0xf0] }
  0x8f   :  { %v128_v43 = vadd.f32 %v127_v42, %v41_v33  ;;  %v6691_v33 = vor.u32 %v10215_v24, %v6688_v25  ;;  %v6739_v39 = vor.u32 %v10227_v31, %v6736_v32  ;;  %v6600_v42 = vld [vmem:[%s15893_s3 + $0x1a8] sm:$0xf0]  ;;  %v10250_v24 = vld [vmem:[%s15893_s3 + $0x364] sm:$0xf0]  ;;  %v6934_v25 = vld [vmem:[%s15893_s3 + $0x3e0] sm:$0xf] }
  0x90   :  { %v11452_v45 = vpack.c.bf16 %v115_v41, %v115_v41  ;;  %v10193_v41 = vld [vmem:[%s15893_s3 + $0x1a4] sm:$0xf]  ;;  %v6648_v31 = vld [vmem:[%s15893_s3 + $0x208] sm:$0xf0] }
  0x91   :  { %v11463_v51 = vpack.c.bf16 %v128_v43, %v128_v43  ;;  %v10225_v43 = vld [vmem:[%s15893_s3 + $0x2a4] sm:$0xf]  ;;  %v6603_v48 = vor.u32 %v10193_v41, %v6600_v42  ;;  %v10264_v41 = vld [vmem:[%s15893_s3 + $0x3d4] sm:$0xf0]  ;;  %v10247_v42 = vld [vmem:[%s15893_s3 + $0x354] sm:$0xf] }
  0x92   :  { %443 = vmatmul.bf16.vlgmr.msra.gmra.mxu3 %v11452_v45  ;;  %482 = vmatmul.bf16.vlgmr.msrb.gmra.mxu2 %v11452_v45 }
  0x93   :  { %456 = vmatmul.bf16.vlgmr.msrb.gmra.mxu0 %v11463_v51  ;;  %831 = vmatpush.bf16.msra.mxu3 %v6767_v44  ;;  %v6728_v44 = vld [vmem:[%s15893_s3 + $0x2a8] sm:$0xf0] }
  0x94   :  { %844 = vmatpush.bf16.msrb.mxu0 %v6643_v46  ;;  %870 = vmatpush.bf16.msrb.mxu2 %v6771_v47  ;;  %v6683_v46 = vor.u32 %v10213_v36, %v6680_v37  ;;  %v6727_v47 = vor.u32 %v10226_v40, %v6726_v38  ;;  %v6731_v53 = vor.u32 %v10225_v43, %v6728_v44  ;;  %v6862_v37 = vld [vmem:[%s15893_s3 + $0x350] sm:$0xf]  ;;  %v10248_v38 = vld [vmem:[%s15893_s3 + $0x354] sm:$0xf0]  ;;  %v6864_v43 = vld [vmem:[%s15893_s3 + $0x358] sm:$0xf0] }
  0x95   :  { %v116_v1 = vpop.f32.mrf.mxu0  ;;  %v6875_v36 = vor.u32 %v10249_v28, %v6872_v29  ;;  %v6651_v40 = vor.u32 %v10205_v30, %v6648_v31  ;;  %v10256_v28 = vld [vmem:[%s15893_s3 + $0x394] sm:$0xf0]  ;;  %v10239_v29 = vld [vmem:[%s15893_s3 + $0x314] sm:$0xf]  ;;  %v6832_v30 = vld [vmem:[%s15893_s3 + $0x318] sm:$0xf0] }
  0x96   :  { %v140_v0 = vpop.f32.mrf.mxu2  ;;  %v129_v6 = vpop.f32.mrf.mxu1  ;;  %v10222_v1 = vld [vmem:[%s15893_s3 + $0x284] sm:$0xf0] }
  0x97   :  { %v141_v5 = vadd.f32 %v140_v0, %v42_v55  ;;  %832 = vmatpush.bf16.msra.mxu3 %v6759_v56  ;;  %v10191_v55 = vld [vmem:[%s15893_s3 + $0x194] sm:$0xf]  ;;  %v6592_v56 = vld [vmem:[%s15893_s3 + $0x198] sm:$0xf0]  ;;  %v6710_v0 = vld [vmem:[%s15893_s3 + $0x280] sm:$0xf] }
  0x98   :  { %845 = vmatpush.bf16.msrb.mxu0 %v6635_v59  ;;  %871 = vmatpush.bf16.msrb.mxu2 %v6763_v60  ;;  %v6675_v59 = vor.u32 %v10211_v49, %v6672_v50  ;;  %v10209_v60 = vld [vmem:[%s15893_s3 + $0x224] sm:$0xf]  ;;  %v6595_v63 = vor.u32 %v10191_v55, %v6592_v56  ;;  %v6712_v6 = vld [vmem:[%s15893_s3 + $0x288] sm:$0xf0]  ;;  %v6711_v15 = vor.u32 %v10222_v1, %v6710_v0  ;;  %v10262_v55 = vld [vmem:[%s15893_s3 + $0x3c4] sm:$0xf0] }
  0x99   :  { %v11507_v11 = vpack.c.bf16 %v141_v5, %v141_v5  ;;  %v10221_v5 = vld [vmem:[%s15893_s3 + $0x284] sm:$0xf]  ;;  %v6667_v10 = vor.u32 %v10209_v60, %v6664_v61  ;;  %v6867_v50 = vor.u32 %v10247_v42, %v6864_v43  ;;  %v6990_v60 = vld [vmem:[%s15893_s3 + $0x450] sm:$0xf]  ;;  %v10280_v61 = vld [vmem:[%s15893_s3 + $0x454] sm:$0xf0] }
  0x9a   :  { %v6715_v19 = vor.u32 %v10221_v5, %v6712_v6  ;;  %v10245_v56 = vld [vmem:[%s15893_s3 + $0x344] sm:$0xf]  ;;  %v6846_v0 = vld [vmem:[%s15893_s3 + $0x330] sm:$0xf]  ;;  %v10244_v1 = vld [vmem:[%s15893_s3 + $0x334] sm:$0xf0]  ;;  %v6991_v6 = vor.u32 %v10280_v61, %v6990_v60 }
  0x9b   :  { %469 = vmatmul.bf16.vlgmr.msrb.gmra.mxu1 %v11507_v11  ;;  %833 = vmatpush.bf16.msra.mxu3 %v6751_v8  ;;  %v10252_v8 = vld [vmem:[%s15893_s3 + $0x374] sm:$0xf0]  ;;  %v6848_v5 = vld [vmem:[%s15893_s3 + $0x338] sm:$0xf0]  ;;  %v6824_v42 = vld [vmem:[%s15893_s3 + $0x308] sm:$0xf0] }
  0x9c   :  { %857 = vmatpush.bf16.msrb.mxu1 %v6707_v7  ;;  %846 = vmatpush.bf16.msrb.mxu0 %v6627_v12  ;;  %v6878_v7 = vld [vmem:[%s15893_s3 + $0x370] sm:$0xf]  ;;  %v10268_v12 = vld [vmem:[%s15893_s3 + $0x3f4] sm:$0xf0]  ;;  %v10267_v43 = vld [vmem:[%s15893_s3 + $0x3f4] sm:$0xf] }
  0x9d   :  { %872 = vmatpush.bf16.msrb.mxu2 %v6755_v13  ;;  %v10251_v13 = vld [vmem:[%s15893_s3 + $0x374] sm:$0xf]  ;;  %v6936_v60 = vld [vmem:[%s15893_s3 + $0x3e8] sm:$0xf0] }
  0x9e   :  { %v142_v27 = vpop.f32.mrf.mxu2 }
  0x9f   :  { %834 = vmatpush.bf16.msra.mxu3 %v6743_v21  ;;  %v6943_v21 = vor.u32 %v10268_v12, %v6942_v9  ;;  %v10266_v27 = vld [vmem:[%s15893_s3 + $0x3e4] sm:$0xf0]  ;;  %v6851_v12 = vor.u32 %v10243_v4, %v6848_v5  ;;  %v7118_v5 = vld [vmem:[%s15893_s3 + $0x4f0] sm:$0xf] }
  0xa0   :  { %858 = vmatpush.bf16.msrb.mxu1 %v6699_v20  ;;  %847 = vmatpush.bf16.msrb.mxu0 %v6619_v22  ;;  %v6879_v20 = vor.u32 %v10252_v8, %v6878_v7  ;;  %v6883_v22 = vor.u32 %v10251_v13, %v6880_v14  ;;  %v6847_v7 = vor.u32 %v10244_v1, %v6846_v0  ;;  %v6982_v8 = vld [vmem:[%s15893_s3 + $0x440] sm:$0xf]  ;;  %v10278_v9 = vld [vmem:[%s15893_s3 + $0x444] sm:$0xf0]  ;;  %v7000_v0 = vld [vmem:[%s15893_s3 + $0x468] sm:$0xf0] }
  0xa1   :  { %873 = vmatpush.bf16.msrb.mxu2 %v6747_v23  ;;  %v6870_v23 = vld [vmem:[%s15893_s3 + $0x360] sm:$0xf]  ;;  %v10242_v14 = vld [vmem:[%s15893_s3 + $0x324] sm:$0xf0] }
  0xa2   :  { %495 = vmatmul.bf16.vlgmr.msrb.gmra.mxu3 %v11463_v51  ;;  %826 = vmatmul.bf16.vlgmr.msra.gmra.mxu2 %v11463_v51  ;;  %v6871_v32 = vor.u32 %v10250_v24, %v6870_v23  ;;  %v6838_v13 = vld [vmem:[%s15893_s3 + $0x320] sm:$0xf]  ;;  %v6843_v24 = vor.u32 %v10241_v17, %v6840_v18  ;;  %v10270_v4 = vld [vmem:[%s15893_s3 + $0x404] sm:$0xf0]  ;;  %v7166_v17 = vld [vmem:[%s15893_s3 + $0x550] sm:$0xf] }
  0xa3   :  { %508 = vmatmul.bf16.vlgmr.msra.gmra.mxu0 %v11507_v11  ;;  %835 = vmatpush.bf16.msra.mxu3 %v6735_v34  ;;  %v10284_v34 = vld [vmem:[%s15893_s3 + $0x474] sm:$0xf0]  ;;  %v7174_v1 = vld [vmem:[%s15893_s3 + $0x560] sm:$0xf] }
  0xa4   :  { %859 = vmatpush.bf16.msrb.mxu1 %v6691_v33  ;;  %848 = vmatpush.bf16.msrb.mxu0 %v6611_v35  ;;  %v7006_v33 = vld [vmem:[%s15893_s3 + $0x470] sm:$0xf]  ;;  %v6935_v35 = vor.u32 %v10266_v27, %v6934_v25  ;;  %v10312_v18 = vld [vmem:[%s15893_s3 + $0x554] sm:$0xf0] }
  0xa5   :  { %874 = vmatpush.bf16.msrb.mxu2 %v6739_v39  ;;  %v6926_v39 = vld [vmem:[%s15893_s3 + $0x3d0] sm:$0xf]  ;;  %v7007_v44 = vor.u32 %v10284_v34, %v7006_v33  ;;  %v10274_v34 = vld [vmem:[%s15893_s3 + $0x424] sm:$0xf0] }
  0xa6   :  { %v6927_v49 = vor.u32 %v10264_v41, %v6926_v39  ;;  %v6830_v25 = vld [vmem:[%s15893_s3 + $0x310] sm:$0xf]  ;;  %v6886_v39 = vld [vmem:[%s15893_s3 + $0x380] sm:$0xf]  ;;  %v10237_v41 = vld [vmem:[%s15893_s3 + $0x304] sm:$0xf] }
  0xa7   :  { %836 = vmatpush.bf16.msra.mxu3 %v6727_v47  ;;  %v6998_v47 = vld [vmem:[%s15893_s3 + $0x460] sm:$0xf]  ;;  %v6894_v27 = vld [vmem:[%s15893_s3 + $0x390] sm:$0xf] }
  0xa8   :  { %860 = vmatpush.bf16.msrb.mxu1 %v6683_v46  ;;  %849 = vmatpush.bf16.msrb.mxu0 %v6603_v48  ;;  %v6863_v46 = vor.u32 %v10248_v38, %v6862_v37  ;;  %v10282_v48 = vld [vmem:[%s15893_s3 + $0x464] sm:$0xf0]  ;;  %v6895_v37 = vor.u32 %v10256_v28, %v6894_v27  ;;  %v6835_v38 = vor.u32 %v10239_v29, %v6832_v30  ;;  %v6984_v28 = vld [vmem:[%s15893_s3 + $0x448] sm:$0xf0]  ;;  %v7158_v29 = vld [vmem:[%s15893_s3 + $0x540] sm:$0xf] }
  0xa9   :  { %875 = vmatpush.bf16.msrb.mxu2 %v6731_v53  ;;  %v10246_v53 = vld [vmem:[%s15893_s3 + $0x344] sm:$0xf0]  ;;  %v6999_v58 = vor.u32 %v10282_v48, %v6998_v47  ;;  %v10283_v47 = vld [vmem:[%s15893_s3 + $0x474] sm:$0xf]  ;;  %v7008_v48 = vld [vmem:[%s15893_s3 + $0x478] sm:$0xf0] }
  0xaa   :  { %v10310_v30 = vld [vmem:[%s15893_s3 + $0x544] sm:$0xf0] }
  0xab   :  { %813 = vmatmul.bf16.vlgmr.msra.gmra.mxu1 %v11452_v45  ;;  %837 = vmatpush.bf16.msra.mxu3 %v6719_v62  ;;  %v6919_v62 = vor.u32 %v10262_v55, %v6918_v54  ;;  %v10272_v54 = vld [vmem:[%s15893_s3 + $0x414] sm:$0xf0] }
  0xac   :  { %861 = vmatpush.bf16.msrb.mxu1 %v6675_v59  ;;  %850 = vmatpush.bf16.msrb.mxu0 %v6595_v63  ;;  %v6855_v59 = vor.u32 %v10246_v53, %v6854_v52  ;;  %v6859_v63 = vor.u32 %v10245_v56, %v6856_v57  ;;  %v10316_v52 = vld [vmem:[%s15893_s3 + $0x574] sm:$0xf0]  ;;  %v6958_v53 = vld [vmem:[%s15893_s3 + $0x410] sm:$0xf]  ;;  %v6827_v56 = vor.u32 %v10237_v41, %v6824_v42 }
  0xad   :  { %876 = vmatpush.bf16.msrb.mxu2 %v6723_v3  ;;  %v10260_v3 = vld [vmem:[%s15893_s3 + $0x3b4] sm:$0xf0]  ;;  %v7150_v41 = vld [vmem:[%s15893_s3 + $0x530] sm:$0xf] }
  0xae   :  { %v10308_v42 = vld [vmem:[%s15893_s3 + $0x534] sm:$0xf0] }
  0xaf   :  { %838 = vmatpush.bf16.msra.mxu3 %v6711_v15  ;;  %v6902_v15 = vld [vmem:[%s15893_s3 + $0x3a0] sm:$0xf] }
  0xb0   :  { %862 = vmatpush.bf16.msrb.mxu1 %v6667_v10  ;;  %851 = vmatpush.bf16.msrb.mxu0 %v6587_v16  ;;  %v6911_v10 = vor.u32 %v10260_v3, %v6910_v2  ;;  %v10258_v16 = vld [vmem:[%s15893_s3 + $0x3a4] sm:$0xf0]  ;;  %v6950_v3 = vld [vmem:[%s15893_s3 + $0x400] sm:$0xf] }
  0xb1   :  { %877 = vmatpush.bf16.msrb.mxu2 %v6715_v19  ;;  %v6983_v19 = vor.u32 %v10278_v9, %v6982_v8  ;;  %v6903_v23 = vor.u32 %v10258_v16, %v6902_v15  ;;  %v10314_v2 = vld [vmem:[%s15893_s3 + $0x564] sm:$0xf0]  ;;  %v6992_v16 = vld [vmem:[%s15893_s3 + $0x458] sm:$0xf0] }
  0xb2   :  { %839 = vmatmul.bf16.vlgmr.msra.gmra.mxu3 %v11507_v11  ;;  %v7175_v9 = vor.u32 %v10314_v2, %v7174_v1  ;;  %v6960_v2 = vld [vmem:[%s15893_s3 + $0x418] sm:$0xf0] }
  0xb3   :  { %1181 = vmatpush.bf16.msrb.mxu3 %v6879_v20  ;;  %852 = vmatmul.bf16.vlgmr.msrb.gmra.mxu0 %v11452_v45  ;;  %v6839_v20 = vor.u32 %v10242_v14, %v6838_v13  ;;  %v6928_v13 = vld [vmem:[%s15893_s3 + $0x3d8] sm:$0xf0]  ;;  %v10279_v14 = vld [vmem:[%s15893_s3 + $0x454] sm:$0xf] }
  0xb4   :  { %1194 = vmatpush.bf16.msra.mxu0 %v6943_v21  ;;  %863 = vmatpush.bf16.msrb.mxu1 %v6659_v26  ;;  %v6974_v21 = vld [vmem:[%s15893_s3 + $0x430] sm:$0xf]  ;;  %v10240_v26 = vld [vmem:[%s15893_s3 + $0x314] sm:$0xf0] }
  0xb5   :  { %1220 = vmatpush.bf16.msra.mxu2 %v6883_v22  ;;  %v10276_v22 = vld [vmem:[%s15893_s3 + $0x434] sm:$0xf0]  ;;  %v6831_v33 = vor.u32 %v10240_v26, %v6830_v25  ;;  %v6920_v25 = vld [vmem:[%s15893_s3 + $0x3c8] sm:$0xf0]  ;;  %v10277_v26 = vld [vmem:[%s15893_s3 + $0x444] sm:$0xf] }
  0xb6   :  { %878 = vmatmul.bf16.vlgmr.msrb.gmra.mxu2 %v11507_v11  ;;  %v6975_v31 = vor.u32 %v10276_v22, %v6974_v21  ;;  %v6995_v22 = vor.u32 %v10279_v14, %v6992_v16  ;;  %v6952_v14 = vld [vmem:[%s15893_s3 + $0x408] sm:$0xf0] }
  0xb7   :  { %1182 = vmatpush.bf16.msrb.mxu3 %v6871_v32  ;;  %v6966_v32 = vld [vmem:[%s15893_s3 + $0x420] sm:$0xf] }
  0xb8   :  { %1195 = vmatpush.bf16.msra.mxu0 %v6935_v35  ;;  %864 = vmatpush.bf16.msrb.mxu1 %v6651_v40  ;;  %v6822_v35 = vld [vmem:[%s15893_s3 + $0x300] sm:$0xf]  ;;  %v10254_v40 = vld [vmem:[%s15893_s3 + $0x384] sm:$0xf0] }
  0xb9   :  { %1221 = vmatpush.bf16.msra.mxu2 %v6875_v36  ;;  %v10238_v36 = vld [vmem:[%s15893_s3 + $0x304] sm:$0xf0]  ;;  %v6887_v55 = vor.u32 %v10254_v40, %v6886_v39  ;;  %v6976_v40 = vld [vmem:[%s15893_s3 + $0x438] sm:$0xf0] }
  0xbb   :  { %1183 = vmatpush.bf16.msrb.mxu3 %v6863_v46  ;;  %865 = vmatmul.bf16.vlgmr.msrb.gmra.mxu1 %v11463_v51  ;;  %v6967_v46 = vor.u32 %v10274_v34, %v6966_v32  ;;  %v10296_v32 = vld [vmem:[%s15893_s3 + $0x4d4] sm:$0xf0]  ;;  %v6987_v34 = vor.u32 %v10277_v26, %v6984_v28 }
  0xbc   :  { %1207 = vmatpush.bf16.msra.mxu1 %v7007_v44  ;;  %1196 = vmatpush.bf16.msra.mxu0 %v6927_v49  ;;  %v6944_v44 = vld [vmem:[%s15893_s3 + $0x3f8] sm:$0xf0]  ;;  %v7182_v49 = vld [vmem:[%s15893_s3 + $0x570] sm:$0xf]  ;;  %v10288_v26 = vld [vmem:[%s15893_s3 + $0x494] sm:$0xf0] }
  0xbd   :  { %1222 = vmatpush.bf16.msra.mxu2 %v6867_v50  ;;  %v6823_v50 = vor.u32 %v10238_v36, %v6822_v35  ;;  %v6947_v57 = vor.u32 %v10267_v43, %v6944_v44  ;;  %v7183_v61 = vor.u32 %v10316_v52, %v7182_v49  ;;  %v7159_v35 = vor.u32 %v10310_v30, %v7158_v29  ;;  %v10259_v36 = vld [vmem:[%s15893_s3 + $0x3b4] sm:$0xf]  ;;  %v7094_v43 = vld [vmem:[%s15893_s3 + $0x4c0] sm:$0xf]  ;;  %v10294_v44 = vld [vmem:[%s15893_s3 + $0x4c4] sm:$0xf0] }
  0xbe   :  { %v10257_v49 = vld [vmem:[%s15893_s3 + $0x3a4] sm:$0xf] }
  0xbf   :  { %1184 = vmatpush.bf16.msrb.mxu3 %v6855_v59  ;;  %v10265_v59 = vld [vmem:[%s15893_s3 + $0x3e4] sm:$0xf] }
  0xc0   :  { %1208 = vmatpush.bf16.msra.mxu1 %v6999_v58  ;;  %1197 = vmatpush.bf16.msra.mxu0 %v6919_v62  ;;  %v7011_v58 = vor.u32 %v10283_v47, %v7008_v48  ;;  %v6959_v62 = vor.u32 %v10272_v54, %v6958_v53  ;;  %v7151_v48 = vor.u32 %v10308_v42, %v7150_v41  ;;  %v10273_v52 = vld [vmem:[%s15893_s3 + $0x424] sm:$0xf]  ;;  %v6968_v54 = vld [vmem:[%s15893_s3 + $0x428] sm:$0xf0]  ;;  %v10315_v41 = vld [vmem:[%s15893_s3 + $0x574] sm:$0xf] }
  0xc1   :  { %1223 = vmatpush.bf16.msra.mxu2 %v6859_v63  ;;  %v10281_v63 = vld [vmem:[%s15893_s3 + $0x464] sm:$0xf]  ;;  %v7095_v53 = vor.u32 %v10294_v44, %v7094_v43  ;;  %v7184_v42 = vld [vmem:[%s15893_s3 + $0x578] sm:$0xf0] }
  0xc2   :  { %v7003_v8 = vor.u32 %v10281_v63, %v7000_v0  ;;  %v6896_v63 = vld [vmem:[%s15893_s3 + $0x398] sm:$0xf0]  ;;  %v10271_v0 = vld [vmem:[%s15893_s3 + $0x414] sm:$0xf] }
  0xc3   :  { %1185 = vmatpush.bf16.msrb.mxu3 %v6847_v7  ;;  %v6939_v7 = vor.u32 %v10265_v59, %v6936_v60  ;;  %v6971_v60 = vor.u32 %v10273_v52, %v6968_v54  ;;  %v7187_v52 = vor.u32 %v10315_v41, %v7184_v42  ;;  %v10327_v54 = vld [vmem:[%s15893_s3 + $0x5d4] sm:$0xf]  ;;  %v10305_v41 = vld [vmem:[%s15893_s3 + $0x524] sm:$0xf]  ;;  %v7144_v42 = vld [vmem:[%s15893_s3 + $0x528] sm:$0xf0] }
  0xc4   :  { %1209 = vmatpush.bf16.msra.mxu1 %v6991_v6  ;;  %1198 = vmatpush.bf16.msra.mxu0 %v6911_v10  ;;  %v10300_v6 = vld [vmem:[%s15893_s3 + $0x4f4] sm:$0xf0]  ;;  %v6951_v10 = vor.u32 %v10270_v4, %v6950_v3  ;;  %v7134_v3 = vld [vmem:[%s15893_s3 + $0x510] sm:$0xf] }
  0xc5   :  { %1224 = vmatpush.bf16.msra.mxu2 %v6851_v12  ;;  %v10263_v12 = vld [vmem:[%s15893_s3 + $0x3d4] sm:$0xf]  ;;  %v7119_v15 = vor.u32 %v10300_v6, %v7118_v5  ;;  %v10304_v4 = vld [vmem:[%s15893_s3 + $0x514] sm:$0xf0]  ;;  %v7078_v5 = vld [vmem:[%s15893_s3 + $0x4a0] sm:$0xf] }
  0xc6   :  { %v6931_v21 = vor.u32 %v10263_v12, %v6928_v13  ;;  %v10290_v6 = vld [vmem:[%s15893_s3 + $0x4a4] sm:$0xf0]  ;;  %v7135_v12 = vor.u32 %v10304_v4, %v7134_v3  ;;  %v10269_v13 = vld [vmem:[%s15893_s3 + $0x404] sm:$0xf]  ;;  %v7224_v3 = vld [vmem:[%s15893_s3 + $0x5c8] sm:$0xf0] }
  0xc7   :  { %1186 = vmatpush.bf16.msrb.mxu3 %v6839_v20  ;;  %v10298_v20 = vld [vmem:[%s15893_s3 + $0x4e4] sm:$0xf0]  ;;  %v7079_v16 = vor.u32 %v10290_v6, %v7078_v5  ;;  %v10311_v4 = vld [vmem:[%s15893_s3 + $0x554] sm:$0xf]  ;;  %v7168_v5 = vld [vmem:[%s15893_s3 + $0x558] sm:$0xf0] }
  0xc8   :  { %1210 = vmatpush.bf16.msra.mxu1 %v6983_v19  ;;  %1199 = vmatpush.bf16.msra.mxu0 %v6903_v23  ;;  %v7110_v19 = vld [vmem:[%s15893_s3 + $0x4e0] sm:$0xf]  ;;  %v7167_v23 = vor.u32 %v10312_v18, %v7166_v17  ;;  %v10302_v17 = vld [vmem:[%s15893_s3 + $0x504] sm:$0xf0]  ;;  %v7246_v18 = vld [vmem:[%s15893_s3 + $0x5f0] sm:$0xf] }
  0xc9   :  { %1225 = vmatpush.bf16.msra.mxu2 %v6843_v24  ;;  %v10261_v24 = vld [vmem:[%s15893_s3 + $0x3c4] sm:$0xf]  ;;  %v7111_v27 = vor.u32 %v10298_v20, %v7110_v19  ;;  %v10332_v19 = vld [vmem:[%s15893_s3 + $0x5f4] sm:$0xf0]  ;;  %v10299_v20 = vld [vmem:[%s15893_s3 + $0x4f4] sm:$0xf] }
  0xca   :  { %v7247_v29 = vor.u32 %v10332_v19, %v7246_v18  ;;  %v7160_v18 = vld [vmem:[%s15893_s3 + $0x548] sm:$0xf0] }
  0xcb   :  { %1187 = vmatpush.bf16.msrb.mxu3 %v6831_v33  ;;  %v6923_v33 = vor.u32 %v10261_v24, %v6920_v25  ;;  %v7248_v24 = vld [vmem:[%s15893_s3 + $0x5f8] sm:$0xf0]  ;;  %v7070_v25 = vld [vmem:[%s15893_s3 + $0x490] sm:$0xf] }
  0xcc   :  { %1211 = vmatpush.bf16.msra.mxu1 %v6975_v31  ;;  %1200 = vmatpush.bf16.msra.mxu0 %v6895_v37  ;;  %v7102_v31 = vld [vmem:[%s15893_s3 + $0x4d0] sm:$0xf]  ;;  %v6912_v37 = vld [vmem:[%s15893_s3 + $0x3b8] sm:$0xf0] }
  0xcd   :  { %1226 = vmatpush.bf16.msra.mxu2 %v6835_v38  ;;  %v10275_v38 = vld [vmem:[%s15893_s3 + $0x434] sm:$0xf]  ;;  %v7103_v39 = vor.u32 %v10296_v32, %v7102_v31  ;;  %v7238_v31 = vld [vmem:[%s15893_s3 + $0x5e0] sm:$0xf]  ;;  %v10330_v32 = vld [vmem:[%s15893_s3 + $0x5e4] sm:$0xf0] }
  0xce   :  { %v6979_v47 = vor.u32 %v10275_v38, %v6976_v40  ;;  %v7240_v38 = vld [vmem:[%s15893_s3 + $0x5e8] sm:$0xf0]  ;;  %v10286_v40 = vld [vmem:[%s15893_s3 + $0x484] sm:$0xf0]  ;;  %v7239_v43 = vor.u32 %v10330_v32, %v7238_v31 }
  0xcf   :  { %1188 = vmatpush.bf16.msrb.mxu3 %v6823_v50  ;;  %v6904_v50 = vld [vmem:[%s15893_s3 + $0x3a8] sm:$0xf0] }
  0xd0   :  { %1212 = vmatpush.bf16.msra.mxu1 %v6967_v46  ;;  %1201 = vmatpush.bf16.msra.mxu0 %v6887_v55  ;;  %v6915_v46 = vor.u32 %v10259_v36, %v6912_v37  ;;  %v7142_v55 = vld [vmem:[%s15893_s3 + $0x520] sm:$0xf]  ;;  %v6907_v59 = vor.u32 %v10257_v49, %v6904_v50  ;;  %v7112_v36 = vld [vmem:[%s15893_s3 + $0x4e8] sm:$0xf0]  ;;  %v10329_v37 = vld [vmem:[%s15893_s3 + $0x5e4] sm:$0xf] }
  0xd1   :  { %1227 = vmatpush.bf16.msra.mxu2 %v6827_v56  ;;  %v10306_v56 = vld [vmem:[%s15893_s3 + $0x524] sm:$0xf0]  ;;  %v10328_v49 = vld [vmem:[%s15893_s3 + $0x5d4] sm:$0xf0]  ;;  %v10295_v50 = vld [vmem:[%s15893_s3 + $0x4d4] sm:$0xf] }
  0xd2   :  { %1189 = vmatmul.bf16.vlgmr.msrb.gmra.mxu3 %v11452_v45 }
  0xd3   :  { %1233 = vmatpush.bf16.msra.mxu3 %v6947_v57  ;;  %1202 = vmatmul.bf16.vlgmr.msra.gmra.mxu0 %v11463_v51  ;;  %v7086_v57 = vld [vmem:[%s15893_s3 + $0x4b0] sm:$0xf] }
  0xd4   :  { %1246 = vmatpush.bf16.msrb.mxu0 %v7011_v58  ;;  %1213 = vmatpush.bf16.msra.mxu1 %v6959_v62  ;;  %v10292_v58 = vld [vmem:[%s15893_s3 + $0x4b4] sm:$0xf0]  ;;  %v10255_v62 = vld [vmem:[%s15893_s3 + $0x394] sm:$0xf] }
  0xd5   :  { %1570 = vmatpush.bf16.msrb.mxu2 %v7183_v61  ;;  %v7143_v61 = vor.u32 %v10306_v56, %v7142_v55  ;;  %v7087_v1 = vor.u32 %v10292_v58, %v7086_v57  ;;  %v7232_v55 = vld [vmem:[%s15893_s3 + $0x5d8] sm:$0xf0]  ;;  %v10313_v56 = vld [vmem:[%s15893_s3 + $0x564] sm:$0xf]  ;;  %v7176_v57 = vld [vmem:[%s15893_s3 + $0x568] sm:$0xf0] }
  0xd6   :  { %1228 = vmatmul.bf16.vlgmr.msra.gmra.mxu2 %v11452_v45 }
  0xd7   :  { %1234 = vmatpush.bf16.msra.mxu3 %v6939_v7  ;;  %v6899_v7 = vor.u32 %v10255_v62, %v6896_v63  ;;  %v10326_v62 = vld [vmem:[%s15893_s3 + $0x5c4] sm:$0xf0]  ;;  %v10293_v63 = vld [vmem:[%s15893_s3 + $0x4c4] sm:$0xf] }
  0xd8   :  { %1247 = vmatpush.bf16.msrb.mxu0 %v7003_v8  ;;  %1214 = vmatpush.bf16.msra.mxu1 %v6951_v10  ;;  %v10253_v8 = vld [vmem:[%s15893_s3 + $0x384] sm:$0xf]  ;;  %v6963_v10 = vor.u32 %v10271_v0, %v6960_v2  ;;  %v7179_v0 = vor.u32 %v10313_v56, %v7176_v57  ;;  %v10348_v56 = vld [vmem:[%s15893_s3 + $0x674] sm:$0xf0]  ;;  %v7422_v57 = vld [vmem:[%s15893_s3 + $0x6f0] sm:$0xf] }
  0xd9   :  { %1571 = vmatpush.bf16.msrb.mxu2 %v7175_v9  ;;  %v6888_v9 = vld [vmem:[%s15893_s3 + $0x388] sm:$0xf0]  ;;  %v10325_v2 = vld [vmem:[%s15893_s3 + $0x5c4] sm:$0xf] }
  0xdb   :  { %1215 = vmatmul.bf16.vlgmr.msra.gmra.mxu1 %v11507_v11  ;;  %1235 = vmatpush.bf16.msra.mxu3 %v6931_v21  ;;  %v7120_v21 = vld [vmem:[%s15893_s3 + $0x4f8] sm:$0xf0] }
  0xdc   :  { %1557 = vmatpush.bf16.msrb.mxu1 %v7119_v15  ;;  %1248 = vmatpush.bf16.msrb.mxu0 %v6995_v22  ;;  %v7126_v15 = vld [vmem:[%s15893_s3 + $0x500] sm:$0xf]  ;;  %v10331_v22 = vld [vmem:[%s15893_s3 + $0x5f4] sm:$0xf]  ;;  %v7123_v30 = vor.u32 %v10299_v20, %v7120_v21 }
  0xdd   :  { %1572 = vmatpush.bf16.msrb.mxu2 %v7167_v23  ;;  %v6891_v23 = vor.u32 %v10253_v8, %v6888_v9  ;;  %v7127_v28 = vor.u32 %v10302_v17, %v7126_v15  ;;  %v7227_v8 = vor.u32 %v10325_v2, %v7224_v3  ;;  %v7214_v9 = vld [vmem:[%s15893_s3 + $0x5b0] sm:$0xf]  ;;  %v10323_v15 = vld [vmem:[%s15893_s3 + $0x5b4] sm:$0xf]  ;;  %v10309_v17 = vld [vmem:[%s15893_s3 + $0x544] sm:$0xf] }
  0xdf   :  { %1236 = vmatpush.bf16.msra.mxu3 %v6923_v33  ;;  %v7251_v33 = vor.u32 %v10331_v22, %v7248_v24  ;;  %v7206_v22 = vld [vmem:[%s15893_s3 + $0x5a0] sm:$0xf]  ;;  %v10289_v24 = vld [vmem:[%s15893_s3 + $0x4a4] sm:$0xf] }
  0xe0   :  { %1558 = vmatpush.bf16.msrb.mxu1 %v7111_v27  ;;  %1249 = vmatpush.bf16.msrb.mxu0 %v6987_v34  ;;  %v6955_v27 = vor.u32 %v10269_v13, %v6952_v14  ;;  %v7071_v34 = vor.u32 %v10288_v26, %v7070_v25  ;;  %v7171_v13 = vor.u32 %v10311_v4, %v7168_v5  ;;  %v7088_v14 = vld [vmem:[%s15893_s3 + $0x4b8] sm:$0xf0]  ;;  %v7080_v26 = vld [vmem:[%s15893_s3 + $0x4a8] sm:$0xf0]  ;;  %v7350_v4 = vld [vmem:[%s15893_s3 + $0x660] sm:$0xf] }
  0xe1   :  { %1573 = vmatpush.bf16.msrb.mxu2 %v7159_v35  ;;  %v10297_v35 = vld [vmem:[%s15893_s3 + $0x4e4] sm:$0xf]  ;;  %v7163_v25 = vor.u32 %v10309_v17, %v7160_v18  ;;  %v7083_v32 = vor.u32 %v10289_v24, %v7080_v26  ;;  %v10346_v5 = vld [vmem:[%s15893_s3 + $0x664] sm:$0xf0]  ;;  %v10343_v26 = vld [vmem:[%s15893_s3 + $0x654] sm:$0xf] }
  0xe2   :  { %v7115_v44 = vor.u32 %v10297_v35, %v7112_v36  ;;  %v10320_v35 = vld [vmem:[%s15893_s3 + $0x594] sm:$0xf0]  ;;  %v10287_v36 = vld [vmem:[%s15893_s3 + $0x494] sm:$0xf]  ;;  %v7351_v17 = vor.u32 %v10346_v5, %v7350_v4  ;;  %v7382_v4 = vld [vmem:[%s15893_s3 + $0x6a0] sm:$0xf] }
  0xe3   :  { %1237 = vmatpush.bf16.msra.mxu3 %v6915_v46  ;;  %v7243_v46 = vor.u32 %v10329_v37, %v7240_v38  ;;  %v7072_v38 = vld [vmem:[%s15893_s3 + $0x498] sm:$0xf0] }
  0xe4   :  { %1559 = vmatpush.bf16.msrb.mxu1 %v7103_v39  ;;  %1250 = vmatpush.bf16.msrb.mxu0 %v6979_v47  ;;  %v7062_v39 = vld [vmem:[%s15893_s3 + $0x480] sm:$0xf] }
  0xe5   :  { %1574 = vmatpush.bf16.msrb.mxu2 %v7151_v48  ;;  %v7063_v47 = vor.u32 %v10286_v40, %v7062_v39  ;;  %v7230_v48 = vld [vmem:[%s15893_s3 + $0x5d0] sm:$0xf]  ;;  %v10319_v39 = vld [vmem:[%s15893_s3 + $0x594] sm:$0xf]  ;;  %v7200_v40 = vld [vmem:[%s15893_s3 + $0x598] sm:$0xf0] }
  0xe6   :  { %v7231_v58 = vor.u32 %v10328_v49, %v7230_v48  ;;  %v7203_v48 = vor.u32 %v10319_v39, %v7200_v40  ;;  %v10285_v49 = vld [vmem:[%s15893_s3 + $0x484] sm:$0xf]  ;;  %v7336_v40 = vld [vmem:[%s15893_s3 + $0x648] sm:$0xf0] }
  0xe7   :  { %1238 = vmatpush.bf16.msra.mxu3 %v6907_v59  ;;  %v10341_v39 = vld [vmem:[%s15893_s3 + $0x644] sm:$0xf] }
  0xe8   :  { %1560 = vmatpush.bf16.msrb.mxu1 %v7095_v53  ;;  %1251 = vmatpush.bf16.msrb.mxu0 %v6971_v60  ;;  %v7104_v53 = vld [vmem:[%s15893_s3 + $0x4d8] sm:$0xf0]  ;;  %v7235_v60 = vor.u32 %v10327_v54, %v7232_v55  ;;  %v7192_v54 = vld [vmem:[%s15893_s3 + $0x588] sm:$0xf0]  ;;  %v7358_v55 = vld [vmem:[%s15893_s3 + $0x670] sm:$0xf] }
  0xe9   :  { %1575 = vmatpush.bf16.msrb.mxu2 %v7143_v61  ;;  %v7107_v59 = vor.u32 %v10295_v50, %v7104_v53  ;;  %v7222_v61 = vld [vmem:[%s15893_s3 + $0x5c0] sm:$0xf]  ;;  %v7064_v50 = vld [vmem:[%s15893_s3 + $0x488] sm:$0xf0]  ;;  %v7147_v53 = vor.u32 %v10305_v41, %v7144_v42  ;;  %v7359_v2 = vor.u32 %v10348_v56, %v7358_v55  ;;  %v7470_v41 = vld [vmem:[%s15893_s3 + $0x750] sm:$0xf] }
  0xea   :  { %v7223_v6 = vor.u32 %v10326_v62, %v7222_v61  ;;  %v7360_v61 = vld [vmem:[%s15893_s3 + $0x678] sm:$0xf0]  ;;  %v10303_v62 = vld [vmem:[%s15893_s3 + $0x514] sm:$0xf]  ;;  %v10376_v42 = vld [vmem:[%s15893_s3 + $0x754] sm:$0xf0] }
  0xeb   :  { %1239 = vmatpush.bf16.msra.mxu3 %v6899_v7  ;;  %v10339_v55 = vld [vmem:[%s15893_s3 + $0x634] sm:$0xf]  ;;  %v7328_v56 = vld [vmem:[%s15893_s3 + $0x638] sm:$0xf0] }
  0xec   :  { %1561 = vmatpush.bf16.msrb.mxu1 %v7087_v1  ;;  %1252 = vmatpush.bf16.msrb.mxu0 %v6963_v10  ;;  %v7096_v1 = vld [vmem:[%s15893_s3 + $0x4c8] sm:$0xf0]  ;;  %v10324_v10 = vld [vmem:[%s15893_s3 + $0x5b4] sm:$0xf0] }
  0xed   :  { %1576 = vmatpush.bf16.msrb.mxu2 %v7135_v12  ;;  %v7099_v7 = vor.u32 %v10293_v63, %v7096_v1  ;;  %v10291_v12 = vld [vmem:[%s15893_s3 + $0x4b4] sm:$0xf]  ;;  %v7215_v19 = vor.u32 %v10324_v10, %v7214_v9  ;;  %v7136_v63 = vld [vmem:[%s15893_s3 + $0x518] sm:$0xf0]  ;;  %v10362_v9 = vld [vmem:[%s15893_s3 + $0x6e4] sm:$0xf0] }
  0xee   :  { %v7091_v20 = vor.u32 %v10291_v12, %v7088_v14  ;;  %v10345_v10 = vld [vmem:[%s15893_s3 + $0x664] sm:$0xf]  ;;  %v7352_v12 = vld [vmem:[%s15893_s3 + $0x668] sm:$0xf0] }
  0xef   :  { %1240 = vmatpush.bf16.msra.mxu3 %v6891_v23  ;;  %v10322_v23 = vld [vmem:[%s15893_s3 + $0x5a4] sm:$0xf0]  ;;  %v7128_v14 = vld [vmem:[%s15893_s3 + $0x508] sm:$0xf0] }
  0xf0   :  { %1562 = vmatpush.bf16.msrb.mxu1 %v7079_v16  ;;  %1253 = vmatpush.bf16.msrb.mxu0 %v6955_v27  ;;  %v7216_v16 = vld [vmem:[%s15893_s3 + $0x5b8] sm:$0xf0]  ;;  %v10321_v27 = vld [vmem:[%s15893_s3 + $0x5a4] sm:$0xf]  ;;  %v7207_v31 = vor.u32 %v10322_v23, %v7206_v22  ;;  %v10344_v22 = vld [vmem:[%s15893_s3 + $0x654] sm:$0xf0] }
  0xf1   :  { %1577 = vmatpush.bf16.msrb.mxu2 %v7127_v28  ;;  %v7219_v21 = vor.u32 %v10323_v15, %v7216_v16  ;;  %v7208_v28 = vld [vmem:[%s15893_s3 + $0x5a8] sm:$0xf0]  ;;  %v7486_v15 = vld [vmem:[%s15893_s3 + $0x770] sm:$0xf]  ;;  %v10380_v16 = vld [vmem:[%s15893_s3 + $0x774] sm:$0xf0] }
  0xf2   :  { %1241 = vmatmul.bf16.vlgmr.msra.gmra.mxu3 %v11463_v51  ;;  %v7406_v23 = vld [vmem:[%s15893_s3 + $0x6d0] sm:$0xf]  ;;  %v7487_v24 = vor.u32 %v10380_v16, %v7486_v15  ;;  %v10336_v16 = vld [vmem:[%s15893_s3 + $0x614] sm:$0xf0] }
  0xf3   :  { %1583 = vmatpush.bf16.msrb.mxu3 %v7247_v29  ;;  %1254 = vmatmul.bf16.vlgmr.msrb.gmra.mxu0 %v11507_v11  ;;  %v10307_v29 = vld [vmem:[%s15893_s3 + $0x534] sm:$0xf]  ;;  %v7310_v15 = vld [vmem:[%s15893_s3 + $0x610] sm:$0xf] }
  0xf4   :  { %1596 = vmatpush.bf16.msra.mxu0 %v7123_v30  ;;  %1563 = vmatpush.bf16.msrb.mxu1 %v7071_v34  ;;  %v7152_v30 = vld [vmem:[%s15893_s3 + $0x538] sm:$0xf0]  ;;  %v7198_v34 = vld [vmem:[%s15893_s3 + $0x590] sm:$0xf] }
  0xf5   :  { %1622 = vmatpush.bf16.msra.mxu2 %v7251_v33  ;;  %v7211_v33 = vor.u32 %v10321_v27, %v7208_v28  ;;  %v7155_v37 = vor.u32 %v10307_v29, %v7152_v30  ;;  %v7344_v27 = vld [vmem:[%s15893_s3 + $0x658] sm:$0xf0]  ;;  %v7478_v28 = vld [vmem:[%s15893_s3 + $0x760] sm:$0xf]  ;;  %v10378_v29 = vld [vmem:[%s15893_s3 + $0x764] sm:$0xf0] }
  0xf6   :  { %1578 = vmatmul.bf16.vlgmr.msrb.gmra.mxu2 %v11463_v51 }
  0xf7   :  { %1584 = vmatpush.bf16.msrb.mxu3 %v7239_v43  ;;  %v7199_v43 = vor.u32 %v10320_v35, %v7198_v34  ;;  %v7334_v34 = vld [vmem:[%s15893_s3 + $0x640] sm:$0xf]  ;;  %v10342_v35 = vld [vmem:[%s15893_s3 + $0x644] sm:$0xf0] }
  0xf8   :  { %1597 = vmatpush.bf16.msra.mxu0 %v7115_v44  ;;  %1564 = vmatpush.bf16.msrb.mxu1 %v7063_v47  ;;  %v7190_v44 = vld [vmem:[%s15893_s3 + $0x580] sm:$0xf]  ;;  %v7075_v47 = vor.u32 %v10287_v36, %v7072_v38  ;;  %v10358_v38 = vld [vmem:[%s15893_s3 + $0x6c4] sm:$0xf0] }
  0xf9   :  { %1623 = vmatpush.bf16.msra.mxu2 %v7243_v46  ;;  %v10318_v46 = vld [vmem:[%s15893_s3 + $0x584] sm:$0xf0]  ;;  %v7398_v36 = vld [vmem:[%s15893_s3 + $0x6c0] sm:$0xf] }
  0xfb   :  { %1565 = vmatmul.bf16.vlgmr.msrb.gmra.mxu1 %v11452_v45  ;;  %1585 = vmatpush.bf16.msrb.mxu3 %v7231_v58  ;;  %v10364_v58 = vld [vmem:[%s15893_s3 + $0x6f4] sm:$0xf0] }
  0xfc   :  { %1609 = vmatpush.bf16.msra.mxu1 %v7187_v52  ;;  %1598 = vmatpush.bf16.msra.mxu0 %v7107_v59  ;;  %v10317_v52 = vld [vmem:[%s15893_s3 + $0x584] sm:$0xf]  ;;  %v10347_v59 = vld [vmem:[%s15893_s3 + $0x674] sm:$0xf]  ;;  %v7423_v3 = vor.u32 %v10364_v58, %v7422_v57  ;;  %v7462_v58 = vld [vmem:[%s15893_s3 + $0x740] sm:$0xf] }
  0xfd   :  { %1624 = vmatpush.bf16.msra.mxu2 %v7235_v60  ;;  %v7191_v60 = vor.u32 %v10318_v46, %v7190_v44  ;;  %v7195_v1 = vor.u32 %v10317_v52, %v7192_v54  ;;  %v7399_v44 = vor.u32 %v10358_v38, %v7398_v36  ;;  %v7339_v46 = vor.u32 %v10341_v39, %v7336_v40  ;;  %v10356_v54 = vld [vmem:[%s15893_s3 + $0x6b4] sm:$0xf0]  ;;  %v10363_v38 = vld [vmem:[%s15893_s3 + $0x6f4] sm:$0xf]  ;;  %v7424_v39 = vld [vmem:[%s15893_s3 + $0x6f8] sm:$0xf0] }
  0xfe   :  { %v10379_v40 = vld [vmem:[%s15893_s3 + $0x774] sm:$0xf] }
  0xff   :  { %1586 = vmatpush.bf16.msrb.mxu3 %v7223_v6  ;;  %v7363_v6 = vor.u32 %v10347_v59, %v7360_v61  ;;  %v10374_v59 = vld [vmem:[%s15893_s3 + $0x744] sm:$0xf0] }
 0x100   :  { %1610 = vmatpush.bf16.msra.mxu1 %v7179_v0  ;;  %1599 = vmatpush.bf16.msra.mxu0 %v7099_v7  ;;  %v7067_v0 = vor.u32 %v10285_v49, %v7064_v50  ;;  %v7139_v7 = vor.u32 %v10303_v62, %v7136_v63  ;;  %v7390_v49 = vld [vmem:[%s15893_s3 + $0x6b0] sm:$0xf]  ;;  %v7471_v50 = vor.u32 %v10376_v42, %v7470_v41  ;;  %v7488_v41 = vld [vmem:[%s15893_s3 + $0x778] sm:$0xf0] }
 0x101   :  { %1625 = vmatpush.bf16.msra.mxu2 %v7227_v8  ;;  %v7414_v8 = vld [vmem:[%s15893_s3 + $0x6e0] sm:$0xf]  ;;  %v7391_v63 = vor.u32 %v10356_v54, %v7390_v49  ;;  %v7463_v5 = vor.u32 %v10374_v59, %v7462_v58  ;;  %v7662_v42 = vld [vmem:[%s15893_s3 + $0x870] sm:$0xf] }
 0x102   :  { %v7415_v18 = vor.u32 %v10362_v9, %v7414_v8  ;;  %v7320_v8 = vld [vmem:[%s15893_s3 + $0x628] sm:$0xf0]  ;;  %v7454_v9 = vld [vmem:[%s15893_s3 + $0x730] sm:$0xf] }
 0x103   :  { %1587 = vmatpush.bf16.msrb.mxu3 %v7215_v19  ;;  %v7355_v19 = vor.u32 %v10345_v10, %v7352_v12  ;;  %v10372_v10 = vld [vmem:[%s15893_s3 + $0x734] sm:$0xf0] }
 0x104   :  { %1611 = vmatpush.bf16.msra.mxu1 %v7171_v13  ;;  %1600 = vmatpush.bf16.msra.mxu0 %v7091_v20  ;;  %v10301_v13 = vld [vmem:[%s15893_s3 + $0x504] sm:$0xf] }
 0x105   :  { %1626 = vmatpush.bf16.msra.mxu2 %v7219_v21  ;;  %v7131_v20 = vor.u32 %v10301_v13, %v7128_v14  ;;  %v7342_v21 = vld [vmem:[%s15893_s3 + $0x650] sm:$0xf] }
 0x106   :  { %v7343_v30 = vor.u32 %v10344_v22, %v7342_v21  ;;  %v10352_v21 = vld [vmem:[%s15893_s3 + $0x694] sm:$0xf0]  ;;  %v10335_v22 = vld [vmem:[%s15893_s3 + $0x614] sm:$0xf] }
 0x107   :  { %1588 = vmatpush.bf16.msrb.mxu3 %v7207_v31 }
 0x108   :  { %1612 = vmatpush.bf16.msra.mxu1 %v7163_v25  ;;  %1601 = vmatpush.bf16.msra.mxu0 %v7083_v32  ;;  %v10360_v25 = vld [vmem:[%s15893_s3 + $0x6d4] sm:$0xf0]  ;;  %v7347_v32 = vor.u32 %v10343_v26, %v7344_v27  ;;  %v7311_v27 = vor.u32 %v10336_v16, %v7310_v15  ;;  %v7472_v16 = vld [vmem:[%s15893_s3 + $0x758] sm:$0xf0] }
 0x109   :  { %1627 = vmatpush.bf16.msra.mxu2 %v7211_v33  ;;  %v7407_v31 = vor.u32 %v10360_v25, %v7406_v23  ;;  %v7312_v23 = vld [vmem:[%s15893_s3 + $0x618] sm:$0xf0]  ;;  %v10370_v25 = vld [vmem:[%s15893_s3 + $0x724] sm:$0xf0] }
 0x10b   :  { %1589 = vmatpush.bf16.msrb.mxu3 %v7199_v43  ;;  %v7335_v43 = vor.u32 %v10342_v35, %v7334_v34  ;;  %v10350_v34 = vld [vmem:[%s15893_s3 + $0x684] sm:$0xf0]  ;;  %v10333_v35 = vld [vmem:[%s15893_s3 + $0x604] sm:$0xf] }
 0x10c   :  { %1613 = vmatpush.bf16.msra.mxu1 %v7155_v37  ;;  %1602 = vmatpush.bf16.msra.mxu0 %v7075_v47  ;;  %v7479_v37 = vor.u32 %v10378_v29, %v7478_v28  ;;  %v7326_v47 = vld [vmem:[%s15893_s3 + $0x630] sm:$0xf]  ;;  %v7302_v28 = vld [vmem:[%s15893_s3 + $0x600] sm:$0xf]  ;;  %v10334_v29 = vld [vmem:[%s15893_s3 + $0x604] sm:$0xf0] }
 0x10d   :  { %1628 = vmatpush.bf16.msra.mxu2 %v7203_v48  ;;  %v10340_v48 = vld [vmem:[%s15893_s3 + $0x634] sm:$0xf0] }
 0x10e   :  { %v7327_v61 = vor.u32 %v10340_v48, %v7326_v47  ;;  %v10368_v47 = vld [vmem:[%s15893_s3 + $0x714] sm:$0xf0] }
 0x10f   :  { %1590 = vmatpush.bf16.msrb.mxu3 %v7191_v60 }
 0x110   :  { %1614 = vmatpush.bf16.msra.mxu1 %v7147_v53  ;;  %1603 = vmatpush.bf16.msra.mxu0 %v7067_v0  ;;  %v457_v33 = vpop.f32.mrf.mxu0  ;;  %v7331_v0 = vor.u32 %v10339_v55, %v7328_v56  ;;  %v10361_v56 = vld [vmem:[%s15893_s3 + $0x6e4] sm:$0xf] }
 0x111   :  { %1629 = vmatpush.bf16.msra.mxu2 %v7195_v1 }
 0x112   :  { %1591 = vmatmul.bf16.vlgmr.msrb.gmra.mxu3 %v11507_v11 }
 0x113   :  { %1933 = vmatpush.bf16.msra.mxu3 %v7359_v2  ;;  %1604 = vmatmul.bf16.vlgmr.msra.gmra.mxu0 %v11452_v45  ;;  %v7318_v2 = vld [vmem:[%s15893_s3 + $0x620] sm:$0xf] }
 0x114   :  { %1946 = vmatpush.bf16.msrb.mxu0 %v7423_v3  ;;  %1615 = vmatpush.bf16.msra.mxu1 %v7139_v7  ;;  %v10338_v3 = vld [vmem:[%s15893_s3 + $0x624] sm:$0xf0]  ;;  %v10337_v7 = vld [vmem:[%s15893_s3 + $0x624] sm:$0xf] }
 0x115   :  { %1972 = vmatpush.bf16.msrb.mxu2 %v7363_v6  ;;  %v444_v52 = vpop.f32.mrf.mxu3  ;;  %v12331_v53 = vpop.f32.mrf.mxu2  ;;  %v10354_v6 = vld [vmem:[%s15893_s3 + $0x6a4] sm:$0xf0]  ;;  %v7319_v12 = vor.u32 %v10338_v3, %v7318_v2  ;;  %v7323_v14 = vor.u32 %v10337_v7, %v7320_v8 }
 0x116   :  { %1630 = vmatmul.bf16.vlgmr.msra.gmra.mxu2 %v11507_v11  ;;  %v458_v57 = vadd.f32 %v457_v33, %v444_v52  ;;  %v7383_v13 = vor.u32 %v10354_v6, %v7382_v4  ;;  %v7366_v33 = vld [vmem:[%s15893_s3 + $0x680] sm:$0xf]  ;;  %v7491_v52 = vor.u32 %v10379_v40, %v7488_v41  ;;  %v10366_v2 = vld [vmem:[%s15893_s3 + $0x704] sm:$0xf0]  ;;  %v10396_v6 = vld [vmem:[%s15893_s3 + $0x7f4] sm:$0xf0] }
 0x117   :  { %1934 = vmatpush.bf16.msra.mxu3 %v7351_v17  ;;  %v7374_v17 = vld [vmem:[%s15893_s3 + $0x690] sm:$0xf]  ;;  %v7367_v48 = vor.u32 %v10350_v34, %v7366_v33  ;;  %v10406_v33 = vld [vmem:[%s15893_s3 + $0x844] sm:$0xf0]  ;;  %v10355_v40 = vld [vmem:[%s15893_s3 + $0x6b4] sm:$0xf] }
 0x118   :  { %1947 = vmatpush.bf16.msrb.mxu0 %v7415_v18  ;;  %1616 = vmatpush.bf16.msra.mxu1 %v7131_v20  ;;  %v470_v60 = vpop.f32.mrf.mxu1  ;;  %v459_v1 = vpop.f32.mrf.mxu0  ;;  %v7455_v18 = vor.u32 %v10372_v10, %v7454_v9  ;;  %v10359_v9 = vld [vmem:[%s15893_s3 + $0x6d4] sm:$0xf]  ;;  %v7582_v34 = vld [vmem:[%s15893_s3 + $0x7d0] sm:$0xf]  ;;  %v7392_v41 = vld [vmem:[%s15893_s3 + $0x6b8] sm:$0xf0] }
 0x119   :  { %1973 = vmatpush.bf16.msrb.mxu2 %v7355_v19  ;;  %v471_v62 = vadd.f32 %v470_v60, %v458_v57  ;;  %v7416_v57 = vld [vmem:[%s15893_s3 + $0x6e8] sm:$0xf0]  ;;  %v10410_v1 = vld [vmem:[%s15893_s3 + $0x864] sm:$0xf0] }
 0x11a   :  { %v7419_v7 = vor.u32 %v10361_v56, %v7416_v57 }
 0x11b   :  { %1617 = vmatmul.bf16.vlgmr.msra.gmra.mxu1 %v11463_v51  ;;  %1935 = vmatpush.bf16.msra.mxu3 %v7343_v30  ;;  %513 = vst [vmem:[#allocation2] sm:$0x3] %v471_v62  ;;  %v7375_v30 = vor.u32 %v10352_v21, %v7374_v17  ;;  %v7480_v62 = vld [vmem:[%s15893_s3 + $0x768] sm:$0xf0]  ;;  %v7646_v17 = vld [vmem:[%s15893_s3 + $0x850] sm:$0xf] }
 0x11c   :  { %1959 = vmatpush.bf16.msrb.mxu1 %v7487_v24  ;;  %1948 = vmatpush.bf16.msrb.mxu0 %v7407_v31  ;;  %v7446_v24 = vld [vmem:[%s15893_s3 + $0x720] sm:$0xf]  ;;  %v7315_v31 = vor.u32 %v10335_v22, %v7312_v23 }
 0x11d   :  { %1974 = vmatpush.bf16.msrb.mxu2 %v7347_v32  ;;  %v446_v19 = vpop.f32.mrf.mxu3  ;;  %v485_v20 = vpop.f32.mrf.mxu2  ;;  %v7447_v36 = vor.u32 %v10370_v25, %v7446_v24 }
 0x11e   :  { %v7590_v19 = vld [vmem:[%s15893_s3 + $0x7e0] sm:$0xf]  ;;  %v10394_v20 = vld [vmem:[%s15893_s3 + $0x7e4] sm:$0xf0] }
 0x11f   :  { %1936 = vmatpush.bf16.msra.mxu3 %v7335_v43  ;;  %v7303_v43 = vor.u32 %v10334_v29, %v7302_v28  ;;  %v10373_v28 = vld [vmem:[%s15893_s3 + $0x744] sm:$0xf] }
 0x120   :  { %1960 = vmatpush.bf16.msrb.mxu1 %v7479_v37  ;;  %1949 = vmatpush.bf16.msrb.mxu0 %v7399_v44  ;;  %v472_v26 = vpop.f32.mrf.mxu1  ;;  %v509_v32 = vpop.f32.mrf.mxu0  ;;  %v7304_v37 = vld [vmem:[%s15893_s3 + $0x608] sm:$0xf0]  ;;  %v10412_v44 = vld [vmem:[%s15893_s3 + $0x874] sm:$0xf0] }
 0x121   :  { %1975 = vmatpush.bf16.msrb.mxu2 %v7339_v46  ;;  %v7438_v46 = vld [vmem:[%s15893_s3 + $0x710] sm:$0xf]  ;;  %v7307_v49 = vor.u32 %v10333_v35, %v7304_v37  ;;  %v7663_v58 = vor.u32 %v10412_v44, %v7662_v42  ;;  %v10357_v26 = vld [vmem:[%s15893_s3 + $0x6c4] sm:$0xf]  ;;  %v10392_v35 = vld [vmem:[%s15893_s3 + $0x7d4] sm:$0xf0] }
 0x122   :  { %v7439_v59 = vor.u32 %v10368_v47, %v7438_v46  ;;  %v10371_v42 = vld [vmem:[%s15893_s3 + $0x734] sm:$0xf]  ;;  %v7456_v44 = vld [vmem:[%s15893_s3 + $0x738] sm:$0xf0]  ;;  %v7630_v46 = vld [vmem:[%s15893_s3 + $0x830] sm:$0xf] }
 0x123   :  { %1937 = vmatpush.bf16.msra.mxu3 %v7327_v61  ;;  %v10377_v61 = vld [vmem:[%s15893_s3 + $0x764] sm:$0xf]  ;;  %v10404_v47 = vld [vmem:[%s15893_s3 + $0x834] sm:$0xf0] }
 0x124   :  { %1961 = vmatpush.bf16.msrb.mxu1 %v7471_v50  ;;  %1950 = vmatpush.bf16.msrb.mxu0 %v7391_v63  ;;  %v7427_v50 = vor.u32 %v10363_v38, %v7424_v39  ;;  %v7654_v63 = vld [vmem:[%s15893_s3 + $0x860] sm:$0xf]  ;;  %v7483_v8 = vor.u32 %v10377_v61, %v7480_v62  ;;  %v7631_v56 = vor.u32 %v10404_v47, %v7630_v46 }
 0x125   :  { %1976 = vmatpush.bf16.msrb.mxu2 %v7331_v0  ;;  %v496_v54 = vpop.f32.mrf.mxu3  ;;  %v12438_v55 = vpop.f32.mrf.mxu2  ;;  %v7655_v10 = vor.u32 %v10410_v1, %v7654_v63  ;;  %v7448_v63 = vld [vmem:[%s15893_s3 + $0x728] sm:$0xf0]  ;;  %v10402_v1 = vld [vmem:[%s15893_s3 + $0x824] sm:$0xf0] }
 0x126   :  { %v497_v60 = vadd.f32 %v496_v54, %v12331_v53  ;;  %v7430_v53 = vld [vmem:[%s15893_s3 + $0x700] sm:$0xf]  ;;  %v7459_v54 = vor.u32 %v10371_v42, %v7456_v44  ;;  %v7550_v42 = vld [vmem:[%s15893_s3 + $0x790] sm:$0xf] }
 0x127   :  { %1938 = vmatpush.bf16.msra.mxu3 %v7319_v12  ;;  %v7431_v12 = vor.u32 %v10366_v2, %v7430_v53  ;;  %v7566_v2 = vld [vmem:[%s15893_s3 + $0x7b0] sm:$0xf] }
 0x128   :  { %1962 = vmatpush.bf16.msrb.mxu1 %v7463_v5  ;;  %1951 = vmatpush.bf16.msrb.mxu0 %v7383_v13  ;;  %v12456_v0 = vpop.f32.mrf.mxu1  ;;  %v510_v3 = vadd.f32 %v509_v32, %v497_v60  ;;  %v511_v4 = vpop.f32.mrf.mxu0  ;;  %v7598_v5 = vld [vmem:[%s15893_s3 + $0x7f0] sm:$0xf]  ;;  %v7408_v13 = vld [vmem:[%s15893_s3 + $0x6d8] sm:$0xf0]  ;;  %v7638_v32 = vld [vmem:[%s15893_s3 + $0x840] sm:$0xf] }
 0x129   :  { %1977 = vmatpush.bf16.msrb.mxu2 %v7323_v14  ;;  %v10375_v14 = vld [vmem:[%s15893_s3 + $0x754] sm:$0xf]  ;;  %v7599_v15 = vor.u32 %v10396_v6, %v7598_v5  ;;  %v7411_v21 = vor.u32 %v10359_v9, %v7408_v13  ;;  %v7639_v39 = vor.u32 %v10406_v33, %v7638_v32  ;;  %v10369_v60 = vld [vmem:[%s15893_s3 + $0x724] sm:$0xf] }
 0x12a   :  { %515 = vst.msk [vmem:[#allocation2 + $0x8] sm:$0x3] %vm514_vm2, %v510_v3  ;;  %v7475_v24 = vor.u32 %v10375_v14, %v7472_v16  ;;  %v10388_v3 = vld [vmem:[%s15893_s3 + $0x7b4] sm:$0xf0]  ;;  %v7451_v9 = vor.u32 %v10369_v60, %v7448_v63  ;;  %v10367_v13 = vld [vmem:[%s15893_s3 + $0x714] sm:$0xf] }
 0x12b   :  { %1939 = vmatpush.bf16.msra.mxu3 %v7311_v27  ;;  %v7400_v27 = vld [vmem:[%s15893_s3 + $0x6c8] sm:$0xf0]  ;;  %v7440_v14 = vld [vmem:[%s15893_s3 + $0x718] sm:$0xf0]  ;;  %v7567_v16 = vor.u32 %v10388_v3, %v7566_v2  ;;  %v7542_v60 = vld [vmem:[%s15893_s3 + $0x780] sm:$0xf] }
 0x12c   :  { %1963 = vmatpush.bf16.msrb.mxu1 %v7455_v18  ;;  %1952 = vmatpush.bf16.msrb.mxu0 %v7375_v30  ;;  %v10408_v18 = vld [vmem:[%s15893_s3 + $0x854] sm:$0xf0]  ;;  %v7591_v30 = vor.u32 %v10394_v20, %v7590_v19  ;;  %v7403_v37 = vor.u32 %v10357_v26, %v7400_v27  ;;  %v7558_v19 = vld [vmem:[%s15893_s3 + $0x7a0] sm:$0xf]  ;;  %v10386_v20 = vld [vmem:[%s15893_s3 + $0x7a4] sm:$0xf0]  ;;  %v7443_v26 = vor.u32 %v10367_v13, %v7440_v14 }
 0x12d   :  { %1978 = vmatpush.bf16.msrb.mxu2 %v7315_v31  ;;  %v498_v22 = vpop.f32.mrf.mxu3  ;;  %v829_v23 = vpop.f32.mrf.mxu2  ;;  %v7647_v25 = vor.u32 %v10408_v18, %v7646_v17  ;;  %v7464_v31 = vld [vmem:[%s15893_s3 + $0x748] sm:$0xf0]  ;;  %v7614_v17 = vld [vmem:[%s15893_s3 + $0x810] sm:$0xf]  ;;  %v10400_v18 = vld [vmem:[%s15893_s3 + $0x814] sm:$0xf0]  ;;  %v7559_v33 = vor.u32 %v10386_v20, %v7558_v19 }
 0x12e   :  { %v7467_v38 = vor.u32 %v10373_v28, %v7464_v31  ;;  %v7615_v27 = vor.u32 %v10400_v18, %v7614_v17  ;;  %v10398_v31 = vld [vmem:[%s15893_s3 + $0x804] sm:$0xf0]  ;;  %v7710_v2 = vld [vmem:[%s15893_s3 + $0x8d0] sm:$0xf]  ;;  %v10424_v3 = vld [vmem:[%s15893_s3 + $0x8d4] sm:$0xf0] }
 0x12f   :  { %1940 = vmatpush.bf16.msra.mxu3 %v7303_v43  ;;  %v7583_v43 = vor.u32 %v10392_v35, %v7582_v34  ;;  %v7726_v34 = vld [vmem:[%s15893_s3 + $0x8f0] sm:$0xf]  ;;  %v10428_v35 = vld [vmem:[%s15893_s3 + $0x8f4] sm:$0xf0]  ;;  %v10389_v17 = vld [vmem:[%s15893_s3 + $0x7c4] sm:$0xf] }
 0x130   :  { %1964 = vmatpush.bf16.msrb.mxu1 %v7447_v36  ;;  %1953 = vmatpush.bf16.msrb.mxu0 %v7367_v48  ;;  %v816_v29 = vpop.f32.mrf.mxu1  ;;  %v853_v36 = vpop.f32.mrf.mxu0  ;;  %v7574_v48 = vld [vmem:[%s15893_s3 + $0x7c0] sm:$0xf]  ;;  %v7727_v47 = vor.u32 %v10428_v35, %v7726_v34  ;;  %v7576_v19 = vld [vmem:[%s15893_s3 + $0x7c8] sm:$0xf0]  ;;  %v10421_v20 = vld [vmem:[%s15893_s3 + $0x8c4] sm:$0xf] }
 0x131   :  { %1979 = vmatpush.bf16.msrb.mxu2 %v7307_v49  ;;  %v10390_v49 = vld [vmem:[%s15893_s3 + $0x7c4] sm:$0xf0]  ;;  %v7432_v29 = vld [vmem:[%s15893_s3 + $0x708] sm:$0xf0]  ;;  %v7696_v34 = vld [vmem:[%s15893_s3 + $0x8b8] sm:$0xf0] }
 0x132   :  { %1941 = vmatmul.bf16.vlgmr.msra.gmra.mxu3 %v11452_v45  ;;  %v7575_v62 = vor.u32 %v10390_v49, %v7574_v48  ;;  %v7718_v49 = vld [vmem:[%s15893_s3 + $0x8e0] sm:$0xf]  ;;  %v10405_v35 = vld [vmem:[%s15893_s3 + $0x844] sm:$0xf] }
 0x133   :  { %1985 = vmatpush.bf16.msrb.mxu3 %v7427_v50  ;;  %1954 = vmatmul.bf16.vlgmr.msrb.gmra.mxu0 %v11463_v51  ;;  %v828_v50 = vadd.f32 %v12438_v55, %v12456_v0  ;;  %v7622_v0 = vld [vmem:[%s15893_s3 + $0x820] sm:$0xf] }
 0x134   :  { %1998 = vmatpush.bf16.msra.mxu0 %v7491_v52  ;;  %1965 = vmatpush.bf16.msrb.mxu1 %v7439_v59  ;;  %v7395_v52 = vor.u32 %v10355_v40, %v7392_v41  ;;  %v7384_v59 = vld [vmem:[%s15893_s3 + $0x6a8] sm:$0xf0]  ;;  %v7728_v41 = vld [vmem:[%s15893_s3 + $0x8f8] sm:$0xf0] }
 0x135   :  { %2315 = vmatpush.bf16.msra.mxu2 %v7663_v58  ;;  %v840_v57 = vpop.f32.mrf.mxu3  ;;  %v10353_v58 = vld [vmem:[%s15893_s3 + $0x6a4] sm:$0xf] }
 0x136   :  { %1980 = vmatmul.bf16.vlgmr.msrb.gmra.mxu2 %v11452_v45  ;;  %v841_v55 = vadd.f32 %v840_v57, %v828_v50  ;;  %v10426_v50 = vld [vmem:[%s15893_s3 + $0x8e4] sm:$0xf0]  ;;  %v7592_v57 = vld [vmem:[%s15893_s3 + $0x7e8] sm:$0xf0] }
 0x137   :  { %1986 = vmatpush.bf16.msrb.mxu3 %v7419_v7  ;;  %v7387_v7 = vor.u32 %v10353_v58, %v7384_v59  ;;  %v10425_v58 = vld [vmem:[%s15893_s3 + $0x8e4] sm:$0xf]  ;;  %v7720_v59 = vld [vmem:[%s15893_s3 + $0x8e8] sm:$0xf0]  ;;  %v7719_v63 = vor.u32 %v10426_v50, %v7718_v49 }
 0x138   :  { %1999 = vmatpush.bf16.msra.mxu0 %v7483_v8  ;;  %1966 = vmatpush.bf16.msrb.mxu1 %v7431_v12  ;;  %v866_v53 = vpop.f32.mrf.mxu1  ;;  %v885_v4 = vrot.slane %v841_v55, 6  ;;  %v855_v6 = vpop.f32.mrf.mxu0  ;;  %v10351_v8 = vld [vmem:[%s15893_s3 + $0x694] sm:$0xf]  ;;  %v7376_v12 = vld [vmem:[%s15893_s3 + $0x698] sm:$0xf0] }
 0x139   :  { %2316 = vmatpush.bf16.msra.mxu2 %v7655_v10  ;;  %v879_v61 = vpop.f32.mrf.mxu2  ;;  %v867_v5 = vadd.f32 %v866_v53, %v853_v36  ;;  %v7623_v10 = vor.u32 %v10402_v1, %v7622_v0  ;;  %v7379_v23 = vor.u32 %v10351_v8, %v7376_v12  ;;  %v10382_v55 = vld [vmem:[%s15893_s3 + $0x784] sm:$0xf0]  ;;  %v7723_v1 = vor.u32 %v10425_v58, %v7720_v59  ;;  %v7584_v6 = vld [vmem:[%s15893_s3 + $0x7d8] sm:$0xf0]  ;;  %v7560_v49 = vld [vmem:[%s15893_s3 + $0x7a8] sm:$0xf0] }
 0x13a   :  { %889 = vst [vmem:[#allocation2] sm:$0xc] %v885_v4  ;;  %v7543_v53 = vor.u32 %v10382_v55, %v7542_v60  ;;  %v10391_v4 = vld [vmem:[%s15893_s3 + $0x7d4] sm:$0xf]  ;;  %v7712_v8 = vld [vmem:[%s15893_s3 + $0x8d8] sm:$0xf0]  ;;  %v7711_v12 = vor.u32 %v10424_v3, %v7710_v2 }
 0x13b   :  { %1967 = vmatmul.bf16.vlgmr.msrb.gmra.mxu1 %v11507_v11  ;;  %1987 = vmatpush.bf16.msrb.mxu3 %v7411_v21  ;;  %v10349_v21 = vld [vmem:[%s15893_s3 + $0x684] sm:$0xf]  ;;  %v7587_v13 = vor.u32 %v10391_v4, %v7584_v6  ;;  %v7678_v60 = vld [vmem:[%s15893_s3 + $0x890] sm:$0xf]  ;;  %v10415_v2 = vld [vmem:[%s15893_s3 + $0x894] sm:$0xf] }
 0x13c   :  { %2302 = vmatpush.bf16.msra.mxu1 %v7599_v15  ;;  %2000 = vmatpush.bf16.msra.mxu0 %v7475_v24  ;;  %v880_v15 = vadd.f32 %v879_v61, %v867_v5  ;;  %v7368_v24 = vld [vmem:[%s15893_s3 + $0x688] sm:$0xf0]  ;;  %v10411_v61 = vld [vmem:[%s15893_s3 + $0x874] sm:$0xf]  ;;  %v10417_v50 = vld [vmem:[%s15893_s3 + $0x8a4] sm:$0xf] }
 0x13d   :  { %2317 = vmatpush.bf16.msra.mxu2 %v7647_v25  ;;  %v10365_v25 = vld [vmem:[%s15893_s3 + $0x704] sm:$0xf]  ;;  %v842_v28 = vpop.f32.mrf.mxu3  ;;  %v7371_v40 = vor.u32 %v10349_v21, %v7368_v24  ;;  %v7704_v21 = vld [vmem:[%s15893_s3 + $0x8c8] sm:$0xf0]  ;;  %v7648_v24 = vld [vmem:[%s15893_s3 + $0x858] sm:$0xf0] }
 0x13e   :  { %v886_v22 = vrot.slane %v880_v15, 6  ;;  %v7435_v44 = vor.u32 %v10365_v25, %v7432_v29  ;;  %v7702_v15 = vld [vmem:[%s15893_s3 + $0x8c0] sm:$0xf]  ;;  %v7694_v28 = vld [vmem:[%s15893_s3 + $0x8b0] sm:$0xf] }
 0x13f   :  { %1988 = vmatpush.bf16.msrb.mxu3 %v7403_v37  ;;  %v10395_v37 = vld [vmem:[%s15893_s3 + $0x7f4] sm:$0xf]  ;;  %v10420_v29 = vld [vmem:[%s15893_s3 + $0x8b4] sm:$0xf0]  ;;  %v7680_v3 = vld [vmem:[%s15893_s3 + $0x898] sm:$0xf0] }
 0x140   :  { %2303 = vmatpush.bf16.msra.mxu1 %v7591_v30  ;;  %2001 = vmatpush.bf16.msra.mxu0 %v7467_v38  ;;  %v7606_v30 = vld [vmem:[%s15893_s3 + $0x800] sm:$0xf]  ;;  %891 = vst.msk [vmem:[#allocation2 + $0x8] sm:$0xc] %vm890_vm3, %v886_v22  ;;  %v868_v36 = vpop.f32.mrf.mxu1  ;;  %v7600_v38 = vld [vmem:[%s15893_s3 + $0x7f8] sm:$0xf0] }
 0x141   :  { %2318 = vmatpush.bf16.msra.mxu2 %v7639_v39  ;;  %v881_v32 = vpop.f32.mrf.mxu2  ;;  %v10427_v39 = vld [vmem:[%s15893_s3 + $0x8f4] sm:$0xf]  ;;  %v7607_v46 = vor.u32 %v10398_v31, %v7606_v30  ;;  %v7603_v48 = vor.u32 %v10395_v37, %v7600_v38  ;;  %v7640_v36 = vld [vmem:[%s15893_s3 + $0x848] sm:$0xf0]  ;;  %v7695_v37 = vor.u32 %v10420_v29, %v7694_v28  ;;  %v10401_v4 = vld [vmem:[%s15893_s3 + $0x824] sm:$0xf] }
 0x142   :  { %v10387_v30 = vld [vmem:[%s15893_s3 + $0x7b4] sm:$0xf]  ;;  %v7568_v32 = vld [vmem:[%s15893_s3 + $0x7b8] sm:$0xf0] }
 0x143   :  { %1989 = vmatpush.bf16.msrb.mxu3 %v7395_v52  ;;  %v7731_v52 = vor.u32 %v10427_v39, %v7728_v41  ;;  %v7571_v38 = vor.u32 %v10387_v30, %v7568_v32  ;;  %v7616_v28 = vld [vmem:[%s15893_s3 + $0x818] sm:$0xf0] }
 0x144   :  { %2304 = vmatpush.bf16.msra.mxu1 %v7583_v43  ;;  %2002 = vmatpush.bf16.msra.mxu0 %v7459_v54  ;;  %v10384_v43 = vld [vmem:[%s15893_s3 + $0x794] sm:$0xf0] }
 0x145   :  { %2319 = vmatpush.bf16.msra.mxu2 %v7631_v56  ;;  %v7551_v54 = vor.u32 %v10384_v43, %v7550_v42  ;;  %v10393_v56 = vld [vmem:[%s15893_s3 + $0x7e4] sm:$0xf]  ;;  %v7686_v42 = vld [vmem:[%s15893_s3 + $0x8a0] sm:$0xf]  ;;  %v10418_v43 = vld [vmem:[%s15893_s3 + $0x8a4] sm:$0xf0] }
 0x146   :  { %v7595_v0 = vor.u32 %v10393_v56, %v7592_v57  ;;  %v10403_v56 = vld [vmem:[%s15893_s3 + $0x834] sm:$0xf]  ;;  %v7632_v57 = vld [vmem:[%s15893_s3 + $0x838] sm:$0xf0]  ;;  %v7687_v59 = vor.u32 %v10418_v43, %v7686_v42  ;;  %v7608_v42 = vld [vmem:[%s15893_s3 + $0x808] sm:$0xf0] }
 0x147   :  { %1990 = vmatpush.bf16.msrb.mxu3 %v7387_v7  ;;  %v10423_v7 = vld [vmem:[%s15893_s3 + $0x8d4] sm:$0xf]  ;;  %v7966_v43 = vld [vmem:[%s15893_s3 + $0xa70] sm:$0xf] }
 0x148   :  { %2305 = vmatpush.bf16.msra.mxu1 %v7575_v62  ;;  %2003 = vmatpush.bf16.msra.mxu0 %v7451_v9  ;;  %v7664_v62 = vld [vmem:[%s15893_s3 + $0x878] sm:$0xf0]  ;;  %v10409_v9 = vld [vmem:[%s15893_s3 + $0x864] sm:$0xf]  ;;  %v7715_v14 = vor.u32 %v10423_v7, %v7712_v8  ;;  %v7670_v7 = vld [vmem:[%s15893_s3 + $0x880] sm:$0xf] }
 0x149   :  { %2320 = vmatpush.bf16.msra.mxu2 %v7623_v10  ;;  %v7667_v5 = vor.u32 %v10411_v61, %v7664_v62  ;;  %v7656_v10 = vld [vmem:[%s15893_s3 + $0x868] sm:$0xf0]  ;;  %v10416_v62 = vld [vmem:[%s15893_s3 + $0x894] sm:$0xf0]  ;;  %v10414_v8 = vld [vmem:[%s15893_s3 + $0x884] sm:$0xf0] }
 0x14a   :  { %v7659_v18 = vor.u32 %v10409_v9, %v7656_v10  ;;  %v7679_v6 = vor.u32 %v10416_v62, %v7678_v60  ;;  %v7683_v10 = vor.u32 %v10415_v2, %v7680_v3  ;;  %v7824_v60 = vld [vmem:[%s15893_s3 + $0x958] sm:$0xf0]  ;;  %v7878_v2 = vld [vmem:[%s15893_s3 + $0x9c0] sm:$0xf] }
 0x14b   :  { %1991 = vmatpush.bf16.msrb.mxu3 %v7379_v23  ;;  %v10407_v23 = vld [vmem:[%s15893_s3 + $0x854] sm:$0xf] }
 0x14c   :  { %2306 = vmatpush.bf16.msra.mxu1 %v7567_v16  ;;  %2004 = vmatpush.bf16.msra.mxu0 %v7443_v26  ;;  %v10422_v16 = vld [vmem:[%s15893_s3 + $0x8c4] sm:$0xf0]  ;;  %v7579_v26 = vor.u32 %v10389_v17, %v7576_v19  ;;  %v7651_v31 = vor.u32 %v10407_v23, %v7648_v24  ;;  %v7672_v19 = vld [vmem:[%s15893_s3 + $0x888] sm:$0xf0]  ;;  %v10460_v23 = vld [vmem:[%s15893_s3 + $0x9f4] sm:$0xf0] }
 0x14d   :  { %2321 = vmatpush.bf16.msra.mxu2 %v7615_v27  ;;  %v7703_v25 = vor.u32 %v10422_v16, %v7702_v15  ;;  %v7707_v27 = vor.u32 %v10421_v20, %v7704_v21  ;;  %v7544_v15 = vld [vmem:[%s15893_s3 + $0x788] sm:$0xf0]  ;;  %v10413_v16 = vld [vmem:[%s15893_s3 + $0x884] sm:$0xf]  ;;  %v7838_v20 = vld [vmem:[%s15893_s3 + $0x970] sm:$0xf] }
 0x14e   :  { %v10444_v21 = vld [vmem:[%s15893_s3 + $0x974] sm:$0xf0]  ;;  %v10443_v24 = vld [vmem:[%s15893_s3 + $0x974] sm:$0xf]  ;;  %v7675_v30 = vor.u32 %v10413_v16, %v7672_v19  ;;  %v7870_v16 = vld [vmem:[%s15893_s3 + $0x9b0] sm:$0xf] }
 0x14f   :  { %1992 = vmatpush.bf16.msrb.mxu3 %v7371_v40  ;;  %v10435_v19 = vld [vmem:[%s15893_s3 + $0x934] sm:$0xf] }
 0x150   :  { %2307 = vmatpush.bf16.msra.mxu1 %v7559_v33  ;;  %2005 = vmatpush.bf16.msra.mxu0 %v7435_v44  ;;  %v1203_v22 = vpop.f32.mrf.mxu0  ;;  %v10419_v33 = vld [vmem:[%s15893_s3 + $0x8b4] sm:$0xf]  ;;  %v10385_v44 = vld [vmem:[%s15893_s3 + $0x7a4] sm:$0xf] }
 0x151   :  { %2322 = vmatpush.bf16.msra.mxu2 %v7607_v46  ;;  %v7699_v39 = vor.u32 %v10419_v33, %v7696_v34  ;;  %v7563_v55 = vor.u32 %v10385_v44, %v7560_v49  ;;  %v7830_v33 = vld [vmem:[%s15893_s3 + $0x960] sm:$0xf]  ;;  %v10442_v34 = vld [vmem:[%s15893_s3 + $0x964] sm:$0xf0]  ;;  %v10476_v44 = vld [vmem:[%s15893_s3 + $0xa74] sm:$0xf0] }
 0x152   :  { %1993 = vmatmul.bf16.vlgmr.msrb.gmra.mxu3 %v11463_v51 }
 0x153   :  { %2328 = vmatpush.bf16.msra.mxu3 %v7727_v47  ;;  %2006 = vmatmul.bf16.vlgmr.msra.gmra.mxu0 %v11507_v11 }
 0x154   :  { %2341 = vmatpush.bf16.msrb.mxu0 %v7603_v48  ;;  %2308 = vmatpush.bf16.msra.mxu1 %v7551_v54  ;;  %v7643_v48 = vor.u32 %v10405_v35, %v7640_v36 }
 0x155   :  { %2367 = vmatpush.bf16.msrb.mxu2 %v7731_v52  ;;  %v1190_v40 = vpop.f32.mrf.mxu3  ;;  %v7688_v52 = vld [vmem:[%s15893_s3 + $0x8a8] sm:$0xf0] }
 0x156   :  { %2323 = vmatmul.bf16.vlgmr.msra.gmra.mxu2 %v11463_v51  ;;  %v1204_v46 = vadd.f32 %v1203_v22, %v1190_v40  ;;  %v7691_v61 = vor.u32 %v10417_v50, %v7688_v52  ;;  %v7902_v22 = vld [vmem:[%s15893_s3 + $0x9f0] sm:$0xf]  ;;  %v7832_v40 = vld [vmem:[%s15893_s3 + $0x968] sm:$0xf0] }
 0x157   :  { %2329 = vmatpush.bf16.msra.mxu3 %v7719_v63  ;;  %v10383_v63 = vld [vmem:[%s15893_s3 + $0x794] sm:$0xf]  ;;  %v7903_v32 = vor.u32 %v10460_v23, %v7902_v22  ;;  %v7822_v52 = vld [vmem:[%s15893_s3 + $0x950] sm:$0xf]  ;;  %v10470_v22 = vld [vmem:[%s15893_s3 + $0xa44] sm:$0xf0] }
 0x158   :  { %2342 = vmatpush.bf16.msrb.mxu0 %v7595_v0  ;;  %2309 = vmatpush.bf16.msra.mxu1 %v7543_v53  ;;  %v1216_v41 = vpop.f32.mrf.mxu1  ;;  %v1205_v54 = vpop.f32.mrf.mxu0  ;;  %v7552_v0 = vld [vmem:[%s15893_s3 + $0x798] sm:$0xf0]  ;;  %v7635_v53 = vor.u32 %v10403_v56, %v7632_v57  ;;  %v7886_v56 = vld [vmem:[%s15893_s3 + $0x9d0] sm:$0xf]  ;;  %v7967_v57 = vor.u32 %v10476_v44, %v7966_v43  ;;  %v10432_v44 = vld [vmem:[%s15893_s3 + $0x914] sm:$0xf0] }
 0x159   :  { %2368 = vmatpush.bf16.msrb.mxu2 %v7723_v1  ;;  %v12758_v47 = vpop.f32.mrf.mxu2  ;;  %v1217_v58 = vadd.f32 %v1216_v41, %v1204_v46  ;;  %v7555_v9 = vor.u32 %v10383_v63, %v7552_v0  ;;  %v10397_v41 = vld [vmem:[%s15893_s3 + $0x804] sm:$0xf]  ;;  %v7831_v46 = vor.u32 %v10442_v34, %v7830_v33  ;;  %v10440_v54 = vld [vmem:[%s15893_s3 + $0x954] sm:$0xf0]  ;;  %v10450_v34 = vld [vmem:[%s15893_s3 + $0x9a4] sm:$0xf0] }
 0x15a   :  { %v7611_v50 = vor.u32 %v10397_v41, %v7608_v42  ;;  %v7823_v62 = vor.u32 %v10440_v54, %v7822_v52  ;;  %v7790_v41 = vld [vmem:[%s15893_s3 + $0x910] sm:$0xf]  ;;  %v10431_v52 = vld [vmem:[%s15893_s3 + $0x914] sm:$0xf]  ;;  %v7792_v54 = vld [vmem:[%s15893_s3 + $0x918] sm:$0xf0] }
 0x15b   :  { %2310 = vmatmul.bf16.vlgmr.msra.gmra.mxu1 %v11452_v45  ;;  %2330 = vmatpush.bf16.msra.mxu3 %v7711_v12  ;;  %v1261_v1 = vrot.slane %v1217_v58, 4  ;;  %v10456_v58 = vld [vmem:[%s15893_s3 + $0x9d4] sm:$0xf0] }
 0x15c   :  { %2354 = vmatpush.bf16.msrb.mxu1 %v7667_v5  ;;  %2343 = vmatpush.bf16.msrb.mxu0 %v7587_v13  ;;  %v7624_v5 = vld [vmem:[%s15893_s3 + $0x828] sm:$0xf0]  ;;  %v7887_v63 = vor.u32 %v10456_v58, %v7886_v56  ;;  %v7926_v56 = vld [vmem:[%s15893_s3 + $0xa20] sm:$0xf]  ;;  %v7791_v58 = vor.u32 %v10432_v44, %v7790_v41  ;;  %v8126_v41 = vld [vmem:[%s15893_s3 + $0xb50] sm:$0xf] }
 0x15d   :  { %2369 = vmatpush.bf16.msrb.mxu2 %v7715_v14  ;;  %1265 = vst [vmem:[#allocation2] sm:$0x30] %v1261_v1  ;;  %v1192_v12 = vpop.f32.mrf.mxu3  ;;  %v10381_v14 = vld [vmem:[%s15893_s3 + $0x784] sm:$0xf]  ;;  %v7814_v1 = vld [vmem:[%s15893_s3 + $0x940] sm:$0xf] }
 0x15e   :  { %v7547_v29 = vor.u32 %v10381_v14, %v7544_v15  ;;  %v7806_v14 = vld [vmem:[%s15893_s3 + $0x930] sm:$0xf]  ;;  %v10436_v15 = vld [vmem:[%s15893_s3 + $0x934] sm:$0xf0]  ;;  %v10490_v44 = vld [vmem:[%s15893_s3 + $0xae4] sm:$0xf0] }
 0x15f   :  { %2331 = vmatpush.bf16.msra.mxu3 %v7703_v25  ;;  %v7671_v25 = vor.u32 %v10414_v8, %v7670_v7  ;;  %v7950_v8 = vld [vmem:[%s15893_s3 + $0xa50] sm:$0xf]  ;;  %v7807_v23 = vor.u32 %v10436_v15, %v7806_v14  ;;  %v10464_v14 = vld [vmem:[%s15893_s3 + $0xa14] sm:$0xf0] }
 0x160   :  { %2355 = vmatpush.bf16.msrb.mxu1 %v7659_v18  ;;  %2344 = vmatpush.bf16.msrb.mxu0 %v7579_v26  ;;  %v1218_v13 = vpop.f32.mrf.mxu1  ;;  %v7627_v18 = vor.u32 %v10401_v4, %v7624_v5  ;;  %v7840_v26 = vld [vmem:[%s15893_s3 + $0x978] sm:$0xf0]  ;;  %v10454_v4 = vld [vmem:[%s15893_s3 + $0x9c4] sm:$0xf0]  ;;  %v10437_v5 = vld [vmem:[%s15893_s3 + $0x944] sm:$0xf] }
 0x161   :  { %2370 = vmatpush.bf16.msrb.mxu2 %v7707_v27  ;;  %v1231_v17 = vpop.f32.mrf.mxu2  ;;  %v10399_v27 = vld [vmem:[%s15893_s3 + $0x814] sm:$0xf]  ;;  %v7843_v35 = vor.u32 %v10443_v24, %v7840_v26  ;;  %v7879_v12 = vor.u32 %v10454_v4, %v7878_v2  ;;  %v7784_v4 = vld [vmem:[%s15893_s3 + $0x908] sm:$0xf0] }
 0x162   :  { %v7619_v36 = vor.u32 %v10399_v27, %v7616_v28  ;;  %v7798_v28 = vld [vmem:[%s15893_s3 + $0x920] sm:$0xf] }
 0x163   :  { %2332 = vmatpush.bf16.msra.mxu3 %v7695_v37  ;;  %v7894_v37 = vld [vmem:[%s15893_s3 + $0x9e0] sm:$0xf] }
 0x164   :  { %2356 = vmatpush.bf16.msrb.mxu1 %v7651_v31  ;;  %2345 = vmatpush.bf16.msrb.mxu0 %v7571_v38  ;;  %v7839_v31 = vor.u32 %v10444_v21, %v7838_v20  ;;  %v10458_v38 = vld [vmem:[%s15893_s3 + $0x9e4] sm:$0xf0]  ;;  %v7808_v20 = vld [vmem:[%s15893_s3 + $0x938] sm:$0xf0]  ;;  %v7942_v21 = vld [vmem:[%s15893_s3 + $0xa40] sm:$0xf] }
 0x165   :  { %2371 = vmatpush.bf16.msrb.mxu2 %v7699_v39  ;;  %v10441_v39 = vld [vmem:[%s15893_s3 + $0x964] sm:$0xf]  ;;  %v7943_v33 = vor.u32 %v10470_v22, %v7942_v21 }
 0x166   :  { %v7835_v49 = vor.u32 %v10441_v39, %v7832_v40 }
 0x167   :  { %2333 = vmatpush.bf16.msra.mxu3 %v7687_v59  ;;  %v10439_v59 = vld [vmem:[%s15893_s3 + $0x954] sm:$0xf] }
 0x168   :  { %2357 = vmatpush.bf16.msrb.mxu1 %v7643_v48  ;;  %2346 = vmatpush.bf16.msrb.mxu0 %v7563_v55  ;;  %v7895_v48 = vor.u32 %v10458_v38, %v7894_v37  ;;  %v7958_v55 = vld [vmem:[%s15893_s3 + $0xa60] sm:$0xf]  ;;  %v7827_v0 = vor.u32 %v10439_v59, %v7824_v60  ;;  %v10468_v38 = vld [vmem:[%s15893_s3 + $0xa34] sm:$0xf0]  ;;  %v10430_v60 = vld [vmem:[%s15893_s3 + $0x904] sm:$0xf0] }
 0x169   :  { %2372 = vmatpush.bf16.msrb.mxu2 %v7691_v61  ;;  %v10474_v61 = vld [vmem:[%s15893_s3 + $0xa64] sm:$0xf0]  ;;  %v7782_v59 = vld [vmem:[%s15893_s3 + $0x900] sm:$0xf] }
 0x16a   :  { %v7959_v3 = vor.u32 %v10474_v61, %v7958_v55  ;;  %v7795_v61 = vor.u32 %v10431_v52, %v7792_v54  ;;  %v7880_v52 = vld [vmem:[%s15893_s3 + $0x9c8] sm:$0xf0]  ;;  %v10469_v54 = vld [vmem:[%s15893_s3 + $0xa44] sm:$0xf] }
 0x16b   :  { %2334 = vmatpush.bf16.msra.mxu3 %v7679_v6  ;;  %v7816_v6 = vld [vmem:[%s15893_s3 + $0x948] sm:$0xf0] }
 0x16c   :  { %2358 = vmatpush.bf16.msrb.mxu1 %v7635_v53  ;;  %2347 = vmatpush.bf16.msrb.mxu0 %v7555_v9  ;;  %v10438_v53 = vld [vmem:[%s15893_s3 + $0x944] sm:$0xf0]  ;;  %v10472_v9 = vld [vmem:[%s15893_s3 + $0xa54] sm:$0xf0]  ;;  %v7819_v13 = vor.u32 %v10437_v5, %v7816_v6  ;;  %v10459_v5 = vld [vmem:[%s15893_s3 + $0x9f4] sm:$0xf] }
 0x16d   :  { %2373 = vmatpush.bf16.msrb.mxu2 %v7683_v10  ;;  %v7815_v10 = vor.u32 %v10438_v53, %v7814_v1  ;;  %v7951_v17 = vor.u32 %v10472_v9, %v7950_v8  ;;  %v10446_v1 = vld [vmem:[%s15893_s3 + $0x984] sm:$0xf0]  ;;  %v10429_v53 = vld [vmem:[%s15893_s3 + $0x904] sm:$0xf]  ;;  %v7904_v6 = vld [vmem:[%s15893_s3 + $0x9f8] sm:$0xf0] }
 0x16e   :  { %v7968_v8 = vld [vmem:[%s15893_s3 + $0xa78] sm:$0xf0]  ;;  %v8142_v9 = vld [vmem:[%s15893_s3 + $0xb70] sm:$0xf] }
 0x16f   :  { %2335 = vmatpush.bf16.msra.mxu3 %v7671_v25  ;;  %v7811_v25 = vor.u32 %v10435_v19, %v7808_v20  ;;  %v10457_v19 = vld [vmem:[%s15893_s3 + $0x9e4] sm:$0xf]  ;;  %v7896_v20 = vld [vmem:[%s15893_s3 + $0x9e8] sm:$0xf0] }
 0x170   :  { %2359 = vmatpush.bf16.msrb.mxu1 %v7627_v18  ;;  %2348 = vmatpush.bf16.msrb.mxu0 %v7547_v29  ;;  %v1255_v7 = vpop.f32.mrf.mxu0  ;;  %v10452_v18 = vld [vmem:[%s15893_s3 + $0x9b4] sm:$0xf0]  ;;  %v10434_v29 = vld [vmem:[%s15893_s3 + $0x924] sm:$0xf0] }
 0x171   :  { %2374 = vmatpush.bf16.msrb.mxu2 %v7675_v30  ;;  %v7871_v24 = vor.u32 %v10452_v18, %v7870_v16  ;;  %v7862_v30 = vld [vmem:[%s15893_s3 + $0x9a0] sm:$0xf]  ;;  %v7799_v40 = vor.u32 %v10434_v29, %v7798_v28  ;;  %v7787_v16 = vor.u32 %v10429_v53, %v7784_v4  ;;  %v10462_v29 = vld [vmem:[%s15893_s3 + $0xa04] sm:$0xf0]  ;;  %v7872_v53 = vld [vmem:[%s15893_s3 + $0x9b8] sm:$0xf0] }
 0x172   :  { %2336 = vmatmul.bf16.vlgmr.msra.gmra.mxu3 %v11507_v11  ;;  %v7863_v42 = vor.u32 %v10450_v34, %v7862_v30  ;;  %v7910_v28 = vld [vmem:[%s15893_s3 + $0xa00] sm:$0xf]  ;;  %v8078_v30 = vld [vmem:[%s15893_s3 + $0xaf0] sm:$0xf]  ;;  %v7936_v4 = vld [vmem:[%s15893_s3 + $0xa38] sm:$0xf0] }
 0x173   :  { %2677 = vmatpush.bf16.msrb.mxu3 %v7839_v31  ;;  %2349 = vmatmul.bf16.vlgmr.msrb.gmra.mxu0 %v11452_v45 }
 0x174   :  { %2690 = vmatpush.bf16.msra.mxu0 %v7903_v32  ;;  %2360 = vmatpush.bf16.msrb.mxu1 %v7619_v36  ;;  %v7800_v36 = vld [vmem:[%s15893_s3 + $0x928] sm:$0xf0] }
 0x175   :  { %2716 = vmatpush.bf16.msra.mxu2 %v7843_v35  ;;  %v1242_v26 = vpop.f32.mrf.mxu3  ;;  %v10433_v35 = vld [vmem:[%s15893_s3 + $0x924] sm:$0xf] }
 0x176   :  { %2375 = vmatmul.bf16.vlgmr.msrb.gmra.mxu2 %v11507_v11  ;;  %v1243_v31 = vadd.f32 %v1242_v26, %v12758_v47  ;;  %v7934_v47 = vld [vmem:[%s15893_s3 + $0xa30] sm:$0xf]  ;;  %v7803_v43 = vor.u32 %v10433_v35, %v7800_v36  ;;  %v10506_v26 = vld [vmem:[%s15893_s3 + $0xb64] sm:$0xf0]  ;;  %v7911_v36 = vor.u32 %v10462_v29, %v7910_v28 }
 0x177   :  { %2678 = vmatpush.bf16.msrb.mxu3 %v7831_v46  ;;  %v7854_v46 = vld [vmem:[%s15893_s3 + $0x990] sm:$0xf] }
 0x178   :  { %2691 = vmatpush.bf16.msra.mxu0 %v7895_v48  ;;  %2361 = vmatpush.bf16.msrb.mxu1 %v7611_v50  ;;  %v12947_v27 = vpop.f32.mrf.mxu1  ;;  %v1257_v37 = vpop.f32.mrf.mxu0  ;;  %v1256_v39 = vadd.f32 %v1255_v7, %v1243_v31  ;;  %v10448_v48 = vld [vmem:[%s15893_s3 + $0x994] sm:$0xf0]  ;;  %v7935_v50 = vor.u32 %v10468_v38, %v7934_v47  ;;  %v10475_v7 = vld [vmem:[%s15893_s3 + $0xa74] sm:$0xf]  ;;  %v7888_v47 = vld [vmem:[%s15893_s3 + $0x9d8] sm:$0xf0] }
 0x179   :  { %2717 = vmatpush.bf16.msra.mxu2 %v7835_v49  ;;  %v12959_v32 = vpop.f32.mrf.mxu2  ;;  %v7855_v55 = vor.u32 %v10448_v48, %v7854_v46  ;;  %v7971_v18 = vor.u32 %v10475_v7, %v7968_v8  ;;  %v10492_v31 = vld [vmem:[%s15893_s3 + $0xaf4] sm:$0xf0]  ;;  %v10455_v37 = vld [vmem:[%s15893_s3 + $0x9d4] sm:$0xf]  ;;  %v8054_v7 = vld [vmem:[%s15893_s3 + $0xac0] sm:$0xf] }
 0x17a   :  { %v1262_v49 = vrot.slane %v1256_v39, 4  ;;  %v10471_v38 = vld [vmem:[%s15893_s3 + $0xa54] sm:$0xf]  ;;  %v8079_v39 = vor.u32 %v10492_v31, %v8078_v30  ;;  %v7891_v46 = vor.u32 %v10455_v37, %v7888_v47  ;;  %v10486_v8 = vld [vmem:[%s15893_s3 + $0xac4] sm:$0xf0] }
 0x17b   :  { %2362 = vmatmul.bf16.vlgmr.msrb.gmra.mxu1 %v11463_v51  ;;  %2679 = vmatpush.bf16.msrb.mxu3 %v7823_v62  ;;  %v10447_v31 = vld [vmem:[%s15893_s3 + $0x994] sm:$0xf]  ;;  %v7920_v37 = vld [vmem:[%s15893_s3 + $0xa18] sm:$0xf0]  ;;  %v8094_v47 = vld [vmem:[%s15893_s3 + $0xb10] sm:$0xf] }
 0x17c   :  { %2703 = vmatpush.bf16.msra.mxu1 %v7967_v57  ;;  %2692 = vmatpush.bf16.msra.mxu0 %v7887_v63  ;;  %v10466_v57 = vld [vmem:[%s15893_s3 + $0xa24] sm:$0xf0]  ;;  %1267 = vst.msk [vmem:[#allocation2 + $0x8] sm:$0x30] %vm1266_vm4, %v1262_v49 }
 0x17d   :  { %2718 = vmatpush.bf16.msra.mxu2 %v7827_v0  ;;  %v1244_v62 = vpop.f32.mrf.mxu3  ;;  %v7846_v0 = vld [vmem:[%s15893_s3 + $0x980] sm:$0xf] }
 0x17e   :  { %v7847_v15 = vor.u32 %v10446_v1, %v7846_v0  ;;  %v10451_v1 = vld [vmem:[%s15893_s3 + $0x9b4] sm:$0xf] }
 0x17f   :  { %2680 = vmatpush.bf16.msrb.mxu3 %v7815_v10  ;;  %v7783_v10 = vor.u32 %v10430_v60, %v7782_v59  ;;  %v10502_v59 = vld [vmem:[%s15893_s3 + $0xb44] sm:$0xf0] }
 0x180   :  { %2704 = vmatpush.bf16.msra.mxu1 %v7959_v3  ;;  %2693 = vmatpush.bf16.msra.mxu0 %v7879_v12  ;;  %v1568_v63 = vpop.f32.mrf.mxu1  ;;  %v7927_v3 = vor.u32 %v10466_v57, %v7926_v56  ;;  %v10508_v12 = vld [vmem:[%s15893_s3 + $0xb74] sm:$0xf0]  ;;  %v7944_v57 = vld [vmem:[%s15893_s3 + $0xa48] sm:$0xf0] }
 0x181   :  { %2719 = vmatpush.bf16.msra.mxu2 %v7819_v13  ;;  %v1581_v2 = vpop.f32.mrf.mxu2  ;;  %v7918_v13 = vld [vmem:[%s15893_s3 + $0xa10] sm:$0xf]  ;;  %v8143_v21 = vor.u32 %v10508_v12, %v8142_v9  ;;  %v7947_v63 = vor.u32 %v10469_v54, %v7944_v57  ;;  %v1580_v9 = vadd.f32 %v12959_v32, %v12947_v27  ;;  %v10465_v27 = vld [vmem:[%s15893_s3 + $0xa24] sm:$0xf]  ;;  %v8086_v57 = vld [vmem:[%s15893_s3 + $0xb00] sm:$0xf] }
 0x182   :  { %v7919_v22 = vor.u32 %v10464_v14, %v7918_v13  ;;  %v10467_v2 = vld [vmem:[%s15893_s3 + $0xa34] sm:$0xf]  ;;  %v10461_v54 = vld [vmem:[%s15893_s3 + $0xa04] sm:$0xf] }
 0x183   :  { %2681 = vmatpush.bf16.msrb.mxu3 %v7807_v23  ;;  %v10473_v23 = vld [vmem:[%s15893_s3 + $0xa64] sm:$0xf]  ;;  %v7939_v12 = vor.u32 %v10467_v2, %v7936_v4  ;;  %v8030_v2 = vld [vmem:[%s15893_s3 + $0xa90] sm:$0xf] }
 0x184   :  { %2705 = vmatpush.bf16.msra.mxu1 %v7951_v17  ;;  %2694 = vmatpush.bf16.msra.mxu0 %v7871_v24  ;;  %v7907_v17 = vor.u32 %v10459_v5, %v7904_v6  ;;  %v7960_v24 = vld [vmem:[%s15893_s3 + $0xa68] sm:$0xf0]  ;;  %v8110_v5 = vld [vmem:[%s15893_s3 + $0xb30] sm:$0xf]  ;;  %v10500_v6 = vld [vmem:[%s15893_s3 + $0xb34] sm:$0xf0] }
 0x185   :  { %2720 = vmatpush.bf16.msra.mxu2 %v7811_v25  ;;  %v8134_v25 = vld [vmem:[%s15893_s3 + $0xb60] sm:$0xf]  ;;  %v7963_v34 = vor.u32 %v10473_v23, %v7960_v24  ;;  %v8111_v13 = vor.u32 %v10500_v6, %v8110_v5  ;;  %v10498_v23 = vld [vmem:[%s15893_s3 + $0xb24] sm:$0xf0] }
 0x186   :  { %v8135_v35 = vor.u32 %v10506_v26, %v8134_v25  ;;  %v8046_v25 = vld [vmem:[%s15893_s3 + $0xab0] sm:$0xf]  ;;  %v10484_v26 = vld [vmem:[%s15893_s3 + $0xab4] sm:$0xf0] }
 0x187   :  { %2682 = vmatpush.bf16.msrb.mxu3 %v7799_v40  ;;  %v7952_v40 = vld [vmem:[%s15893_s3 + $0xa58] sm:$0xf0] }
 0x188   :  { %2706 = vmatpush.bf16.msra.mxu1 %v7943_v33  ;;  %2695 = vmatpush.bf16.msra.mxu0 %v7863_v42  ;;  %v7899_v33 = vor.u32 %v10457_v19, %v7896_v20  ;;  %v10504_v42 = vld [vmem:[%s15893_s3 + $0xb54] sm:$0xf0]  ;;  %v7955_v48 = vor.u32 %v10471_v38, %v7952_v40  ;;  %v8055_v20 = vor.u32 %v10486_v8, %v8054_v7  ;;  %v8198_v8 = vld [vmem:[%s15893_s3 + $0xbe0] sm:$0xf] }
 0x189   :  { %2721 = vmatpush.bf16.msra.mxu2 %v7803_v43  ;;  %v8070_v43 = vld [vmem:[%s15893_s3 + $0xae0] sm:$0xf]  ;;  %v8127_v49 = vor.u32 %v10504_v42, %v8126_v41  ;;  %v10496_v40 = vld [vmem:[%s15893_s3 + $0xb14] sm:$0xf0]  ;;  %v10482_v42 = vld [vmem:[%s15893_s3 + $0xaa4] sm:$0xf0] }
 0x18a   :  { %v8071_v56 = vor.u32 %v10490_v44, %v8070_v43  ;;  %v8038_v41 = vld [vmem:[%s15893_s3 + $0xaa0] sm:$0xf]  ;;  %v10445_v44 = vld [vmem:[%s15893_s3 + $0x984] sm:$0xf] }
 0x18b   :  { %2683 = vmatpush.bf16.msrb.mxu3 %v7791_v58  ;;  %v8118_v58 = vld [vmem:[%s15893_s3 + $0xb40] sm:$0xf] }
 0x18c   :  { %2707 = vmatpush.bf16.msra.mxu1 %v7935_v50  ;;  %2696 = vmatpush.bf16.msra.mxu0 %v7855_v55  ;;  %v10453_v50 = vld [vmem:[%s15893_s3 + $0x9c4] sm:$0xf]  ;;  %v8062_v55 = vld [vmem:[%s15893_s3 + $0xad0] sm:$0xf]  ;;  %v8119_v0 = vor.u32 %v10502_v59, %v8118_v58  ;;  %v8039_v59 = vor.u32 %v10482_v42, %v8038_v41  ;;  %v8184_v42 = vld [vmem:[%s15893_s3 + $0xbc8] sm:$0xf0] }
 0x18d   :  { %2722 = vmatpush.bf16.msra.mxu2 %v7795_v61  ;;  %v10488_v61 = vld [vmem:[%s15893_s3 + $0xad4] sm:$0xf0]  ;;  %v7883_v62 = vor.u32 %v10453_v50, %v7880_v52  ;;  %v10517_v41 = vld [vmem:[%s15893_s3 + $0xbc4] sm:$0xf] }
 0x18f   :  { %2684 = vmatpush.bf16.msrb.mxu3 %v7783_v10  ;;  %v7875_v10 = vor.u32 %v10451_v1, %v7872_v53  ;;  %v8208_v53 = vld [vmem:[%s15893_s3 + $0xbf8] sm:$0xf0] }
 0x190   :  { %2708 = vmatpush.bf16.msra.mxu1 %v7927_v3  ;;  %2697 = vmatpush.bf16.msra.mxu0 %v7847_v15  ;;  %v1605_v60 = vpop.f32.mrf.mxu0  ;;  %v8063_v3 = vor.u32 %v10488_v61, %v8062_v55  ;;  %v8206_v55 = vld [vmem:[%s15893_s3 + $0xbf0] sm:$0xf]  ;;  %v10524_v61 = vld [vmem:[%s15893_s3 + $0xbf4] sm:$0xf0] }
 0x191   :  { %2723 = vmatpush.bf16.msra.mxu2 %v7787_v16  ;;  %v10449_v16 = vld [vmem:[%s15893_s3 + $0x9a4] sm:$0xf]  ;;  %v8207_v6 = vor.u32 %v10524_v61, %v8206_v55  ;;  %v8120_v61 = vld [vmem:[%s15893_s3 + $0xb48] sm:$0xf0] }
 0x192   :  { %2685 = vmatmul.bf16.vlgmr.msrb.gmra.mxu3 %v11452_v45  ;;  %v10501_v55 = vld [vmem:[%s15893_s3 + $0xb44] sm:$0xf] }
 0x193   :  { %2729 = vmatpush.bf16.msra.mxu3 %v7907_v17  ;;  %2698 = vmatmul.bf16.vlgmr.msra.gmra.mxu0 %v11463_v51  ;;  %v7864_v17 = vld [vmem:[%s15893_s3 + $0x9a8] sm:$0xf0] }
 0x194   :  { %2742 = vmatpush.bf16.msrb.mxu0 %v7971_v18  ;;  %2709 = vmatpush.bf16.msra.mxu1 %v7919_v22  ;;  %v8102_v22 = vld [vmem:[%s15893_s3 + $0xb20] sm:$0xf]  ;;  %v7867_v30 = vor.u32 %v10449_v16, %v7864_v17  ;;  %v8200_v16 = vld [vmem:[%s15893_s3 + $0xbe8] sm:$0xf0] }
 0x195   :  { %3065 = vmatpush.bf16.msrb.mxu2 %v8143_v21  ;;  %v1592_v14 = vpop.f32.mrf.mxu3  ;;  %v7928_v21 = vld [vmem:[%s15893_s3 + $0xa28] sm:$0xf0]  ;;  %v8022_v17 = vld [vmem:[%s15893_s3 + $0xa80] sm:$0xf] }
 0x196   :  { %2724 = vmatmul.bf16.vlgmr.msra.gmra.mxu2 %v11452_v45  ;;  %v1593_v32 = vadd.f32 %v1592_v14, %v1580_v9  ;;  %v10522_v9 = vld [vmem:[%s15893_s3 + $0xbe4] sm:$0xf0]  ;;  %v8072_v14 = vld [vmem:[%s15893_s3 + $0xae8] sm:$0xf0] }
 0x197   :  { %2730 = vmatpush.bf16.msra.mxu3 %v7899_v33  ;;  %v7856_v33 = vld [vmem:[%s15893_s3 + $0x998] sm:$0xf0] }
 0x198   :  { %2743 = vmatpush.bf16.msrb.mxu0 %v7963_v34  ;;  %2710 = vmatpush.bf16.msra.mxu1 %v7911_v36  ;;  %v1618_v15 = vpop.f32.mrf.mxu1  ;;  %v1607_v24 = vpop.f32.mrf.mxu0  ;;  %v1637_v28 = vrot.slane %v1593_v32, 2  ;;  %v7931_v34 = vor.u32 %v10465_v27, %v7928_v21  ;;  %v10463_v36 = vld [vmem:[%s15893_s3 + $0xa14] sm:$0xf]  ;;  %v7859_v43 = vor.u32 %v10447_v31, %v7856_v33  ;;  %v10478_v27 = vld [vmem:[%s15893_s3 + $0xa84] sm:$0xf0] }
 0x199   :  { %3066 = vmatpush.bf16.msrb.mxu2 %v8135_v35  ;;  %v1619_v18 = vadd.f32 %v1618_v15, %v1605_v60  ;;  %v1631_v19 = vpop.f32.mrf.mxu2  ;;  %v8103_v35 = vor.u32 %v10498_v23, %v8102_v22  ;;  %v10494_v60 = vld [vmem:[%s15893_s3 + $0xb04] sm:$0xf0]  ;;  %v10521_v15 = vld [vmem:[%s15893_s3 + $0xbe4] sm:$0xf]  ;;  %v10507_v32 = vld [vmem:[%s15893_s3 + $0xb74] sm:$0xf]  ;;  %v8023_v22 = vor.u32 %v10478_v27, %v8022_v17 }
 0x19a   :  { %1641 = vst [vmem:[#allocation2] sm:$0xc0] %v1637_v28  ;;  %v8087_v5 = vor.u32 %v10494_v60, %v8086_v57  ;;  %v8203_v21 = vor.u32 %v10521_v15, %v8200_v16  ;;  %v8190_v23 = vld [vmem:[%s15893_s3 + $0xbd0] sm:$0xf]  ;;  %v10520_v24 = vld [vmem:[%s15893_s3 + $0xbd4] sm:$0xf0] }
 0x19b   :  { %2711 = vmatmul.bf16.vlgmr.msra.gmra.mxu1 %v11507_v11  ;;  %2731 = vmatpush.bf16.msra.mxu3 %v7891_v46  ;;  %v1632_v29 = vadd.f32 %v1631_v19, %v1619_v18  ;;  %v7848_v46 = vld [vmem:[%s15893_s3 + $0x988] sm:$0xf0]  ;;  %v8144_v18 = vld [vmem:[%s15893_s3 + $0xb78] sm:$0xf0]  ;;  %v8199_v19 = vor.u32 %v10522_v9, %v8198_v8  ;;  %v10505_v31 = vld [vmem:[%s15893_s3 + $0xb64] sm:$0xf] }
 0x19c   :  { %3052 = vmatpush.bf16.msrb.mxu1 %v8079_v39  ;;  %2744 = vmatpush.bf16.msrb.mxu0 %v7955_v48  ;;  %v8047_v39 = vor.u32 %v10484_v26, %v8046_v25  ;;  %v7923_v48 = vor.u32 %v10463_v36, %v7920_v37  ;;  %v7851_v1 = vor.u32 %v10445_v44, %v7848_v46  ;;  %v10487_v25 = vld [vmem:[%s15893_s3 + $0xad4] sm:$0xf]  ;;  %v8064_v28 = vld [vmem:[%s15893_s3 + $0xad8] sm:$0xf0]  ;;  %v8136_v33 = vld [vmem:[%s15893_s3 + $0xb68] sm:$0xf0] }
 0x19d   :  { %3067 = vmatpush.bf16.msrb.mxu2 %v8127_v49  ;;  %v1638_v38 = vrot.slane %v1632_v29, 2  ;;  %v8095_v49 = vor.u32 %v10496_v40, %v8094_v47  ;;  %v1594_v50 = vpop.f32.mrf.mxu3  ;;  %v8147_v26 = vor.u32 %v10507_v32, %v8144_v18  ;;  %v10519_v29 = vld [vmem:[%s15893_s3 + $0xbd4] sm:$0xf]  ;;  %v8182_v37 = vld [vmem:[%s15893_s3 + $0xbc0] sm:$0xf] }
 0x19e   :  { %v10518_v47 = vld [vmem:[%s15893_s3 + $0xbc4] sm:$0xf0]  ;;  %v8056_v40 = vld [vmem:[%s15893_s3 + $0xac8] sm:$0xf0]  ;;  %v10503_v44 = vld [vmem:[%s15893_s3 + $0xb54] sm:$0xf]  ;;  %v8187_v50 = vor.u32 %v10517_v41, %v8184_v42 }
 0x19f   :  { %2732 = vmatpush.bf16.msra.mxu3 %v7883_v62  ;;  %1643 = vst.msk [vmem:[#allocation2 + $0x8] sm:$0xc0] %vm1642_vm5, %v1638_v38  ;;  %v10491_v62 = vld [vmem:[%s15893_s3 + $0xaf4] sm:$0xf]  ;;  %v10485_v38 = vld [vmem:[%s15893_s3 + $0xac4] sm:$0xf] }
 0x1a0   :  { %3053 = vmatpush.bf16.msrb.mxu1 %v8071_v56  ;;  %2745 = vmatpush.bf16.msrb.mxu0 %v7947_v63  ;;  %v1620_v52 = vpop.f32.mrf.mxu1  ;;  %v7912_v56 = vld [vmem:[%s15893_s3 + $0xa08] sm:$0xf0]  ;;  %v8080_v63 = vld [vmem:[%s15893_s3 + $0xaf8] sm:$0xf0]  ;;  %v10513_v9 = vld [vmem:[%s15893_s3 + $0xba4] sm:$0xf] }
 0x1a1   :  { %3068 = vmatpush.bf16.msrb.mxu2 %v8119_v0  ;;  %v1633_v58 = vpop.f32.mrf.mxu2  ;;  %v10523_v0 = vld [vmem:[%s15893_s3 + $0xbf4] sm:$0xf]  ;;  %v7915_v4 = vor.u32 %v10461_v54, %v7912_v56  ;;  %v8083_v7 = vor.u32 %v10491_v62, %v8080_v63  ;;  %v8128_v46 = vld [vmem:[%s15893_s3 + $0xb58] sm:$0xf0]  ;;  %v8174_v52 = vld [vmem:[%s15893_s3 + $0xbb0] sm:$0xf] }
 0x1a2   :  { %v10516_v54 = vld [vmem:[%s15893_s3 + $0xbb4] sm:$0xf0]  ;;  %v10483_v56 = vld [vmem:[%s15893_s3 + $0xab4] sm:$0xf]  ;;  %v8131_v57 = vor.u32 %v10503_v44, %v8128_v46  ;;  %v8048_v58 = vld [vmem:[%s15893_s3 + $0xab8] sm:$0xf0] }
 0x1a3   :  { %2733 = vmatpush.bf16.msra.mxu3 %v7875_v10  ;;  %v8211_v10 = vor.u32 %v10523_v0, %v8208_v53  ;;  %v8176_v60 = vld [vmem:[%s15893_s3 + $0xbb8] sm:$0xf0]  ;;  %v8175_v62 = vor.u32 %v10516_v54, %v8174_v52  ;;  %v8051_v63 = vor.u32 %v10483_v56, %v8048_v58  ;;  %v8040_v8 = vld [vmem:[%s15893_s3 + $0xaa8] sm:$0xf0]  ;;  %v8158_v17 = vld [vmem:[%s15893_s3 + $0xb90] sm:$0xf] }
 0x1a4   :  { %3054 = vmatpush.bf16.msrb.mxu1 %v8063_v3  ;;  %2746 = vmatpush.bf16.msrb.mxu0 %v7939_v12  ;;  %v10480_v3 = vld [vmem:[%s15893_s3 + $0xa94] sm:$0xf0]  ;;  %v8382_v42 = vld [vmem:[%s15893_s3 + $0xcf0] sm:$0xf]  ;;  %v10539_v44 = vld [vmem:[%s15893_s3 + $0xc74] sm:$0xf] }
 0x1a5   :  { %3069 = vmatpush.bf16.msrb.mxu2 %v8111_v13  ;;  %v8031_v12 = vor.u32 %v10480_v3, %v8030_v2  ;;  %v10489_v13 = vld [vmem:[%s15893_s3 + $0xae4] sm:$0xf]  ;;  %v8166_v2 = vld [vmem:[%s15893_s3 + $0xba0] sm:$0xf]  ;;  %v10514_v3 = vld [vmem:[%s15893_s3 + $0xba4] sm:$0xf0] }
 0x1a6   :  { %v8167_v16 = vor.u32 %v10514_v3, %v8166_v2  ;;  %v10512_v18 = vld [vmem:[%s15893_s3 + $0xb94] sm:$0xf0]  ;;  %v8310_v58 = vld [vmem:[%s15893_s3 + $0xc60] sm:$0xf]  ;;  %v8446_v2 = vld [vmem:[%s15893_s3 + $0xd70] sm:$0xf] }
 0x1a7   :  { %2734 = vmatpush.bf16.msra.mxu3 %v7867_v30  ;;  %v8192_v30 = vld [vmem:[%s15893_s3 + $0xbd8] sm:$0xf0]  ;;  %v10540_v41 = vld [vmem:[%s15893_s3 + $0xc74] sm:$0xf0] }
 0x1a8   :  { %3055 = vmatpush.bf16.msrb.mxu1 %v8055_v20  ;;  %2747 = vmatpush.bf16.msrb.mxu0 %v7931_v34  ;;  %v8075_v20 = vor.u32 %v10489_v13, %v8072_v14  ;;  %v8191_v34 = vor.u32 %v10520_v24, %v8190_v23  ;;  %v8195_v36 = vor.u32 %v10519_v29, %v8192_v30  ;;  %v10499_v13 = vld [vmem:[%s15893_s3 + $0xb34] sm:$0xf]  ;;  %v8112_v14 = vld [vmem:[%s15893_s3 + $0xb38] sm:$0xf0]  ;;  %v10497_v24 = vld [vmem:[%s15893_s3 + $0xb24] sm:$0xf] }
 0x1a9   :  { %3070 = vmatpush.bf16.msrb.mxu2 %v8103_v35  ;;  %v8067_v35 = vor.u32 %v10487_v25, %v8064_v28  ;;  %v8160_v23 = vld [vmem:[%s15893_s3 + $0xb98] sm:$0xf0]  ;;  %v8104_v25 = vld [vmem:[%s15893_s3 + $0xb28] sm:$0xf0]  ;;  %v8150_v28 = vld [vmem:[%s15893_s3 + $0xb80] sm:$0xf] }
 0x1aa   :  { %v10510_v29 = vld [vmem:[%s15893_s3 + $0xb84] sm:$0xf0]  ;;  %v10572_v3 = vld [vmem:[%s15893_s3 + $0xd74] sm:$0xf0] }
 0x1ab   :  { %2735 = vmatpush.bf16.msra.mxu3 %v7859_v43  ;;  %v8151_v46 = vor.u32 %v10510_v29, %v8150_v28  ;;  %v8430_v29 = vld [vmem:[%s15893_s3 + $0xd50] sm:$0xf] }
 0x1ac   :  { %3056 = vmatpush.bf16.msrb.mxu1 %v8047_v39  ;;  %2748 = vmatpush.bf16.msrb.mxu0 %v7923_v48  ;;  %v8139_v39 = vor.u32 %v10505_v31, %v8136_v33  ;;  %v8183_v48 = vor.u32 %v10518_v47, %v8182_v37  ;;  %v10509_v37 = vld [vmem:[%s15893_s3 + $0xb84] sm:$0xf] }
 0x1ad   :  { %3071 = vmatpush.bf16.msrb.mxu2 %v8095_v49  ;;  %v8059_v49 = vor.u32 %v10485_v38, %v8056_v40  ;;  %v8107_v38 = vor.u32 %v10497_v24, %v8104_v25  ;;  %v8318_v40 = vld [vmem:[%s15893_s3 + $0xc70] sm:$0xf]  ;;  %v10550_v24 = vld [vmem:[%s15893_s3 + $0xcc4] sm:$0xf0]  ;;  %v10533_v25 = vld [vmem:[%s15893_s3 + $0xc44] sm:$0xf] }
 0x1ae   :  { %v8319_v56 = vor.u32 %v10540_v41, %v8318_v40  ;;  %v8288_v40 = vld [vmem:[%s15893_s3 + $0xc38] sm:$0xf0]  ;;  %v8422_v41 = vld [vmem:[%s15893_s3 + $0xd40] sm:$0xf] }
 0x1af   :  { %2736 = vmatpush.bf16.msra.mxu3 %v7851_v1 }
 0x1b0   :  { %3057 = vmatpush.bf16.msrb.mxu1 %v8039_v59  ;;  %2749 = vmatpush.bf16.msrb.mxu0 %v7915_v4  ;;  %v1955_v43 = vpop.f32.mrf.mxu0  ;;  %v10515_v59 = vld [vmem:[%s15893_s3 + $0xbb4] sm:$0xf]  ;;  %v10481_v4 = vld [vmem:[%s15893_s3 + $0xaa4] sm:$0xf] }
 0x1b1   :  { %3072 = vmatpush.bf16.msrb.mxu2 %v8087_v5  ;;  %v8179_v0 = vor.u32 %v10515_v59, %v8176_v60  ;;  %v8043_v27 = vor.u32 %v10481_v4, %v8040_v8  ;;  %v10538_v59 = vld [vmem:[%s15893_s3 + $0xc64] sm:$0xf0] }
 0x1b2   :  { %2737 = vmatmul.bf16.vlgmr.msra.gmra.mxu3 %v11463_v51  ;;  %v8311_v4 = vor.u32 %v10538_v59, %v8310_v58  ;;  %v10546_v59 = vld [vmem:[%s15893_s3 + $0xca4] sm:$0xf0] }
 0x1b3   :  { %3078 = vmatpush.bf16.msrb.mxu3 %v8207_v6  ;;  %2750 = vmatmul.bf16.vlgmr.msrb.gmra.mxu0 %v11507_v11 }
 0x1b4   :  { %3091 = vmatpush.bf16.msra.mxu0 %v8083_v7  ;;  %3058 = vmatpush.bf16.msrb.mxu1 %v8031_v12  ;;  %v8123_v7 = vor.u32 %v10501_v55, %v8120_v61  ;;  %v8374_v61 = vld [vmem:[%s15893_s3 + $0xce0] sm:$0xf] }
 0x1b5   :  { %3117 = vmatpush.bf16.msra.mxu2 %v8211_v10  ;;  %v1942_v1 = vpop.f32.mrf.mxu3  ;;  %v8168_v10 = vld [vmem:[%s15893_s3 + $0xba8] sm:$0xf0] }
 0x1b6   :  { %3073 = vmatmul.bf16.vlgmr.msrb.gmra.mxu2 %v11463_v51  ;;  %v1956_v5 = vadd.f32 %v1955_v43, %v1942_v1  ;;  %v8171_v32 = vor.u32 %v10513_v9, %v8168_v10  ;;  %v10556_v43 = vld [vmem:[%s15893_s3 + $0xcf4] sm:$0xf0]  ;;  %v10493_v1 = vld [vmem:[%s15893_s3 + $0xb04] sm:$0xf]  ;;  %v8302_v9 = vld [vmem:[%s15893_s3 + $0xc50] sm:$0xf] }
 0x1b7   :  { %3079 = vmatpush.bf16.msrb.mxu3 %v8199_v19  ;;  %v10479_v19 = vld [vmem:[%s15893_s3 + $0xa94] sm:$0xf]  ;;  %v10536_v10 = vld [vmem:[%s15893_s3 + $0xc54] sm:$0xf0] }
 0x1b8   :  { %3092 = vmatpush.bf16.msra.mxu0 %v8075_v20  ;;  %3059 = vmatpush.bf16.msrb.mxu1 %v8023_v22  ;;  %v1968_v53 = vpop.f32.mrf.mxu1  ;;  %v1957_v12 = vpop.f32.mrf.mxu0  ;;  %v8032_v20 = vld [vmem:[%s15893_s3 + $0xa98] sm:$0xf0]  ;;  %v10511_v22 = vld [vmem:[%s15893_s3 + $0xb94] sm:$0xf] }
 0x1b9   :  { %3118 = vmatpush.bf16.msra.mxu2 %v8203_v21  ;;  %v13357_v6 = vpop.f32.mrf.mxu2  ;;  %v1969_v15 = vadd.f32 %v1968_v53, %v1956_v5  ;;  %v8115_v21 = vor.u32 %v10499_v13, %v8112_v14  ;;  %v8035_v30 = vor.u32 %v10479_v19, %v8032_v20  ;;  %v8163_v31 = vor.u32 %v10511_v22, %v8160_v23  ;;  %v8088_v53 = vld [vmem:[%s15893_s3 + $0xb08] sm:$0xf0]  ;;  %v8366_v12 = vld [vmem:[%s15893_s3 + $0xcd0] sm:$0xf]  ;;  %v10552_v14 = vld [vmem:[%s15893_s3 + $0xcd4] sm:$0xf0] }
 0x1ba   :  { %v8091_v8 = vor.u32 %v10493_v1, %v8088_v53  ;;  %v8447_v13 = vor.u32 %v10572_v3, %v8446_v2  ;;  %v8294_v20 = vld [vmem:[%s15893_s3 + $0xc40] sm:$0xf]  ;;  %v8270_v1 = vld [vmem:[%s15893_s3 + $0xc10] sm:$0xf]  ;;  %v10528_v3 = vld [vmem:[%s15893_s3 + $0xc14] sm:$0xf0] }
 0x1bb   :  { %3060 = vmatmul.bf16.vlgmr.msrb.gmra.mxu1 %v11452_v45  ;;  %3080 = vmatpush.bf16.msrb.mxu3 %v8191_v34  ;;  %2011 = vst [vmem:[#allocation2 + $0x10] sm:$0x3] %v1969_v15  ;;  %v10535_v15 = vld [vmem:[%s15893_s3 + $0xc54] sm:$0xf]  ;;  %v8358_v22 = vld [vmem:[%s15893_s3 + $0xcc0] sm:$0xf] }
 0x1bc   :  { %3104 = vmatpush.bf16.msra.mxu1 %v8147_v26  ;;  %3093 = vmatpush.bf16.msra.mxu0 %v8067_v35  ;;  %v8159_v26 = vor.u32 %v10512_v18, %v8158_v17  ;;  %v10477_v35 = vld [vmem:[%s15893_s3 + $0xa84] sm:$0xf]  ;;  %v8438_v17 = vld [vmem:[%s15893_s3 + $0xd60] sm:$0xf]  ;;  %v8367_v18 = vor.u32 %v10552_v14, %v8366_v12  ;;  %v10562_v12 = vld [vmem:[%s15893_s3 + $0xd24] sm:$0xf0] }
 0x1bd   :  { %3119 = vmatpush.bf16.msra.mxu2 %v8195_v36  ;;  %v1944_v33 = vpop.f32.mrf.mxu3  ;;  %v8024_v36 = vld [vmem:[%s15893_s3 + $0xa88] sm:$0xf0]  ;;  %v8262_v14 = vld [vmem:[%s15893_s3 + $0xc00] sm:$0xf] }
 0x1be   :  { %v8027_v52 = vor.u32 %v10477_v35, %v8024_v36  ;;  %v8359_v33 = vor.u32 %v10550_v24, %v8358_v22  ;;  %v8286_v35 = vld [vmem:[%s15893_s3 + $0xc30] sm:$0xf]  ;;  %v10532_v36 = vld [vmem:[%s15893_s3 + $0xc34] sm:$0xf0]  ;;  %v10555_v24 = vld [vmem:[%s15893_s3 + $0xcf4] sm:$0xf] }
 0x1bf   :  { %3081 = vmatpush.bf16.msrb.mxu3 %v8183_v48  ;;  %v8320_v48 = vld [vmem:[%s15893_s3 + $0xc78] sm:$0xf0] }
 0x1c0   :  { %3105 = vmatpush.bf16.msra.mxu1 %v8139_v39  ;;  %3094 = vmatpush.bf16.msra.mxu0 %v8059_v49  ;;  %v1970_v34 = vpop.f32.mrf.mxu1  ;;  %v8152_v39 = vld [vmem:[%s15893_s3 + $0xb88] sm:$0xf0]  ;;  %v10495_v49 = vld [vmem:[%s15893_s3 + $0xb14] sm:$0xf]  ;;  %v8323_v60 = vor.u32 %v10539_v44, %v8320_v48 }
 0x1c1   :  { %3120 = vmatpush.bf16.msra.mxu2 %v8187_v50  ;;  %v1983_v47 = vpop.f32.mrf.mxu2  ;;  %v8096_v50 = vld [vmem:[%s15893_s3 + $0xb18] sm:$0xf0]  ;;  %v8155_v54 = vor.u32 %v10509_v37, %v8152_v39  ;;  %v8350_v37 = vld [vmem:[%s15893_s3 + $0xcb0] sm:$0xf]  ;;  %v10531_v39 = vld [vmem:[%s15893_s3 + $0xc34] sm:$0xf] }
 0x1c2   :  { %v8099_v55 = vor.u32 %v10495_v49, %v8096_v50  ;;  %v8278_v50 = vld [vmem:[%s15893_s3 + $0xc20] sm:$0xf] }
 0x1c3   :  { %3082 = vmatpush.bf16.msrb.mxu3 %v8175_v62  ;;  %v10554_v62 = vld [vmem:[%s15893_s3 + $0xce4] sm:$0xf0] }
 0x1c4   :  { %3106 = vmatpush.bf16.msra.mxu1 %v8131_v57  ;;  %3095 = vmatpush.bf16.msra.mxu0 %v8051_v63  ;;  %v8383_v57 = vor.u32 %v10556_v43, %v8382_v42  ;;  %v10537_v63 = vld [vmem:[%s15893_s3 + $0xc64] sm:$0xf]  ;;  %v8375_v5 = vor.u32 %v10554_v62, %v8374_v61  ;;  %v10566_v42 = vld [vmem:[%s15893_s3 + $0xd44] sm:$0xf0]  ;;  %v8287_v43 = vor.u32 %v10532_v36, %v8286_v35  ;;  %v10564_v62 = vld [vmem:[%s15893_s3 + $0xd34] sm:$0xf0] }
 0x1c5   :  { %3121 = vmatpush.bf16.msra.mxu2 %v8179_v0  ;;  %v8312_v0 = vld [vmem:[%s15893_s3 + $0xc68] sm:$0xf0]  ;;  %v8423_v58 = vor.u32 %v10566_v42, %v8422_v41  ;;  %v10569_v42 = vld [vmem:[%s15893_s3 + $0xd64] sm:$0xf] }
 0x1c7   :  { %3083 = vmatpush.bf16.msrb.mxu3 %v8167_v16  ;;  %v8304_v16 = vld [vmem:[%s15893_s3 + $0xc58] sm:$0xf0] }
 0x1c8   :  { %3107 = vmatpush.bf16.msra.mxu1 %v8123_v7  ;;  %3096 = vmatpush.bf16.msra.mxu0 %v8043_v27  ;;  %v8315_v7 = vor.u32 %v10537_v63, %v8312_v0  ;;  %v10570_v27 = vld [vmem:[%s15893_s3 + $0xd64] sm:$0xf0]  ;;  %v8307_v19 = vor.u32 %v10535_v15, %v8304_v16 }
 0x1c9   :  { %3122 = vmatpush.bf16.msra.mxu2 %v8171_v32  ;;  %v8303_v32 = vor.u32 %v10536_v10, %v8302_v9  ;;  %v8439_v23 = vor.u32 %v10570_v27, %v8438_v17  ;;  %v8272_v9 = vld [vmem:[%s15893_s3 + $0xc18] sm:$0xf0]  ;;  %v8406_v10 = vld [vmem:[%s15893_s3 + $0xd20] sm:$0xf]  ;;  %v10526_v15 = vld [vmem:[%s15893_s3 + $0xc04] sm:$0xf0] }
 0x1ca   :  { %v8407_v22 = vor.u32 %v10562_v12, %v8406_v10  ;;  %v8424_v12 = vld [vmem:[%s15893_s3 + $0xd48] sm:$0xf0] }
 0x1cb   :  { %3084 = vmatpush.bf16.msrb.mxu3 %v8159_v26  ;;  %v8296_v26 = vld [vmem:[%s15893_s3 + $0xc48] sm:$0xf0] }
 0x1cc   :  { %3108 = vmatpush.bf16.msra.mxu1 %v8115_v21  ;;  %3097 = vmatpush.bf16.msra.mxu0 %v8035_v30  ;;  %v10534_v21 = vld [vmem:[%s15893_s3 + $0xc44] sm:$0xf0]  ;;  %v10568_v30 = vld [vmem:[%s15893_s3 + $0xd54] sm:$0xf0]  ;;  %v8299_v34 = vor.u32 %v10533_v25, %v8296_v26  ;;  %v8384_v25 = vld [vmem:[%s15893_s3 + $0xcf8] sm:$0xf0] }
 0x1cd   :  { %3123 = vmatpush.bf16.msra.mxu2 %v8163_v31  ;;  %v8295_v31 = vor.u32 %v10534_v21, %v8294_v20  ;;  %v8431_v47 = vor.u32 %v10568_v30, %v8430_v29  ;;  %v10525_v20 = vld [vmem:[%s15893_s3 + $0xc04] sm:$0xf]  ;;  %v10571_v26 = vld [vmem:[%s15893_s3 + $0xd74] sm:$0xf]  ;;  %v8622_v29 = vld [vmem:[%s15893_s3 + $0xe70] sm:$0xf]  ;;  %v8263_v30 = vor.u32 %v10526_v15, %v8262_v14 }
 0x1ce   :  { %v10598_v14 = vld [vmem:[%s15893_s3 + $0xe44] sm:$0xf0] }
 0x1cf   :  { %3085 = vmatpush.bf16.msrb.mxu3 %v8151_v46  ;;  %v8291_v46 = vor.u32 %v10531_v39, %v8288_v40  ;;  %v8376_v39 = vld [vmem:[%s15893_s3 + $0xce8] sm:$0xf0] }
 0x1d0   :  { %3109 = vmatpush.bf16.msra.mxu1 %v8107_v38  ;;  %3098 = vmatpush.bf16.msra.mxu0 %v8027_v52  ;;  %v2007_v28 = vpop.f32.mrf.mxu0  ;;  %v10548_v38 = vld [vmem:[%s15893_s3 + $0xcb4] sm:$0xf0]  ;;  %v10530_v52 = vld [vmem:[%s15893_s3 + $0xc24] sm:$0xf0] }
 0x1d1   :  { %3124 = vmatpush.bf16.msra.mxu2 %v8155_v54  ;;  %v8351_v44 = vor.u32 %v10548_v38, %v8350_v37  ;;  %v8342_v54 = vld [vmem:[%s15893_s3 + $0xca0] sm:$0xf]  ;;  %v8279_v0 = vor.u32 %v10530_v52, %v8278_v50  ;;  %v8387_v37 = vor.u32 %v10555_v24, %v8384_v25  ;;  %v10553_v38 = vld [vmem:[%s15893_s3 + $0xce4] sm:$0xf]  ;;  %v10558_v50 = vld [vmem:[%s15893_s3 + $0xd04] sm:$0xf0] }
 0x1d2   :  { %3086 = vmatmul.bf16.vlgmr.msrb.gmra.mxu3 %v11507_v11  ;;  %v8343_v53 = vor.u32 %v10546_v59, %v8342_v54  ;;  %v8558_v52 = vld [vmem:[%s15893_s3 + $0xdf0] sm:$0xf]  ;;  %v10588_v54 = vld [vmem:[%s15893_s3 + $0xdf4] sm:$0xf0] }
 0x1d3   :  { %3427 = vmatpush.bf16.msra.mxu3 %v8319_v56  ;;  %3099 = vmatmul.bf16.vlgmr.msra.gmra.mxu0 %v11452_v45  ;;  %v8590_v24 = vld [vmem:[%s15893_s3 + $0xe30] sm:$0xf]  ;;  %v10596_v25 = vld [vmem:[%s15893_s3 + $0xe34] sm:$0xf0] }
 0x1d4   :  { %3440 = vmatpush.bf16.msrb.mxu0 %v8383_v57  ;;  %3110 = vmatpush.bf16.msra.mxu1 %v8099_v55  ;;  %v8280_v55 = vld [vmem:[%s15893_s3 + $0xc28] sm:$0xf0] }
 0x1d5   :  { %3466 = vmatpush.bf16.msrb.mxu2 %v8323_v60  ;;  %v1994_v48 = vpop.f32.mrf.mxu3  ;;  %v10529_v60 = vld [vmem:[%s15893_s3 + $0xc24] sm:$0xf] }
 0x1d6   :  { %3125 = vmatmul.bf16.vlgmr.msra.gmra.mxu2 %v11507_v11  ;;  %v1995_v56 = vadd.f32 %v1994_v48, %v13357_v6  ;;  %v8414_v6 = vld [vmem:[%s15893_s3 + $0xd30] sm:$0xf]  ;;  %v8283_v2 = vor.u32 %v10529_v60, %v8280_v55  ;;  %v8390_v48 = vld [vmem:[%s15893_s3 + $0xd00] sm:$0xf]  ;;  %v10551_v55 = vld [vmem:[%s15893_s3 + $0xcd4] sm:$0xf] }
 0x1d7   :  { %3428 = vmatpush.bf16.msra.mxu3 %v8311_v4  ;;  %v8334_v4 = vld [vmem:[%s15893_s3 + $0xc90] sm:$0xf]  ;;  %v8391_v60 = vor.u32 %v10558_v50, %v8390_v48 }
 0x1d8   :  { %3441 = vmatpush.bf16.msrb.mxu0 %v8375_v5  ;;  %3111 = vmatpush.bf16.msra.mxu1 %v8091_v8  ;;  %v13546_v49 = vpop.f32.mrf.mxu1  ;;  %v2009_v61 = vpop.f32.mrf.mxu0  ;;  %v2008_v63 = vadd.f32 %v2007_v28, %v1995_v56  ;;  %v10544_v5 = vld [vmem:[%s15893_s3 + $0xc94] sm:$0xf0]  ;;  %v10527_v8 = vld [vmem:[%s15893_s3 + $0xc14] sm:$0xf]  ;;  %v8448_v28 = vld [vmem:[%s15893_s3 + $0xd78] sm:$0xf0]  ;;  %v8379_v56 = vor.u32 %v10553_v38, %v8376_v39 }
 0x1d9   :  { %3467 = vmatpush.bf16.msrb.mxu2 %v8315_v7  ;;  %v13558_v57 = vpop.f32.mrf.mxu2  ;;  %v8415_v7 = vor.u32 %v10564_v62, %v8414_v6  ;;  %v8335_v16 = vor.u32 %v10544_v5, %v8334_v4  ;;  %v8275_v17 = vor.u32 %v10527_v8, %v8272_v9  ;;  %v8368_v61 = vld [vmem:[%s15893_s3 + $0xcd8] sm:$0xf0]  ;;  %v10567_v6 = vld [vmem:[%s15893_s3 + $0xd54] sm:$0xf]  ;;  %v8559_v62 = vor.u32 %v10588_v54, %v8558_v52  ;;  %v8360_v8 = vld [vmem:[%s15893_s3 + $0xcc8] sm:$0xf0] }
 0x1da   :  { %2012 = vst.msk [vmem:[#allocation2 + $0x18] sm:$0x3] %vm514_vm2, %v2008_v63  ;;  %v8432_v63 = vld [vmem:[%s15893_s3 + $0xd58] sm:$0xf0]  ;;  %v10565_v9 = vld [vmem:[%s15893_s3 + $0xd44] sm:$0xf] }
 0x1db   :  { %3112 = vmatmul.bf16.vlgmr.msra.gmra.mxu1 %v11463_v51  ;;  %3429 = vmatpush.bf16.msra.mxu3 %v8303_v32  ;;  %v8435_v4 = vor.u32 %v10567_v6, %v8432_v63  ;;  %v10543_v54 = vld [vmem:[%s15893_s3 + $0xc94] sm:$0xf]  ;;  %v10592_v63 = vld [vmem:[%s15893_s3 + $0xe14] sm:$0xf0] }
 0x1dc   :  { %3453 = vmatpush.bf16.msrb.mxu1 %v8447_v13  ;;  %3442 = vmatpush.bf16.msrb.mxu0 %v8367_v18  ;;  %v8271_v13 = vor.u32 %v10528_v3, %v8270_v1  ;;  %v8326_v18 = vld [vmem:[%s15893_s3 + $0xc80] sm:$0xf]  ;;  %v10600_v1 = vld [vmem:[%s15893_s3 + $0xe54] sm:$0xf0]  ;;  %v8371_v3 = vor.u32 %v10551_v55, %v8368_v61  ;;  %v8400_v55 = vld [vmem:[%s15893_s3 + $0xd18] sm:$0xf0] }
 0x1dd   :  { %3468 = vmatpush.bf16.msrb.mxu2 %v8307_v19  ;;  %v1996_v27 = vpop.f32.mrf.mxu3  ;;  %v10542_v19 = vld [vmem:[%s15893_s3 + $0xc84] sm:$0xf0]  ;;  %v8574_v61 = vld [vmem:[%s15893_s3 + $0xe10] sm:$0xf] }
 0x1de   :  { %v8327_v35 = vor.u32 %v10542_v19, %v8326_v18  ;;  %v10547_v19 = vld [vmem:[%s15893_s3 + $0xcb4] sm:$0xf] }
 0x1df   :  { %3430 = vmatpush.bf16.msra.mxu3 %v8295_v31  ;;  %v10604_v31 = vld [vmem:[%s15893_s3 + $0xe74] sm:$0xf0] }
 0x1e0   :  { %3454 = vmatpush.bf16.msrb.mxu1 %v8439_v23  ;;  %3443 = vmatpush.bf16.msrb.mxu0 %v8359_v33  ;;  %v2313_v32 = vpop.f32.mrf.mxu1  ;;  %v8264_v23 = vld [vmem:[%s15893_s3 + $0xc08] sm:$0xf0]  ;;  %v8398_v33 = vld [vmem:[%s15893_s3 + $0xd10] sm:$0xf]  ;;  %v8623_v40 = vor.u32 %v10604_v31, %v8622_v29  ;;  %v2325_v29 = vadd.f32 %v13558_v57, %v13546_v49  ;;  %v10561_v49 = vld [vmem:[%s15893_s3 + $0xd24] sm:$0xf] }
 0x1e1   :  { %3469 = vmatpush.bf16.msrb.mxu2 %v8299_v34  ;;  %v2326_v21 = vpop.f32.mrf.mxu2  ;;  %v10560_v34 = vld [vmem:[%s15893_s3 + $0xd14] sm:$0xf0]  ;;  %v8267_v36 = vor.u32 %v10525_v20, %v8264_v23  ;;  %v8427_v32 = vor.u32 %v10565_v9, %v8424_v12  ;;  %v8352_v20 = vld [vmem:[%s15893_s3 + $0xcb8] sm:$0xf0]  ;;  %v10557_v9 = vld [vmem:[%s15893_s3 + $0xd04] sm:$0xf] }
 0x1e2   :  { %v8399_v41 = vor.u32 %v10560_v34, %v8398_v33  ;;  %v10563_v21 = vld [vmem:[%s15893_s3 + $0xd34] sm:$0xf]  ;;  %v8416_v23 = vld [vmem:[%s15893_s3 + $0xd38] sm:$0xf0]  ;;  %v8591_v33 = vor.u32 %v10596_v25, %v8590_v24  ;;  %v8566_v12 = vld [vmem:[%s15893_s3 + $0xe00] sm:$0xf] }
 0x1e3   :  { %3431 = vmatpush.bf16.msra.mxu3 %v8287_v43  ;;  %v8440_v43 = vld [vmem:[%s15893_s3 + $0xd68] sm:$0xf0]  ;;  %v8419_v31 = vor.u32 %v10563_v21, %v8416_v23  ;;  %v8510_v21 = vld [vmem:[%s15893_s3 + $0xd90] sm:$0xf] }
 0x1e4   :  { %3455 = vmatpush.bf16.msrb.mxu1 %v8431_v47  ;;  %3444 = vmatpush.bf16.msrb.mxu0 %v8351_v44  ;;  %v8451_v47 = vor.u32 %v10571_v26, %v8448_v28  ;;  %v8614_v44 = vld [vmem:[%s15893_s3 + $0xe60] sm:$0xf]  ;;  %v10582_v28 = vld [vmem:[%s15893_s3 + $0xdc4] sm:$0xf0] }
 0x1e5   :  { %3470 = vmatpush.bf16.msrb.mxu2 %v8291_v46  ;;  %v10602_v46 = vld [vmem:[%s15893_s3 + $0xe64] sm:$0xf0]  ;;  %v8534_v26 = vld [vmem:[%s15893_s3 + $0xdc0] sm:$0xf] }
 0x1e6   :  { %v8615_v59 = vor.u32 %v10602_v46, %v8614_v44  ;;  %v8535_v39 = vor.u32 %v10582_v28, %v8534_v26  ;;  %v8526_v44 = vld [vmem:[%s15893_s3 + $0xdb0] sm:$0xf]  ;;  %v10580_v46 = vld [vmem:[%s15893_s3 + $0xdb4] sm:$0xf0]  ;;  %v8678_v28 = vld [vmem:[%s15893_s3 + $0xee0] sm:$0xf] }
 0x1e7   :  { %3432 = vmatpush.bf16.msra.mxu3 %v8279_v0  ;;  %v8606_v0 = vld [vmem:[%s15893_s3 + $0xe50] sm:$0xf] }
 0x1e8   :  { %3456 = vmatpush.bf16.msrb.mxu1 %v8423_v58  ;;  %3445 = vmatpush.bf16.msrb.mxu0 %v8343_v53  ;;  %v8443_v58 = vor.u32 %v10569_v42, %v8440_v43  ;;  %v8550_v53 = vld [vmem:[%s15893_s3 + $0xde0] sm:$0xf]  ;;  %v8607_v5 = vor.u32 %v10600_v1, %v8606_v0  ;;  %v10594_v42 = vld [vmem:[%s15893_s3 + $0xe24] sm:$0xf0] }
 0x1e9   :  { %3471 = vmatpush.bf16.msrb.mxu2 %v8283_v2  ;;  %v10586_v2 = vld [vmem:[%s15893_s3 + $0xde4] sm:$0xf0]  ;;  %v8518_v0 = vld [vmem:[%s15893_s3 + $0xda0] sm:$0xf] }
 0x1ea   :  { %v8551_v10 = vor.u32 %v10586_v2, %v8550_v53  ;;  %v10578_v1 = vld [vmem:[%s15893_s3 + $0xda4] sm:$0xf0]  ;;  %v10541_v2 = vld [vmem:[%s15893_s3 + $0xc84] sm:$0xf] }
 0x1eb   :  { %3433 = vmatpush.bf16.msra.mxu3 %v8271_v13  ;;  %v8598_v13 = vld [vmem:[%s15893_s3 + $0xe40] sm:$0xf] }
 0x1ec   :  { %3457 = vmatpush.bf16.msrb.mxu1 %v8415_v7  ;;  %3446 = vmatpush.bf16.msrb.mxu0 %v8335_v16  ;;  %v10549_v7 = vld [vmem:[%s15893_s3 + $0xcc4] sm:$0xf]  ;;  %v8542_v16 = vld [vmem:[%s15893_s3 + $0xdd0] sm:$0xf]  ;;  %v8599_v18 = vor.u32 %v10598_v14, %v8598_v13  ;;  %v8519_v14 = vor.u32 %v10578_v1, %v8518_v0  ;;  %v8664_v1 = vld [vmem:[%s15893_s3 + $0xec8] sm:$0xf0] }
 0x1ed   :  { %3472 = vmatpush.bf16.msrb.mxu2 %v8275_v17  ;;  %v10584_v17 = vld [vmem:[%s15893_s3 + $0xdd4] sm:$0xf0]  ;;  %v8363_v27 = vor.u32 %v10549_v7, %v8360_v8  ;;  %v10613_v0 = vld [vmem:[%s15893_s3 + $0xec4] sm:$0xf] }
 0x1ef   :  { %3434 = vmatpush.bf16.msra.mxu3 %v8263_v30  ;;  %v8355_v30 = vor.u32 %v10547_v19, %v8352_v20  ;;  %v8688_v20 = vld [vmem:[%s15893_s3 + $0xef8] sm:$0xf0] }
 0x1f0   :  { %3458 = vmatpush.bf16.msrb.mxu1 %v8407_v22  ;;  %3447 = vmatpush.bf16.msrb.mxu0 %v8327_v35  ;;  %v2350_v15 = vpop.f32.mrf.mxu0  ;;  %v8543_v22 = vor.u32 %v10584_v17, %v8542_v16  ;;  %v8686_v16 = vld [vmem:[%s15893_s3 + $0xef0] sm:$0xf]  ;;  %v10620_v17 = vld [vmem:[%s15893_s3 + $0xef4] sm:$0xf0] }
 0x1f1   :  { %3473 = vmatpush.bf16.msrb.mxu2 %v8267_v36  ;;  %v10545_v36 = vld [vmem:[%s15893_s3 + $0xca4] sm:$0xf]  ;;  %v8687_v25 = vor.u32 %v10620_v17, %v8686_v16  ;;  %v8600_v17 = vld [vmem:[%s15893_s3 + $0xe48] sm:$0xf0] }
 0x1f2   :  { %3435 = vmatmul.bf16.vlgmr.msra.gmra.mxu3 %v11452_v45  ;;  %v10597_v16 = vld [vmem:[%s15893_s3 + $0xe44] sm:$0xf] }
 0x1f3   :  { %3479 = vmatpush.bf16.msrb.mxu3 %v8387_v37  ;;  %3448 = vmatmul.bf16.vlgmr.msrb.gmra.mxu0 %v11463_v51  ;;  %v8344_v37 = vld [vmem:[%s15893_s3 + $0xca8] sm:$0xf0] }
 0x1f4   :  { %3492 = vmatpush.bf16.msra.mxu0 %v8451_v47  ;;  %3459 = vmatpush.bf16.msrb.mxu1 %v8399_v41  ;;  %v8582_v41 = vld [vmem:[%s15893_s3 + $0xe20] sm:$0xf]  ;;  %v8347_v52 = vor.u32 %v10545_v36, %v8344_v37  ;;  %v8680_v36 = vld [vmem:[%s15893_s3 + $0xee8] sm:$0xf0] }
 0x1f5   :  { %3809 = vmatpush.bf16.msra.mxu2 %v8623_v40  ;;  %v2337_v34 = vpop.f32.mrf.mxu3  ;;  %v8408_v40 = vld [vmem:[%s15893_s3 + $0xd28] sm:$0xf0]  ;;  %v8502_v37 = vld [vmem:[%s15893_s3 + $0xd80] sm:$0xf] }
 0x1f6   :  { %3474 = vmatmul.bf16.vlgmr.msrb.gmra.mxu2 %v11452_v45  ;;  %v2338_v57 = vadd.f32 %v2337_v34, %v2325_v29  ;;  %v10618_v29 = vld [vmem:[%s15893_s3 + $0xee4] sm:$0xf0]  ;;  %v8552_v34 = vld [vmem:[%s15893_s3 + $0xde8] sm:$0xf0] }
 0x1f7   :  { %3480 = vmatpush.bf16.msrb.mxu3 %v8379_v56  ;;  %v8336_v56 = vld [vmem:[%s15893_s3 + $0xc98] sm:$0xf0] }
 0x1f8   :  { %3493 = vmatpush.bf16.msra.mxu0 %v8443_v58  ;;  %3460 = vmatpush.bf16.msrb.mxu1 %v8391_v60  ;;  %v2363_v35 = vpop.f32.mrf.mxu1  ;;  %v2352_v43 = vpop.f32.mrf.mxu0  ;;  %v2382_v48 = vrot.slane %v2338_v57, 6  ;;  %v8411_v58 = vor.u32 %v10561_v49, %v8408_v40  ;;  %v10559_v60 = vld [vmem:[%s15893_s3 + $0xd14] sm:$0xf]  ;;  %v8339_v53 = vor.u32 %v10543_v54, %v8336_v56  ;;  %v10574_v49 = vld [vmem:[%s15893_s3 + $0xd84] sm:$0xf0] }
 0x1f9   :  { %3810 = vmatpush.bf16.msra.mxu2 %v8615_v59  ;;  %v2364_v47 = vadd.f32 %v2363_v35, %v2350_v15  ;;  %v2376_v38 = vpop.f32.mrf.mxu2  ;;  %v8583_v59 = vor.u32 %v10594_v42, %v8582_v41  ;;  %v10590_v15 = vld [vmem:[%s15893_s3 + $0xe04] sm:$0xf0]  ;;  %v10617_v35 = vld [vmem:[%s15893_s3 + $0xee4] sm:$0xf]  ;;  %v10603_v57 = vld [vmem:[%s15893_s3 + $0xe74] sm:$0xf]  ;;  %v8503_v41 = vor.u32 %v10574_v49, %v8502_v37 }
 0x1fa   :  { %2386 = vst [vmem:[#allocation2 + $0x10] sm:$0xc] %v2382_v48  ;;  %v8567_v24 = vor.u32 %v10590_v15, %v8566_v12  ;;  %v8683_v40 = vor.u32 %v10617_v35, %v8680_v36  ;;  %v8670_v42 = vld [vmem:[%s15893_s3 + $0xed0] sm:$0xf]  ;;  %v10616_v43 = vld [vmem:[%s15893_s3 + $0xed4] sm:$0xf0] }
 0x1fb   :  { %3461 = vmatmul.bf16.vlgmr.msrb.gmra.mxu1 %v11507_v11  ;;  %3481 = vmatpush.bf16.msrb.mxu3 %v8371_v3  ;;  %v2377_v50 = vadd.f32 %v2376_v38, %v2364_v47  ;;  %v8328_v3 = vld [vmem:[%s15893_s3 + $0xc88] sm:$0xf0]  ;;  %v8624_v47 = vld [vmem:[%s15893_s3 + $0xe78] sm:$0xf0]  ;;  %v8679_v38 = vor.u32 %v10618_v29, %v8678_v28  ;;  %v10601_v54 = vld [vmem:[%s15893_s3 + $0xe64] sm:$0xf] }
 0x1fc   :  { %3796 = vmatpush.bf16.msra.mxu1 %v8559_v62  ;;  %3494 = vmatpush.bf16.msra.mxu0 %v8435_v4  ;;  %v8527_v62 = vor.u32 %v10580_v46, %v8526_v44  ;;  %v8403_v4 = vor.u32 %v10559_v60, %v8400_v55  ;;  %v8331_v19 = vor.u32 %v10541_v2, %v8328_v3  ;;  %v10583_v44 = vld [vmem:[%s15893_s3 + $0xdd4] sm:$0xf]  ;;  %v8544_v48 = vld [vmem:[%s15893_s3 + $0xdd8] sm:$0xf0]  ;;  %v8616_v56 = vld [vmem:[%s15893_s3 + $0xe68] sm:$0xf0] }
 0x1fd   :  { %3811 = vmatpush.bf16.msra.mxu2 %v8607_v5  ;;  %v2383_v6 = vrot.slane %v2377_v50, 6  ;;  %v8575_v5 = vor.u32 %v10592_v63, %v8574_v61  ;;  %v2339_v7 = vpop.f32.mrf.mxu3  ;;  %v8627_v46 = vor.u32 %v10603_v57, %v8624_v47  ;;  %v10615_v50 = vld [vmem:[%s15893_s3 + $0xed4] sm:$0xf]  ;;  %v8662_v55 = vld [vmem:[%s15893_s3 + $0xec0] sm:$0xf] }
 0x1fe   :  { %v10614_v61 = vld [vmem:[%s15893_s3 + $0xec4] sm:$0xf0]  ;;  %v8536_v63 = vld [vmem:[%s15893_s3 + $0xdc8] sm:$0xf0]  ;;  %v10599_v2 = vld [vmem:[%s15893_s3 + $0xe54] sm:$0xf]  ;;  %v8667_v7 = vor.u32 %v10613_v0, %v8664_v1 }
 0x1ff   :  { %3482 = vmatpush.bf16.msrb.mxu3 %v8363_v27  ;;  %2387 = vst.msk [vmem:[#allocation2 + $0x18] sm:$0xc] %vm890_vm3, %v2383_v6  ;;  %v10587_v27 = vld [vmem:[%s15893_s3 + $0xdf4] sm:$0xf]  ;;  %v10581_v6 = vld [vmem:[%s15893_s3 + $0xdc4] sm:$0xf] }
 0x200   :  { %3797 = vmatpush.bf16.msra.mxu1 %v8551_v10  ;;  %3495 = vmatpush.bf16.msra.mxu0 %v8427_v32  ;;  %v2365_v8 = vpop.f32.mrf.mxu1  ;;  %v8392_v10 = vld [vmem:[%s15893_s3 + $0xd08] sm:$0xf0]  ;;  %v8560_v32 = vld [vmem:[%s15893_s3 + $0xdf8] sm:$0xf0]  ;;  %v10609_v29 = vld [vmem:[%s15893_s3 + $0xea4] sm:$0xf] }
 0x201   :  { %3812 = vmatpush.bf16.msra.mxu2 %v8599_v18  ;;  %v2378_v13 = vpop.f32.mrf.mxu2  ;;  %v10619_v18 = vld [vmem:[%s15893_s3 + $0xef4] sm:$0xf]  ;;  %v8395_v23 = vor.u32 %v10557_v9, %v8392_v10  ;;  %v8563_v26 = vor.u32 %v10587_v27, %v8560_v32  ;;  %v8608_v3 = vld [vmem:[%s15893_s3 + $0xe58] sm:$0xf0]  ;;  %v8654_v8 = vld [vmem:[%s15893_s3 + $0xeb0] sm:$0xf] }
 0x202   :  { %v10612_v9 = vld [vmem:[%s15893_s3 + $0xeb4] sm:$0xf0]  ;;  %v10579_v10 = vld [vmem:[%s15893_s3 + $0xdb4] sm:$0xf]  ;;  %v8611_v12 = vor.u32 %v10599_v2, %v8608_v3  ;;  %v8528_v13 = vld [vmem:[%s15893_s3 + $0xdb8] sm:$0xf0] }
 0x203   :  { %3483 = vmatpush.bf16.msrb.mxu3 %v8355_v30  ;;  %v8691_v30 = vor.u32 %v10619_v18, %v8688_v20  ;;  %v8656_v15 = vld [vmem:[%s15893_s3 + $0xeb8] sm:$0xf0]  ;;  %v8655_v27 = vor.u32 %v10612_v9, %v8654_v8  ;;  %v8531_v32 = vor.u32 %v10579_v10, %v8528_v13  ;;  %v8520_v28 = vld [vmem:[%s15893_s3 + $0xda8] sm:$0xf0]  ;;  %v8638_v37 = vld [vmem:[%s15893_s3 + $0xe90] sm:$0xf] }
 0x204   :  { %3798 = vmatpush.bf16.msra.mxu1 %v8543_v22  ;;  %3496 = vmatpush.bf16.msra.mxu0 %v8419_v31  ;;  %v10576_v22 = vld [vmem:[%s15893_s3 + $0xd94] sm:$0xf0]  ;;  %v8798_v0 = vld [vmem:[%s15893_s3 + $0xf70] sm:$0xf]  ;;  %v10635_v3 = vld [vmem:[%s15893_s3 + $0xf74] sm:$0xf] }
 0x205   :  { %3813 = vmatpush.bf16.msra.mxu2 %v8591_v33  ;;  %v8511_v31 = vor.u32 %v10576_v22, %v8510_v21  ;;  %v10585_v33 = vld [vmem:[%s15893_s3 + $0xde4] sm:$0xf]  ;;  %v8646_v21 = vld [vmem:[%s15893_s3 + $0xea0] sm:$0xf]  ;;  %v10610_v22 = vld [vmem:[%s15893_s3 + $0xea4] sm:$0xf0] }
 0x206   :  { %v8647_v36 = vor.u32 %v10610_v22, %v8646_v21  ;;  %v10608_v47 = vld [vmem:[%s15893_s3 + $0xe94] sm:$0xf0]  ;;  %v8576_v8 = vld [vmem:[%s15893_s3 + $0xe18] sm:$0xf0]  ;;  %v8568_v21 = vld [vmem:[%s15893_s3 + $0xe08] sm:$0xf0] }
 0x207   :  { %3484 = vmatpush.bf16.msrb.mxu3 %v8347_v52  ;;  %v8672_v52 = vld [vmem:[%s15893_s3 + $0xed8] sm:$0xf0]  ;;  %v10636_v1 = vld [vmem:[%s15893_s3 + $0xf74] sm:$0xf0]  ;;  %v8926_v22 = vld [vmem:[%s15893_s3 + $0x1070] sm:$0xf] }
 0x208   :  { %3799 = vmatpush.bf16.msra.mxu1 %v8535_v39  ;;  %3497 = vmatpush.bf16.msra.mxu0 %v8411_v58  ;;  %v8555_v39 = vor.u32 %v10585_v33, %v8552_v34  ;;  %v8671_v58 = vor.u32 %v10616_v43, %v8670_v42  ;;  %v8675_v60 = vor.u32 %v10615_v50, %v8672_v52  ;;  %v10595_v33 = vld [vmem:[%s15893_s3 + $0xe34] sm:$0xf]  ;;  %v8592_v34 = vld [vmem:[%s15893_s3 + $0xe38] sm:$0xf0]  ;;  %v8630_v50 = vld [vmem:[%s15893_s3 + $0xe80] sm:$0xf] }
 0x209   :  { %3814 = vmatpush.bf16.msra.mxu2 %v8583_v59  ;;  %v8547_v59 = vor.u32 %v10583_v44, %v8544_v48  ;;  %v10607_v42 = vld [vmem:[%s15893_s3 + $0xe94] sm:$0xf]  ;;  %v8640_v43 = vld [vmem:[%s15893_s3 + $0xe98] sm:$0xf0]  ;;  %v10593_v44 = vld [vmem:[%s15893_s3 + $0xe24] sm:$0xf]  ;;  %v8639_v48 = vor.u32 %v10608_v47, %v8638_v37 }
 0x20a   :  { %v10606_v52 = vld [vmem:[%s15893_s3 + $0xe84] sm:$0xf0]  ;;  %v10652_v2 = vld [vmem:[%s15893_s3 + $0xff4] sm:$0xf0]  ;;  %v8784_v37 = vld [vmem:[%s15893_s3 + $0xf58] sm:$0xf0] }
 0x20b   :  { %3485 = vmatpush.bf16.msrb.mxu3 %v8339_v53 }
 0x20c   :  { %3800 = vmatpush.bf16.msra.mxu1 %v8527_v62  ;;  %3498 = vmatpush.bf16.msra.mxu0 %v8403_v4  ;;  %v8619_v62 = vor.u32 %v10601_v54, %v8616_v56  ;;  %v8663_v4 = vor.u32 %v10614_v61, %v8662_v55  ;;  %v8643_v56 = vor.u32 %v10607_v42, %v8640_v43  ;;  %v8504_v55 = vld [vmem:[%s15893_s3 + $0xd88] sm:$0xf0]  ;;  %v10605_v61 = vld [vmem:[%s15893_s3 + $0xe84] sm:$0xf]  ;;  %v8838_v42 = vld [vmem:[%s15893_s3 + $0xfc0] sm:$0xf] }
 0x20d   :  { %3815 = vmatpush.bf16.msra.mxu2 %v8575_v5  ;;  %v8539_v5 = vor.u32 %v10581_v6, %v8536_v63  ;;  %v8632_v63 = vld [vmem:[%s15893_s3 + $0xe88] sm:$0xf0] }
 0x20e   :  { %v8635_v10 = vor.u32 %v10605_v61, %v8632_v63  ;;  %v8830_v61 = vld [vmem:[%s15893_s3 + $0xfb0] sm:$0xf]  ;;  %v10627_v63 = vld [vmem:[%s15893_s3 + $0xf34] sm:$0xf] }
 0x20f   :  { %3486 = vmatpush.bf16.msrb.mxu3 %v8331_v19 }
 0x210   :  { %3801 = vmatpush.bf16.msra.mxu1 %v8519_v14  ;;  %3499 = vmatpush.bf16.msra.mxu0 %v8395_v23  ;;  %v2699_v53 = vpop.f32.mrf.mxu0  ;;  %v10611_v14 = vld [vmem:[%s15893_s3 + $0xeb4] sm:$0xf]  ;;  %v10577_v23 = vld [vmem:[%s15893_s3 + $0xda4] sm:$0xf] }
 0x211   :  { %3816 = vmatpush.bf16.msra.mxu2 %v8567_v24  ;;  %v8659_v18 = vor.u32 %v10611_v14, %v8656_v15  ;;  %v8523_v49 = vor.u32 %v10577_v23, %v8520_v28  ;;  %v8790_v14 = vld [vmem:[%s15893_s3 + $0xf60] sm:$0xf]  ;;  %v10634_v15 = vld [vmem:[%s15893_s3 + $0xf64] sm:$0xf0]  ;;  %v10668_v23 = vld [vmem:[%s15893_s3 + $0x1074] sm:$0xf0] }
 0x212   :  { %3487 = vmatmul.bf16.vlgmr.msrb.gmra.mxu3 %v11463_v51 }
 0x213   :  { %3822 = vmatpush.bf16.msra.mxu3 %v8687_v25  ;;  %3500 = vmatmul.bf16.vlgmr.msra.gmra.mxu0 %v11507_v11 }
 0x214   :  { %3835 = vmatpush.bf16.msrb.mxu0 %v8563_v26  ;;  %3802 = vmatpush.bf16.msra.mxu1 %v8511_v31  ;;  %v8603_v26 = vor.u32 %v10597_v16, %v8600_v17 }
 0x215   :  { %3861 = vmatpush.bf16.msrb.mxu2 %v8691_v30  ;;  %v2686_v19 = vpop.f32.mrf.mxu3  ;;  %v8648_v30 = vld [vmem:[%s15893_s3 + $0xea8] sm:$0xf0] }
 0x216   :  { %3817 = vmatmul.bf16.vlgmr.msra.gmra.mxu2 %v11463_v51  ;;  %v2700_v24 = vadd.f32 %v2699_v53, %v2686_v19  ;;  %v8651_v57 = vor.u32 %v10609_v29, %v8648_v30  ;;  %v8862_v53 = vld [vmem:[%s15893_s3 + $0xff0] sm:$0xf]  ;;  %v8792_v19 = vld [vmem:[%s15893_s3 + $0xf68] sm:$0xf0] }
 0x217   :  { %3823 = vmatpush.bf16.msra.mxu3 %v8679_v38  ;;  %v10575_v38 = vld [vmem:[%s15893_s3 + $0xd94] sm:$0xf]  ;;  %v8863_v13 = vor.u32 %v10652_v2, %v8862_v53  ;;  %v8782_v30 = vld [vmem:[%s15893_s3 + $0xf50] sm:$0xf]  ;;  %v10662_v53 = vld [vmem:[%s15893_s3 + $0x1044] sm:$0xf0] }
 0x218   :  { %3836 = vmatpush.bf16.msrb.mxu0 %v8555_v39  ;;  %3803 = vmatpush.bf16.msra.mxu1 %v8503_v41  ;;  %v2712_v20 = vpop.f32.mrf.mxu1  ;;  %v2701_v31 = vpop.f32.mrf.mxu0  ;;  %v8512_v39 = vld [vmem:[%s15893_s3 + $0xd98] sm:$0xf0]  ;;  %v8595_v41 = vor.u32 %v10595_v33, %v8592_v34  ;;  %v8846_v33 = vld [vmem:[%s15893_s3 + $0xfd0] sm:$0xf]  ;;  %v8927_v34 = vor.u32 %v10668_v23, %v8926_v22  ;;  %v10624_v23 = vld [vmem:[%s15893_s3 + $0xf14] sm:$0xf0] }
 0x219   :  { %3862 = vmatpush.bf16.msrb.mxu2 %v8683_v40  ;;  %v13956_v25 = vpop.f32.mrf.mxu2  ;;  %v2713_v35 = vadd.f32 %v2712_v20, %v2700_v24  ;;  %v8515_v54 = vor.u32 %v10575_v38, %v8512_v39  ;;  %v10589_v20 = vld [vmem:[%s15893_s3 + $0xe04] sm:$0xf]  ;;  %v8791_v24 = vor.u32 %v10634_v15, %v8790_v14  ;;  %v10632_v31 = vld [vmem:[%s15893_s3 + $0xf54] sm:$0xf0]  ;;  %v10642_v15 = vld [vmem:[%s15893_s3 + $0xfa4] sm:$0xf0] }
 0x21a   :  { %v8571_v29 = vor.u32 %v10589_v20, %v8568_v21  ;;  %v8783_v47 = vor.u32 %v10632_v31, %v8782_v30  ;;  %v8750_v20 = vld [vmem:[%s15893_s3 + $0xf10] sm:$0xf]  ;;  %v10623_v30 = vld [vmem:[%s15893_s3 + $0xf14] sm:$0xf]  ;;  %v8752_v31 = vld [vmem:[%s15893_s3 + $0xf18] sm:$0xf0] }
 0x21b   :  { %3804 = vmatmul.bf16.vlgmr.msra.gmra.mxu1 %v11452_v45  ;;  %3824 = vmatpush.bf16.msra.mxu3 %v8671_v58  ;;  %v2757_v40 = vrot.slane %v2713_v35, 4  ;;  %v10648_v35 = vld [vmem:[%s15893_s3 + $0xfd4] sm:$0xf0] }
 0x21c   :  { %3848 = vmatpush.bf16.msrb.mxu1 %v8627_v46  ;;  %3837 = vmatpush.bf16.msrb.mxu0 %v8547_v59  ;;  %v8584_v46 = vld [vmem:[%s15893_s3 + $0xe28] sm:$0xf0]  ;;  %v8847_v38 = vor.u32 %v10648_v35, %v8846_v33  ;;  %v8886_v33 = vld [vmem:[%s15893_s3 + $0x1020] sm:$0xf]  ;;  %v8751_v35 = vor.u32 %v10624_v23, %v8750_v20  ;;  %v9086_v20 = vld [vmem:[%s15893_s3 + $0x1150] sm:$0xf] }
 0x21d   :  { %3863 = vmatpush.bf16.msrb.mxu2 %v8675_v60  ;;  %2761 = vst [vmem:[#allocation2 + $0x10] sm:$0x30] %v2757_v40  ;;  %v2688_v58 = vpop.f32.mrf.mxu3  ;;  %v10573_v60 = vld [vmem:[%s15893_s3 + $0xd84] sm:$0xf]  ;;  %v8774_v40 = vld [vmem:[%s15893_s3 + $0xf40] sm:$0xf] }
 0x21e   :  { %v8507_v9 = vor.u32 %v10573_v60, %v8504_v55  ;;  %v8766_v60 = vld [vmem:[%s15893_s3 + $0xf30] sm:$0xf]  ;;  %v10628_v55 = vld [vmem:[%s15893_s3 + $0xf34] sm:$0xf0]  ;;  %v10682_v23 = vld [vmem:[%s15893_s3 + $0x10e4] sm:$0xf0] }
 0x21f   :  { %3825 = vmatpush.bf16.msra.mxu3 %v8663_v4  ;;  %v8631_v4 = vor.u32 %v10606_v52, %v8630_v50  ;;  %v8910_v52 = vld [vmem:[%s15893_s3 + $0x1050] sm:$0xf]  ;;  %v8767_v2 = vor.u32 %v10628_v55, %v8766_v60  ;;  %v10656_v60 = vld [vmem:[%s15893_s3 + $0x1014] sm:$0xf0] }
 0x220   :  { %3849 = vmatpush.bf16.msrb.mxu1 %v8619_v62  ;;  %3838 = vmatpush.bf16.msrb.mxu0 %v8539_v5  ;;  %v2714_v59 = vpop.f32.mrf.mxu1  ;;  %v8587_v62 = vor.u32 %v10593_v44, %v8584_v46  ;;  %v8800_v5 = vld [vmem:[%s15893_s3 + $0xf78] sm:$0xf0]  ;;  %v10646_v44 = vld [vmem:[%s15893_s3 + $0xfc4] sm:$0xf0]  ;;  %v10629_v46 = vld [vmem:[%s15893_s3 + $0xf44] sm:$0xf] }
 0x221   :  { %3864 = vmatpush.bf16.msrb.mxu2 %v8667_v7  ;;  %v2727_v6 = vpop.f32.mrf.mxu2  ;;  %v10591_v7 = vld [vmem:[%s15893_s3 + $0xe14] sm:$0xf]  ;;  %v8803_v16 = vor.u32 %v10635_v3, %v8800_v5  ;;  %v8839_v58 = vor.u32 %v10646_v44, %v8838_v42  ;;  %v8744_v44 = vld [vmem:[%s15893_s3 + $0xf08] sm:$0xf0] }
 0x222   :  { %v8579_v17 = vor.u32 %v10591_v7, %v8576_v8  ;;  %v8758_v8 = vld [vmem:[%s15893_s3 + $0xf20] sm:$0xf] }
 0x223   :  { %3826 = vmatpush.bf16.msra.mxu3 %v8655_v27  ;;  %v8854_v27 = vld [vmem:[%s15893_s3 + $0xfe0] sm:$0xf] }
 0x224   :  { %3850 = vmatpush.bf16.msrb.mxu1 %v8611_v12  ;;  %3839 = vmatpush.bf16.msrb.mxu0 %v8531_v32  ;;  %v8799_v12 = vor.u32 %v10636_v1, %v8798_v0  ;;  %v10650_v32 = vld [vmem:[%s15893_s3 + $0xfe4] sm:$0xf0]  ;;  %v8768_v0 = vld [vmem:[%s15893_s3 + $0xf38] sm:$0xf0]  ;;  %v8902_v1 = vld [vmem:[%s15893_s3 + $0x1040] sm:$0xf] }
 0x225   :  { %3865 = vmatpush.bf16.msrb.mxu2 %v8659_v18  ;;  %v10633_v18 = vld [vmem:[%s15893_s3 + $0xf64] sm:$0xf]  ;;  %v8903_v14 = vor.u32 %v10662_v53, %v8902_v1 }
 0x226   :  { %v8795_v28 = vor.u32 %v10633_v18, %v8792_v19 }
 0x227   :  { %3827 = vmatpush.bf16.msra.mxu3 %v8647_v36  ;;  %v10631_v36 = vld [vmem:[%s15893_s3 + $0xf54] sm:$0xf] }
 0x228   :  { %3851 = vmatpush.bf16.msrb.mxu1 %v8603_v26  ;;  %3840 = vmatpush.bf16.msrb.mxu0 %v8523_v49  ;;  %v8855_v26 = vor.u32 %v10650_v32, %v8854_v27  ;;  %v8918_v49 = vld [vmem:[%s15893_s3 + $0x1060] sm:$0xf]  ;;  %v8787_v39 = vor.u32 %v10631_v36, %v8784_v37  ;;  %v10660_v32 = vld [vmem:[%s15893_s3 + $0x1034] sm:$0xf0]  ;;  %v10622_v37 = vld [vmem:[%s15893_s3 + $0xf04] sm:$0xf0] }
 0x229   :  { %3866 = vmatpush.bf16.msrb.mxu2 %v8651_v57  ;;  %v10666_v57 = vld [vmem:[%s15893_s3 + $0x1064] sm:$0xf0]  ;;  %v8742_v36 = vld [vmem:[%s15893_s3 + $0xf00] sm:$0xf] }
 0x22a   :  { %v8919_v43 = vor.u32 %v10666_v57, %v8918_v49  ;;  %v8755_v57 = vor.u32 %v10623_v30, %v8752_v31  ;;  %v8840_v30 = vld [vmem:[%s15893_s3 + $0xfc8] sm:$0xf0]  ;;  %v10661_v31 = vld [vmem:[%s15893_s3 + $0x1044] sm:$0xf] }
 0x22b   :  { %3828 = vmatpush.bf16.msra.mxu3 %v8639_v48  ;;  %v8776_v48 = vld [vmem:[%s15893_s3 + $0xf48] sm:$0xf0] }
 0x22c   :  { %3852 = vmatpush.bf16.msrb.mxu1 %v8595_v41  ;;  %3841 = vmatpush.bf16.msrb.mxu0 %v8515_v54  ;;  %v10630_v41 = vld [vmem:[%s15893_s3 + $0xf44] sm:$0xf0]  ;;  %v10664_v54 = vld [vmem:[%s15893_s3 + $0x1054] sm:$0xf0]  ;;  %v8779_v59 = vor.u32 %v10629_v46, %v8776_v48  ;;  %v10651_v46 = vld [vmem:[%s15893_s3 + $0xff4] sm:$0xf] }
 0x22d   :  { %3867 = vmatpush.bf16.msrb.mxu2 %v8643_v56  ;;  %v8775_v56 = vor.u32 %v10630_v41, %v8774_v40  ;;  %v8911_v6 = vor.u32 %v10664_v54, %v8910_v52  ;;  %v10638_v40 = vld [vmem:[%s15893_s3 + $0xf84] sm:$0xf0]  ;;  %v10621_v41 = vld [vmem:[%s15893_s3 + $0xf04] sm:$0xf]  ;;  %v8864_v48 = vld [vmem:[%s15893_s3 + $0xff8] sm:$0xf0] }
 0x22e   :  { %v8928_v52 = vld [vmem:[%s15893_s3 + $0x1078] sm:$0xf0]  ;;  %v9102_v54 = vld [vmem:[%s15893_s3 + $0x1170] sm:$0xf] }
 0x22f   :  { %3829 = vmatpush.bf16.msra.mxu3 %v8631_v4  ;;  %v8771_v4 = vor.u32 %v10627_v63, %v8768_v0  ;;  %v10649_v63 = vld [vmem:[%s15893_s3 + $0xfe4] sm:$0xf]  ;;  %v8856_v0 = vld [vmem:[%s15893_s3 + $0xfe8] sm:$0xf0] }
 0x230   :  { %3853 = vmatpush.bf16.msrb.mxu1 %v8587_v62  ;;  %3842 = vmatpush.bf16.msrb.mxu0 %v8507_v9  ;;  %v2751_v50 = vpop.f32.mrf.mxu0  ;;  %v10644_v62 = vld [vmem:[%s15893_s3 + $0xfb4] sm:$0xf0]  ;;  %v10626_v9 = vld [vmem:[%s15893_s3 + $0xf24] sm:$0xf0] }
 0x231   :  { %3868 = vmatpush.bf16.msrb.mxu2 %v8635_v10  ;;  %v8831_v3 = vor.u32 %v10644_v62, %v8830_v61  ;;  %v8822_v10 = vld [vmem:[%s15893_s3 + $0xfa0] sm:$0xf]  ;;  %v8759_v19 = vor.u32 %v10626_v9, %v8758_v8  ;;  %v8747_v61 = vor.u32 %v10621_v41, %v8744_v44  ;;  %v10654_v9 = vld [vmem:[%s15893_s3 + $0x1004] sm:$0xf0]  ;;  %v8832_v41 = vld [vmem:[%s15893_s3 + $0xfb8] sm:$0xf0] }
 0x232   :  { %3830 = vmatmul.bf16.vlgmr.msra.gmra.mxu3 %v11507_v11  ;;  %v8823_v21 = vor.u32 %v10642_v15, %v8822_v10  ;;  %v8870_v8 = vld [vmem:[%s15893_s3 + $0x1000] sm:$0xf]  ;;  %v9038_v10 = vld [vmem:[%s15893_s3 + $0x10f0] sm:$0xf]  ;;  %v8896_v44 = vld [vmem:[%s15893_s3 + $0x1038] sm:$0xf0] }
 0x233   :  { %4171 = vmatpush.bf16.msrb.mxu3 %v8799_v12  ;;  %3843 = vmatmul.bf16.vlgmr.msrb.gmra.mxu0 %v11452_v45 }
 0x234   :  { %4184 = vmatpush.bf16.msra.mxu0 %v8863_v13  ;;  %3854 = vmatpush.bf16.msrb.mxu1 %v8579_v17  ;;  %v8760_v17 = vld [vmem:[%s15893_s3 + $0xf28] sm:$0xf0] }
 0x235   :  { %4210 = vmatpush.bf16.msra.mxu2 %v8803_v16  ;;  %v2738_v5 = vpop.f32.mrf.mxu3  ;;  %v10625_v16 = vld [vmem:[%s15893_s3 + $0xf24] sm:$0xf] }
 0x236   :  { %3869 = vmatmul.bf16.vlgmr.msrb.gmra.mxu2 %v11507_v11  ;;  %v2739_v12 = vadd.f32 %v2738_v5, %v13956_v25  ;;  %v8894_v25 = vld [vmem:[%s15893_s3 + $0x1030] sm:$0xf]  ;;  %v8763_v22 = vor.u32 %v10625_v16, %v8760_v17  ;;  %v10698_v5 = vld [vmem:[%s15893_s3 + $0x1164] sm:$0xf0]  ;;  %v8871_v17 = vor.u32 %v10654_v9, %v8870_v8 }
 0x237   :  { %4172 = vmatpush.bf16.msrb.mxu3 %v8791_v24  ;;  %v8814_v24 = vld [vmem:[%s15893_s3 + $0xf90] sm:$0xf] }
 0x238   :  { %4185 = vmatpush.bf16.msra.mxu0 %v8855_v26  ;;  %3855 = vmatpush.bf16.msrb.mxu1 %v8571_v29  ;;  %v14145_v7 = vpop.f32.mrf.mxu1  ;;  %v2753_v27 = vpop.f32.mrf.mxu0  ;;  %v2752_v18 = vadd.f32 %v2751_v50, %v2739_v12  ;;  %v10640_v26 = vld [vmem:[%s15893_s3 + $0xf94] sm:$0xf0]  ;;  %v8895_v29 = vor.u32 %v10660_v32, %v8894_v25  ;;  %v10667_v50 = vld [vmem:[%s15893_s3 + $0x1074] sm:$0xf]  ;;  %v8848_v25 = vld [vmem:[%s15893_s3 + $0xfd8] sm:$0xf0] }
 0x239   :  { %4211 = vmatpush.bf16.msra.mxu2 %v8795_v28  ;;  %v14157_v13 = vpop.f32.mrf.mxu2  ;;  %v8815_v49 = vor.u32 %v10640_v26, %v8814_v24  ;;  %v8931_v62 = vor.u32 %v10667_v50, %v8928_v52  ;;  %v10684_v12 = vld [vmem:[%s15893_s3 + $0x10f4] sm:$0xf0]  ;;  %v10647_v27 = vld [vmem:[%s15893_s3 + $0xfd4] sm:$0xf]  ;;  %v9014_v50 = vld [vmem:[%s15893_s3 + $0x10c0] sm:$0xf] }
 0x23a   :  { %v2758_v28 = vrot.slane %v2752_v18, 4  ;;  %v10663_v32 = vld [vmem:[%s15893_s3 + $0x1054] sm:$0xf]  ;;  %v9039_v18 = vor.u32 %v10684_v12, %v9038_v10  ;;  %v8851_v24 = vor.u32 %v10647_v27, %v8848_v25  ;;  %v10678_v52 = vld [vmem:[%s15893_s3 + $0x10c4] sm:$0xf0] }
 0x23b   :  { %3856 = vmatmul.bf16.vlgmr.msrb.gmra.mxu1 %v11463_v51  ;;  %4173 = vmatpush.bf16.msrb.mxu3 %v8783_v47  ;;  %v10639_v12 = vld [vmem:[%s15893_s3 + $0xf94] sm:$0xf]  ;;  %v8880_v27 = vld [vmem:[%s15893_s3 + $0x1018] sm:$0xf0]  ;;  %v9054_v25 = vld [vmem:[%s15893_s3 + $0x1110] sm:$0xf] }
 0x23c   :  { %4197 = vmatpush.bf16.msra.mxu1 %v8927_v34  ;;  %4186 = vmatpush.bf16.msra.mxu0 %v8847_v38  ;;  %v10658_v34 = vld [vmem:[%s15893_s3 + $0x1024] sm:$0xf0]  ;;  %2762 = vst.msk [vmem:[#allocation2 + $0x18] sm:$0x30] %vm1266_vm4, %v2758_v28 }
 0x23d   :  { %4212 = vmatpush.bf16.msra.mxu2 %v8787_v39  ;;  %v2740_v47 = vpop.f32.mrf.mxu3  ;;  %v8806_v39 = vld [vmem:[%s15893_s3 + $0xf80] sm:$0xf] }
 0x23e   :  { %v8807_v55 = vor.u32 %v10638_v40, %v8806_v39  ;;  %v10643_v40 = vld [vmem:[%s15893_s3 + $0xfb4] sm:$0xf] }
 0x23f   :  { %4174 = vmatpush.bf16.msrb.mxu3 %v8775_v56  ;;  %v8743_v56 = vor.u32 %v10622_v37, %v8742_v36  ;;  %v10694_v36 = vld [vmem:[%s15893_s3 + $0x1144] sm:$0xf0] }
 0x240   :  { %4198 = vmatpush.bf16.msra.mxu1 %v8919_v43  ;;  %4187 = vmatpush.bf16.msra.mxu0 %v8839_v58  ;;  %v3063_v38 = vpop.f32.mrf.mxu1  ;;  %v8887_v43 = vor.u32 %v10658_v34, %v8886_v33  ;;  %v10700_v58 = vld [vmem:[%s15893_s3 + $0x1174] sm:$0xf0]  ;;  %v8904_v34 = vld [vmem:[%s15893_s3 + $0x1048] sm:$0xf0] }
 0x241   :  { %4213 = vmatpush.bf16.msra.mxu2 %v8779_v59  ;;  %v3076_v42 = vpop.f32.mrf.mxu2  ;;  %v8878_v59 = vld [vmem:[%s15893_s3 + $0x1010] sm:$0xf]  ;;  %v9103_v1 = vor.u32 %v10700_v58, %v9102_v54  ;;  %v8907_v38 = vor.u32 %v10661_v31, %v8904_v34  ;;  %v3075_v54 = vadd.f32 %v14157_v13, %v14145_v7  ;;  %v10657_v7 = vld [vmem:[%s15893_s3 + $0x1024] sm:$0xf]  ;;  %v9046_v34 = vld [vmem:[%s15893_s3 + $0x1100] sm:$0xf] }
 0x242   :  { %v8879_v53 = vor.u32 %v10656_v60, %v8878_v59  ;;  %v10659_v42 = vld [vmem:[%s15893_s3 + $0x1034] sm:$0xf]  ;;  %v10653_v31 = vld [vmem:[%s15893_s3 + $0x1004] sm:$0xf] }
 0x243   :  { %4175 = vmatpush.bf16.msrb.mxu3 %v8767_v2  ;;  %v10665_v2 = vld [vmem:[%s15893_s3 + $0x1064] sm:$0xf]  ;;  %v8899_v58 = vor.u32 %v10659_v42, %v8896_v44  ;;  %v8990_v42 = vld [vmem:[%s15893_s3 + $0x1090] sm:$0xf] }
 0x244   :  { %4199 = vmatpush.bf16.msra.mxu1 %v8911_v6  ;;  %4188 = vmatpush.bf16.msra.mxu0 %v8831_v3  ;;  %v8867_v6 = vor.u32 %v10651_v46, %v8864_v48  ;;  %v8920_v3 = vld [vmem:[%s15893_s3 + $0x1068] sm:$0xf0]  ;;  %v9070_v46 = vld [vmem:[%s15893_s3 + $0x1130] sm:$0xf]  ;;  %v10692_v48 = vld [vmem:[%s15893_s3 + $0x1134] sm:$0xf0] }
 0x245   :  { %4214 = vmatpush.bf16.msra.mxu2 %v8771_v4  ;;  %v9094_v4 = vld [vmem:[%s15893_s3 + $0x1160] sm:$0xf]  ;;  %v8923_v15 = vor.u32 %v10665_v2, %v8920_v3  ;;  %v9071_v59 = vor.u32 %v10692_v48, %v9070_v46  ;;  %v10690_v2 = vld [vmem:[%s15893_s3 + $0x1124] sm:$0xf0] }
 0x246   :  { %v9095_v16 = vor.u32 %v10698_v5, %v9094_v4  ;;  %v9006_v4 = vld [vmem:[%s15893_s3 + $0x10b0] sm:$0xf]  ;;  %v10676_v5 = vld [vmem:[%s15893_s3 + $0x10b4] sm:$0xf0] }
 0x247   :  { %4176 = vmatpush.bf16.msrb.mxu3 %v8759_v19  ;;  %v8912_v19 = vld [vmem:[%s15893_s3 + $0x1058] sm:$0xf0] }
 0x248   :  { %4200 = vmatpush.bf16.msra.mxu1 %v8903_v14  ;;  %4189 = vmatpush.bf16.msra.mxu0 %v8823_v21  ;;  %v8859_v14 = vor.u32 %v10649_v63, %v8856_v0  ;;  %v10696_v21 = vld [vmem:[%s15893_s3 + $0x1154] sm:$0xf0]  ;;  %v8915_v26 = vor.u32 %v10663_v32, %v8912_v19  ;;  %v9015_v0 = vor.u32 %v10678_v52, %v9014_v50  ;;  %v9158_v52 = vld [vmem:[%s15893_s3 + $0x11e0] sm:$0xf] }
 0x249   :  { %4215 = vmatpush.bf16.msra.mxu2 %v8763_v22  ;;  %v9030_v22 = vld [vmem:[%s15893_s3 + $0x10e0] sm:$0xf]  ;;  %v9087_v28 = vor.u32 %v10696_v21, %v9086_v20  ;;  %v10688_v19 = vld [vmem:[%s15893_s3 + $0x1114] sm:$0xf0]  ;;  %v10674_v21 = vld [vmem:[%s15893_s3 + $0x10a4] sm:$0xf0] }
 0x24a   :  { %v9031_v33 = vor.u32 %v10682_v23, %v9030_v22  ;;  %v8998_v20 = vld [vmem:[%s15893_s3 + $0x10a0] sm:$0xf]  ;;  %v10637_v23 = vld [vmem:[%s15893_s3 + $0xf84] sm:$0xf] }
 0x24b   :  { %4177 = vmatpush.bf16.msrb.mxu3 %v8751_v35  ;;  %v9078_v35 = vld [vmem:[%s15893_s3 + $0x1140] sm:$0xf] }
 0x24c   :  { %4201 = vmatpush.bf16.msra.mxu1 %v8895_v29  ;;  %4190 = vmatpush.bf16.msra.mxu0 %v8815_v49  ;;  %v10645_v29 = vld [vmem:[%s15893_s3 + $0xfc4] sm:$0xf]  ;;  %v9022_v49 = vld [vmem:[%s15893_s3 + $0x10d0] sm:$0xf]  ;;  %v9079_v39 = vor.u32 %v10694_v36, %v9078_v35  ;;  %v8999_v36 = vor.u32 %v10674_v21, %v8998_v20  ;;  %v9144_v21 = vld [vmem:[%s15893_s3 + $0x11c8] sm:$0xf0] }
 0x24d   :  { %4216 = vmatpush.bf16.msra.mxu2 %v8755_v57  ;;  %v10680_v57 = vld [vmem:[%s15893_s3 + $0x10d4] sm:$0xf0]  ;;  %v8843_v47 = vor.u32 %v10645_v29, %v8840_v30  ;;  %v10709_v20 = vld [vmem:[%s15893_s3 + $0x11c4] sm:$0xf] }
 0x24f   :  { %4178 = vmatpush.bf16.msrb.mxu3 %v8743_v56  ;;  %v8835_v56 = vor.u32 %v10643_v40, %v8832_v41  ;;  %v9168_v41 = vld [vmem:[%s15893_s3 + $0x11f8] sm:$0xf0] }
 0x250   :  { %4202 = vmatpush.bf16.msra.mxu1 %v8887_v43  ;;  %4191 = vmatpush.bf16.msra.mxu0 %v8807_v55  ;;  %v3100_v37 = vpop.f32.mrf.mxu0  ;;  %v9023_v43 = vor.u32 %v10680_v57, %v9022_v49  ;;  %v9166_v49 = vld [vmem:[%s15893_s3 + $0x11f0] sm:$0xf]  ;;  %v10716_v57 = vld [vmem:[%s15893_s3 + $0x11f4] sm:$0xf0] }
 0x251   :  { %4217 = vmatpush.bf16.msra.mxu2 %v8747_v61  ;;  %v10641_v61 = vld [vmem:[%s15893_s3 + $0xfa4] sm:$0xf]  ;;  %v9167_v48 = vor.u32 %v10716_v57, %v9166_v49  ;;  %v9080_v57 = vld [vmem:[%s15893_s3 + $0x1148] sm:$0xf0] }
 0x252   :  { %4179 = vmatmul.bf16.vlgmr.msrb.gmra.mxu3 %v11452_v45  ;;  %v10693_v49 = vld [vmem:[%s15893_s3 + $0x1144] sm:$0xf] }
 0x253   :  { %4223 = vmatpush.bf16.msra.mxu3 %v8867_v6  ;;  %4192 = vmatmul.bf16.vlgmr.msra.gmra.mxu0 %v11463_v51  ;;  %v8824_v6 = vld [vmem:[%s15893_s3 + $0xfa8] sm:$0xf0] }
 0x254   :  { %4236 = vmatpush.bf16.msrb.mxu0 %v8931_v62  ;;  %4203 = vmatpush.bf16.msra.mxu1 %v8879_v53  ;;  %v9062_v53 = vld [vmem:[%s15893_s3 + $0x1120] sm:$0xf]  ;;  %v8827_v10 = vor.u32 %v10641_v61, %v8824_v6  ;;  %v9160_v61 = vld [vmem:[%s15893_s3 + $0x11e8] sm:$0xf0] }
 0x255   :  { %4559 = vmatpush.bf16.msrb.mxu2 %v9103_v1  ;;  %v3087_v60 = vpop.f32.mrf.mxu3  ;;  %v8888_v1 = vld [vmem:[%s15893_s3 + $0x1028] sm:$0xf0]  ;;  %v8982_v6 = vld [vmem:[%s15893_s3 + $0x1080] sm:$0xf] }
 0x256   :  { %4218 = vmatmul.bf16.vlgmr.msra.gmra.mxu2 %v11452_v45  ;;  %v3088_v13 = vadd.f32 %v3087_v60, %v3075_v54  ;;  %v10714_v54 = vld [vmem:[%s15893_s3 + $0x11e4] sm:$0xf0]  ;;  %v9032_v60 = vld [vmem:[%s15893_s3 + $0x10e8] sm:$0xf0] }
 0x257   :  { %4224 = vmatpush.bf16.msra.mxu3 %v8859_v14  ;;  %v8816_v14 = vld [vmem:[%s15893_s3 + $0xf98] sm:$0xf0] }
 0x258   :  { %4237 = vmatpush.bf16.msrb.mxu0 %v8923_v15  ;;  %4204 = vmatpush.bf16.msra.mxu1 %v8871_v17  ;;  %v3113_v55 = vpop.f32.mrf.mxu1  ;;  %v3102_v3 = vpop.f32.mrf.mxu0  ;;  %v3132_v8 = vrot.slane %v3088_v13, 2  ;;  %v8891_v15 = vor.u32 %v10657_v7, %v8888_v1  ;;  %v10655_v17 = vld [vmem:[%s15893_s3 + $0x1014] sm:$0xf]  ;;  %v8819_v22 = vor.u32 %v10639_v12, %v8816_v14  ;;  %v10670_v7 = vld [vmem:[%s15893_s3 + $0x1084] sm:$0xf0] }
 0x259   :  { %4560 = vmatpush.bf16.msrb.mxu2 %v9095_v16  ;;  %v3114_v62 = vadd.f32 %v3113_v55, %v3100_v37  ;;  %v3126_v63 = vpop.f32.mrf.mxu2  ;;  %v9063_v16 = vor.u32 %v10690_v2, %v9062_v53  ;;  %v10686_v37 = vld [vmem:[%s15893_s3 + $0x1104] sm:$0xf0]  ;;  %v10713_v55 = vld [vmem:[%s15893_s3 + $0x11e4] sm:$0xf]  ;;  %v10699_v13 = vld [vmem:[%s15893_s3 + $0x1174] sm:$0xf]  ;;  %v8983_v53 = vor.u32 %v10670_v7, %v8982_v6 }
 0x25a   :  { %3136 = vst [vmem:[#allocation2 + $0x10] sm:$0xc0] %v3132_v8  ;;  %v9047_v46 = vor.u32 %v10686_v37, %v9046_v34  ;;  %v9163_v1 = vor.u32 %v10713_v55, %v9160_v61  ;;  %v9150_v2 = vld [vmem:[%s15893_s3 + $0x11d0] sm:$0xf]  ;;  %v10712_v3 = vld [vmem:[%s15893_s3 + $0x11d4] sm:$0xf0] }
 0x25b   :  { %4205 = vmatmul.bf16.vlgmr.msra.gmra.mxu1 %v11507_v11  ;;  %4225 = vmatpush.bf16.msra.mxu3 %v8851_v24  ;;  %v3127_v9 = vadd.f32 %v3126_v63, %v3114_v62  ;;  %v8808_v24 = vld [vmem:[%s15893_s3 + $0xf88] sm:$0xf0]  ;;  %v9104_v62 = vld [vmem:[%s15893_s3 + $0x1178] sm:$0xf0]  ;;  %v9159_v63 = vor.u32 %v10714_v54, %v9158_v52  ;;  %v10697_v12 = vld [vmem:[%s15893_s3 + $0x1164] sm:$0xf] }
 0x25c   :  { %4546 = vmatpush.bf16.msrb.mxu1 %v9039_v18  ;;  %4238 = vmatpush.bf16.msrb.mxu0 %v8915_v26  ;;  %v9007_v18 = vor.u32 %v10676_v5, %v9006_v4  ;;  %v8883_v26 = vor.u32 %v10655_v17, %v8880_v27  ;;  %v8811_v40 = vor.u32 %v10637_v23, %v8808_v24  ;;  %v10679_v4 = vld [vmem:[%s15893_s3 + $0x10d4] sm:$0xf]  ;;  %v9024_v8 = vld [vmem:[%s15893_s3 + $0x10d8] sm:$0xf0]  ;;  %v9096_v14 = vld [vmem:[%s15893_s3 + $0x1168] sm:$0xf0] }
 0x25d   :  { %4561 = vmatpush.bf16.msrb.mxu2 %v9087_v28  ;;  %v3133_v32 = vrot.slane %v3127_v9, 2  ;;  %v9055_v28 = vor.u32 %v10688_v19, %v9054_v25  ;;  %v3089_v29 = vpop.f32.mrf.mxu3  ;;  %v9107_v5 = vor.u32 %v10699_v13, %v9104_v62  ;;  %v10711_v9 = vld [vmem:[%s15893_s3 + $0x11d4] sm:$0xf]  ;;  %v9142_v27 = vld [vmem:[%s15893_s3 + $0x11c0] sm:$0xf] }
 0x25e   :  { %v10710_v25 = vld [vmem:[%s15893_s3 + $0x11c4] sm:$0xf0]  ;;  %v9016_v19 = vld [vmem:[%s15893_s3 + $0x10c8] sm:$0xf0]  ;;  %v10695_v23 = vld [vmem:[%s15893_s3 + $0x1154] sm:$0xf]  ;;  %v9147_v29 = vor.u32 %v10709_v20, %v9144_v21 }
 0x25f   :  { %4226 = vmatpush.bf16.msra.mxu3 %v8843_v47  ;;  %3137 = vst.msk [vmem:[#allocation2 + $0x18] sm:$0xc0] %vm1642_vm5, %v3133_v32  ;;  %v10683_v47 = vld [vmem:[%s15893_s3 + $0x10f4] sm:$0xf]  ;;  %v10677_v32 = vld [vmem:[%s15893_s3 + $0x10c4] sm:$0xf] }
 0x260   :  { %4547 = vmatpush.bf16.msrb.mxu1 %v9031_v33  ;;  %4239 = vmatpush.bf16.msrb.mxu0 %v8907_v38  ;;  %v3115_v30 = vpop.f32.mrf.mxu1  ;;  %v8872_v33 = vld [vmem:[%s15893_s3 + $0x1008] sm:$0xf0]  ;;  %v9040_v38 = vld [vmem:[%s15893_s3 + $0x10f8] sm:$0xf0]  ;;  %v10705_v54 = vld [vmem:[%s15893_s3 + $0x11a4] sm:$0xf] }
 0x261   :  { %4562 = vmatpush.bf16.msrb.mxu2 %v9079_v39  ;;  %v3128_v35 = vpop.f32.mrf.mxu2  ;;  %v10715_v39 = vld [vmem:[%s15893_s3 + $0x11f4] sm:$0xf]  ;;  %v8875_v44 = vor.u32 %v10653_v31, %v8872_v33  ;;  %v9043_v50 = vor.u32 %v10683_v47, %v9040_v38  ;;  %v9088_v24 = vld [vmem:[%s15893_s3 + $0x1158] sm:$0xf0]  ;;  %v9134_v30 = vld [vmem:[%s15893_s3 + $0x11b0] sm:$0xf] }
 0x262   :  { %v10708_v31 = vld [vmem:[%s15893_s3 + $0x11b4] sm:$0xf0]  ;;  %v10675_v33 = vld [vmem:[%s15893_s3 + $0x10b4] sm:$0xf]  ;;  %v9091_v34 = vor.u32 %v10695_v23, %v9088_v24  ;;  %v9008_v35 = vld [vmem:[%s15893_s3 + $0x10b8] sm:$0xf0] }
 0x263   :  { %4227 = vmatpush.bf16.msra.mxu3 %v8835_v56  ;;  %v9171_v56 = vor.u32 %v10715_v39, %v9168_v41  ;;  %v9136_v37 = vld [vmem:[%s15893_s3 + $0x11b8] sm:$0xf0]  ;;  %v9135_v47 = vor.u32 %v10708_v31, %v9134_v30  ;;  %v9011_v38 = vor.u32 %v10675_v33, %v9008_v35  ;;  %v9000_v52 = vld [vmem:[%s15893_s3 + $0x10a8] sm:$0xf0]  ;;  %v9118_v6 = vld [vmem:[%s15893_s3 + $0x1190] sm:$0xf] }
 0x264   :  { %4548 = vmatpush.bf16.msrb.mxu1 %v9023_v43  ;;  %4240 = vmatpush.bf16.msrb.mxu0 %v8899_v58  ;;  %v10672_v43 = vld [vmem:[%s15893_s3 + $0x1094] sm:$0xf0]  ;;  %v9342_v21 = vld [vmem:[%s15893_s3 + $0x12f0] sm:$0xf]  ;;  %v10731_v23 = vld [vmem:[%s15893_s3 + $0x1274] sm:$0xf] }
 0x265   :  { %4563 = vmatpush.bf16.msrb.mxu2 %v9071_v59  ;;  %v8991_v58 = vor.u32 %v10672_v43, %v8990_v42  ;;  %v10681_v59 = vld [vmem:[%s15893_s3 + $0x10e4] sm:$0xf]  ;;  %v9126_v42 = vld [vmem:[%s15893_s3 + $0x11a0] sm:$0xf]  ;;  %v10706_v43 = vld [vmem:[%s15893_s3 + $0x11a4] sm:$0xf0] }
 0x266   :  { %v9127_v61 = vor.u32 %v10706_v43, %v9126_v42  ;;  %v10704_v62 = vld [vmem:[%s15893_s3 + $0x1194] sm:$0xf0]  ;;  %v9270_v35 = vld [vmem:[%s15893_s3 + $0x1260] sm:$0xf]  ;;  %v9406_v42 = vld [vmem:[%s15893_s3 + $0x1370] sm:$0xf] }
 0x267   :  { %4228 = vmatpush.bf16.msra.mxu3 %v8827_v10  ;;  %v9152_v10 = vld [vmem:[%s15893_s3 + $0x11d8] sm:$0xf0]  ;;  %v10732_v20 = vld [vmem:[%s15893_s3 + $0x1274] sm:$0xf0] }
 0x268   :  { %4549 = vmatpush.bf16.msrb.mxu1 %v9015_v0  ;;  %4241 = vmatpush.bf16.msrb.mxu0 %v8891_v15  ;;  %v9035_v0 = vor.u32 %v10681_v59, %v9032_v60  ;;  %v9151_v15 = vor.u32 %v10712_v3, %v9150_v2  ;;  %v9155_v17 = vor.u32 %v10711_v9, %v9152_v10  ;;  %v10691_v59 = vld [vmem:[%s15893_s3 + $0x1134] sm:$0xf]  ;;  %v9072_v60 = vld [vmem:[%s15893_s3 + $0x1138] sm:$0xf0]  ;;  %v10689_v3 = vld [vmem:[%s15893_s3 + $0x1124] sm:$0xf] }
 0x269   :  { %4564 = vmatpush.bf16.msrb.mxu2 %v9063_v16  ;;  %v9027_v16 = vor.u32 %v10679_v4, %v9024_v8  ;;  %v9120_v2 = vld [vmem:[%s15893_s3 + $0x1198] sm:$0xf0]  ;;  %v9064_v4 = vld [vmem:[%s15893_s3 + $0x1128] sm:$0xf0]  ;;  %v9110_v8 = vld [vmem:[%s15893_s3 + $0x1180] sm:$0xf] }
 0x26a   :  { %v10702_v9 = vld [vmem:[%s15893_s3 + $0x1184] sm:$0xf0]  ;;  %v10764_v43 = vld [vmem:[%s15893_s3 + $0x1374] sm:$0xf0] }
 0x26b   :  { %4229 = vmatpush.bf16.msra.mxu3 %v8819_v22  ;;  %v9111_v24 = vor.u32 %v10702_v9, %v9110_v8  ;;  %v9390_v9 = vld [vmem:[%s15893_s3 + $0x1350] sm:$0xf] }
 0x26c   :  { %4550 = vmatpush.bf16.msrb.mxu1 %v9007_v18  ;;  %4242 = vmatpush.bf16.msrb.mxu0 %v8883_v26  ;;  %v9099_v18 = vor.u32 %v10697_v12, %v9096_v14  ;;  %v9143_v26 = vor.u32 %v10710_v25, %v9142_v27  ;;  %v10701_v27 = vld [vmem:[%s15893_s3 + $0x1184] sm:$0xf] }
 0x26d   :  { %4565 = vmatpush.bf16.msrb.mxu2 %v9055_v28  ;;  %v9019_v28 = vor.u32 %v10677_v32, %v9016_v19  ;;  %v9067_v32 = vor.u32 %v10689_v3, %v9064_v4  ;;  %v9278_v19 = vld [vmem:[%s15893_s3 + $0x1270] sm:$0xf]  ;;  %v10742_v3 = vld [vmem:[%s15893_s3 + $0x12c4] sm:$0xf0]  ;;  %v10725_v4 = vld [vmem:[%s15893_s3 + $0x1244] sm:$0xf] }
 0x26e   :  { %v9279_v33 = vor.u32 %v10732_v20, %v9278_v19  ;;  %v9248_v19 = vld [vmem:[%s15893_s3 + $0x1238] sm:$0xf0]  ;;  %v9382_v20 = vld [vmem:[%s15893_s3 + $0x1340] sm:$0xf] }
 0x26f   :  { %4230 = vmatpush.bf16.msra.mxu3 %v8811_v40 }
 0x270   :  { %4551 = vmatpush.bf16.msrb.mxu1 %v8999_v36  ;;  %4243 = vmatpush.bf16.msrb.mxu0 %v8875_v44  ;;  %v3449_v22 = vpop.f32.mrf.mxu0  ;;  %v10707_v36 = vld [vmem:[%s15893_s3 + $0x11b4] sm:$0xf]  ;;  %v10673_v44 = vld [vmem:[%s15893_s3 + $0x10a4] sm:$0xf] }
 0x271   :  { %4566 = vmatpush.bf16.msrb.mxu2 %v9047_v46  ;;  %v9139_v39 = vor.u32 %v10707_v36, %v9136_v37  ;;  %v9003_v7 = vor.u32 %v10673_v44, %v9000_v52  ;;  %v10730_v36 = vld [vmem:[%s15893_s3 + $0x1264] sm:$0xf0] }
 0x272   :  { %4231 = vmatmul.bf16.vlgmr.msra.gmra.mxu3 %v11463_v51  ;;  %v9271_v44 = vor.u32 %v10730_v36, %v9270_v35  ;;  %v10738_v36 = vld [vmem:[%s15893_s3 + $0x12a4] sm:$0xf0] }
 0x273   :  { %4572 = vmatpush.bf16.msrb.mxu3 %v9167_v48  ;;  %4244 = vmatmul.bf16.vlgmr.msrb.gmra.mxu0 %v11507_v11 }
 0x274   :  { %4585 = vmatpush.bf16.msra.mxu0 %v9043_v50  ;;  %4552 = vmatpush.bf16.msrb.mxu1 %v8991_v58  ;;  %v9083_v50 = vor.u32 %v10693_v49, %v9080_v57  ;;  %v9334_v57 = vld [vmem:[%s15893_s3 + $0x12e0] sm:$0xf] }
 0x275   :  { %4611 = vmatpush.bf16.msra.mxu2 %v9171_v56  ;;  %v3436_v40 = vpop.f32.mrf.mxu3  ;;  %v9128_v56 = vld [vmem:[%s15893_s3 + $0x11a8] sm:$0xf0] }
 0x276   :  { %4567 = vmatmul.bf16.vlgmr.msrb.gmra.mxu2 %v11463_v51  ;;  %v3450_v46 = vadd.f32 %v3449_v22, %v3436_v40  ;;  %v9131_v13 = vor.u32 %v10705_v54, %v9128_v56  ;;  %v10748_v22 = vld [vmem:[%s15893_s3 + $0x12f4] sm:$0xf0]  ;;  %v10685_v40 = vld [vmem:[%s15893_s3 + $0x1104] sm:$0xf]  ;;  %v9262_v54 = vld [vmem:[%s15893_s3 + $0x1250] sm:$0xf] }
 0x277   :  { %4573 = vmatpush.bf16.msrb.mxu3 %v9159_v63  ;;  %v10671_v63 = vld [vmem:[%s15893_s3 + $0x1094] sm:$0xf]  ;;  %v10728_v56 = vld [vmem:[%s15893_s3 + $0x1254] sm:$0xf0] }
 0x278   :  { %4586 = vmatpush.bf16.msra.mxu0 %v9035_v0  ;;  %4553 = vmatpush.bf16.msrb.mxu1 %v8983_v53  ;;  %v3462_v41 = vpop.f32.mrf.mxu1  ;;  %v3451_v58 = vpop.f32.mrf.mxu0  ;;  %v8992_v0 = vld [vmem:[%s15893_s3 + $0x1098] sm:$0xf0]  ;;  %v10703_v53 = vld [vmem:[%s15893_s3 + $0x1194] sm:$0xf] }
 0x279   :  { %4612 = vmatpush.bf16.msra.mxu2 %v9163_v1  ;;  %v14555_v48 = vpop.f32.mrf.mxu2  ;;  %v3463_v55 = vadd.f32 %v3462_v41, %v3450_v46  ;;  %v9075_v1 = vor.u32 %v10691_v59, %v9072_v60  ;;  %v8995_v10 = vor.u32 %v10671_v63, %v8992_v0  ;;  %v9123_v12 = vor.u32 %v10703_v53, %v9120_v2  ;;  %v9048_v41 = vld [vmem:[%s15893_s3 + $0x1108] sm:$0xf0]  ;;  %v9326_v58 = vld [vmem:[%s15893_s3 + $0x12d0] sm:$0xf]  ;;  %v10744_v60 = vld [vmem:[%s15893_s3 + $0x12d4] sm:$0xf0] }
 0x27a   :  { %v9051_v52 = vor.u32 %v10685_v40, %v9048_v41  ;;  %v9407_v59 = vor.u32 %v10764_v43, %v9406_v42  ;;  %v9254_v0 = vld [vmem:[%s15893_s3 + $0x1240] sm:$0xf]  ;;  %v9230_v40 = vld [vmem:[%s15893_s3 + $0x1210] sm:$0xf]  ;;  %v10720_v43 = vld [vmem:[%s15893_s3 + $0x1214] sm:$0xf0] }
 0x27b   :  { %4554 = vmatmul.bf16.vlgmr.msrb.gmra.mxu1 %v11452_v45  ;;  %4574 = vmatpush.bf16.msrb.mxu3 %v9151_v15  ;;  %3505 = vst [vmem:[#allocation2 + $0x20] sm:$0x3] %v3463_v55  ;;  %v10727_v55 = vld [vmem:[%s15893_s3 + $0x1254] sm:$0xf]  ;;  %v9318_v53 = vld [vmem:[%s15893_s3 + $0x12c0] sm:$0xf] }
 0x27c   :  { %4598 = vmatpush.bf16.msra.mxu1 %v9107_v5  ;;  %4587 = vmatpush.bf16.msra.mxu0 %v9027_v16  ;;  %v9119_v5 = vor.u32 %v10704_v62, %v9118_v6  ;;  %v10669_v16 = vld [vmem:[%s15893_s3 + $0x1084] sm:$0xf]  ;;  %v9398_v6 = vld [vmem:[%s15893_s3 + $0x1360] sm:$0xf]  ;;  %v9327_v62 = vor.u32 %v10744_v60, %v9326_v58  ;;  %v10754_v58 = vld [vmem:[%s15893_s3 + $0x1324] sm:$0xf0] }
 0x27d   :  { %4613 = vmatpush.bf16.msra.mxu2 %v9155_v17  ;;  %v3438_v14 = vpop.f32.mrf.mxu3  ;;  %v8984_v17 = vld [vmem:[%s15893_s3 + $0x1088] sm:$0xf0]  ;;  %v9222_v60 = vld [vmem:[%s15893_s3 + $0x1200] sm:$0xf] }
 0x27e   :  { %v8987_v30 = vor.u32 %v10669_v16, %v8984_v17  ;;  %v9319_v14 = vor.u32 %v10742_v3, %v9318_v53  ;;  %v9246_v16 = vld [vmem:[%s15893_s3 + $0x1230] sm:$0xf]  ;;  %v10724_v17 = vld [vmem:[%s15893_s3 + $0x1234] sm:$0xf0]  ;;  %v10747_v3 = vld [vmem:[%s15893_s3 + $0x12f4] sm:$0xf] }
 0x27f   :  { %4575 = vmatpush.bf16.msrb.mxu3 %v9143_v26  ;;  %v9280_v26 = vld [vmem:[%s15893_s3 + $0x1278] sm:$0xf0] }
 0x280   :  { %4599 = vmatpush.bf16.msra.mxu1 %v9099_v18  ;;  %4588 = vmatpush.bf16.msra.mxu0 %v9019_v28  ;;  %v3464_v15 = vpop.f32.mrf.mxu1  ;;  %v9112_v18 = vld [vmem:[%s15893_s3 + $0x1188] sm:$0xf0]  ;;  %v10687_v28 = vld [vmem:[%s15893_s3 + $0x1114] sm:$0xf]  ;;  %v9283_v37 = vor.u32 %v10731_v23, %v9280_v26 }
 0x281   :  { %4614 = vmatpush.bf16.msra.mxu2 %v9147_v29  ;;  %v3477_v25 = vpop.f32.mrf.mxu2  ;;  %v9056_v29 = vld [vmem:[%s15893_s3 + $0x1118] sm:$0xf0]  ;;  %v9115_v31 = vor.u32 %v10701_v27, %v9112_v18  ;;  %v9310_v27 = vld [vmem:[%s15893_s3 + $0x12b0] sm:$0xf]  ;;  %v10723_v18 = vld [vmem:[%s15893_s3 + $0x1234] sm:$0xf] }
 0x282   :  { %v9059_v49 = vor.u32 %v10687_v28, %v9056_v29  ;;  %v9238_v29 = vld [vmem:[%s15893_s3 + $0x1220] sm:$0xf] }
 0x283   :  { %4576 = vmatpush.bf16.msrb.mxu3 %v9135_v47  ;;  %v10746_v47 = vld [vmem:[%s15893_s3 + $0x12e4] sm:$0xf0] }
 0x284   :  { %4600 = vmatpush.bf16.msra.mxu1 %v9091_v34  ;;  %4589 = vmatpush.bf16.msra.mxu0 %v9011_v38  ;;  %v9343_v34 = vor.u32 %v10748_v22, %v9342_v21  ;;  %v10729_v38 = vld [vmem:[%s15893_s3 + $0x1264] sm:$0xf]  ;;  %v9335_v46 = vor.u32 %v10746_v47, %v9334_v57  ;;  %v10758_v21 = vld [vmem:[%s15893_s3 + $0x1344] sm:$0xf0]  ;;  %v9247_v22 = vor.u32 %v10724_v17, %v9246_v16  ;;  %v10756_v47 = vld [vmem:[%s15893_s3 + $0x1334] sm:$0xf0] }
 0x285   :  { %4615 = vmatpush.bf16.msra.mxu2 %v9139_v39  ;;  %v9272_v39 = vld [vmem:[%s15893_s3 + $0x1268] sm:$0xf0]  ;;  %v9383_v35 = vor.u32 %v10758_v21, %v9382_v20  ;;  %v10761_v21 = vld [vmem:[%s15893_s3 + $0x1364] sm:$0xf] }
 0x287   :  { %4577 = vmatpush.bf16.msrb.mxu3 %v9127_v61  ;;  %v9264_v61 = vld [vmem:[%s15893_s3 + $0x1258] sm:$0xf0] }
 0x288   :  { %4601 = vmatpush.bf16.msra.mxu1 %v9083_v50  ;;  %4590 = vmatpush.bf16.msra.mxu0 %v9003_v7  ;;  %v9275_v50 = vor.u32 %v10729_v38, %v9272_v39  ;;  %v10762_v7 = vld [vmem:[%s15893_s3 + $0x1364] sm:$0xf0]  ;;  %v9267_v63 = vor.u32 %v10727_v55, %v9264_v61 }
 0x289   :  { %4616 = vmatpush.bf16.msra.mxu2 %v9131_v13  ;;  %v9263_v13 = vor.u32 %v10728_v56, %v9262_v54  ;;  %v9399_v2 = vor.u32 %v10762_v7, %v9398_v6  ;;  %v9232_v54 = vld [vmem:[%s15893_s3 + $0x1218] sm:$0xf0]  ;;  %v9366_v56 = vld [vmem:[%s15893_s3 + $0x1320] sm:$0xf]  ;;  %v10718_v55 = vld [vmem:[%s15893_s3 + $0x1204] sm:$0xf0] }
 0x28a   :  { %v9367_v53 = vor.u32 %v10754_v58, %v9366_v56  ;;  %v9384_v58 = vld [vmem:[%s15893_s3 + $0x1348] sm:$0xf0] }
 0x28b   :  { %4578 = vmatpush.bf16.msrb.mxu3 %v9119_v5  ;;  %v9256_v5 = vld [vmem:[%s15893_s3 + $0x1248] sm:$0xf0] }
 0x28c   :  { %4602 = vmatpush.bf16.msra.mxu1 %v9075_v1  ;;  %4591 = vmatpush.bf16.msra.mxu0 %v8995_v10  ;;  %v10726_v1 = vld [vmem:[%s15893_s3 + $0x1244] sm:$0xf0]  ;;  %v10760_v10 = vld [vmem:[%s15893_s3 + $0x1354] sm:$0xf0]  ;;  %v9259_v15 = vor.u32 %v10725_v4, %v9256_v5  ;;  %v9344_v4 = vld [vmem:[%s15893_s3 + $0x12f8] sm:$0xf0] }
 0x28d   :  { %4617 = vmatpush.bf16.msra.mxu2 %v9123_v12  ;;  %v9255_v12 = vor.u32 %v10726_v1, %v9254_v0  ;;  %v9391_v25 = vor.u32 %v10760_v10, %v9390_v9  ;;  %v10717_v0 = vld [vmem:[%s15893_s3 + $0x1204] sm:$0xf]  ;;  %v10763_v5 = vld [vmem:[%s15893_s3 + $0x1374] sm:$0xf]  ;;  %v9582_v9 = vld [vmem:[%s15893_s3 + $0x1470] sm:$0xf]  ;;  %v9223_v10 = vor.u32 %v10718_v55, %v9222_v60 }
 0x28e   :  { %v10790_v60 = vld [vmem:[%s15893_s3 + $0x1444] sm:$0xf0] }
 0x28f   :  { %4579 = vmatpush.bf16.msrb.mxu3 %v9111_v24  ;;  %v9251_v24 = vor.u32 %v10723_v18, %v9248_v19  ;;  %v9336_v18 = vld [vmem:[%s15893_s3 + $0x12e8] sm:$0xf0] }
 0x290   :  { %4603 = vmatpush.bf16.msra.mxu1 %v9067_v32  ;;  %4592 = vmatpush.bf16.msra.mxu0 %v8987_v30  ;;  %v3501_v8 = vpop.f32.mrf.mxu0  ;;  %v10740_v32 = vld [vmem:[%s15893_s3 + $0x12b4] sm:$0xf0]  ;;  %v10722_v30 = vld [vmem:[%s15893_s3 + $0x1224] sm:$0xf0] }
 0x291   :  { %4618 = vmatpush.bf16.msra.mxu2 %v9115_v31  ;;  %v9311_v23 = vor.u32 %v10740_v32, %v9310_v27  ;;  %v9302_v31 = vld [vmem:[%s15893_s3 + $0x12a0] sm:$0xf]  ;;  %v9239_v39 = vor.u32 %v10722_v30, %v9238_v29  ;;  %v9347_v27 = vor.u32 %v10747_v3, %v9344_v4  ;;  %v10745_v32 = vld [vmem:[%s15893_s3 + $0x12e4] sm:$0xf]  ;;  %v10750_v29 = vld [vmem:[%s15893_s3 + $0x1304] sm:$0xf0] }
 0x292   :  { %4580 = vmatmul.bf16.vlgmr.msrb.gmra.mxu3 %v11507_v11  ;;  %v9303_v41 = vor.u32 %v10738_v36, %v9302_v31  ;;  %v9518_v30 = vld [vmem:[%s15893_s3 + $0x13f0] sm:$0xf]  ;;  %v10780_v31 = vld [vmem:[%s15893_s3 + $0x13f4] sm:$0xf0] }
 0x293   :  { %4921 = vmatpush.bf16.msra.mxu3 %v9279_v33  ;;  %4593 = vmatmul.bf16.vlgmr.msra.gmra.mxu0 %v11452_v45  ;;  %v9550_v3 = vld [vmem:[%s15893_s3 + $0x1430] sm:$0xf]  ;;  %v10788_v4 = vld [vmem:[%s15893_s3 + $0x1434] sm:$0xf0] }
 0x294   :  { %4934 = vmatpush.bf16.msrb.mxu0 %v9343_v34  ;;  %4604 = vmatpush.bf16.msra.mxu1 %v9059_v49  ;;  %v9240_v49 = vld [vmem:[%s15893_s3 + $0x1228] sm:$0xf0] }
 0x295   :  { %4960 = vmatpush.bf16.msrb.mxu2 %v9283_v37  ;;  %v3488_v26 = vpop.f32.mrf.mxu3  ;;  %v10721_v37 = vld [vmem:[%s15893_s3 + $0x1224] sm:$0xf] }
 0x296   :  { %4619 = vmatmul.bf16.vlgmr.msra.gmra.mxu2 %v11507_v11  ;;  %v3489_v33 = vadd.f32 %v3488_v26, %v14555_v48  ;;  %v9374_v48 = vld [vmem:[%s15893_s3 + $0x1330] sm:$0xf]  ;;  %v9243_v42 = vor.u32 %v10721_v37, %v9240_v49  ;;  %v9350_v26 = vld [vmem:[%s15893_s3 + $0x1300] sm:$0xf]  ;;  %v10743_v49 = vld [vmem:[%s15893_s3 + $0x12d4] sm:$0xf] }
 0x297   :  { %4922 = vmatpush.bf16.msra.mxu3 %v9271_v44  ;;  %v9294_v44 = vld [vmem:[%s15893_s3 + $0x1290] sm:$0xf]  ;;  %v9351_v37 = vor.u32 %v10750_v29, %v9350_v26 }
 0x298   :  { %4935 = vmatpush.bf16.msrb.mxu0 %v9335_v46  ;;  %4605 = vmatpush.bf16.msra.mxu1 %v9051_v52  ;;  %v14744_v28 = vpop.f32.mrf.mxu1  ;;  %v3503_v57 = vpop.f32.mrf.mxu0  ;;  %v3502_v38 = vadd.f32 %v3501_v8, %v3489_v33  ;;  %v10736_v46 = vld [vmem:[%s15893_s3 + $0x1294] sm:$0xf0]  ;;  %v10719_v52 = vld [vmem:[%s15893_s3 + $0x1214] sm:$0xf]  ;;  %v9408_v8 = vld [vmem:[%s15893_s3 + $0x1378] sm:$0xf0]  ;;  %v9339_v33 = vor.u32 %v10745_v32, %v9336_v18 }
 0x299   :  { %4961 = vmatpush.bf16.msrb.mxu2 %v9275_v50  ;;  %v14756_v34 = vpop.f32.mrf.mxu2  ;;  %v9375_v50 = vor.u32 %v10756_v47, %v9374_v48  ;;  %v9295_v61 = vor.u32 %v10736_v46, %v9294_v44  ;;  %v9235_v6 = vor.u32 %v10719_v52, %v9232_v54  ;;  %v9328_v57 = vld [vmem:[%s15893_s3 + $0x12d8] sm:$0xf0]  ;;  %v10759_v48 = vld [vmem:[%s15893_s3 + $0x1354] sm:$0xf]  ;;  %v9519_v47 = vor.u32 %v10780_v31, %v9518_v30  ;;  %v9320_v52 = vld [vmem:[%s15893_s3 + $0x12c8] sm:$0xf0] }
 0x29a   :  { %3506 = vst.msk [vmem:[#allocation2 + $0x28] sm:$0x3] %vm514_vm2, %v3502_v38  ;;  %v9392_v38 = vld [vmem:[%s15893_s3 + $0x1358] sm:$0xf0]  ;;  %v10757_v54 = vld [vmem:[%s15893_s3 + $0x1344] sm:$0xf] }
 0x29b   :  { %4606 = vmatmul.bf16.vlgmr.msra.gmra.mxu1 %v11463_v51  ;;  %4923 = vmatpush.bf16.msra.mxu3 %v9263_v13  ;;  %v9395_v44 = vor.u32 %v10759_v48, %v9392_v38  ;;  %v10735_v31 = vld [vmem:[%s15893_s3 + $0x1294] sm:$0xf]  ;;  %v10784_v38 = vld [vmem:[%s15893_s3 + $0x1414] sm:$0xf0] }
 0x29c   :  { %4947 = vmatpush.bf16.msrb.mxu1 %v9407_v59  ;;  %4936 = vmatpush.bf16.msrb.mxu0 %v9327_v62  ;;  %v9231_v59 = vor.u32 %v10720_v43, %v9230_v40  ;;  %v9286_v62 = vld [vmem:[%s15893_s3 + $0x1280] sm:$0xf]  ;;  %v10792_v40 = vld [vmem:[%s15893_s3 + $0x1454] sm:$0xf0]  ;;  %v9331_v43 = vor.u32 %v10743_v49, %v9328_v57  ;;  %v9360_v49 = vld [vmem:[%s15893_s3 + $0x1318] sm:$0xf0] }
 0x29d   :  { %4962 = vmatpush.bf16.msrb.mxu2 %v9267_v63  ;;  %v3490_v7 = vpop.f32.mrf.mxu3  ;;  %v10734_v63 = vld [vmem:[%s15893_s3 + $0x1284] sm:$0xf0]  ;;  %v9534_v57 = vld [vmem:[%s15893_s3 + $0x1410] sm:$0xf] }
 0x29e   :  { %v9287_v16 = vor.u32 %v10734_v63, %v9286_v62  ;;  %v10739_v63 = vld [vmem:[%s15893_s3 + $0x12b4] sm:$0xf] }
 0x29f   :  { %4924 = vmatpush.bf16.msra.mxu3 %v9255_v12  ;;  %v10796_v12 = vld [vmem:[%s15893_s3 + $0x1474] sm:$0xf0] }
 0x2a0   :  { %4948 = vmatpush.bf16.msrb.mxu1 %v9399_v2  ;;  %4937 = vmatpush.bf16.msrb.mxu0 %v9319_v14  ;;  %v3807_v13 = vpop.f32.mrf.mxu1  ;;  %v9224_v2 = vld [vmem:[%s15893_s3 + $0x1208] sm:$0xf0]  ;;  %v9358_v14 = vld [vmem:[%s15893_s3 + $0x1310] sm:$0xf]  ;;  %v9583_v19 = vor.u32 %v10796_v12, %v9582_v9  ;;  %v3819_v9 = vadd.f32 %v14756_v34, %v14744_v28  ;;  %v10753_v28 = vld [vmem:[%s15893_s3 + $0x1324] sm:$0xf] }
 0x2a1   :  { %4963 = vmatpush.bf16.msrb.mxu2 %v9259_v15  ;;  %v3820_v1 = vpop.f32.mrf.mxu2  ;;  %v10752_v15 = vld [vmem:[%s15893_s3 + $0x1314] sm:$0xf0]  ;;  %v9227_v17 = vor.u32 %v10717_v0, %v9224_v2  ;;  %v9387_v13 = vor.u32 %v10757_v54, %v9384_v58  ;;  %v9312_v0 = vld [vmem:[%s15893_s3 + $0x12b8] sm:$0xf0]  ;;  %v10749_v54 = vld [vmem:[%s15893_s3 + $0x1304] sm:$0xf] }
 0x2a2   :  { %v9359_v20 = vor.u32 %v10752_v15, %v9358_v14  ;;  %v10755_v1 = vld [vmem:[%s15893_s3 + $0x1334] sm:$0xf]  ;;  %v9376_v2 = vld [vmem:[%s15893_s3 + $0x1338] sm:$0xf0]  ;;  %v9551_v14 = vor.u32 %v10788_v4, %v9550_v3  ;;  %v9526_v58 = vld [vmem:[%s15893_s3 + $0x1400] sm:$0xf] }
 0x2a3   :  { %4925 = vmatpush.bf16.msra.mxu3 %v9247_v22  ;;  %v9400_v22 = vld [vmem:[%s15893_s3 + $0x1368] sm:$0xf0]  ;;  %v9379_v12 = vor.u32 %v10755_v1, %v9376_v2  ;;  %v9470_v1 = vld [vmem:[%s15893_s3 + $0x1390] sm:$0xf] }
 0x2a4   :  { %4949 = vmatpush.bf16.msrb.mxu1 %v9391_v25  ;;  %4938 = vmatpush.bf16.msrb.mxu0 %v9311_v23  ;;  %v9411_v25 = vor.u32 %v10763_v5, %v9408_v8  ;;  %v9574_v23 = vld [vmem:[%s15893_s3 + $0x1460] sm:$0xf]  ;;  %v10774_v8 = vld [vmem:[%s15893_s3 + $0x13c4] sm:$0xf0] }
 0x2a5   :  { %4964 = vmatpush.bf16.msrb.mxu2 %v9251_v24  ;;  %v10794_v24 = vld [vmem:[%s15893_s3 + $0x1464] sm:$0xf0]  ;;  %v9494_v5 = vld [vmem:[%s15893_s3 + $0x13c0] sm:$0xf] }
 0x2a6   :  { %v9575_v36 = vor.u32 %v10794_v24, %v9574_v23  ;;  %v9495_v18 = vor.u32 %v10774_v8, %v9494_v5  ;;  %v9486_v23 = vld [vmem:[%s15893_s3 + $0x13b0] sm:$0xf]  ;;  %v10772_v24 = vld [vmem:[%s15893_s3 + $0x13b4] sm:$0xf0]  ;;  %v9638_v8 = vld [vmem:[%s15893_s3 + $0x14e0] sm:$0xf] }
 0x2a7   :  { %4926 = vmatpush.bf16.msra.mxu3 %v9239_v39  ;;  %v9566_v39 = vld [vmem:[%s15893_s3 + $0x1450] sm:$0xf] }
 0x2a8   :  { %4950 = vmatpush.bf16.msrb.mxu1 %v9383_v35  ;;  %4939 = vmatpush.bf16.msrb.mxu0 %v9303_v41  ;;  %v9403_v35 = vor.u32 %v10761_v21, %v9400_v22  ;;  %v9510_v41 = vld [vmem:[%s15893_s3 + $0x13e0] sm:$0xf]  ;;  %v9567_v46 = vor.u32 %v10792_v40, %v9566_v39  ;;  %v10786_v21 = vld [vmem:[%s15893_s3 + $0x1424] sm:$0xf0] }
 0x2a9   :  { %4965 = vmatpush.bf16.msrb.mxu2 %v9243_v42  ;;  %v10778_v42 = vld [vmem:[%s15893_s3 + $0x13e4] sm:$0xf0]  ;;  %v9478_v39 = vld [vmem:[%s15893_s3 + $0x13a0] sm:$0xf] }
 0x2aa   :  { %v9511_v56 = vor.u32 %v10778_v42, %v9510_v41  ;;  %v10770_v40 = vld [vmem:[%s15893_s3 + $0x13a4] sm:$0xf0]  ;;  %v10733_v42 = vld [vmem:[%s15893_s3 + $0x1284] sm:$0xf] }
 0x2ab   :  { %4927 = vmatpush.bf16.msra.mxu3 %v9231_v59  ;;  %v9558_v59 = vld [vmem:[%s15893_s3 + $0x1440] sm:$0xf] }
 0x2ac   :  { %4951 = vmatpush.bf16.msrb.mxu1 %v9375_v50  ;;  %4940 = vmatpush.bf16.msrb.mxu0 %v9295_v61  ;;  %v10741_v50 = vld [vmem:[%s15893_s3 + $0x12c4] sm:$0xf]  ;;  %v9502_v61 = vld [vmem:[%s15893_s3 + $0x13d0] sm:$0xf]  ;;  %v9559_v62 = vor.u32 %v10790_v60, %v9558_v59  ;;  %v9479_v60 = vor.u32 %v10770_v40, %v9478_v39  ;;  %v9624_v40 = vld [vmem:[%s15893_s3 + $0x14c8] sm:$0xf0] }
 0x2ad   :  { %4966 = vmatpush.bf16.msrb.mxu2 %v9235_v6  ;;  %v10776_v6 = vld [vmem:[%s15893_s3 + $0x13d4] sm:$0xf0]  ;;  %v9323_v7 = vor.u32 %v10741_v50, %v9320_v52  ;;  %v10805_v39 = vld [vmem:[%s15893_s3 + $0x14c4] sm:$0xf] }
 0x2af   :  { %4928 = vmatpush.bf16.msra.mxu3 %v9223_v10  ;;  %v9315_v10 = vor.u32 %v10739_v63, %v9312_v0  ;;  %v9648_v0 = vld [vmem:[%s15893_s3 + $0x14f8] sm:$0xf0] }
 0x2b0   :  { %4952 = vmatpush.bf16.msrb.mxu1 %v9367_v53  ;;  %4941 = vmatpush.bf16.msrb.mxu0 %v9287_v16  ;;  %v3844_v55 = vpop.f32.mrf.mxu0  ;;  %v9503_v53 = vor.u32 %v10776_v6, %v9502_v61  ;;  %v9646_v61 = vld [vmem:[%s15893_s3 + $0x14f0] sm:$0xf]  ;;  %v10812_v6 = vld [vmem:[%s15893_s3 + $0x14f4] sm:$0xf0] }
 0x2b1   :  { %4967 = vmatpush.bf16.msrb.mxu2 %v9227_v17  ;;  %v10737_v17 = vld [vmem:[%s15893_s3 + $0x12a4] sm:$0xf]  ;;  %v9647_v4 = vor.u32 %v10812_v6, %v9646_v61  ;;  %v9560_v6 = vld [vmem:[%s15893_s3 + $0x1448] sm:$0xf0] }
 0x2b2   :  { %4929 = vmatmul.bf16.vlgmr.msra.gmra.mxu3 %v11452_v45  ;;  %v10789_v61 = vld [vmem:[%s15893_s3 + $0x1444] sm:$0xf] }
 0x2b3   :  { %4973 = vmatpush.bf16.msrb.mxu3 %v9347_v27  ;;  %4942 = vmatmul.bf16.vlgmr.msrb.gmra.mxu0 %v11463_v51  ;;  %v9304_v27 = vld [vmem:[%s15893_s3 + $0x12a8] sm:$0xf0] }
 0x2b4   :  { %4986 = vmatpush.bf16.msra.mxu0 %v9411_v25  ;;  %4953 = vmatpush.bf16.msrb.mxu1 %v9359_v20  ;;  %v9542_v20 = vld [vmem:[%s15893_s3 + $0x1420] sm:$0xf]  ;;  %v9307_v30 = vor.u32 %v10737_v17, %v9304_v27  ;;  %v9640_v17 = vld [vmem:[%s15893_s3 + $0x14e8] sm:$0xf0] }
 0x2b5   :  { %5303 = vmatpush.bf16.msra.mxu2 %v9583_v19  ;;  %v3831_v15 = vpop.f32.mrf.mxu3  ;;  %v9368_v19 = vld [vmem:[%s15893_s3 + $0x1328] sm:$0xf0]  ;;  %v9462_v27 = vld [vmem:[%s15893_s3 + $0x1380] sm:$0xf] }
 0x2b6   :  { %4968 = vmatmul.bf16.vlgmr.msrb.gmra.mxu2 %v11452_v45  ;;  %v3832_v34 = vadd.f32 %v3831_v15, %v3819_v9  ;;  %v10810_v9 = vld [vmem:[%s15893_s3 + $0x14e4] sm:$0xf0]  ;;  %v9512_v15 = vld [vmem:[%s15893_s3 + $0x13e8] sm:$0xf0] }
 0x2b7   :  { %4974 = vmatpush.bf16.msrb.mxu3 %v9339_v33  ;;  %v9296_v33 = vld [vmem:[%s15893_s3 + $0x1298] sm:$0xf0] }
 0x2b8   :  { %4987 = vmatpush.bf16.msra.mxu0 %v9403_v35  ;;  %4954 = vmatpush.bf16.msrb.mxu1 %v9351_v37  ;;  %v3857_v16 = vpop.f32.mrf.mxu1  ;;  %v3846_v22 = vpop.f32.mrf.mxu0  ;;  %v3876_v26 = vrot.slane %v3832_v34, 6  ;;  %v9371_v35 = vor.u32 %v10753_v28, %v9368_v19  ;;  %v10751_v37 = vld [vmem:[%s15893_s3 + $0x1314] sm:$0xf]  ;;  %v9299_v41 = vor.u32 %v10735_v31, %v9296_v33  ;;  %v10766_v28 = vld [vmem:[%s15893_s3 + $0x1384] sm:$0xf0] }
 0x2b9   :  { %5304 = vmatpush.bf16.msra.mxu2 %v9575_v36  ;;  %v3858_v25 = vadd.f32 %v3857_v16, %v3844_v55  ;;  %v3870_v32 = vpop.f32.mrf.mxu2  ;;  %v9543_v36 = vor.u32 %v10786_v21, %v9542_v20  ;;  %v10782_v55 = vld [vmem:[%s15893_s3 + $0x1404] sm:$0xf0]  ;;  %v10809_v16 = vld [vmem:[%s15893_s3 + $0x14e4] sm:$0xf]  ;;  %v10795_v34 = vld [vmem:[%s15893_s3 + $0x1474] sm:$0xf]  ;;  %v9463_v20 = vor.u32 %v10766_v28, %v9462_v27 }
 0x2ba   :  { %3880 = vst [vmem:[#allocation2 + $0x20] sm:$0xc] %v3876_v26  ;;  %v9527_v3 = vor.u32 %v10782_v55, %v9526_v58  ;;  %v9643_v19 = vor.u32 %v10809_v16, %v9640_v17  ;;  %v9630_v21 = vld [vmem:[%s15893_s3 + $0x14d0] sm:$0xf]  ;;  %v10808_v22 = vld [vmem:[%s15893_s3 + $0x14d4] sm:$0xf0] }
 0x2bb   :  { %4955 = vmatmul.bf16.vlgmr.msrb.gmra.mxu1 %v11507_v11  ;;  %4975 = vmatpush.bf16.msrb.mxu3 %v9331_v43  ;;  %v3871_v29 = vadd.f32 %v3870_v32, %v3858_v25  ;;  %v9288_v43 = vld [vmem:[%s15893_s3 + $0x1288] sm:$0xf0]  ;;  %v9584_v25 = vld [vmem:[%s15893_s3 + $0x1478] sm:$0xf0]  ;;  %v9639_v32 = vor.u32 %v10810_v9, %v9638_v8  ;;  %v10793_v31 = vld [vmem:[%s15893_s3 + $0x1464] sm:$0xf] }
 0x2bc   :  { %5290 = vmatpush.bf16.msra.mxu1 %v9519_v47  ;;  %4988 = vmatpush.bf16.msra.mxu0 %v9395_v44  ;;  %v9487_v47 = vor.u32 %v10772_v24, %v9486_v23  ;;  %v9363_v44 = vor.u32 %v10751_v37, %v9360_v49  ;;  %v9291_v63 = vor.u32 %v10733_v42, %v9288_v43  ;;  %v10775_v23 = vld [vmem:[%s15893_s3 + $0x13d4] sm:$0xf]  ;;  %v9504_v26 = vld [vmem:[%s15893_s3 + $0x13d8] sm:$0xf0]  ;;  %v9576_v33 = vld [vmem:[%s15893_s3 + $0x1468] sm:$0xf0] }
 0x2bd   :  { %5305 = vmatpush.bf16.msra.mxu2 %v9567_v46  ;;  %v3877_v48 = vrot.slane %v3871_v29, 6  ;;  %v9535_v46 = vor.u32 %v10784_v38, %v9534_v57  ;;  %v3833_v50 = vpop.f32.mrf.mxu3  ;;  %v9587_v24 = vor.u32 %v10795_v34, %v9584_v25  ;;  %v10807_v29 = vld [vmem:[%s15893_s3 + $0x14d4] sm:$0xf]  ;;  %v9622_v49 = vld [vmem:[%s15893_s3 + $0x14c0] sm:$0xf] }
 0x2be   :  { %v10806_v57 = vld [vmem:[%s15893_s3 + $0x14c4] sm:$0xf0]  ;;  %v9496_v38 = vld [vmem:[%s15893_s3 + $0x13c8] sm:$0xf0]  ;;  %v10791_v42 = vld [vmem:[%s15893_s3 + $0x1454] sm:$0xf]  ;;  %v9627_v50 = vor.u32 %v10805_v39, %v9624_v40 }
 0x2bf   :  { %4976 = vmatpush.bf16.msrb.mxu3 %v9323_v7  ;;  %3881 = vst.msk [vmem:[#allocation2 + $0x28] sm:$0xc] %vm890_vm3, %v3877_v48  ;;  %v10779_v7 = vld [vmem:[%s15893_s3 + $0x13f4] sm:$0xf]  ;;  %v10773_v48 = vld [vmem:[%s15893_s3 + $0x13c4] sm:$0xf] }
 0x2c0   :  { %5291 = vmatpush.bf16.msra.mxu1 %v9511_v56  ;;  %4989 = vmatpush.bf16.msra.mxu0 %v9387_v13  ;;  %v3859_v52 = vpop.f32.mrf.mxu1  ;;  %v9352_v56 = vld [vmem:[%s15893_s3 + $0x1308] sm:$0xf0]  ;;  %v9520_v13 = vld [vmem:[%s15893_s3 + $0x13f8] sm:$0xf0]  ;;  %v10801_v9 = vld [vmem:[%s15893_s3 + $0x14a4] sm:$0xf] }
 0x2c1   :  { %5306 = vmatpush.bf16.msra.mxu2 %v9559_v62  ;;  %v3872_v59 = vpop.f32.mrf.mxu2  ;;  %v10811_v62 = vld [vmem:[%s15893_s3 + $0x14f4] sm:$0xf]  ;;  %v9355_v2 = vor.u32 %v10749_v54, %v9352_v56  ;;  %v9523_v5 = vor.u32 %v10779_v7, %v9520_v13  ;;  %v9568_v43 = vld [vmem:[%s15893_s3 + $0x1458] sm:$0xf0]  ;;  %v9614_v52 = vld [vmem:[%s15893_s3 + $0x14b0] sm:$0xf] }
 0x2c2   :  { %v10804_v54 = vld [vmem:[%s15893_s3 + $0x14b4] sm:$0xf0]  ;;  %v10771_v56 = vld [vmem:[%s15893_s3 + $0x13b4] sm:$0xf]  ;;  %v9571_v58 = vor.u32 %v10791_v42, %v9568_v43  ;;  %v9488_v59 = vld [vmem:[%s15893_s3 + $0x13b8] sm:$0xf0] }
 0x2c3   :  { %4977 = vmatpush.bf16.msrb.mxu3 %v9315_v10  ;;  %v9651_v10 = vor.u32 %v10811_v62, %v9648_v0  ;;  %v9616_v55 = vld [vmem:[%s15893_s3 + $0x14b8] sm:$0xf0]  ;;  %v9615_v7 = vor.u32 %v10804_v54, %v9614_v52  ;;  %v9491_v13 = vor.u32 %v10771_v56, %v9488_v59  ;;  %v9480_v8 = vld [vmem:[%s15893_s3 + $0x13a8] sm:$0xf0]  ;;  %v9598_v27 = vld [vmem:[%s15893_s3 + $0x1490] sm:$0xf] }
 0x2c4   :  { %5292 = vmatpush.bf16.msra.mxu1 %v9503_v53  ;;  %4990 = vmatpush.bf16.msra.mxu0 %v9379_v12  ;;  %v10768_v53 = vld [vmem:[%s15893_s3 + $0x1394] sm:$0xf0]  ;;  %v9758_v39 = vld [vmem:[%s15893_s3 + $0x1570] sm:$0xf]  ;;  %v10827_v43 = vld [vmem:[%s15893_s3 + $0x1574] sm:$0xf] }
 0x2c5   :  { %5307 = vmatpush.bf16.msra.mxu2 %v9551_v14  ;;  %v9471_v12 = vor.u32 %v10768_v53, %v9470_v1  ;;  %v10777_v14 = vld [vmem:[%s15893_s3 + $0x13e4] sm:$0xf]  ;;  %v9606_v1 = vld [vmem:[%s15893_s3 + $0x14a0] sm:$0xf]  ;;  %v10802_v53 = vld [vmem:[%s15893_s3 + $0x14a4] sm:$0xf0] }
 0x2c6   :  { %v9607_v17 = vor.u32 %v10802_v53, %v9606_v1  ;;  %v10800_v25 = vld [vmem:[%s15893_s3 + $0x1494] sm:$0xf0]  ;;  %v9536_v52 = vld [vmem:[%s15893_s3 + $0x1418] sm:$0xf0]  ;;  %v9528_v1 = vld [vmem:[%s15893_s3 + $0x1408] sm:$0xf0] }
 0x2c7   :  { %4978 = vmatpush.bf16.msrb.mxu3 %v9307_v30  ;;  %v9632_v30 = vld [vmem:[%s15893_s3 + $0x14d8] sm:$0xf0]  ;;  %v10828_v40 = vld [vmem:[%s15893_s3 + $0x1574] sm:$0xf0]  ;;  %v9886_v53 = vld [vmem:[%s15893_s3 + $0x1670] sm:$0xf] }
 0x2c8   :  { %5293 = vmatpush.bf16.msra.mxu1 %v9495_v18  ;;  %4991 = vmatpush.bf16.msra.mxu0 %v9371_v35  ;;  %v9515_v18 = vor.u32 %v10777_v14, %v9512_v15  ;;  %v9631_v35 = vor.u32 %v10808_v22, %v9630_v21  ;;  %v9635_v37 = vor.u32 %v10807_v29, %v9632_v30  ;;  %v10787_v14 = vld [vmem:[%s15893_s3 + $0x1434] sm:$0xf]  ;;  %v9552_v15 = vld [vmem:[%s15893_s3 + $0x1438] sm:$0xf0]  ;;  %v9590_v29 = vld [vmem:[%s15893_s3 + $0x1480] sm:$0xf] }
 0x2c9   :  { %5308 = vmatpush.bf16.msra.mxu2 %v9543_v36  ;;  %v9507_v36 = vor.u32 %v10775_v23, %v9504_v26  ;;  %v10799_v21 = vld [vmem:[%s15893_s3 + $0x1494] sm:$0xf]  ;;  %v9600_v22 = vld [vmem:[%s15893_s3 + $0x1498] sm:$0xf0]  ;;  %v10785_v23 = vld [vmem:[%s15893_s3 + $0x1424] sm:$0xf]  ;;  %v9599_v26 = vor.u32 %v10800_v25, %v9598_v27 }
 0x2ca   :  { %v10798_v30 = vld [vmem:[%s15893_s3 + $0x1484] sm:$0xf0]  ;;  %v10844_v42 = vld [vmem:[%s15893_s3 + $0x15f4] sm:$0xf0]  ;;  %v9744_v27 = vld [vmem:[%s15893_s3 + $0x1558] sm:$0xf0] }
 0x2cb   :  { %4979 = vmatpush.bf16.msrb.mxu3 %v9299_v41 }
 0x2cc   :  { %5294 = vmatpush.bf16.msra.mxu1 %v9487_v47  ;;  %4992 = vmatpush.bf16.msra.mxu0 %v9363_v44  ;;  %v9579_v47 = vor.u32 %v10793_v31, %v9576_v33  ;;  %v9623_v44 = vor.u32 %v10806_v57, %v9622_v49  ;;  %v9603_v33 = vor.u32 %v10799_v21, %v9600_v22  ;;  %v9464_v49 = vld [vmem:[%s15893_s3 + $0x1388] sm:$0xf0]  ;;  %v10797_v57 = vld [vmem:[%s15893_s3 + $0x1484] sm:$0xf]  ;;  %v9798_v21 = vld [vmem:[%s15893_s3 + $0x15c0] sm:$0xf] }
 0x2cd   :  { %5309 = vmatpush.bf16.msra.mxu2 %v9535_v46  ;;  %v9499_v46 = vor.u32 %v10773_v48, %v9496_v38  ;;  %v9592_v38 = vld [vmem:[%s15893_s3 + $0x1488] sm:$0xf0] }
 0x2ce   :  { %v9595_v56 = vor.u32 %v10797_v57, %v9592_v38  ;;  %v9790_v57 = vld [vmem:[%s15893_s3 + $0x15b0] sm:$0xf]  ;;  %v10819_v38 = vld [vmem:[%s15893_s3 + $0x1534] sm:$0xf] }
 0x2cf   :  { %4980 = vmatpush.bf16.msrb.mxu3 %v9291_v63 }
 0x2d0   :  { %5295 = vmatpush.bf16.msra.mxu1 %v9479_v60  ;;  %4993 = vmatpush.bf16.msra.mxu0 %v9355_v2  ;;  %v4193_v41 = vpop.f32.mrf.mxu0  ;;  %v10803_v60 = vld [vmem:[%s15893_s3 + $0x14b4] sm:$0xf]  ;;  %v10769_v2 = vld [vmem:[%s15893_s3 + $0x13a4] sm:$0xf] }
 0x2d1   :  { %5310 = vmatpush.bf16.msra.mxu2 %v9527_v3  ;;  %v9619_v62 = vor.u32 %v10803_v60, %v9616_v55  ;;  %v9483_v28 = vor.u32 %v10769_v2, %v9480_v8  ;;  %v9750_v60 = vld [vmem:[%s15893_s3 + $0x1560] sm:$0xf]  ;;  %v10826_v55 = vld [vmem:[%s15893_s3 + $0x1564] sm:$0xf0]  ;;  %v10860_v2 = vld [vmem:[%s15893_s3 + $0x1674] sm:$0xf0] }
 0x2d2   :  { %4981 = vmatmul.bf16.vlgmr.msrb.gmra.mxu3 %v11463_v51 }
 0x2d3   :  { %5316 = vmatpush.bf16.msra.mxu3 %v9647_v4  ;;  %4994 = vmatmul.bf16.vlgmr.msra.gmra.mxu0 %v11507_v11 }
 0x2d4   :  { %5329 = vmatpush.bf16.msrb.mxu0 %v9523_v5  ;;  %5296 = vmatpush.bf16.msra.mxu1 %v9471_v12  ;;  %v9563_v5 = vor.u32 %v10789_v61, %v9560_v6 }
 0x2d5   :  { %5355 = vmatpush.bf16.msrb.mxu2 %v9651_v10  ;;  %v4180_v63 = vpop.f32.mrf.mxu3  ;;  %v9608_v10 = vld [vmem:[%s15893_s3 + $0x14a8] sm:$0xf0] }
 0x2d6   :  { %5311 = vmatmul.bf16.vlgmr.msra.gmra.mxu2 %v11463_v51  ;;  %v4194_v3 = vadd.f32 %v4193_v41, %v4180_v63  ;;  %v9611_v34 = vor.u32 %v10801_v9, %v9608_v10  ;;  %v9822_v41 = vld [vmem:[%s15893_s3 + $0x15f0] sm:$0xf]  ;;  %v9752_v63 = vld [vmem:[%s15893_s3 + $0x1568] sm:$0xf0] }
 0x2d7   :  { %5317 = vmatpush.bf16.msra.mxu3 %v9639_v32  ;;  %v10767_v32 = vld [vmem:[%s15893_s3 + $0x1394] sm:$0xf]  ;;  %v9823_v59 = vor.u32 %v10844_v42, %v9822_v41  ;;  %v9742_v10 = vld [vmem:[%s15893_s3 + $0x1550] sm:$0xf]  ;;  %v10854_v41 = vld [vmem:[%s15893_s3 + $0x1644] sm:$0xf0] }
 0x2d8   :  { %5330 = vmatpush.bf16.msrb.mxu0 %v9515_v18  ;;  %5297 = vmatpush.bf16.msra.mxu1 %v9463_v20  ;;  %v4206_v0 = vpop.f32.mrf.mxu1  ;;  %v4195_v12 = vpop.f32.mrf.mxu0  ;;  %v9472_v18 = vld [vmem:[%s15893_s3 + $0x1398] sm:$0xf0]  ;;  %v9555_v20 = vor.u32 %v10787_v14, %v9552_v15  ;;  %v9806_v14 = vld [vmem:[%s15893_s3 + $0x15d0] sm:$0xf]  ;;  %v9887_v15 = vor.u32 %v10860_v2, %v9886_v53  ;;  %v10816_v2 = vld [vmem:[%s15893_s3 + $0x1514] sm:$0xf0] }
 0x2d9   :  { %5356 = vmatpush.bf16.msrb.mxu2 %v9643_v19  ;;  %v15154_v4 = vpop.f32.mrf.mxu2  ;;  %v4207_v16 = vadd.f32 %v4206_v0, %v4194_v3  ;;  %v9475_v31 = vor.u32 %v10767_v32, %v9472_v18  ;;  %v10781_v0 = vld [vmem:[%s15893_s3 + $0x1404] sm:$0xf]  ;;  %v9751_v3 = vor.u32 %v10826_v55, %v9750_v60  ;;  %v10824_v12 = vld [vmem:[%s15893_s3 + $0x1554] sm:$0xf0]  ;;  %v10834_v55 = vld [vmem:[%s15893_s3 + $0x15a4] sm:$0xf0] }
 0x2da   :  { %v9531_v9 = vor.u32 %v10781_v0, %v9528_v1  ;;  %v9743_v25 = vor.u32 %v10824_v12, %v9742_v10  ;;  %v9710_v0 = vld [vmem:[%s15893_s3 + $0x1510] sm:$0xf]  ;;  %v10815_v10 = vld [vmem:[%s15893_s3 + $0x1514] sm:$0xf]  ;;  %v9712_v12 = vld [vmem:[%s15893_s3 + $0x1518] sm:$0xf0] }
 0x2db   :  { %5298 = vmatmul.bf16.vlgmr.msra.gmra.mxu1 %v11452_v45  ;;  %5318 = vmatpush.bf16.msra.mxu3 %v9631_v35  ;;  %v4251_v19 = vrot.slane %v4207_v16, 4  ;;  %v10840_v16 = vld [vmem:[%s15893_s3 + $0x15d4] sm:$0xf0] }
 0x2dc   :  { %5342 = vmatpush.bf16.msrb.mxu1 %v9587_v24  ;;  %5331 = vmatpush.bf16.msrb.mxu0 %v9507_v36  ;;  %v9544_v24 = vld [vmem:[%s15893_s3 + $0x1428] sm:$0xf0]  ;;  %v9807_v32 = vor.u32 %v10840_v16, %v9806_v14  ;;  %v9846_v14 = vld [vmem:[%s15893_s3 + $0x1620] sm:$0xf]  ;;  %v9711_v16 = vor.u32 %v10816_v2, %v9710_v0  ;;  %v10046_v0 = vld [vmem:[%s15893_s3 + $0x1750] sm:$0xf] }
 0x2dd   :  { %5357 = vmatpush.bf16.msrb.mxu2 %v9635_v37  ;;  %4255 = vst [vmem:[#allocation2 + $0x20] sm:$0x30] %v4251_v19  ;;  %v4182_v35 = vpop.f32.mrf.mxu3  ;;  %v10765_v37 = vld [vmem:[%s15893_s3 + $0x1384] sm:$0xf]  ;;  %v9734_v19 = vld [vmem:[%s15893_s3 + $0x1540] sm:$0xf] }
 0x2de   :  { %v9467_v54 = vor.u32 %v10765_v37, %v9464_v49  ;;  %v9726_v37 = vld [vmem:[%s15893_s3 + $0x1530] sm:$0xf]  ;;  %v10820_v49 = vld [vmem:[%s15893_s3 + $0x1534] sm:$0xf0]  ;;  %v10874_v2 = vld [vmem:[%s15893_s3 + $0x16e4] sm:$0xf0] }
 0x2df   :  { %5319 = vmatpush.bf16.msra.mxu3 %v9623_v44  ;;  %v9591_v44 = vor.u32 %v10798_v30, %v9590_v29  ;;  %v9870_v30 = vld [vmem:[%s15893_s3 + $0x1650] sm:$0xf]  ;;  %v9727_v42 = vor.u32 %v10820_v49, %v9726_v37  ;;  %v10848_v37 = vld [vmem:[%s15893_s3 + $0x1614] sm:$0xf0] }
 0x2e0   :  { %5343 = vmatpush.bf16.msrb.mxu1 %v9579_v47  ;;  %5332 = vmatpush.bf16.msrb.mxu0 %v9499_v46  ;;  %v4208_v36 = vpop.f32.mrf.mxu1  ;;  %v9547_v47 = vor.u32 %v10785_v23, %v9544_v24  ;;  %v9760_v46 = vld [vmem:[%s15893_s3 + $0x1578] sm:$0xf0]  ;;  %v10838_v23 = vld [vmem:[%s15893_s3 + $0x15c4] sm:$0xf0]  ;;  %v10821_v24 = vld [vmem:[%s15893_s3 + $0x1544] sm:$0xf] }
 0x2e1   :  { %5358 = vmatpush.bf16.msrb.mxu2 %v9627_v50  ;;  %v4221_v48 = vpop.f32.mrf.mxu2  ;;  %v10783_v50 = vld [vmem:[%s15893_s3 + $0x1414] sm:$0xf]  ;;  %v9763_v61 = vor.u32 %v10827_v43, %v9760_v46  ;;  %v9799_v35 = vor.u32 %v10838_v23, %v9798_v21  ;;  %v9704_v23 = vld [vmem:[%s15893_s3 + $0x1508] sm:$0xf0] }
 0x2e2   :  { %v9539_v6 = vor.u32 %v10783_v50, %v9536_v52  ;;  %v9718_v52 = vld [vmem:[%s15893_s3 + $0x1520] sm:$0xf] }
 0x2e3   :  { %5320 = vmatpush.bf16.msra.mxu3 %v9615_v7  ;;  %v9814_v7 = vld [vmem:[%s15893_s3 + $0x15e0] sm:$0xf] }
 0x2e4   :  { %5344 = vmatpush.bf16.msrb.mxu1 %v9571_v58  ;;  %5333 = vmatpush.bf16.msrb.mxu0 %v9491_v13  ;;  %v9759_v58 = vor.u32 %v10828_v40, %v9758_v39  ;;  %v10842_v13 = vld [vmem:[%s15893_s3 + $0x15e4] sm:$0xf0]  ;;  %v9728_v39 = vld [vmem:[%s15893_s3 + $0x1538] sm:$0xf0]  ;;  %v9862_v40 = vld [vmem:[%s15893_s3 + $0x1640] sm:$0xf] }
 0x2e5   :  { %5359 = vmatpush.bf16.msrb.mxu2 %v9619_v62  ;;  %v10825_v62 = vld [vmem:[%s15893_s3 + $0x1564] sm:$0xf]  ;;  %v9863_v60 = vor.u32 %v10854_v41, %v9862_v40 }
 0x2e6   :  { %v9755_v8 = vor.u32 %v10825_v62, %v9752_v63 }
 0x2e7   :  { %5321 = vmatpush.bf16.msra.mxu3 %v9607_v17  ;;  %v10823_v17 = vld [vmem:[%s15893_s3 + $0x1554] sm:$0xf] }
 0x2e8   :  { %5345 = vmatpush.bf16.msrb.mxu1 %v9563_v5  ;;  %5334 = vmatpush.bf16.msrb.mxu0 %v9483_v28  ;;  %v9815_v5 = vor.u32 %v10842_v13, %v9814_v7  ;;  %v9878_v28 = vld [vmem:[%s15893_s3 + $0x1660] sm:$0xf]  ;;  %v9747_v18 = vor.u32 %v10823_v17, %v9744_v27  ;;  %v10852_v13 = vld [vmem:[%s15893_s3 + $0x1634] sm:$0xf0]  ;;  %v10814_v27 = vld [vmem:[%s15893_s3 + $0x1504] sm:$0xf0] }
 0x2e9   :  { %5360 = vmatpush.bf16.msrb.mxu2 %v9611_v34  ;;  %v10858_v34 = vld [vmem:[%s15893_s3 + $0x1664] sm:$0xf0]  ;;  %v9702_v17 = vld [vmem:[%s15893_s3 + $0x1500] sm:$0xf] }
 0x2ea   :  { %v9879_v22 = vor.u32 %v10858_v34, %v9878_v28  ;;  %v9715_v34 = vor.u32 %v10815_v10, %v9712_v12  ;;  %v9800_v10 = vld [vmem:[%s15893_s3 + $0x15c8] sm:$0xf0]  ;;  %v10853_v12 = vld [vmem:[%s15893_s3 + $0x1644] sm:$0xf] }
 0x2eb   :  { %5322 = vmatpush.bf16.msra.mxu3 %v9599_v26  ;;  %v9736_v26 = vld [vmem:[%s15893_s3 + $0x1548] sm:$0xf0] }
 0x2ec   :  { %5346 = vmatpush.bf16.msrb.mxu1 %v9555_v20  ;;  %5335 = vmatpush.bf16.msrb.mxu0 %v9475_v31  ;;  %v10822_v20 = vld [vmem:[%s15893_s3 + $0x1544] sm:$0xf0]  ;;  %v10856_v31 = vld [vmem:[%s15893_s3 + $0x1654] sm:$0xf0]  ;;  %v9739_v36 = vor.u32 %v10821_v24, %v9736_v26  ;;  %v10843_v24 = vld [vmem:[%s15893_s3 + $0x15f4] sm:$0xf] }
 0x2ed   :  { %5361 = vmatpush.bf16.msrb.mxu2 %v9603_v33  ;;  %v9735_v33 = vor.u32 %v10822_v20, %v9734_v19  ;;  %v9871_v48 = vor.u32 %v10856_v31, %v9870_v30  ;;  %v10830_v19 = vld [vmem:[%s15893_s3 + $0x1584] sm:$0xf0]  ;;  %v10813_v20 = vld [vmem:[%s15893_s3 + $0x1504] sm:$0xf]  ;;  %v9824_v26 = vld [vmem:[%s15893_s3 + $0x15f8] sm:$0xf0] }
 0x2ee   :  { %v9888_v30 = vld [vmem:[%s15893_s3 + $0x1678] sm:$0xf0]  ;;  %v10062_v31 = vld [vmem:[%s15893_s3 + $0x1770] sm:$0xf] }
 0x2ef   :  { %5323 = vmatpush.bf16.msra.mxu3 %v9591_v44  ;;  %v9731_v44 = vor.u32 %v10819_v38, %v9728_v39  ;;  %v10841_v38 = vld [vmem:[%s15893_s3 + $0x15e4] sm:$0xf]  ;;  %v9816_v39 = vld [vmem:[%s15893_s3 + $0x15e8] sm:$0xf0] }
 0x2f0   :  { %5347 = vmatpush.bf16.msrb.mxu1 %v9547_v47  ;;  %5336 = vmatpush.bf16.msrb.mxu0 %v9467_v54  ;;  %v4245_v29 = vpop.f32.mrf.mxu0  ;;  %v10836_v47 = vld [vmem:[%s15893_s3 + $0x15b4] sm:$0xf0]  ;;  %v10818_v54 = vld [vmem:[%s15893_s3 + $0x1524] sm:$0xf0] }
 0x2f1   :  { %5362 = vmatpush.bf16.msrb.mxu2 %v9595_v56  ;;  %v9791_v43 = vor.u32 %v10836_v47, %v9790_v57  ;;  %v9782_v56 = vld [vmem:[%s15893_s3 + $0x15a0] sm:$0xf]  ;;  %v9719_v63 = vor.u32 %v10818_v54, %v9718_v52  ;;  %v9707_v57 = vor.u32 %v10813_v20, %v9704_v23  ;;  %v10846_v54 = vld [vmem:[%s15893_s3 + $0x1604] sm:$0xf0]  ;;  %v9792_v20 = vld [vmem:[%s15893_s3 + $0x15b8] sm:$0xf0] }
 0x2f2   :  { %5324 = vmatmul.bf16.vlgmr.msra.gmra.mxu3 %v11507_v11  ;;  %v9783_v1 = vor.u32 %v10834_v55, %v9782_v56  ;;  %v9830_v52 = vld [vmem:[%s15893_s3 + $0x1600] sm:$0xf]  ;;  %v9998_v56 = vld [vmem:[%s15893_s3 + $0x16f0] sm:$0xf]  ;;  %v9856_v23 = vld [vmem:[%s15893_s3 + $0x1638] sm:$0xf0] }
 0x2f3   :  { %5665 = vmatpush.bf16.msrb.mxu3 %v9759_v58  ;;  %5337 = vmatmul.bf16.vlgmr.msrb.gmra.mxu0 %v11452_v45 }
 0x2f4   :  { %5678 = vmatpush.bf16.msra.mxu0 %v9823_v59  ;;  %5348 = vmatpush.bf16.msrb.mxu1 %v9539_v6  ;;  %v9720_v6 = vld [vmem:[%s15893_s3 + $0x1528] sm:$0xf0] }
 0x2f5   :  { %5704 = vmatpush.bf16.msra.mxu2 %v9763_v61  ;;  %v4232_v46 = vpop.f32.mrf.mxu3  ;;  %v10817_v61 = vld [vmem:[%s15893_s3 + $0x1524] sm:$0xf] }
 0x2f6   :  { %5363 = vmatmul.bf16.vlgmr.msrb.gmra.mxu2 %v11507_v11  ;;  %v4233_v58 = vadd.f32 %v4232_v46, %v15154_v4  ;;  %v9854_v4 = vld [vmem:[%s15893_s3 + $0x1630] sm:$0xf]  ;;  %v9723_v53 = vor.u32 %v10817_v61, %v9720_v6  ;;  %v10890_v46 = vld [vmem:[%s15893_s3 + $0x1764] sm:$0xf0]  ;;  %v9831_v6 = vor.u32 %v10846_v54, %v9830_v52 }
 0x2f7   :  { %5666 = vmatpush.bf16.msrb.mxu3 %v9751_v3  ;;  %v9774_v3 = vld [vmem:[%s15893_s3 + $0x1590] sm:$0xf] }
 0x2f8   :  { %5679 = vmatpush.bf16.msra.mxu0 %v9815_v5  ;;  %5349 = vmatpush.bf16.msrb.mxu1 %v9531_v9  ;;  %v15343_v50 = vpop.f32.mrf.mxu1  ;;  %v4247_v7 = vpop.f32.mrf.mxu0  ;;  %v4246_v62 = vadd.f32 %v4245_v29, %v4233_v58  ;;  %v10832_v5 = vld [vmem:[%s15893_s3 + $0x1594] sm:$0xf0]  ;;  %v9855_v9 = vor.u32 %v10852_v13, %v9854_v4  ;;  %v10859_v29 = vld [vmem:[%s15893_s3 + $0x1674] sm:$0xf]  ;;  %v9808_v4 = vld [vmem:[%s15893_s3 + $0x15d8] sm:$0xf0] }
 0x2f9   :  { %5705 = vmatpush.bf16.msra.mxu2 %v9755_v8  ;;  %v15355_v59 = vpop.f32.mrf.mxu2  ;;  %v9775_v28 = vor.u32 %v10832_v5, %v9774_v3  ;;  %v9891_v47 = vor.u32 %v10859_v29, %v9888_v30  ;;  %v10876_v58 = vld [vmem:[%s15893_s3 + $0x16f4] sm:$0xf0]  ;;  %v10839_v7 = vld [vmem:[%s15893_s3 + $0x15d4] sm:$0xf]  ;;  %v9974_v29 = vld [vmem:[%s15893_s3 + $0x16c0] sm:$0xf] }
 0x2fa   :  { %v4252_v8 = vrot.slane %v4246_v62, 4  ;;  %v10855_v13 = vld [vmem:[%s15893_s3 + $0x1654] sm:$0xf]  ;;  %v9999_v62 = vor.u32 %v10876_v58, %v9998_v56  ;;  %v9811_v3 = vor.u32 %v10839_v7, %v9808_v4  ;;  %v10870_v30 = vld [vmem:[%s15893_s3 + $0x16c4] sm:$0xf0] }
 0x2fb   :  { %5350 = vmatmul.bf16.vlgmr.msrb.gmra.mxu1 %v11463_v51  ;;  %5667 = vmatpush.bf16.msrb.mxu3 %v9743_v25  ;;  %v10831_v58 = vld [vmem:[%s15893_s3 + $0x1594] sm:$0xf]  ;;  %v9840_v7 = vld [vmem:[%s15893_s3 + $0x1618] sm:$0xf0]  ;;  %v10014_v4 = vld [vmem:[%s15893_s3 + $0x1710] sm:$0xf] }
 0x2fc   :  { %5691 = vmatpush.bf16.msra.mxu1 %v9887_v15  ;;  %5680 = vmatpush.bf16.msra.mxu0 %v9807_v32  ;;  %v10850_v15 = vld [vmem:[%s15893_s3 + $0x1624] sm:$0xf0]  ;;  %4256 = vst.msk [vmem:[#allocation2 + $0x28] sm:$0x30] %vm1266_vm4, %v4252_v8 }
 0x2fd   :  { %5706 = vmatpush.bf16.msra.mxu2 %v9747_v18  ;;  %v4234_v25 = vpop.f32.mrf.mxu3  ;;  %v9766_v18 = vld [vmem:[%s15893_s3 + $0x1580] sm:$0xf] }
 0x2fe   :  { %v9767_v49 = vor.u32 %v10830_v19, %v9766_v18  ;;  %v10835_v19 = vld [vmem:[%s15893_s3 + $0x15b4] sm:$0xf] }
 0x2ff   :  { %5668 = vmatpush.bf16.msrb.mxu3 %v9735_v33  ;;  %v9703_v33 = vor.u32 %v10814_v27, %v9702_v17  ;;  %v10886_v17 = vld [vmem:[%s15893_s3 + $0x1744] sm:$0xf0] }
 0x300   :  { %5692 = vmatpush.bf16.msra.mxu1 %v9879_v22  ;;  %5681 = vmatpush.bf16.msra.mxu0 %v9799_v35  ;;  %v4557_v32 = vpop.f32.mrf.mxu1  ;;  %v9847_v22 = vor.u32 %v10850_v15, %v9846_v14  ;;  %v10892_v35 = vld [vmem:[%s15893_s3 + $0x1774] sm:$0xf0]  ;;  %v9864_v15 = vld [vmem:[%s15893_s3 + $0x1648] sm:$0xf0] }
 0x301   :  { %5707 = vmatpush.bf16.msra.mxu2 %v9739_v36  ;;  %v4570_v21 = vpop.f32.mrf.mxu2  ;;  %v9838_v36 = vld [vmem:[%s15893_s3 + $0x1610] sm:$0xf]  ;;  %v10063_v40 = vor.u32 %v10892_v35, %v10062_v31  ;;  %v9867_v32 = vor.u32 %v10853_v12, %v9864_v15  ;;  %v4569_v31 = vadd.f32 %v15355_v59, %v15343_v50  ;;  %v10849_v50 = vld [vmem:[%s15893_s3 + $0x1624] sm:$0xf]  ;;  %v10006_v15 = vld [vmem:[%s15893_s3 + $0x1700] sm:$0xf] }
 0x302   :  { %v9839_v41 = vor.u32 %v10848_v37, %v9838_v36  ;;  %v10851_v21 = vld [vmem:[%s15893_s3 + $0x1634] sm:$0xf]  ;;  %v10845_v12 = vld [vmem:[%s15893_s3 + $0x1604] sm:$0xf] }
 0x303   :  { %5669 = vmatpush.bf16.msrb.mxu3 %v9727_v42  ;;  %v10857_v42 = vld [vmem:[%s15893_s3 + $0x1664] sm:$0xf]  ;;  %v9859_v35 = vor.u32 %v10851_v21, %v9856_v23  ;;  %v9950_v21 = vld [vmem:[%s15893_s3 + $0x1690] sm:$0xf] }
 0x304   :  { %5693 = vmatpush.bf16.msra.mxu1 %v9871_v48  ;;  %5682 = vmatpush.bf16.msra.mxu0 %v9791_v43  ;;  %v9827_v48 = vor.u32 %v10843_v24, %v9824_v26  ;;  %v9880_v43 = vld [vmem:[%s15893_s3 + $0x1668] sm:$0xf0]  ;;  %v10030_v24 = vld [vmem:[%s15893_s3 + $0x1730] sm:$0xf]  ;;  %v10884_v26 = vld [vmem:[%s15893_s3 + $0x1734] sm:$0xf0] }
 0x305   :  { %5708 = vmatpush.bf16.msra.mxu2 %v9731_v44  ;;  %v10054_v44 = vld [vmem:[%s15893_s3 + $0x1760] sm:$0xf]  ;;  %v9883_v55 = vor.u32 %v10857_v42, %v9880_v43  ;;  %v10031_v36 = vor.u32 %v10884_v26, %v10030_v24  ;;  %v10882_v42 = vld [vmem:[%s15893_s3 + $0x1724] sm:$0xf0] }
 0x306   :  { %v10055_v61 = vor.u32 %v10890_v46, %v10054_v44  ;;  %v9966_v44 = vld [vmem:[%s15893_s3 + $0x16b0] sm:$0xf]  ;;  %v10868_v46 = vld [vmem:[%s15893_s3 + $0x16b4] sm:$0xf0] }
 0x307   :  { %5670 = vmatpush.bf16.msrb.mxu3 %v9719_v63  ;;  %v9872_v63 = vld [vmem:[%s15893_s3 + $0x1658] sm:$0xf0] }
 0x308   :  { %5694 = vmatpush.bf16.msra.mxu1 %v9863_v60  ;;  %5683 = vmatpush.bf16.msra.mxu0 %v9783_v1  ;;  %v9819_v60 = vor.u32 %v10841_v38, %v9816_v39  ;;  %v10888_v1 = vld [vmem:[%s15893_s3 + $0x1754] sm:$0xf0]  ;;  %v9875_v5 = vor.u32 %v10855_v13, %v9872_v63  ;;  %v9975_v39 = vor.u32 %v10870_v30, %v9974_v29  ;;  %v10118_v30 = vld [vmem:[%s15893_s3 + $0x17e0] sm:$0xf] }
 0x309   :  { %5709 = vmatpush.bf16.msra.mxu2 %v9723_v53  ;;  %v9990_v53 = vld [vmem:[%s15893_s3 + $0x16e0] sm:$0xf]  ;;  %v10047_v8 = vor.u32 %v10888_v1, %v10046_v0  ;;  %v10880_v63 = vld [vmem:[%s15893_s3 + $0x1714] sm:$0xf0]  ;;  %v10866_v1 = vld [vmem:[%s15893_s3 + $0x16a4] sm:$0xf0] }
 0x30a   :  { %v9991_v14 = vor.u32 %v10874_v2, %v9990_v53  ;;  %v9958_v0 = vld [vmem:[%s15893_s3 + $0x16a0] sm:$0xf]  ;;  %v10829_v2 = vld [vmem:[%s15893_s3 + $0x1584] sm:$0xf] }
 0x30b   :  { %5671 = vmatpush.bf16.msrb.mxu3 %v9711_v16  ;;  %v10038_v16 = vld [vmem:[%s15893_s3 + $0x1740] sm:$0xf] }
 0x30c   :  { %5695 = vmatpush.bf16.msra.mxu1 %v9855_v9  ;;  %5684 = vmatpush.bf16.msra.mxu0 %v9775_v28  ;;  %v10837_v9 = vld [vmem:[%s15893_s3 + $0x15c4] sm:$0xf]  ;;  %v9982_v28 = vld [vmem:[%s15893_s3 + $0x16d0] sm:$0xf]  ;;  %v10039_v18 = vor.u32 %v10886_v17, %v10038_v16  ;;  %v9959_v17 = vor.u32 %v10866_v1, %v9958_v0  ;;  %v10104_v1 = vld [vmem:[%s15893_s3 + $0x17c8] sm:$0xf0] }
 0x30d   :  { %5710 = vmatpush.bf16.msra.mxu2 %v9715_v34  ;;  %v10872_v34 = vld [vmem:[%s15893_s3 + $0x16d4] sm:$0xf0]  ;;  %v9803_v25 = vor.u32 %v10837_v9, %v9800_v10  ;;  %v10901_v0 = vld [vmem:[%s15893_s3 + $0x17c4] sm:$0xf] }
 0x30f   :  { %5672 = vmatpush.bf16.msrb.mxu3 %v9703_v33  ;;  %v9795_v33 = vor.u32 %v10835_v19, %v9792_v20  ;;  %v10128_v20 = vld [vmem:[%s15893_s3 + $0x17f8] sm:$0xf0] }
 0x310   :  { %5696 = vmatpush.bf16.msra.mxu1 %v9847_v22  ;;  %5685 = vmatpush.bf16.msra.mxu0 %v9767_v49  ;;  %v4594_v27 = vpop.f32.mrf.mxu0  ;;  %v9983_v22 = vor.u32 %v10872_v34, %v9982_v28  ;;  %v10126_v28 = vld [vmem:[%s15893_s3 + $0x17f0] sm:$0xf]  ;;  %v10908_v34 = vld [vmem:[%s15893_s3 + $0x17f4] sm:$0xf0] }
 0x311   :  { %5711 = vmatpush.bf16.msra.mxu2 %v9707_v57  ;;  %v10833_v57 = vld [vmem:[%s15893_s3 + $0x15a4] sm:$0xf]  ;;  %v10127_v26 = vor.u32 %v10908_v34, %v10126_v28  ;;  %v10040_v34 = vld [vmem:[%s15893_s3 + $0x1748] sm:$0xf0] }
 0x312   :  { %5673 = vmatmul.bf16.vlgmr.msrb.gmra.mxu3 %v11452_v45  ;;  %v10885_v28 = vld [vmem:[%s15893_s3 + $0x1744] sm:$0xf] }
 0x313   :  { %5717 = vmatpush.bf16.msra.mxu3 %v9827_v48  ;;  %5686 = vmatmul.bf16.vlgmr.msra.gmra.mxu0 %v11463_v51  ;;  %v9784_v48 = vld [vmem:[%s15893_s3 + $0x15a8] sm:$0xf0] }
 0x314   :  { %5730 = vmatpush.bf16.msrb.mxu0 %v9891_v47  ;;  %5697 = vmatpush.bf16.msra.mxu1 %v9839_v41  ;;  %v10022_v41 = vld [vmem:[%s15893_s3 + $0x1720] sm:$0xf]  ;;  %v9787_v56 = vor.u32 %v10833_v57, %v9784_v48  ;;  %v10120_v57 = vld [vmem:[%s15893_s3 + $0x17e8] sm:$0xf0] }
 0x315   :  { %6053 = vmatpush.bf16.msrb.mxu2 %v10063_v40  ;;  %v4581_v37 = vpop.f32.mrf.mxu3  ;;  %v9848_v40 = vld [vmem:[%s15893_s3 + $0x1628] sm:$0xf0]  ;;  %v9942_v48 = vld [vmem:[%s15893_s3 + $0x1680] sm:$0xf] }
 0x316   :  { %5712 = vmatmul.bf16.vlgmr.msra.gmra.mxu2 %v11452_v45  ;;  %v4582_v59 = vadd.f32 %v4581_v37, %v4569_v31  ;;  %v10906_v31 = vld [vmem:[%s15893_s3 + $0x17e4] sm:$0xf0]  ;;  %v9992_v37 = vld [vmem:[%s15893_s3 + $0x16e8] sm:$0xf0] }
 0x317   :  { %5718 = vmatpush.bf16.msra.mxu3 %v9819_v60  ;;  %v9776_v60 = vld [vmem:[%s15893_s3 + $0x1598] sm:$0xf0] }
 0x318   :  { %5731 = vmatpush.bf16.msrb.mxu0 %v9883_v55  ;;  %5698 = vmatpush.bf16.msra.mxu1 %v9831_v6  ;;  %v4607_v49 = vpop.f32.mrf.mxu1  ;;  %v4596_v43 = vpop.f32.mrf.mxu0  ;;  %v4626_v52 = vrot.slane %v4582_v59, 2  ;;  %v9851_v55 = vor.u32 %v10849_v50, %v9848_v40  ;;  %v10847_v6 = vld [vmem:[%s15893_s3 + $0x1614] sm:$0xf]  ;;  %v9779_v53 = vor.u32 %v10831_v58, %v9776_v60  ;;  %v10862_v50 = vld [vmem:[%s15893_s3 + $0x1684] sm:$0xf0] }
 0x319   :  { %6054 = vmatpush.bf16.msrb.mxu2 %v10055_v61  ;;  %v4608_v47 = vadd.f32 %v4607_v49, %v4594_v27  ;;  %v4620_v38 = vpop.f32.mrf.mxu2  ;;  %v10023_v61 = vor.u32 %v10882_v42, %v10022_v41  ;;  %v10878_v27 = vld [vmem:[%s15893_s3 + $0x1704] sm:$0xf0]  ;;  %v10905_v49 = vld [vmem:[%s15893_s3 + $0x17e4] sm:$0xf]  ;;  %v10891_v59 = vld [vmem:[%s15893_s3 + $0x1774] sm:$0xf]  ;;  %v9943_v41 = vor.u32 %v10862_v50, %v9942_v48 }
 0x31a   :  { %4630 = vst [vmem:[#allocation2 + $0x20] sm:$0xc0] %v4626_v52  ;;  %v10007_v24 = vor.u32 %v10878_v27, %v10006_v15  ;;  %v10123_v40 = vor.u32 %v10905_v49, %v10120_v57  ;;  %v10110_v42 = vld [vmem:[%s15893_s3 + $0x17d0] sm:$0xf]  ;;  %v10904_v43 = vld [vmem:[%s15893_s3 + $0x17d4] sm:$0xf0] }
 0x31b   :  { %5699 = vmatmul.bf16.vlgmr.msra.gmra.mxu1 %v11507_v11  ;;  %5719 = vmatpush.bf16.msra.mxu3 %v9811_v3  ;;  %v4621_v54 = vadd.f32 %v4620_v38, %v4608_v47  ;;  %v9768_v3 = vld [vmem:[%s15893_s3 + $0x1588] sm:$0xf0]  ;;  %v10064_v47 = vld [vmem:[%s15893_s3 + $0x1778] sm:$0xf0]  ;;  %v10119_v38 = vor.u32 %v10906_v31, %v10118_v30  ;;  %v10889_v58 = vld [vmem:[%s15893_s3 + $0x1764] sm:$0xf] }
 0x31c   :  { %6040 = vmatpush.bf16.msrb.mxu1 %v9999_v62  ;;  %5732 = vmatpush.bf16.msrb.mxu0 %v9875_v5  ;;  %v9967_v62 = vor.u32 %v10868_v46, %v9966_v44  ;;  %v9843_v5 = vor.u32 %v10847_v6, %v9840_v7  ;;  %v9771_v19 = vor.u32 %v10829_v2, %v9768_v3  ;;  %v10871_v44 = vld [vmem:[%s15893_s3 + $0x16d4] sm:$0xf]  ;;  %v9984_v52 = vld [vmem:[%s15893_s3 + $0x16d8] sm:$0xf0]  ;;  %v10056_v60 = vld [vmem:[%s15893_s3 + $0x1768] sm:$0xf0] }
 0x31d   :  { %6055 = vmatpush.bf16.msrb.mxu2 %v10047_v8  ;;  %v4627_v13 = vrot.slane %v4621_v54, 2  ;;  %v10015_v8 = vor.u32 %v10880_v63, %v10014_v4  ;;  %v4583_v9 = vpop.f32.mrf.mxu3  ;;  %v10067_v46 = vor.u32 %v10891_v59, %v10064_v47  ;;  %v10903_v54 = vld [vmem:[%s15893_s3 + $0x17d4] sm:$0xf]  ;;  %v10102_v7 = vld [vmem:[%s15893_s3 + $0x17c0] sm:$0xf] }
 0x31e   :  { %v10902_v4 = vld [vmem:[%s15893_s3 + $0x17c4] sm:$0xf0]  ;;  %v9976_v63 = vld [vmem:[%s15893_s3 + $0x16c8] sm:$0xf0]  ;;  %v10887_v2 = vld [vmem:[%s15893_s3 + $0x1754] sm:$0xf]  ;;  %v10107_v9 = vor.u32 %v10901_v0, %v10104_v1 }
 0x31f   :  { %5720 = vmatpush.bf16.msra.mxu3 %v9803_v25  ;;  %4631 = vst.msk [vmem:[#allocation2 + $0x28] sm:$0xc0] %vm1642_vm5, %v4627_v13  ;;  %v10875_v25 = vld [vmem:[%s15893_s3 + $0x16f4] sm:$0xf]  ;;  %v10869_v13 = vld [vmem:[%s15893_s3 + $0x16c4] sm:$0xf] }
 0x320   :  { %6041 = vmatpush.bf16.msrb.mxu1 %v9991_v14  ;;  %5733 = vmatpush.bf16.msrb.mxu0 %v9867_v32  ;;  %v4609_v10 = vpop.f32.mrf.mxu1  ;;  %v9832_v14 = vld [vmem:[%s15893_s3 + $0x1608] sm:$0xf0]  ;;  %v10000_v32 = vld [vmem:[%s15893_s3 + $0x16f8] sm:$0xf0]  ;;  %v10897_v31 = vld [vmem:[%s15893_s3 + $0x17a4] sm:$0xf] }
 0x321   :  { %6056 = vmatpush.bf16.msrb.mxu2 %v10039_v18  ;;  %v4622_v16 = vpop.f32.mrf.mxu2  ;;  %v10907_v18 = vld [vmem:[%s15893_s3 + $0x17f4] sm:$0xf]  ;;  %v9835_v23 = vor.u32 %v10845_v12, %v9832_v14  ;;  %v10003_v29 = vor.u32 %v10875_v25, %v10000_v32  ;;  %v10048_v3 = vld [vmem:[%s15893_s3 + $0x1758] sm:$0xf0]  ;;  %v10094_v10 = vld [vmem:[%s15893_s3 + $0x17b0] sm:$0xf] }
 0x322   :  { %v10900_v12 = vld [vmem:[%s15893_s3 + $0x17b4] sm:$0xf0]  ;;  %v10867_v14 = vld [vmem:[%s15893_s3 + $0x16b4] sm:$0xf]  ;;  %v10051_v15 = vor.u32 %v10887_v2, %v10048_v3  ;;  %v9968_v16 = vld [vmem:[%s15893_s3 + $0x16b8] sm:$0xf0] }
 0x323   :  { %5721 = vmatpush.bf16.msra.mxu3 %v9795_v33  ;;  %v10131_v33 = vor.u32 %v10907_v18, %v10128_v20  ;;  %v10096_v27 = vld [vmem:[%s15893_s3 + $0x17b8] sm:$0xf0]  ;;  %v10095_v25 = vor.u32 %v10900_v12, %v10094_v10  ;;  %v9971_v32 = vor.u32 %v10867_v14, %v9968_v16  ;;  %v9960_v30 = vld [vmem:[%s15893_s3 + $0x16a8] sm:$0xf0]  ;;  %v10078_v48 = vld [vmem:[%s15893_s3 + $0x1790] sm:$0xf] }
 0x324   :  { %6042 = vmatpush.bf16.msrb.mxu1 %v9983_v22  ;;  %5734 = vmatpush.bf16.msrb.mxu0 %v9859_v35  ;;  %v10864_v22 = vld [vmem:[%s15893_s3 + $0x1694] sm:$0xf0]  ;;  %v10016_v0 = vld [vmem:[%s15893_s3 + $0x1718] sm:$0xf0] }
 0x325   :  { %6057 = vmatpush.bf16.msrb.mxu2 %v10031_v36  ;;  %v9951_v35 = vor.u32 %v10864_v22, %v9950_v21  ;;  %v10873_v36 = vld [vmem:[%s15893_s3 + $0x16e4] sm:$0xf]  ;;  %v10086_v21 = vld [vmem:[%s15893_s3 + $0x17a0] sm:$0xf]  ;;  %v10898_v22 = vld [vmem:[%s15893_s3 + $0x17a4] sm:$0xf0] }
 0x326   :  { %v10087_v57 = vor.u32 %v10898_v22, %v10086_v21  ;;  %v10896_v47 = vld [vmem:[%s15893_s3 + $0x1794] sm:$0xf0] }
 0x327   :  { %5722 = vmatpush.bf16.msra.mxu3 %v9787_v56  ;;  %v10112_v56 = vld [vmem:[%s15893_s3 + $0x17d8] sm:$0xf0] }
 0x328   :  { %6043 = vmatpush.bf16.msrb.mxu1 %v9975_v39  ;;  %5735 = vmatpush.bf16.msrb.mxu0 %v9851_v55  ;;  %v9995_v39 = vor.u32 %v10873_v36, %v9992_v37  ;;  %v10111_v55 = vor.u32 %v10904_v43, %v10110_v42  ;;  %v10115_v6 = vor.u32 %v10903_v54, %v10112_v56  ;;  %v10883_v36 = vld [vmem:[%s15893_s3 + $0x1734] sm:$0xf]  ;;  %v10032_v37 = vld [vmem:[%s15893_s3 + $0x1738] sm:$0xf0]  ;;  %v10881_v43 = vld [vmem:[%s15893_s3 + $0x1724] sm:$0xf] }
 0x329   :  { %6058 = vmatpush.bf16.msrb.mxu2 %v10023_v61  ;;  %v9987_v61 = vor.u32 %v10871_v44, %v9984_v52  ;;  %v10080_v42 = vld [vmem:[%s15893_s3 + $0x1798] sm:$0xf0]  ;;  %v10024_v44 = vld [vmem:[%s15893_s3 + $0x1728] sm:$0xf0] }
 0x32b   :  { %5723 = vmatpush.bf16.msra.mxu3 %v9779_v53 }
 0x32c   :  { %6044 = vmatpush.bf16.msrb.mxu1 %v9967_v62  ;;  %5736 = vmatpush.bf16.msrb.mxu0 %v9843_v5  ;;  %v10059_v62 = vor.u32 %v10889_v58, %v10056_v60  ;;  %v10103_v5 = vor.u32 %v10902_v4, %v10102_v7  ;;  %v10070_v60 = vld [vmem:[%s15893_s3 + $0x1780] sm:$0xf]  ;;  %v10027_v7 = vor.u32 %v10881_v43, %v10024_v44  ;;  %v9944_v4 = vld [vmem:[%s15893_s3 + $0x1688] sm:$0xf0] }
 0x32d   :  { %6059 = vmatpush.bf16.msrb.mxu2 %v10015_v8  ;;  %v9979_v8 = vor.u32 %v10869_v13, %v9976_v63  ;;  %v10893_v13 = vld [vmem:[%s15893_s3 + $0x1784] sm:$0xf]  ;;  %v10879_v63 = vld [vmem:[%s15893_s3 + $0x1714] sm:$0xf] }
 0x32e   :  { %v10019_v3 = vor.u32 %v10879_v63, %v10016_v0 }
 0x32f   :  { %5724 = vmatpush.bf16.msra.mxu3 %v9771_v19 }
 0x330   :  { %6045 = vmatpush.bf16.msrb.mxu1 %v9959_v17  ;;  %5737 = vmatpush.bf16.msrb.mxu0 %v9835_v23  ;;  %v4943_v53 = vpop.f32.mrf.mxu0  ;;  %v10899_v17 = vld [vmem:[%s15893_s3 + $0x17b4] sm:$0xf]  ;;  %v10865_v23 = vld [vmem:[%s15893_s3 + $0x16a4] sm:$0xf] }
 0x331   :  { %6060 = vmatpush.bf16.msrb.mxu2 %v10007_v24  ;;  %v10099_v18 = vor.u32 %v10899_v17, %v10096_v27  ;;  %v9963_v50 = vor.u32 %v10865_v23, %v9960_v30 }
 0x332   :  { %5725 = vmatmul.bf16.vlgmr.msra.gmra.mxu3 %v11463_v51 }
 0x333   :  { %6066 = vmatpush.bf16.msrb.mxu3 %v10127_v26  ;;  %5738 = vmatmul.bf16.vlgmr.msrb.gmra.mxu0 %v11507_v11 }
 0x334   :  { %6079 = vmatpush.bf16.msra.mxu0 %v10003_v29  ;;  %6046 = vmatpush.bf16.msrb.mxu1 %v9951_v35  ;;  %v10043_v29 = vor.u32 %v10885_v28, %v10040_v34 }
 0x335   :  { %6105 = vmatpush.bf16.msra.mxu2 %v10131_v33  ;;  %v4930_v19 = vpop.f32.mrf.mxu3  ;;  %v10088_v33 = vld [vmem:[%s15893_s3 + $0x17a8] sm:$0xf0] }
 0x336   :  { %6061 = vmatmul.bf16.vlgmr.msrb.gmra.mxu2 %v11463_v51  ;;  %v4944_v24 = vadd.f32 %v4943_v53, %v4930_v19  ;;  %v10091_v59 = vor.u32 %v10897_v31, %v10088_v33 }
 0x337   :  { %6067 = vmatpush.bf16.msrb.mxu3 %v10119_v38  ;;  %v10863_v38 = vld [vmem:[%s15893_s3 + $0x1694] sm:$0xf] }
 0x338   :  { %6080 = vmatpush.bf16.msra.mxu0 %v9995_v39  ;;  %6047 = vmatpush.bf16.msrb.mxu1 %v9943_v41  ;;  %v4956_v20 = vpop.f32.mrf.mxu1  ;;  %v4945_v35 = vpop.f32.mrf.mxu0  ;;  %v9952_v39 = vld [vmem:[%s15893_s3 + $0x1698] sm:$0xf0]  ;;  %v10895_v41 = vld [vmem:[%s15893_s3 + $0x1794] sm:$0xf] }
 0x339   :  { %6106 = vmatpush.bf16.msra.mxu2 %v10123_v40  ;;  %v15753_v26 = vpop.f32.mrf.mxu2  ;;  %v4957_v49 = vadd.f32 %v4956_v20, %v4944_v24  ;;  %v10035_v40 = vor.u32 %v10883_v36, %v10032_v37  ;;  %v9955_v52 = vor.u32 %v10863_v38, %v9952_v39  ;;  %v10083_v54 = vor.u32 %v10895_v41, %v10080_v42 }
 0x33b   :  { %6048 = vmatmul.bf16.vlgmr.msrb.gmra.mxu1 %v11452_v45  ;;  %6068 = vmatpush.bf16.msrb.mxu3 %v10111_v55  ;;  %4999 = vst [vmem:[#allocation2 + $0x30] sm:$0x3] %v4957_v49  ;;  %v10894_v55 = vld [vmem:[%s15893_s3 + $0x1784] sm:$0xf0] }
 0x33c   :  { %6092 = vmatpush.bf16.msra.mxu1 %v10067_v46  ;;  %6081 = vmatpush.bf16.msra.mxu0 %v9987_v61  ;;  %v10079_v46 = vor.u32 %v10896_v47, %v10078_v48  ;;  %v10861_v61 = vld [vmem:[%s15893_s3 + $0x1684] sm:$0xf]  ;;  %v10071_v1 = vor.u32 %v10894_v55, %v10070_v60  ;;  %v10945_v55 = vmov 32.0  }
 0x33d   :  { %6107 = vmatpush.bf16.msra.mxu2 %v10115_v6  ;;  %v4932_v56 = vpop.f32.mrf.mxu3  ;;  %v9947_v53 = vor.u32 %v10861_v61, %v9944_v4  ;;  %10913 = vrcp.f32 %v10945_v55 }
 0x33f   :  { %6069 = vmatpush.bf16.msrb.mxu3 %v10103_v5  ;;  %v10877_v5 = vld [vmem:[%s15893_s3 + $0x1704] sm:$0xf] }
 0x340   :  { %6093 = vmatpush.bf16.msra.mxu1 %v10059_v62  ;;  %6082 = vmatpush.bf16.msra.mxu0 %v9979_v8  ;;  %v4958_v58 = vpop.f32.mrf.mxu1  ;;  %v10072_v62 = vld [vmem:[%s15893_s3 + $0x1788] sm:$0xf0] }
 0x341   :  { %6108 = vmatpush.bf16.msra.mxu2 %v10107_v9  ;;  %v4971_v6 = vpop.f32.mrf.mxu2  ;;  %v10075_v2 = vor.u32 %v10893_v13, %v10072_v62  ;;  %v10008_v8 = vld [vmem:[%s15893_s3 + $0x1708] sm:$0xf0] }
 0x342   :  { %v10011_v9 = vor.u32 %v10877_v5, %v10008_v8  ;;  %v6126_v5 = vld [vmem:[#allocation2] sm:$0xff] }
 0x343   :  { %6070 = vmatpush.bf16.msrb.mxu3 %v10095_v25 }
 0x344   :  { %6094 = vmatpush.bf16.msra.mxu1 %v10051_v15  ;;  %6083 = vmatpush.bf16.msra.mxu0 %v9971_v32 }
 0x345   :  { %6109 = vmatpush.bf16.msra.mxu2 %v10099_v18 }
 0x347   :  { %6071 = vmatpush.bf16.msrb.mxu3 %v10087_v57 }
 0x348   :  { %6095 = vmatpush.bf16.msra.mxu1 %v10043_v29  ;;  %6084 = vmatpush.bf16.msra.mxu0 %v9963_v50 }
 0x349   :  { %6110 = vmatpush.bf16.msra.mxu2 %v10091_v59 }
 0x34b   :  { %6072 = vmatpush.bf16.msrb.mxu3 %v10079_v46 }
 0x34c   :  { %6096 = vmatpush.bf16.msra.mxu1 %v10035_v40  ;;  %6085 = vmatpush.bf16.msra.mxu0 %v9955_v52 }
 0x34d   :  { %6111 = vmatpush.bf16.msra.mxu2 %v10083_v54 }
 0x34f   :  { %6073 = vmatpush.bf16.msrb.mxu3 %v10071_v1  ;;  %v10914_v1 = vpop.eup %10913 }
 0x350   :  { %6097 = vmatpush.bf16.msra.mxu1 %v10027_v7  ;;  %6086 = vmatpush.bf16.msra.mxu0 %v9947_v53  ;;  %v4995_v10 = vpop.f32.mrf.mxu0  ;;  %vm6162_vm7 = vweird.f32 %v10914_v1 }
 0x351   :  { %6112 = vmatpush.bf16.msra.mxu2 %v10075_v2  ;;  %v6128_v2 = vld [vmem:[#allocation2 + $0x10] sm:$0xff] }
 0x352   :  { %6074 = vmatmul.bf16.vlgmr.msrb.gmra.mxu3 %v11507_v11 }
 0x353   :  { %6087 = vmatmul.bf16.vlgmr.msra.gmra.mxu0 %v11452_v45 }
 0x354   :  { %6098 = vmatpush.bf16.msra.mxu1 %v10019_v3  ;;  %6113 = vmatmul.bf16.vlgmr.msra.gmra.mxu2 %v11507_v11  ;;  %v6129_v3 = vld [vmem:[#allocation2 + $0x18] sm:$0xff] }
 0x355   :  { %v4982_v12 = vpop.f32.mrf.mxu3 }
 0x356   :  { %v4983_v15 = vadd.f32 %v4982_v12, %v15753_v26  ;;  %v6130_v12 = vld [vmem:[#allocation2 + $0x20] sm:$0xff] }
 0x358   :  { %6099 = vmatpush.bf16.msra.mxu1 %v10011_v9  ;;  %v5299_v14 = vpop.f32.mrf.mxu1  ;;  %v4997_v17 = vpop.f32.mrf.mxu0  ;;  %v4996_v27 = vadd.f32 %v4995_v10, %v4983_v15  ;;  %v6127_v10 = vld [vmem:[#allocation2 + $0x8] sm:$0xff]  ;;  %v6158_v15 = vmul.f32 32.0, %v10914_v1 }
 0x359   :  { %v5312_v16 = vpop.f32.mrf.mxu2  ;;  %v6134_v17 = vadd.f32 %v6128_v2, %v6126_v5 }
 0x35a   :  { %5000 = vst.msk [vmem:[#allocation2 + $0x38] sm:$0x3] %vm514_vm2, %v4996_v27  ;;  %v5313_v45 = vadd.f32 %v5312_v16, %v5299_v14  ;;  %v6131_v14 = vld [vmem:[#allocation2 + $0x28] sm:$0xff]  ;;  %v6145_v27 = vsel %vm6143_vm6, %v6129_v3, 0.0 }
 0x35b   :  { %6100 = vmatmul.bf16.vlgmr.msra.gmra.mxu1 %v11463_v51 }
 0x35d   :  { %v4984_v28 = vpop.f32.mrf.mxu3 }
 0x35e   :  { %v6135_v28 = vadd.f32 %v6134_v17, %v6130_v12 }
 0x360   :  { %v5301_v34 = vpop.f32.mrf.mxu1 }
 0x361   :  { %v5314_v25 = vpop.f32.mrf.mxu2  ;;  %v6144_v34 = vsel %vm6143_vm6, %v6127_v10, 0.0 }
 0x362   :  { %v6147_v25 = vsel %vm6143_vm6, %v6131_v14, 0.0 }
 0x370   :  { %v5338_v32 = vpop.f32.mrf.mxu0 }
 0x375   :  { %v5325_v18 = vpop.f32.mrf.mxu3 }
 0x376   :  { %v5326_v19 = vadd.f32 %v5325_v18, %v5313_v45  ;;  %v6146_v45 = vadd.f32 %v6145_v27, %v6144_v34  ;;  %v6159_v18 = vsub.f32 1.0, %v6158_v15 }
 0x378   :  { %v5351_v11 = vpop.f32.mrf.mxu1  ;;  %v5340_v21 = vpop.f32.mrf.mxu0  ;;  %v5370_v22 = vrot.slane %v5326_v19, 6 }
 0x379   :  { %v5352_v20 = vadd.f32 %v5351_v11, %v5338_v32  ;;  %v5364_v51 = vpop.f32.mrf.mxu2 }
 0x37a   :  { %5374 = vst [vmem:[#allocation2 + $0x30] sm:$0xc] %v5370_v22 }
 0x37b   :  { %v5365_v23 = vadd.f32 %v5364_v51, %v5352_v20  ;;  %v6148_v20 = vadd.f32 %v6147_v25, %v6146_v45 }
 0x37d   :  { %v5371_v24 = vrot.slane %v5365_v23, 6  ;;  %v5327_v26 = vpop.f32.mrf.mxu3  ;;  %v6160_v23 = vmul.f32 %v10914_v1, %v6159_v18 }
 0x37f   :  { %5375 = vst.msk [vmem:[#allocation2 + $0x38] sm:$0xc] %vm890_vm3, %v5371_v24 }
 0x380   :  { %v5353_v29 = vpop.f32.mrf.mxu1 }
 0x381   :  { %v5366_v30 = vpop.f32.mrf.mxu2 }
 0x390   :  { %v5687_v31 = vpop.f32.mrf.mxu0 }
 0x395   :  { %v5674_v33 = vpop.f32.mrf.mxu3 }
 0x396   :  { %v5688_v36 = vadd.f32 %v5687_v31, %v5674_v33  ;;  %v6161_v31 = vadd.f32 %v10914_v1, %v6160_v23 }
 0x398   :  { %v5700_v35 = vpop.f32.mrf.mxu1  ;;  %v5689_v49 = vpop.f32.mrf.mxu0 }
 0x399   :  { %v5713_v37 = vpop.f32.mrf.mxu2  ;;  %v5701_v57 = vadd.f32 %v5700_v35, %v5688_v36  ;;  %v6163_v49 = vsel %vm6162_vm7, %v10914_v1, %v6161_v31 }
 0x39b   :  { %v5745_v48 = vrot.slane %v5701_v57, 4 }
 0x39d   :  { %5749 = vst [vmem:[#allocation2 + $0x30] sm:$0x30] %v5745_v48  ;;  %v5676_v50 = vpop.f32.mrf.mxu3 }
 0x3a0   :  { %v5702_v59 = vpop.f32.mrf.mxu1 }
 0x3a1   :  { %v5715_v47 = vpop.f32.mrf.mxu2 }
 0x3b0   :  { %v5739_v38 = vpop.f32.mrf.mxu0 }
 0x3b5   :  { %v5726_v39 = vpop.f32.mrf.mxu3 }
 0x3b6   :  { %v5727_v41 = vadd.f32 %v5726_v39, %v5713_v37 }
 0x3b8   :  { %v6049_v40 = vpop.f32.mrf.mxu1  ;;  %v5741_v43 = vpop.f32.mrf.mxu0  ;;  %v5740_v44 = vadd.f32 %v5739_v38, %v5727_v41 }
 0x3b9   :  { %v6062_v42 = vpop.f32.mrf.mxu2 }
 0x3ba   :  { %v5746_v46 = vrot.slane %v5740_v44, 4  ;;  %v6063_v60 = vadd.f32 %v6062_v42, %v6049_v40 }
 0x3bc   :  { %5750 = vst.msk [vmem:[#allocation2 + $0x38] sm:$0x30] %vm1266_vm4, %v5746_v46 }
 0x3bd   :  { %v5728_v52 = vpop.f32.mrf.mxu3 }
 0x3c0   :  { %v6051_v54 = vpop.f32.mrf.mxu1 }
 0x3c1   :  { %v6064_v56 = vpop.f32.mrf.mxu2 }
 0x3d0   :  { %v6088_v58 = vpop.f32.mrf.mxu0 }
 0x3d5   :  { %v6075_v61 = vpop.f32.mrf.mxu3 }
 0x3d6   :  { %v6076_v7 = vadd.f32 %v6075_v61, %v6063_v60 }
 0x3d7   :  { %v6114_v13 = vpop.f32.mrf.mxu2 }
 0x3d8   :  { %v6101_v6 = vpop.f32.mrf.mxu1  ;;  %v6120_v62 = vrot.slane %v6076_v7, 2  ;;  %v6090_v0 = vpop.f32.mrf.mxu0 }
 0x3d9   :  { %v6102_v4 = vadd.f32 %v6101_v6, %v6088_v58 }
 0x3da   :  { %6124 = vst [vmem:[#allocation2 + $0x30] sm:$0xc0] %v6120_v62 }
 0x3db   :  { %v6115_v63 = vadd.f32 %v6114_v13, %v6102_v4 }
 0x3dd   :  { %v6121_v53 = vrot.slane %v6115_v63, 2  ;;  %v6077_v8 = vpop.f32.mrf.mxu3 }
 0x3df   :  { %6125 = vst.msk [vmem:[#allocation2 + $0x38] sm:$0xc0] %vm1642_vm5, %v6121_v53  ;;  %v6116_v16 = vpop.f32.mrf.mxu2 }
 0x3e0   :  { %v6103_v9 = vpop.f32.mrf.mxu1 }
 0x3e1   :  { %v6132_v32 = vld [vmem:[#allocation2 + $0x30] sm:$0xff] }
 0x3e2   :  { %v6136_v11 = vadd.f32 %v6135_v28, %v6132_v32 }
 0x3e4   :  { %v6137_v51 = vrot.slane %v6136_v11, 4 }
 0x3e6   :  { %v6133_v19 = vld [vmem:[#allocation2 + $0x38] sm:$0xff]  ;;  %v6138_v24 = vadd.f32 %v6137_v51, %v6136_v11 }
 0x3e7   :  { %v6149_v21 = vsel %vm6143_vm6, %v6133_v19, 0.0 }
 0x3e8   :  { %v6150_v22 = vadd.f32 %v6149_v21, %v6148_v20  ;;  %v6139_v29 = vrot.slane %v6138_v24, 2 }
 0x3ea   :  { %v6151_v26 = vrot.slane %v6150_v22, 4  ;;  %v6140_v33 = vadd.f32 %v6139_v29, %v6138_v24 }
 0x3ec   :  { %v6152_v30 = vadd.f32 %v6151_v26, %v6150_v22  ;;  %v6141_v36 = vrot.slane %v6140_v33, 1  ;;  %v6236_v26 = vld [vmem:[%s15894_s4] sm:$0x3]  ;;  %s10946_s4 = smov [#allocation3]  }
 0x3ed   :  { %v6238_v31 = vperm.slane %v6236_v26, 0 }
 0x3ee   :  { %v6153_v35 = vrot.slane %v6152_v30, 2  ;;  %v6142_v57 = vadd.f32 %v6141_v36, %v6140_v33  ;;  %v6250_v33 = vld [vmem:[%s15895_s5] sm:$0x3]  ;;  %s6287_s5 = sshll.u32 %s10946_s4, 4  ;;  %s6288_s5 = int_to_ptr.vmem [resolvable:$true] %s6287_s5 }
 0x3f0   :  { %v6154_v37 = vadd.f32 %v6153_v35, %v6152_v30  ;;  %v6164_v50 = vmul.f32 %v6163_v49, %v6142_v57 }
 0x3f2   :  { %v6155_v48 = vrot.slane %v6154_v37, 1  ;;  %v15837_v47 = vsub.f32 %v6126_v5, %v6164_v50  ;;  %v15839_v38 = vsub.f32 %v6128_v2, %v6164_v50  ;;  %v15841_v39 = vsub.f32 %v6130_v12, %v6164_v50 }
 0x3f3   :  { %v15843_v41 = vsub.f32 %v6132_v32, %v6164_v50 }
 0x3f4   :  { %v6156_v59 = vadd.f32 %v6155_v48, %v6154_v37  ;;  %v6174_v42 = vmul.f32 %v15837_v47, %v15837_v47  ;;  %v6176_v43 = vmul.f32 %v15839_v38, %v15839_v38  ;;  %v6178_v56 = vmul.f32 %v15841_v39, %v15841_v39 }
 0x3f5   :  { %v6180_v6 = vmul.f32 %v15843_v41, %v15843_v41 }
 0x3f6   :  { %v6165_v40 = vmul.f32 %v6163_v49, %v6156_v59  ;;  %v6182_v58 = vadd.f32 %v6176_v43, %v6174_v42  ;;  %v6252_v59 = vperm.slane %v6250_v33, 0 }
 0x3f8   :  { %v15849_v44 = vsub.f32 %v6127_v10, %v6165_v40  ;;  %v15851_v46 = vsub.f32 %v6129_v3, %v6165_v40  ;;  %v15853_v52 = vsub.f32 %v6131_v14, %v6165_v40  ;;  %v15855_v54 = vsub.f32 %v6133_v19, %v6165_v40 }
 0x3f9   :  { %v6183_v7 = vadd.f32 %v6182_v58, %v6178_v56  ;;  %v6239_v40 = vperm.slane %v6236_v26, 1 }
 0x3fa   :  { %v6175_v60 = vmul.f32 %v15849_v44, %v15849_v44  ;;  %v6177_v55 = vmul.f32 %v15851_v46, %v15851_v46  ;;  %v6179_v61 = vmul.f32 %v15853_v52, %v15853_v52  ;;  %v6181_v4 = vmul.f32 %v15855_v54, %v15855_v54 }
 0x3fb   :  { %v6184_v63 = vadd.f32 %v6183_v7, %v6180_v6 }
 0x3fc   :  { %v6191_v13 = vsel %vm6143_vm6, %v6175_v60, 0.0  ;;  %v6192_v62 = vsel %vm6143_vm6, %v6177_v55, 0.0  ;;  %v6194_v1 = vsel %vm6143_vm6, %v6179_v61, 0.0  ;;  %v6196_v3 = vsel %vm6143_vm6, %v6181_v4, 0.0 }
 0x3fd   :  { %v6193_v0 = vadd.f32 %v6192_v62, %v6191_v13  ;;  %v6185_v53 = vrot.slane %v6184_v63, 4  ;;  %v6253_v55 = vperm.slane %v6250_v33, 1 }
 0x3ff   :  { %v6195_v2 = vadd.f32 %v6194_v1, %v6193_v0  ;;  %v6186_v5 = vadd.f32 %v6185_v53, %v6184_v63 }
 0x401   :  { %v6197_v8 = vadd.f32 %v6196_v3, %v6195_v2  ;;  %v6187_v9 = vrot.slane %v6186_v5, 2 }
 0x403   :  { %v6198_v10 = vrot.slane %v6197_v8, 4  ;;  %v6188_v12 = vadd.f32 %v6187_v9, %v6186_v5 }
 0x405   :  { %v6199_v14 = vadd.f32 %v6198_v10, %v6197_v8  ;;  %v6189_v15 = vrot.slane %v6188_v12, 1 }
 0x407   :  { %v6200_v16 = vrot.slane %v6199_v14, 2  ;;  %v6190_v17 = vadd.f32 %v6189_v15, %v6188_v12 }
 0x409   :  { %v6201_v27 = vadd.f32 %v6200_v16, %v6199_v14  ;;  %v6204_v34 = vmul.f32 %v6190_v17, %v6163_v49 }
 0x40b   :  { %v6202_v28 = vrot.slane %v6201_v27, 1  ;;  %v6206_v32 = vadd.f32 1e-05, %v6204_v34 }
 0x40d   :  { %v6203_v25 = vadd.f32 %v6202_v28, %v6201_v27  ;;  %10915 = vrsqrt.f32 %v6206_v32  ;;  %vm6214_vm9 = vweird.f32 %v6206_v32 }
 0x40f   :  { %v6205_v45 = vmul.f32 %v6203_v25, %v6163_v49 }
 0x411   :  { %v6207_v18 = vadd.f32 1e-05, %v6205_v45 }
 0x413   :  { %10917 = vrsqrt.f32 %v6207_v18  ;;  %v10916_v11 = vpop.eup %10915  ;;  %vm6224_vm12 = vweird.f32 %v6207_v18 }
 0x414   :  { %v6209_v19 = vmul.f32 %v10916_v11, %v6206_v32  ;;  %vm6215_vm8 = vweird.f32 %v10916_v11 }
 0x415   :  { %vm6216_vm10 = vmor %vm6214_vm9, %vm6215_vm8 }
 0x416   :  { %v6210_v20 = vmul.f32 %v10916_v11, %v6209_v19 }
 0x418   :  { %v6211_v21 = vmul.f32 0.5, %v6210_v20 }
 0x419   :  { %v10918_v51 = vpop.eup %10917 }
 0x41a   :  { %v6219_v22 = vmul.f32 %v10918_v51, %v6207_v18  ;;  %v6212_v23 = vsub.f32 1.5, %v6211_v21  ;;  %vm6225_vm11 = vweird.f32 %v10918_v51 }
 0x41b   :  { %vm6226_vm13 = vmor %vm6224_vm12, %vm6225_vm11 }
 0x41c   :  { %v6220_v24 = vmul.f32 %v10918_v51, %v6219_v22  ;;  %v6213_v29 = vmul.f32 %v10916_v11, %v6212_v23 }
 0x41e   :  { %v6221_v30 = vmul.f32 0.5, %v6220_v24  ;;  %v6217_v35 = vsel %vm6216_vm10, %v10916_v11, %v6213_v29 }
 0x41f   :  { %v6228_v37 = vmul.f32 %v6217_v35, %v15837_v47  ;;  %v6230_v49 = vmul.f32 %v6217_v35, %v15839_v38  ;;  %v6232_v57 = vmul.f32 %v6217_v35, %v15841_v39  ;;  %v6234_v48 = vmul.f32 %v6217_v35, %v15843_v41 }
 0x420   :  { %v6222_v36 = vsub.f32 1.5, %v6221_v30 }
 0x421   :  { %v6242_v42 = vmul.f32 %v6238_v31, %v6228_v37  ;;  %v6244_v43 = vmul.f32 %v6238_v31, %v6230_v49  ;;  %v6246_v56 = vmul.f32 %v6238_v31, %v6232_v57  ;;  %v6248_v60 = vmul.f32 %v6238_v31, %v6234_v48 }
 0x422   :  { %v6223_v50 = vmul.f32 %v10918_v51, %v6222_v36 }
 0x423   :  { %v6256_v41 = vadd.f32 %v6252_v59, %v6242_v42  ;;  %v6258_v6 = vadd.f32 %v6252_v59, %v6244_v43  ;;  %v6260_v7 = vadd.f32 %v6252_v59, %v6246_v56  ;;  %v6262_v0 = vadd.f32 %v6252_v59, %v6248_v60 }
 0x424   :  { %v6227_v58 = vsel %vm6226_vm13, %v10918_v51, %v6223_v50 }
 0x425   :  { %v6229_v61 = vmul.f32 %v6227_v58, %v15849_v44  ;;  %v6231_v47 = vmul.f32 %v6227_v58, %v15851_v46  ;;  %v6233_v38 = vmul.f32 %v6227_v58, %v15853_v52  ;;  %v6235_v39 = vmul.f32 %v6227_v58, %v15855_v54 }
 0x426   :  { %v6264_v3 = vmax.f32 %v6256_v41, 0.0  ;;  %v6266_v46 = vmax.f32 %v6258_v6, 0.0  ;;  %v6268_v5 = vmax.f32 %v6260_v7, 0.0  ;;  %v6270_v10 = vmax.f32 %v6262_v0, 0.0 }
 0x427   :  { %v6243_v4 = vmul.f32 %v6239_v40, %v6229_v61  ;;  %v6245_v13 = vmul.f32 %v6239_v40, %v6231_v47  ;;  %v6247_v62 = vmul.f32 %v6239_v40, %v6233_v38  ;;  %v6249_v63 = vmul.f32 %v6239_v40, %v6235_v39 }
 0x429   :  { %v6257_v1 = vadd.f32 %v6253_v55, %v6243_v4  ;;  %v6259_v53 = vadd.f32 %v6253_v55, %v6245_v13  ;;  %v6261_v2 = vadd.f32 %v6253_v55, %v6247_v62  ;;  %v6263_v44 = vadd.f32 %v6253_v55, %v6249_v63 }
 0x42b   :  { %v6265_v52 = vmax.f32 %v6257_v1, 0.0  ;;  %v6267_v8 = vmax.f32 %v6259_v53, 0.0  ;;  %v6269_v54 = vmax.f32 %v6261_v2, 0.0  ;;  %v6271_v9 = vmax.f32 %v6263_v44, 0.0 }
 0x42d   :  { %v6272_v12 = vpack.c.bf16 %v6265_v52, %v6264_v3  ;;  %v6273_v14 = vpack.c.bf16 %v6267_v8, %v6266_v46  ;;  %v6274_v15 = vpack.c.bf16 %v6269_v54, %v6268_v5  ;;  %v6275_v16 = vpack.c.bf16 %v6271_v9, %v6270_v10 }
 0x42f   :  { %6279 = vst.msk [vmem:[#allocation3] sm:$0xff] %vm6278_vm0, %v6272_v12 }
 0x430   :  { %6280 = vst.msk [vmem:[#allocation3 + $0x8] sm:$0xff] %vm6278_vm0, %v6273_v14 }
 0x431   :  { %6281 = vst.msk [vmem:[#allocation3 + $0x10] sm:$0xff] %vm6278_vm0, %v6274_v15 }
 0x432   :  { %6282 = vst.msk [vmem:[#allocation3 + $0x18] sm:$0xff] %vm6278_vm0, %v6275_v16 }
 0x433   :  { %6295 = dma.vmem_to_hbm [thread:$0]  %s6288_s5, 512, %s6290_s20, [#allocation4], %s10947_s21, %s10947_s21, %s10948_s22  }
 0x434   :  { %10943 = dma.done.wait [#allocation4], 512  }
 0x435   :  { %10944 = vsyncadd [#allocation4], 4294966784 }
 0x436   :  { %6300 = vsyncpa [#allocation4], 1 }

</bundles_post_ra>
